<compile_context>
chip_gen: v6e
topology: v6e:2x2x1
jax: 0.10.0
libtpu: 0.0.40
codegen_flags: <defaults>
</compile_context>

<pallas_src>
import math

import jax
import jax.numpy as jnp
from jax.experimental import pallas as pl
from jax.experimental.pallas import tpu as pltpu

# ---- static model configuration (MambaLayer(dim=4, d_state=16, d_conv=4, expand=2)) ----
DIM = 4                        # d_model == channel dim C
D_STATE = 16
D_CONV = 4
EXPAND = 2
D_INNER = EXPAND * DIM         # 8
DT_RANK = math.ceil(DIM / 16)  # 1
DN = D_INNER * D_STATE         # 128 flattened state columns per batch element
LN_EPS = 1e-5
SCAN_UNROLL = 8


def _silu(x):
    return x * (1.0 / (1.0 + jnp.exp(-x)))


def _softplus(x):
    # matches torch.nn.functional.softplus (threshold = 20)
    safe = jnp.minimum(x, 20.0)
    return jnp.where(x > 20.0, x, jnp.log1p(jnp.exp(safe)))


def mamba_layer_kernel(x_ref, ln_g_ref, ln_b_ref, w_in_ref, conv_w_ref,
                       conv_b_ref, w_dtx_ref, w_b_ref, w_c_ref, w_dt_ref,
                       b_dt_ref, a_row_ref, d_ref, w_out_ref,
                       e_d_ref, e_n_ref, g_d_ref,
                       o_ref, da_sc, dbu_sc, h_sc):
    B, C, L = x_ref.shape
    f32 = jnp.float32

    # ---------------- hoist all parameter loads once (tiny, stay resident) ----------------
    ln_g = ln_g_ref[...]                      # (C, 1)
    ln_b = ln_b_ref[...]                      # (C, 1)
    w_in = w_in_ref[...]                      # (2*D_INNER, C)
    conv_w = conv_w_ref[...]                  # (D_INNER, D_CONV)   taps on lanes
    conv_b = conv_b_ref[...]                  # (D_INNER, 1)
    w_dtx = w_dtx_ref[...]                    # (D_INNER, DT_RANK)
    w_b = w_b_ref[...]                        # (D_INNER, D_STATE)
    w_c = w_c_ref[...]                        # (D_INNER, D_STATE)
    w_dt = w_dt_ref[...]                      # (DT_RANK, D_INNER)
    b_dt = b_dt_ref[...]                      # (1, D_INNER)
    a_row = a_row_ref[...]                    # (1, DN)   = -exp(A_log) flattened (d-major)
    d_col = d_ref[...]                        # (D_INNER, 1)
    w_out = w_out_ref[...]                    # (C, D_INNER)
    e_d = e_d_ref[...]                        # (D_INNER, DN)  e_d[d, j] = (j // N == d)
    e_n = e_n_ref[...]                        # (D_STATE, DN)  e_n[n, j] = (j %  N == n)
    g_d = g_d_ref[...]                        # (DN, D_INNER)  = e_d^T (group-sum matrix)

    u_all, z_all, c_all = [], [], []

    # ================= phase 1: vectorized pre-scan (per batch, lane-dense) =================
    for b in range(B):
        x = x_ref[b].astype(f32)                               # (C, L) channel-major

        # LayerNorm over the channel (sublane) axis
        mean = jnp.mean(x, axis=0, keepdims=True)              # (1, L)
        xc = x - mean
        var = jnp.mean(xc * xc, axis=0, keepdims=True)
        xn = xc * jax.lax.rsqrt(var + LN_EPS) * ln_g + ln_b    # (C, L)

        # in_proj: (2*D_INNER, C) @ (C, L) -> split into x, z
        xz = jnp.dot(w_in, xn, preferred_element_type=f32)     # (2*D_INNER, L)
        x_part = xz[:D_INNER, :]                               # (D_INNER, L)
        z_part = xz[D_INNER:, :]                               # (D_INNER, L) gate (used post-scan)

        # depthwise causal conv1d along L (lane axis) + SiLU -- dense lane shifts
        acc = x_part * conv_w[:, D_CONV - 1:D_CONV]            # zero-shift tap
        for k in range(D_CONV - 1):
            s = D_CONV - 1 - k                                 # causal right shift
            shifted = jnp.concatenate(
                [jnp.zeros((D_INNER, s), f32), x_part[:, :L - s]], axis=1)
            acc = acc + shifted * conv_w[:, k:k + 1]
        u_cm = _silu(acc + conv_b)                             # (D_INNER, L) channel-major

        # x_proj / dt_proj in token-major (single small transpose, then MXU matmuls)
        u_tm = jnp.transpose(u_cm)                             # (L, D_INNER)
        dt_raw = jnp.dot(u_tm, w_dtx, preferred_element_type=f32)  # (L, DT_RANK)
        b_tm = jnp.dot(u_tm, w_b, preferred_element_type=f32)      # (L, D_STATE)
        c_tm = jnp.dot(u_tm, w_c, preferred_element_type=f32)      # (L, D_STATE)

        if DT_RANK == 1:
            dt_lin = dt_raw * w_dt                             # (L,1)*(1,D_INNER)
        else:
            dt_lin = jnp.dot(dt_raw, w_dt, preferred_element_type=f32)
        dt_sp = _softplus(dt_lin + b_dt)                       # (L, D_INNER)
        du_tm = dt_sp * u_tm                                   # (L, D_INNER)

        # expand to dense flattened columns j = d*D_STATE + n via constant selector matmuls
        dt_rep = jnp.dot(dt_sp, e_d, preferred_element_type=f32)   # (L, DN) dt_sp[t, j//N]
        du_rep = jnp.dot(du_tm, e_d, preferred_element_type=f32)   # (L, DN) du[t, j//N]
        b_rep = jnp.dot(b_tm, e_n, preferred_element_type=f32)     # (L, DN) B[t, j%N]

        col0 = b * DN
        da_sc[:, col0:col0 + DN] = jnp.exp(dt_rep * a_row)     # dA_t  (dense, one big exp)
        dbu_sc[:, col0:col0 + DN] = du_rep * b_rep             # dt*u*B

        u_all.append(u_cm)
        z_all.append(z_part)
        c_all.append(c_tm)

    # ================= phase 2: sequential selective scan (both batches at once) ============
    n_cols = B * DN
    main = (L // SCAN_UNROLL) * SCAN_UNROLL
    h0 = jnp.zeros((1, n_cols), f32)

    def unrolled_body(i, h):
        t0 = pl.multiple_of(i * SCAN_UNROLL, SCAN_UNROLL)
        for j in range(SCAN_UNROLL):
            t = t0 + j
            h = da_sc[pl.ds(t, 1), :] * h + dbu_sc[pl.ds(t, 1), :]
            h_sc[pl.ds(t, 1), :] = h
        return h

    def tail_body(t, h):
        h = da_sc[pl.ds(t, 1), :] * h + dbu_sc[pl.ds(t, 1), :]
        h_sc[pl.ds(t, 1), :] = h
        return h

    h = h0
    if main > 0:
        h = jax.lax.fori_loop(0, main // SCAN_UNROLL, unrolled_body, h)
    if main < L:
        h = jax.lax.fori_loop(main, L, tail_body, h)

    # ================= phase 3: y = C.h (dense mul + MXU), skip, gate, out_proj ==============
    for b in range(B):
        col0 = b * DN
        h_hist = h_sc[:, col0:col0 + DN]                       # (L, DN)
        c_rep = jnp.dot(c_all[b], e_n, preferred_element_type=f32)       # (L, DN)
        y_tm = jnp.dot(h_hist * c_rep, g_d, preferred_element_type=f32)  # (L, D_INNER)
        y = jnp.transpose(y_tm)                                # (D_INNER, L) channel-major
        y = (y + u_all[b] * d_col) * _silu(z_all[b])           # skip + gate
        out = jnp.dot(w_out, y, preferred_element_type=f32)    # (C, L) lane-dense
        o_ref[b] = out.astype(o_ref.dtype)


def init_params(key):
    """Deterministic synthetic parameters, stored in the layouts the kernel uses."""
    ks = jax.random.split(key, 7)
    ln_g = jnp.ones((DIM, 1), jnp.float32)
    ln_b = jnp.zeros((DIM, 1), jnp.float32)
    # in_proj.weight (2*d_inner, d_model): used as W @ x (channel-major)
    w_in = 0.2 * jax.random.normal(ks[0], (2 * D_INNER, DIM), jnp.float32)
    # depthwise conv1d: weight (d_inner, d_conv) = channel rows x taps, bias (d_inner, 1)
    conv_w = 0.2 * jax.random.normal(ks[1], (D_INNER, D_CONV), jnp.float32)
    conv_b = 0.1 * jax.random.normal(ks[2], (D_INNER, 1), jnp.float32)
    # x_proj.weight (dt_rank + 2*d_state, d_inner), pre-split and pre-transposed
    # for token-major matmuls u^T @ W^T
    w_x = 0.2 * jax.random.normal(
        ks[3], (DT_RANK + 2 * D_STATE, D_INNER), jnp.float32)
    w_dtx = jnp.transpose(w_x[:DT_RANK])                                 # (d_inner, dt_rank)
    w_b = jnp.transpose(w_x[DT_RANK:DT_RANK + D_STATE])                  # (d_inner, d_state)
    w_c = jnp.transpose(w_x[DT_RANK + D_STATE:DT_RANK + 2 * D_STATE])    # (d_inner, d_state)
    # dt_proj.weight stored transposed as (dt_rank, d_inner)
    w_dt = 0.5 * jax.random.normal(ks[4], (DT_RANK, D_INNER), jnp.float32)
    # Mamba dt-bias init: inverse softplus of dt ~ U[1e-3, 1e-1]
    dt = jnp.exp(jax.random.uniform(ks[5], (1, D_INNER), jnp.float32)
                 * (jnp.log(0.1) - jnp.log(0.001)) + jnp.log(0.001))
    dt = jnp.maximum(dt, 1e-4)
    b_dt = dt + jnp.log(-jnp.expm1(-dt))                                 # (1, d_inner)
    # A_log (d_inner, d_state), A_log[d, n] = log(n+1)
    a_log = (jnp.log(jnp.arange(1, D_STATE + 1, dtype=jnp.float32))[None, :]
             * jnp.ones((D_INNER, 1), jnp.float32))
    d_skip = jnp.ones((D_INNER, 1), jnp.float32)
    # out_proj.weight (d_model, d_inner): used as W @ y (channel-major)
    w_out = 0.2 * jax.random.normal(ks[6], (DIM, D_INNER), jnp.float32)
    return (ln_g, ln_b, w_in, conv_w, conv_b, w_dtx, w_b, w_c, w_dt, b_dt,
            a_log, d_skip, w_out)


def mamba_layer(x, params):
    """x: (B, C, H, W) NCHW float32, returns (B, C, H, W)."""
    B, C, H, W = x.shape
    assert C == DIM
    L = H * W
    # Pure reshape -- channel-major token layout goes straight into the kernel.
    x_tok = x.reshape(B, C, L).astype(jnp.float32)

    (ln_g, ln_b, w_in, conv_w, conv_b, w_dtx, w_b, w_c, w_dt, b_dt,
     a_log, d_skip, w_out) = params

    # Pure functions of the parameters / static dims (precomputed outside the kernel).
    a_row = (-jnp.exp(a_log)).reshape(1, DN)                    # A flattened (d-major)
    cols = jnp.arange(DN, dtype=jnp.int32)
    e_d = (cols[None, :] // D_STATE ==
           jnp.arange(D_INNER, dtype=jnp.int32)[:, None]).astype(jnp.float32)   # (D_INNER, DN)
    e_n = (cols[None, :] % D_STATE ==
           jnp.arange(D_STATE, dtype=jnp.int32)[:, None]).astype(jnp.float32)   # (D_STATE, DN)
    g_d = jnp.transpose(e_d)                                                     # (DN, D_INNER)

    out_tok = pl.pallas_call(
        mamba_layer_kernel,
        out_shape=jax.ShapeDtypeStruct((B, C, L), jnp.float32),
        scratch_shapes=[
            pltpu.VMEM((L, B * DN), jnp.float32),  # dA_t      (dense, lane-packed)
            pltpu.VMEM((L, B * DN), jnp.float32),  # dt*u*B_t
            pltpu.VMEM((L, B * DN), jnp.float32),  # h_t history
        ],
        compiler_params=pltpu.CompilerParams(
            vmem_limit_bytes=32 * 1024 * 1024),
    )(x_tok, ln_g, ln_b, w_in, conv_w, conv_b, w_dtx, w_b, w_c, w_dt, b_dt,
      a_row, d_skip, w_out, e_d, e_n, g_d)

    return out_tok.reshape(B, C, H, W)


if __name__ == "__main__":
    key = jax.random.PRNGKey(0)
    k_x, k_p = jax.random.split(key)
    x = jax.random.normal(k_x, (2, DIM, 16, 16), jnp.float32)   # (B, C, H, W)
    params = init_params(k_p)

    out = mamba_layer(x, params)
    out = jax.block_until_ready(out)

    assert out.shape == x.shape
    assert bool(jnp.all(jnp.isfinite(out)))
    print("KERNEL_OK")
</pallas_src>

<mosaic_0001>
module attributes {stable_mosaic.version = 11 : i64} {
  func.func @mamba_layer_kernel(%arg0: memref<2x4x256xf32, #tpu.memory_space<vmem>>, %arg1: memref<4x1xf32, #tpu.memory_space<vmem>>, %arg2: memref<4x1xf32, #tpu.memory_space<vmem>>, %arg3: memref<16x4xf32, #tpu.memory_space<vmem>>, %arg4: memref<8x4xf32, #tpu.memory_space<vmem>>, %arg5: memref<8x1xf32, #tpu.memory_space<vmem>>, %arg6: memref<8x1xf32, #tpu.memory_space<vmem>>, %arg7: memref<8x16xf32, #tpu.memory_space<vmem>>, %arg8: memref<8x16xf32, #tpu.memory_space<vmem>>, %arg9: memref<1x8xf32, #tpu.memory_space<vmem>>, %arg10: memref<1x8xf32, #tpu.memory_space<vmem>>, %arg11: memref<1x128xf32, #tpu.memory_space<vmem>>, %arg12: memref<8x1xf32, #tpu.memory_space<vmem>>, %arg13: memref<4x8xf32, #tpu.memory_space<vmem>>, %arg14: memref<8x128xf32, #tpu.memory_space<vmem>>, %arg15: memref<16x128xf32, #tpu.memory_space<vmem>>, %arg16: memref<128x8xf32, #tpu.memory_space<vmem>>, %arg17: memref<2x4x256xf32, #tpu.memory_space<vmem>>, %arg18: memref<256x256xf32, #tpu.memory_space<vmem>>, %arg19: memref<256x256xf32, #tpu.memory_space<vmem>>, %arg20: memref<256x256xf32, #tpu.memory_space<vmem>>) attributes {dimension_semantics = [], scalar_prefetch = 0 : i64, scratch_operands = 3 : i64, tpu.core_type = #tpu.core_type<tc>} {
    %c0 = arith.constant 0 : index
    %c0_0 = arith.constant 0 : index
    %0 = vector.load %arg1[%c0, %c0_0] : memref<4x1xf32, #tpu.memory_space<vmem>>, vector<4x1xf32>
    %c0_1 = arith.constant 0 : index
    %c0_2 = arith.constant 0 : index
    %1 = vector.load %arg2[%c0_1, %c0_2] : memref<4x1xf32, #tpu.memory_space<vmem>>, vector<4x1xf32>
    %c0_3 = arith.constant 0 : index
    %c0_4 = arith.constant 0 : index
    %2 = vector.load %arg3[%c0_3, %c0_4] : memref<16x4xf32, #tpu.memory_space<vmem>>, vector<16x4xf32>
    %c0_5 = arith.constant 0 : index
    %c0_6 = arith.constant 0 : index
    %3 = vector.load %arg4[%c0_5, %c0_6] : memref<8x4xf32, #tpu.memory_space<vmem>>, vector<8x4xf32>
    %c0_7 = arith.constant 0 : index
    %c0_8 = arith.constant 0 : index
    %4 = vector.load %arg5[%c0_7, %c0_8] : memref<8x1xf32, #tpu.memory_space<vmem>>, vector<8x1xf32>
    %c0_9 = arith.constant 0 : index
    %c0_10 = arith.constant 0 : index
    %5 = vector.load %arg6[%c0_9, %c0_10] : memref<8x1xf32, #tpu.memory_space<vmem>>, vector<8x1xf32>
    %c0_11 = arith.constant 0 : index
    %c0_12 = arith.constant 0 : index
    %6 = vector.load %arg7[%c0_11, %c0_12] : memref<8x16xf32, #tpu.memory_space<vmem>>, vector<8x16xf32>
    %c0_13 = arith.constant 0 : index
    %c0_14 = arith.constant 0 : index
    %7 = vector.load %arg8[%c0_13, %c0_14] : memref<8x16xf32, #tpu.memory_space<vmem>>, vector<8x16xf32>
    %c0_15 = arith.constant 0 : index
    %c0_16 = arith.constant 0 : index
    %8 = vector.load %arg9[%c0_15, %c0_16] : memref<1x8xf32, #tpu.memory_space<vmem>>, vector<1x8xf32>
    %c0_17 = arith.constant 0 : index
    %c0_18 = arith.constant 0 : index
    %9 = vector.load %arg10[%c0_17, %c0_18] : memref<1x8xf32, #tpu.memory_space<vmem>>, vector<1x8xf32>
    %c0_19 = arith.constant 0 : index
    %c0_20 = arith.constant 0 : index
    %10 = vector.load %arg11[%c0_19, %c0_20] : memref<1x128xf32, #tpu.memory_space<vmem>>, vector<1x128xf32>
    %c0_21 = arith.constant 0 : index
    %c0_22 = arith.constant 0 : index
    %11 = vector.load %arg12[%c0_21, %c0_22] : memref<8x1xf32, #tpu.memory_space<vmem>>, vector<8x1xf32>
    %c0_23 = arith.constant 0 : index
    %c0_24 = arith.constant 0 : index
    %12 = vector.load %arg13[%c0_23, %c0_24] : memref<4x8xf32, #tpu.memory_space<vmem>>, vector<4x8xf32>
    %c0_25 = arith.constant 0 : index
    %c0_26 = arith.constant 0 : index
    %13 = vector.load %arg14[%c0_25, %c0_26] : memref<8x128xf32, #tpu.memory_space<vmem>>, vector<8x128xf32>
    %c0_27 = arith.constant 0 : index
    %c0_28 = arith.constant 0 : index
    %14 = vector.load %arg15[%c0_27, %c0_28] : memref<16x128xf32, #tpu.memory_space<vmem>>, vector<16x128xf32>
    %c0_29 = arith.constant 0 : index
    %c0_30 = arith.constant 0 : index
    %15 = vector.load %arg16[%c0_29, %c0_30] : memref<128x8xf32, #tpu.memory_space<vmem>>, vector<128x8xf32>
    %c0_31 = arith.constant 0 : index
    %c0_32 = arith.constant 0 : index
    %c0_33 = arith.constant 0 : index
    %16 = vector.load %arg0[%c0_31, %c0_32, %c0_33] : memref<2x4x256xf32, #tpu.memory_space<vmem>>, vector<1x4x256xf32>
    %17 = vector.shape_cast %16 : vector<1x4x256xf32> to vector<4x256xf32>
    %cst = arith.constant dense<0.000000e+00> : vector<256xf32>
    %18 = vector.multi_reduction <add>, %17, %cst [0] : vector<4x256xf32> to vector<256xf32>
    %19 = vector.shape_cast %18 : vector<256xf32> to vector<1x256xf32>
    %cst_34 = arith.constant 4.000000e+00 : f32
    %20 = vector.broadcast %cst_34 : f32 to vector<1x256xf32>
    %21 = arith.divf %19, %20 : vector<1x256xf32>
    %22 = vector.broadcast %21 : vector<1x256xf32> to vector<4x256xf32>
    %23 = arith.subf %17, %22 : vector<4x256xf32>
    %24 = arith.mulf %23, %23 : vector<4x256xf32>
    %cst_35 = arith.constant dense<0.000000e+00> : vector<256xf32>
    %25 = vector.multi_reduction <add>, %24, %cst_35 [0] : vector<4x256xf32> to vector<256xf32>
    %26 = vector.shape_cast %25 : vector<256xf32> to vector<1x256xf32>
    %cst_36 = arith.constant 4.000000e+00 : f32
    %27 = vector.broadcast %cst_36 : f32 to vector<1x256xf32>
    %28 = arith.divf %26, %27 : vector<1x256xf32>
    %cst_37 = arith.constant 9.99999974E-6 : f32
    %29 = vector.broadcast %cst_37 : f32 to vector<1x256xf32>
    %30 = arith.addf %28, %29 : vector<1x256xf32>
    %31 = math.rsqrt %30 : vector<1x256xf32>
    %32 = vector.broadcast %31 : vector<1x256xf32> to vector<4x256xf32>
    %33 = arith.mulf %23, %32 : vector<4x256xf32>
    %34 = vector.broadcast %0 : vector<4x1xf32> to vector<4x256xf32>
    %35 = arith.mulf %33, %34 : vector<4x256xf32>
    %36 = vector.broadcast %1 : vector<4x1xf32> to vector<4x256xf32>
    %37 = arith.addf %35, %36 : vector<4x256xf32>
    %cst_38 = arith.constant dense<0.000000e+00> : vector<16x256xf32>
    %38 = tpu.matmul %2, %37, %cst_38 {dimension_numbers = #tpu.dot_dimension_numbers<[1], [0], [0], [1], [0, 0, 1, 1], [], []>} : vector<16x4xf32>, vector<4x256xf32>, vector<16x256xf32> -> vector<16x256xf32>
    %39 = vector.extract_strided_slice %38 {offsets = [0, 0], sizes = [8, 256], strides = [1, 1]} : vector<16x256xf32> to vector<8x256xf32>
    %40 = vector.extract_strided_slice %38 {offsets = [8, 0], sizes = [8, 256], strides = [1, 1]} : vector<16x256xf32> to vector<8x256xf32>
    %41 = vector.extract_strided_slice %3 {offsets = [0, 3], sizes = [8, 1], strides = [1, 1]} : vector<8x4xf32> to vector<8x1xf32>
    %42 = vector.broadcast %41 : vector<8x1xf32> to vector<8x256xf32>
    %43 = arith.mulf %39, %42 : vector<8x256xf32>
    %cst_39 = arith.constant 0.000000e+00 : f32
    %44 = vector.broadcast %cst_39 : f32 to vector<8x3xf32>
    %45 = vector.extract_strided_slice %39 {offsets = [0, 0], sizes = [8, 253], strides = [1, 1]} : vector<8x256xf32> to vector<8x253xf32>
    %46 = tpu.concatenate %44, %45 in 1 : vector<8x3xf32>, vector<8x253xf32> -> vector<8x256xf32>
    %47 = vector.extract_strided_slice %3 {offsets = [0, 0], sizes = [8, 1], strides = [1, 1]} : vector<8x4xf32> to vector<8x1xf32>
    %48 = vector.broadcast %47 : vector<8x1xf32> to vector<8x256xf32>
    %49 = arith.mulf %46, %48 : vector<8x256xf32>
    %50 = arith.addf %43, %49 : vector<8x256xf32>
    %cst_40 = arith.constant 0.000000e+00 : f32
    %51 = vector.broadcast %cst_40 : f32 to vector<8x2xf32>
    %52 = vector.extract_strided_slice %39 {offsets = [0, 0], sizes = [8, 254], strides = [1, 1]} : vector<8x256xf32> to vector<8x254xf32>
    %53 = tpu.concatenate %51, %52 in 1 : vector<8x2xf32>, vector<8x254xf32> -> vector<8x256xf32>
    %54 = vector.extract_strided_slice %3 {offsets = [0, 1], sizes = [8, 1], strides = [1, 1]} : vector<8x4xf32> to vector<8x1xf32>
    %55 = vector.broadcast %54 : vector<8x1xf32> to vector<8x256xf32>
    %56 = arith.mulf %53, %55 : vector<8x256xf32>
    %57 = arith.addf %50, %56 : vector<8x256xf32>
    %cst_41 = arith.constant 0.000000e+00 : f32
    %58 = vector.broadcast %cst_41 : f32 to vector<8x1xf32>
    %59 = vector.extract_strided_slice %39 {offsets = [0, 0], sizes = [8, 255], strides = [1, 1]} : vector<8x256xf32> to vector<8x255xf32>
    %60 = tpu.concatenate %58, %59 in 1 : vector<8x1xf32>, vector<8x255xf32> -> vector<8x256xf32>
    %61 = vector.extract_strided_slice %3 {offsets = [0, 2], sizes = [8, 1], strides = [1, 1]} : vector<8x4xf32> to vector<8x1xf32>
    %62 = vector.broadcast %61 : vector<8x1xf32> to vector<8x256xf32>
    %63 = arith.mulf %60, %62 : vector<8x256xf32>
    %64 = arith.addf %57, %63 : vector<8x256xf32>
    %65 = vector.broadcast %4 : vector<8x1xf32> to vector<8x256xf32>
    %66 = arith.addf %64, %65 : vector<8x256xf32>
    %cst_42 = arith.constant 0.000000e+00 : f32
    %67 = vector.broadcast %cst_42 : f32 to vector<8x256xf32>
    %68 = arith.subf %67, %66 : vector<8x256xf32>
    %69 = math.exp %68 : vector<8x256xf32>
    %cst_43 = arith.constant 1.000000e+00 : f32
    %70 = vector.broadcast %cst_43 : f32 to vector<8x256xf32>
    %71 = arith.addf %70, %69 : vector<8x256xf32>
    %cst_44 = arith.constant 1.000000e+00 : f32
    %72 = vector.broadcast %cst_44 : f32 to vector<8x256xf32>
    %73 = arith.divf %72, %71 : vector<8x256xf32>
    %74 = arith.mulf %66, %73 : vector<8x256xf32>
    %75 = tpu.transpose %74, [1, 0] : vector<8x256xf32> -> vector<256x8xf32>
    %cst_45 = arith.constant dense<0.000000e+00> : vector<256x1xf32>
    %76 = tpu.matmul %75, %5, %cst_45 {dimension_numbers = #tpu.dot_dimension_numbers<[1], [0], [0], [1], [0, 0, 1, 1], [], []>} : vector<256x8xf32>, vector<8x1xf32>, vector<256x1xf32> -> vector<256x1xf32>
    %cst_46 = arith.constant dense<0.000000e+00> : vector<256x16xf32>
    %77 = tpu.matmul %75, %6, %cst_46 {dimension_numbers = #tpu.dot_dimension_numbers<[1], [0], [0], [1], [0, 0, 1, 1], [], []>} : vector<256x8xf32>, vector<8x16xf32>, vector<256x16xf32> -> vector<256x16xf32>
    %cst_47 = arith.constant dense<0.000000e+00> : vector<256x16xf32>
    %78 = tpu.matmul %75, %7, %cst_47 {dimension_numbers = #tpu.dot_dimension_numbers<[1], [0], [0], [1], [0, 0, 1, 1], [], []>} : vector<256x8xf32>, vector<8x16xf32>, vector<256x16xf32> -> vector<256x16xf32>
    %79 = vector.broadcast %76 : vector<256x1xf32> to vector<256x8xf32>
    %80 = vector.broadcast %8 : vector<1x8xf32> to vector<256x8xf32>
    %81 = arith.mulf %79, %80 : vector<256x8xf32>
    %82 = vector.broadcast %9 : vector<1x8xf32> to vector<256x8xf32>
    %83 = arith.addf %81, %82 : vector<256x8xf32>
    %cst_48 = arith.constant 2.000000e+01 : f32
    %84 = vector.broadcast %cst_48 : f32 to vector<256x8xf32>
    %85 = arith.minimumf %83, %84 : vector<256x8xf32>
    %cst_49 = arith.constant 2.000000e+01 : f32
    %86 = vector.broadcast %cst_49 : f32 to vector<256x8xf32>
    %87 = arith.cmpf ogt, %83, %86 : vector<256x8xf32>
    %88 = math.exp %85 : vector<256x8xf32>
    %89 = math.log1p %88 : vector<256x8xf32>
    %90 = arith.select %87, %83, %89 : vector<256x8xi1>, vector<256x8xf32>
    %91 = arith.mulf %90, %75 : vector<256x8xf32>
    %cst_50 = arith.constant dense<0.000000e+00> : vector<256x128xf32>
    %92 = tpu.matmul %90, %13, %cst_50 {dimension_numbers = #tpu.dot_dimension_numbers<[1], [0], [0], [1], [0, 0, 1, 1], [], []>} : vector<256x8xf32>, vector<8x128xf32>, vector<256x128xf32> -> vector<256x128xf32>
    %cst_51 = arith.constant dense<0.000000e+00> : vector<256x128xf32>
    %93 = tpu.matmul %91, %13, %cst_51 {dimension_numbers = #tpu.dot_dimension_numbers<[1], [0], [0], [1], [0, 0, 1, 1], [], []>} : vector<256x8xf32>, vector<8x128xf32>, vector<256x128xf32> -> vector<256x128xf32>
    %cst_52 = arith.constant dense<0.000000e+00> : vector<256x128xf32>
    %94 = tpu.matmul %77, %14, %cst_52 {dimension_numbers = #tpu.dot_dimension_numbers<[1], [0], [0], [1], [0, 0, 1, 1], [], []>} : vector<256x16xf32>, vector<16x128xf32>, vector<256x128xf32> -> vector<256x128xf32>
    %95 = vector.broadcast %10 : vector<1x128xf32> to vector<256x128xf32>
    %96 = arith.mulf %92, %95 : vector<256x128xf32>
    %97 = math.exp %96 : vector<256x128xf32>
    %c0_53 = arith.constant 0 : index
    %c0_54 = arith.constant 0 : index
    %98 = vector.load %arg18[%c0_53, %c0_54] : memref<256x256xf32, #tpu.memory_space<vmem>>, vector<256x128xf32>
    tpu.vector_store %arg18[%c0_53, %c0_54], %97 {strides = array<i32>} : memref<256x256xf32, #tpu.memory_space<vmem>>, vector<256x128xf32>,
    %99 = arith.mulf %93, %94 : vector<256x128xf32>
    %c0_55 = arith.constant 0 : index
    %c0_56 = arith.constant 0 : index
    %100 = vector.load %arg19[%c0_55, %c0_56] : memref<256x256xf32, #tpu.memory_space<vmem>>, vector<256x128xf32>
    tpu.vector_store %arg19[%c0_55, %c0_56], %99 {strides = array<i32>} : memref<256x256xf32, #tpu.memory_space<vmem>>, vector<256x128xf32>,
    %c1 = arith.constant 1 : index
    %c0_57 = arith.constant 0 : index
    %c0_58 = arith.constant 0 : index
    %101 = vector.load %arg0[%c1, %c0_57, %c0_58] : memref<2x4x256xf32, #tpu.memory_space<vmem>>, vector<1x4x256xf32>
    %102 = vector.shape_cast %101 : vector<1x4x256xf32> to vector<4x256xf32>
    %cst_59 = arith.constant dense<0.000000e+00> : vector<256xf32>
    %103 = vector.multi_reduction <add>, %102, %cst_59 [0] : vector<4x256xf32> to vector<256xf32>
    %104 = vector.shape_cast %103 : vector<256xf32> to vector<1x256xf32>
    %cst_60 = arith.constant 4.000000e+00 : f32
    %105 = vector.broadcast %cst_60 : f32 to vector<1x256xf32>
    %106 = arith.divf %104, %105 : vector<1x256xf32>
    %107 = vector.broadcast %106 : vector<1x256xf32> to vector<4x256xf32>
    %108 = arith.subf %102, %107 : vector<4x256xf32>
    %109 = arith.mulf %108, %108 : vector<4x256xf32>
    %cst_61 = arith.constant dense<0.000000e+00> : vector<256xf32>
    %110 = vector.multi_reduction <add>, %109, %cst_61 [0] : vector<4x256xf32> to vector<256xf32>
    %111 = vector.shape_cast %110 : vector<256xf32> to vector<1x256xf32>
    %cst_62 = arith.constant 4.000000e+00 : f32
    %112 = vector.broadcast %cst_62 : f32 to vector<1x256xf32>
    %113 = arith.divf %111, %112 : vector<1x256xf32>
    %cst_63 = arith.constant 9.99999974E-6 : f32
    %114 = vector.broadcast %cst_63 : f32 to vector<1x256xf32>
    %115 = arith.addf %113, %114 : vector<1x256xf32>
    %116 = math.rsqrt %115 : vector<1x256xf32>
    %117 = vector.broadcast %116 : vector<1x256xf32> to vector<4x256xf32>
    %118 = arith.mulf %108, %117 : vector<4x256xf32>
    %119 = vector.broadcast %0 : vector<4x1xf32> to vector<4x256xf32>
    %120 = arith.mulf %118, %119 : vector<4x256xf32>
    %121 = vector.broadcast %1 : vector<4x1xf32> to vector<4x256xf32>
    %122 = arith.addf %120, %121 : vector<4x256xf32>
    %cst_64 = arith.constant dense<0.000000e+00> : vector<16x256xf32>
    %123 = tpu.matmul %2, %122, %cst_64 {dimension_numbers = #tpu.dot_dimension_numbers<[1], [0], [0], [1], [0, 0, 1, 1], [], []>} : vector<16x4xf32>, vector<4x256xf32>, vector<16x256xf32> -> vector<16x256xf32>
    %124 = vector.extract_strided_slice %123 {offsets = [0, 0], sizes = [8, 256], strides = [1, 1]} : vector<16x256xf32> to vector<8x256xf32>
    %125 = vector.extract_strided_slice %123 {offsets = [8, 0], sizes = [8, 256], strides = [1, 1]} : vector<16x256xf32> to vector<8x256xf32>
    %126 = vector.extract_strided_slice %3 {offsets = [0, 3], sizes = [8, 1], strides = [1, 1]} : vector<8x4xf32> to vector<8x1xf32>
    %127 = vector.broadcast %126 : vector<8x1xf32> to vector<8x256xf32>
    %128 = arith.mulf %124, %127 : vector<8x256xf32>
    %cst_65 = arith.constant 0.000000e+00 : f32
    %129 = vector.broadcast %cst_65 : f32 to vector<8x3xf32>
    %130 = vector.extract_strided_slice %124 {offsets = [0, 0], sizes = [8, 253], strides = [1, 1]} : vector<8x256xf32> to vector<8x253xf32>
    %131 = tpu.concatenate %129, %130 in 1 : vector<8x3xf32>, vector<8x253xf32> -> vector<8x256xf32>
    %132 = vector.extract_strided_slice %3 {offsets = [0, 0], sizes = [8, 1], strides = [1, 1]} : vector<8x4xf32> to vector<8x1xf32>
    %133 = vector.broadcast %132 : vector<8x1xf32> to vector<8x256xf32>
    %134 = arith.mulf %131, %133 : vector<8x256xf32>
    %135 = arith.addf %128, %134 : vector<8x256xf32>
    %cst_66 = arith.constant 0.000000e+00 : f32
    %136 = vector.broadcast %cst_66 : f32 to vector<8x2xf32>
    %137 = vector.extract_strided_slice %124 {offsets = [0, 0], sizes = [8, 254], strides = [1, 1]} : vector<8x256xf32> to vector<8x254xf32>
    %138 = tpu.concatenate %136, %137 in 1 : vector<8x2xf32>, vector<8x254xf32> -> vector<8x256xf32>
    %139 = vector.extract_strided_slice %3 {offsets = [0, 1], sizes = [8, 1], strides = [1, 1]} : vector<8x4xf32> to vector<8x1xf32>
    %140 = vector.broadcast %139 : vector<8x1xf32> to vector<8x256xf32>
    %141 = arith.mulf %138, %140 : vector<8x256xf32>
    %142 = arith.addf %135, %141 : vector<8x256xf32>
    %cst_67 = arith.constant 0.000000e+00 : f32
    %143 = vector.broadcast %cst_67 : f32 to vector<8x1xf32>
    %144 = vector.extract_strided_slice %124 {offsets = [0, 0], sizes = [8, 255], strides = [1, 1]} : vector<8x256xf32> to vector<8x255xf32>
    %145 = tpu.concatenate %143, %144 in 1 : vector<8x1xf32>, vector<8x255xf32> -> vector<8x256xf32>
    %146 = vector.extract_strided_slice %3 {offsets = [0, 2], sizes = [8, 1], strides = [1, 1]} : vector<8x4xf32> to vector<8x1xf32>
    %147 = vector.broadcast %146 : vector<8x1xf32> to vector<8x256xf32>
    %148 = arith.mulf %145, %147 : vector<8x256xf32>
    %149 = arith.addf %142, %148 : vector<8x256xf32>
    %150 = vector.broadcast %4 : vector<8x1xf32> to vector<8x256xf32>
    %151 = arith.addf %149, %150 : vector<8x256xf32>
    %cst_68 = arith.constant 0.000000e+00 : f32
    %152 = vector.broadcast %cst_68 : f32 to vector<8x256xf32>
    %153 = arith.subf %152, %151 : vector<8x256xf32>
    %154 = math.exp %153 : vector<8x256xf32>
    %cst_69 = arith.constant 1.000000e+00 : f32
    %155 = vector.broadcast %cst_69 : f32 to vector<8x256xf32>
    %156 = arith.addf %155, %154 : vector<8x256xf32>
    %cst_70 = arith.constant 1.000000e+00 : f32
    %157 = vector.broadcast %cst_70 : f32 to vector<8x256xf32>
    %158 = arith.divf %157, %156 : vector<8x256xf32>
    %159 = arith.mulf %151, %158 : vector<8x256xf32>
    %160 = tpu.transpose %159, [1, 0] : vector<8x256xf32> -> vector<256x8xf32>
    %cst_71 = arith.constant dense<0.000000e+00> : vector<256x1xf32>
    %161 = tpu.matmul %160, %5, %cst_71 {dimension_numbers = #tpu.dot_dimension_numbers<[1], [0], [0], [1], [0, 0, 1, 1], [], []>} : vector<256x8xf32>, vector<8x1xf32>, vector<256x1xf32> -> vector<256x1xf32>
    %cst_72 = arith.constant dense<0.000000e+00> : vector<256x16xf32>
    %162 = tpu.matmul %160, %6, %cst_72 {dimension_numbers = #tpu.dot_dimension_numbers<[1], [0], [0], [1], [0, 0, 1, 1], [], []>} : vector<256x8xf32>, vector<8x16xf32>, vector<256x16xf32> -> vector<256x16xf32>
    %cst_73 = arith.constant dense<0.000000e+00> : vector<256x16xf32>
    %163 = tpu.matmul %160, %7, %cst_73 {dimension_numbers = #tpu.dot_dimension_numbers<[1], [0], [0], [1], [0, 0, 1, 1], [], []>} : vector<256x8xf32>, vector<8x16xf32>, vector<256x16xf32> -> vector<256x16xf32>
    %164 = vector.broadcast %161 : vector<256x1xf32> to vector<256x8xf32>
    %165 = vector.broadcast %8 : vector<1x8xf32> to vector<256x8xf32>
    %166 = arith.mulf %164, %165 : vector<256x8xf32>
    %167 = vector.broadcast %9 : vector<1x8xf32> to vector<256x8xf32>
    %168 = arith.addf %166, %167 : vector<256x8xf32>
    %cst_74 = arith.constant 2.000000e+01 : f32
    %169 = vector.broadcast %cst_74 : f32 to vector<256x8xf32>
    %170 = arith.minimumf %168, %169 : vector<256x8xf32>
    %cst_75 = arith.constant 2.000000e+01 : f32
    %171 = vector.broadcast %cst_75 : f32 to vector<256x8xf32>
    %172 = arith.cmpf ogt, %168, %171 : vector<256x8xf32>
    %173 = math.exp %170 : vector<256x8xf32>
    %174 = math.log1p %173 : vector<256x8xf32>
    %175 = arith.select %172, %168, %174 : vector<256x8xi1>, vector<256x8xf32>
    %176 = arith.mulf %175, %160 : vector<256x8xf32>
    %cst_76 = arith.constant dense<0.000000e+00> : vector<256x128xf32>
    %177 = tpu.matmul %175, %13, %cst_76 {dimension_numbers = #tpu.dot_dimension_numbers<[1], [0], [0], [1], [0, 0, 1, 1], [], []>} : vector<256x8xf32>, vector<8x128xf32>, vector<256x128xf32> -> vector<256x128xf32>
    %cst_77 = arith.constant dense<0.000000e+00> : vector<256x128xf32>
    %178 = tpu.matmul %176, %13, %cst_77 {dimension_numbers = #tpu.dot_dimension_numbers<[1], [0], [0], [1], [0, 0, 1, 1], [], []>} : vector<256x8xf32>, vector<8x128xf32>, vector<256x128xf32> -> vector<256x128xf32>
    %cst_78 = arith.constant dense<0.000000e+00> : vector<256x128xf32>
    %179 = tpu.matmul %162, %14, %cst_78 {dimension_numbers = #tpu.dot_dimension_numbers<[1], [0], [0], [1], [0, 0, 1, 1], [], []>} : vector<256x16xf32>, vector<16x128xf32>, vector<256x128xf32> -> vector<256x128xf32>
    %180 = vector.broadcast %10 : vector<1x128xf32> to vector<256x128xf32>
    %181 = arith.mulf %177, %180 : vector<256x128xf32>
    %182 = math.exp %181 : vector<256x128xf32>
    %c0_79 = arith.constant 0 : index
    %c128 = arith.constant 128 : index
    %183 = vector.load %arg18[%c0_79, %c128] : memref<256x256xf32, #tpu.memory_space<vmem>>, vector<256x128xf32>
    tpu.vector_store %arg18[%c0_79, %c128], %182 {strides = array<i32>} : memref<256x256xf32, #tpu.memory_space<vmem>>, vector<256x128xf32>,
    %184 = arith.mulf %178, %179 : vector<256x128xf32>
    %c0_80 = arith.constant 0 : index
    %c128_81 = arith.constant 128 : index
    %185 = vector.load %arg19[%c0_80, %c128_81] : memref<256x256xf32, #tpu.memory_space<vmem>>, vector<256x128xf32>
    tpu.vector_store %arg19[%c0_80, %c128_81], %184 {strides = array<i32>} : memref<256x256xf32, #tpu.memory_space<vmem>>, vector<256x128xf32>,
    %cst_82 = arith.constant 0.000000e+00 : f32
    %186 = vector.broadcast %cst_82 : f32 to vector<1x256xf32>
    %c0_i32 = arith.constant 0 : i32
    %c32_i32 = arith.constant 32 : i32
    %187 = arith.addi %c0_i32, %c32_i32 : i32
    %c1_i32 = arith.constant 1 : i32
    %188 = scf.for %arg21 = %c0_i32 to %187 step %c1_i32 iter_args(%arg22 = %186) -> (vector<1x256xf32>)  : i32 {
      %c8_i32 = arith.constant 8 : i32
      %231 = arith.muli %arg21, %c8_i32 : i32
      %232 = tpu.assume_multiple %231, 8 : i32
      %c0_i32_106 = arith.constant 0 : i32
      %233 = arith.addi %232, %c0_i32_106 : i32
      %234 = arith.index_cast %233 : i32 to index
      %c0_107 = arith.constant 0 : index
      %235 = vector.load %arg18[%234, %c0_107] : memref<256x256xf32, #tpu.memory_space<vmem>>, vector<1x256xf32>
      %236 = arith.mulf %235, %arg22 : vector<1x256xf32>
      %237 = arith.index_cast %233 : i32 to index
      %c0_108 = arith.constant 0 : index
      %238 = vector.load %arg19[%237, %c0_108] : memref<256x256xf32, #tpu.memory_space<vmem>>, vector<1x256xf32>
      %239 = arith.addf %236, %238 : vector<1x256xf32>
      %240 = arith.index_cast %233 : i32 to index
      %c0_109 = arith.constant 0 : index
      %241 = vector.load %arg20[%240, %c0_109] : memref<256x256xf32, #tpu.memory_space<vmem>>, vector<1x256xf32>
      tpu.vector_store %arg20[%240, %c0_109], %239 {strides = array<i32>} : memref<256x256xf32, #tpu.memory_space<vmem>>, vector<1x256xf32>,
      %c1_i32_110 = arith.constant 1 : i32
      %242 = arith.addi %232, %c1_i32_110 : i32
      %243 = arith.index_cast %242 : i32 to index
      %c0_111 = arith.constant 0 : index
      %244 = vector.load %arg18[%243, %c0_111] : memref<256x256xf32, #tpu.memory_space<vmem>>, vector<1x256xf32>
      %245 = arith.mulf %244, %239 : vector<1x256xf32>
      %246 = arith.index_cast %242 : i32 to index
      %c0_112 = arith.constant 0 : index
      %247 = vector.load %arg19[%246, %c0_112] : memref<256x256xf32, #tpu.memory_space<vmem>>, vector<1x256xf32>
      %248 = arith.addf %245, %247 : vector<1x256xf32>
      %249 = arith.index_cast %242 : i32 to index
      %c0_113 = arith.constant 0 : index
      %250 = vector.load %arg20[%249, %c0_113] : memref<256x256xf32, #tpu.memory_space<vmem>>, vector<1x256xf32>
      tpu.vector_store %arg20[%249, %c0_113], %248 {strides = array<i32>} : memref<256x256xf32, #tpu.memory_space<vmem>>, vector<1x256xf32>,
      %c2_i32 = arith.constant 2 : i32
      %251 = arith.addi %232, %c2_i32 : i32
      %252 = arith.index_cast %251 : i32 to index
      %c0_114 = arith.constant 0 : index
      %253 = vector.load %arg18[%252, %c0_114] : memref<256x256xf32, #tpu.memory_space<vmem>>, vector<1x256xf32>
      %254 = arith.mulf %253, %248 : vector<1x256xf32>
      %255 = arith.index_cast %251 : i32 to index
      %c0_115 = arith.constant 0 : index
      %256 = vector.load %arg19[%255, %c0_115] : memref<256x256xf32, #tpu.memory_space<vmem>>, vector<1x256xf32>
      %257 = arith.addf %254, %256 : vector<1x256xf32>
      %258 = arith.index_cast %251 : i32 to index
      %c0_116 = arith.constant 0 : index
      %259 = vector.load %arg20[%258, %c0_116] : memref<256x256xf32, #tpu.memory_space<vmem>>, vector<1x256xf32>
      tpu.vector_store %arg20[%258, %c0_116], %257 {strides = array<i32>} : memref<256x256xf32, #tpu.memory_space<vmem>>, vector<1x256xf32>,
      %c3_i32 = arith.constant 3 : i32
      %260 = arith.addi %232, %c3_i32 : i32
      %261 = arith.index_cast %260 : i32 to index
      %c0_117 = arith.constant 0 : index
      %262 = vector.load %arg18[%261, %c0_117] : memref<256x256xf32, #tpu.memory_space<vmem>>, vector<1x256xf32>
      %263 = arith.mulf %262, %257 : vector<1x256xf32>
      %264 = arith.index_cast %260 : i32 to index
      %c0_118 = arith.constant 0 : index
      %265 = vector.load %arg19[%264, %c0_118] : memref<256x256xf32, #tpu.memory_space<vmem>>, vector<1x256xf32>
      %266 = arith.addf %263, %265 : vector<1x256xf32>
      %267 = arith.index_cast %260 : i32 to index
      %c0_119 = arith.constant 0 : index
      %268 = vector.load %arg20[%267, %c0_119] : memref<256x256xf32, #tpu.memory_space<vmem>>, vector<1x256xf32>
      tpu.vector_store %arg20[%267, %c0_119], %266 {strides = array<i32>} : memref<256x256xf32, #tpu.memory_space<vmem>>, vector<1x256xf32>,
      %c4_i32 = arith.constant 4 : i32
      %269 = arith.addi %232, %c4_i32 : i32
      %270 = arith.index_cast %269 : i32 to index
      %c0_120 = arith.constant 0 : index
      %271 = vector.load %arg18[%270, %c0_120] : memref<256x256xf32, #tpu.memory_space<vmem>>, vector<1x256xf32>
      %272 = arith.mulf %271, %266 : vector<1x256xf32>
      %273 = arith.index_cast %269 : i32 to index
      %c0_121 = arith.constant 0 : index
      %274 = vector.load %arg19[%273, %c0_121] : memref<256x256xf32, #tpu.memory_space<vmem>>, vector<1x256xf32>
      %275 = arith.addf %272, %274 : vector<1x256xf32>
      %276 = arith.index_cast %269 : i32 to index
      %c0_122 = arith.constant 0 : index
      %277 = vector.load %arg20[%276, %c0_122] : memref<256x256xf32, #tpu.memory_space<vmem>>, vector<1x256xf32>
      tpu.vector_store %arg20[%276, %c0_122], %275 {strides = array<i32>} : memref<256x256xf32, #tpu.memory_space<vmem>>, vector<1x256xf32>,
      %c5_i32 = arith.constant 5 : i32
      %278 = arith.addi %232, %c5_i32 : i32
      %279 = arith.index_cast %278 : i32 to index
      %c0_123 = arith.constant 0 : index
      %280 = vector.load %arg18[%279, %c0_123] : memref<256x256xf32, #tpu.memory_space<vmem>>, vector<1x256xf32>
      %281 = arith.mulf %280, %275 : vector<1x256xf32>
      %282 = arith.index_cast %278 : i32 to index
      %c0_124 = arith.constant 0 : index
      %283 = vector.load %arg19[%282, %c0_124] : memref<256x256xf32, #tpu.memory_space<vmem>>, vector<1x256xf32>
      %284 = arith.addf %281, %283 : vector<1x256xf32>
      %285 = arith.index_cast %278 : i32 to index
      %c0_125 = arith.constant 0 : index
      %286 = vector.load %arg20[%285, %c0_125] : memref<256x256xf32, #tpu.memory_space<vmem>>, vector<1x256xf32>
      tpu.vector_store %arg20[%285, %c0_125], %284 {strides = array<i32>} : memref<256x256xf32, #tpu.memory_space<vmem>>, vector<1x256xf32>,
      %c6_i32 = arith.constant 6 : i32
      %287 = arith.addi %232, %c6_i32 : i32
      %288 = arith.index_cast %287 : i32 to index
      %c0_126 = arith.constant 0 : index
      %289 = vector.load %arg18[%288, %c0_126] : memref<256x256xf32, #tpu.memory_space<vmem>>, vector<1x256xf32>
      %290 = arith.mulf %289, %284 : vector<1x256xf32>
      %291 = arith.index_cast %287 : i32 to index
      %c0_127 = arith.constant 0 : index
      %292 = vector.load %arg19[%291, %c0_127] : memref<256x256xf32, #tpu.memory_space<vmem>>, vector<1x256xf32>
      %293 = arith.addf %290, %292 : vector<1x256xf32>
      %294 = arith.index_cast %287 : i32 to index
      %c0_128 = arith.constant 0 : index
      %295 = vector.load %arg20[%294, %c0_128] : memref<256x256xf32, #tpu.memory_space<vmem>>, vector<1x256xf32>
      tpu.vector_store %arg20[%294, %c0_128], %293 {strides = array<i32>} : memref<256x256xf32, #tpu.memory_space<vmem>>, vector<1x256xf32>,
      %c7_i32 = arith.constant 7 : i32
      %296 = arith.addi %232, %c7_i32 : i32
      %297 = arith.index_cast %296 : i32 to index
      %c0_129 = arith.constant 0 : index
      %298 = vector.load %arg18[%297, %c0_129] : memref<256x256xf32, #tpu.memory_space<vmem>>, vector<1x256xf32>
      %299 = arith.mulf %298, %293 : vector<1x256xf32>
      %300 = arith.index_cast %296 : i32 to index
      %c0_130 = arith.constant 0 : index
      %301 = vector.load %arg19[%300, %c0_130] : memref<256x256xf32, #tpu.memory_space<vmem>>, vector<1x256xf32>
      %302 = arith.addf %299, %301 : vector<1x256xf32>
      %303 = arith.index_cast %296 : i32 to index
      %c0_131 = arith.constant 0 : index
      %304 = vector.load %arg20[%303, %c0_131] : memref<256x256xf32, #tpu.memory_space<vmem>>, vector<1x256xf32>
      tpu.vector_store %arg20[%303, %c0_131], %302 {strides = array<i32>} : memref<256x256xf32, #tpu.memory_space<vmem>>, vector<1x256xf32>,
      scf.yield %302 : vector<1x256xf32>
    }
    %c32_i32_83 = arith.constant 32 : i32
    %c0_84 = arith.constant 0 : index
    %c0_85 = arith.constant 0 : index
    %189 = vector.load %arg20[%c0_84, %c0_85] : memref<256x256xf32, #tpu.memory_space<vmem>>, vector<256x128xf32>
    %cst_86 = arith.constant dense<0.000000e+00> : vector<256x128xf32>
    %190 = tpu.matmul %78, %14, %cst_86 {dimension_numbers = #tpu.dot_dimension_numbers<[1], [0], [0], [1], [0, 0, 1, 1], [], []>} : vector<256x16xf32>, vector<16x128xf32>, vector<256x128xf32> -> vector<256x128xf32>
    %191 = arith.mulf %189, %190 : vector<256x128xf32>
    %cst_87 = arith.constant dense<0.000000e+00> : vector<256x8xf32>
    %192 = tpu.matmul %191, %15, %cst_87 {dimension_numbers = #tpu.dot_dimension_numbers<[1], [0], [0], [1], [0, 0, 1, 1], [], []>} : vector<256x128xf32>, vector<128x8xf32>, vector<256x8xf32> -> vector<256x8xf32>
    %193 = tpu.transpose %192, [1, 0] : vector<256x8xf32> -> vector<8x256xf32>
    %194 = vector.broadcast %11 : vector<8x1xf32> to vector<8x256xf32>
    %195 = arith.mulf %74, %194 : vector<8x256xf32>
    %196 = arith.addf %193, %195 : vector<8x256xf32>
    %cst_88 = arith.constant 0.000000e+00 : f32
    %197 = vector.broadcast %cst_88 : f32 to vector<8x256xf32>
    %198 = arith.subf %197, %40 : vector<8x256xf32>
    %199 = math.exp %198 : vector<8x256xf32>
    %cst_89 = arith.constant 1.000000e+00 : f32
    %200 = vector.broadcast %cst_89 : f32 to vector<8x256xf32>
    %201 = arith.addf %200, %199 : vector<8x256xf32>
    %cst_90 = arith.constant 1.000000e+00 : f32
    %202 = vector.broadcast %cst_90 : f32 to vector<8x256xf32>
    %203 = arith.divf %202, %201 : vector<8x256xf32>
    %204 = arith.mulf %40, %203 : vector<8x256xf32>
    %205 = arith.mulf %196, %204 : vector<8x256xf32>
    %cst_91 = arith.constant dense<0.000000e+00> : vector<4x256xf32>
    %206 = tpu.matmul %12, %205, %cst_91 {dimension_numbers = #tpu.dot_dimension_numbers<[1], [0], [0], [1], [0, 0, 1, 1], [], []>} : vector<4x8xf32>, vector<8x256xf32>, vector<4x256xf32> -> vector<4x256xf32>
    %c0_92 = arith.constant 0 : index
    %c0_93 = arith.constant 0 : index
    %c0_94 = arith.constant 0 : index
    %207 = vector.load %arg17[%c0_92, %c0_93, %c0_94] : memref<2x4x256xf32, #tpu.memory_space<vmem>>, vector<1x4x256xf32>
    %208 = vector.shape_cast %207 : vector<1x4x256xf32> to vector<4x256xf32>
    %209 = vector.shape_cast %206 : vector<4x256xf32> to vector<1x4x256xf32>
    tpu.vector_store %arg17[%c0_92, %c0_93, %c0_94], %209 {strides = array<i32>} : memref<2x4x256xf32, #tpu.memory_space<vmem>>, vector<1x4x256xf32>,
    %c0_95 = arith.constant 0 : index
    %c128_96 = arith.constant 128 : index
    %210 = vector.load %arg20[%c0_95, %c128_96] : memref<256x256xf32, #tpu.memory_space<vmem>>, vector<256x128xf32>
    %cst_97 = arith.constant dense<0.000000e+00> : vector<256x128xf32>
    %211 = tpu.matmul %163, %14, %cst_97 {dimension_numbers = #tpu.dot_dimension_numbers<[1], [0], [0], [1], [0, 0, 1, 1], [], []>} : vector<256x16xf32>, vector<16x128xf32>, vector<256x128xf32> -> vector<256x128xf32>
    %212 = arith.mulf %210, %211 : vector<256x128xf32>
    %cst_98 = arith.constant dense<0.000000e+00> : vector<256x8xf32>
    %213 = tpu.matmul %212, %15, %cst_98 {dimension_numbers = #tpu.dot_dimension_numbers<[1], [0], [0], [1], [0, 0, 1, 1], [], []>} : vector<256x128xf32>, vector<128x8xf32>, vector<256x8xf32> -> vector<256x8xf32>
    %214 = tpu.transpose %213, [1, 0] : vector<256x8xf32> -> vector<8x256xf32>
    %215 = vector.broadcast %11 : vector<8x1xf32> to vector<8x256xf32>
    %216 = arith.mulf %159, %215 : vector<8x256xf32>
    %217 = arith.addf %214, %216 : vector<8x256xf32>
    %cst_99 = arith.constant 0.000000e+00 : f32
    %218 = vector.broadcast %cst_99 : f32 to vector<8x256xf32>
    %219 = arith.subf %218, %125 : vector<8x256xf32>
    %220 = math.exp %219 : vector<8x256xf32>
    %cst_100 = arith.constant 1.000000e+00 : f32
    %221 = vector.broadcast %cst_100 : f32 to vector<8x256xf32>
    %222 = arith.addf %221, %220 : vector<8x256xf32>
    %cst_101 = arith.constant 1.000000e+00 : f32
    %223 = vector.broadcast %cst_101 : f32 to vector<8x256xf32>
    %224 = arith.divf %223, %222 : vector<8x256xf32>
    %225 = arith.mulf %125, %224 : vector<8x256xf32>
    %226 = arith.mulf %217, %225 : vector<8x256xf32>
    %cst_102 = arith.constant dense<0.000000e+00> : vector<4x256xf32>
    %227 = tpu.matmul %12, %226, %cst_102 {dimension_numbers = #tpu.dot_dimension_numbers<[1], [0], [0], [1], [0, 0, 1, 1], [], []>} : vector<4x8xf32>, vector<8x256xf32>, vector<4x256xf32> -> vector<4x256xf32>
    %c1_103 = arith.constant 1 : index
    %c0_104 = arith.constant 0 : index
    %c0_105 = arith.constant 0 : index
    %228 = vector.load %arg17[%c1_103, %c0_104, %c0_105] : memref<2x4x256xf32, #tpu.memory_space<vmem>>, vector<1x4x256xf32>
    %229 = vector.shape_cast %228 : vector<1x4x256xf32> to vector<4x256xf32>
    %230 = vector.shape_cast %227 : vector<4x256xf32> to vector<1x4x256xf32>
    tpu.vector_store %arg17[%c1_103, %c0_104, %c0_105], %230 {strides = array<i32>} : memref<2x4x256xf32, #tpu.memory_space<vmem>>, vector<1x4x256xf32>,
    return
  }
}

</mosaic_0001>

<bundles_post_ra>
// kernel: tpu_custom_call.1
= control target key start
LH: loop header
LB: loop body
LE: loop exit
PB: predicated region body
PF: predicated region fallthrough
CT: control target
= control target key end

     0   :  { %s13189_s0 = inlined_call_operand.vmem [shape: f32[2,4,256], index: 0, kind: input, shape index: {}]   ;;  %s13190_s1 = inlined_call_operand.vmem [shape: f32[4,1], index: 1, kind: input, shape index: {}]   ;;  %s13191_s2 = inlined_call_operand.vmem [shape: f32[4,1], index: 2, kind: input, shape index: {}]   ;;  %s13192_s3 = inlined_call_operand.vmem [shape: f32[16,4], index: 3, kind: input, shape index: {}]   ;;  %s13193_s4 = inlined_call_operand.vmem [shape: f32[8,4], index: 4, kind: input, shape index: {}]   ;;  %s13194_s5 = inlined_call_operand.vmem [shape: f32[8,1], index: 5, kind: input, shape index: {}]   ;;  %s13195_s6 = inlined_call_operand.vmem [shape: f32[8,1], index: 6, kind: input, shape index: {}]   ;;  %s13196_s7 = inlined_call_operand.vmem [shape: f32[8,16], index: 7, kind: input, shape index: {}]   ;;  %s13197_s8 = inlined_call_operand.vmem [shape: f32[8,16], index: 8, kind: input, shape index: {}]   ;;  %s13198_s9 = inlined_call_operand.vmem [shape: f32[1,8], index: 9, kind: input, shape index: {}]   ;;  %s13199_s10 = inlined_call_operand.vmem [shape: f32[1,8], index: 10, kind: input, shape index: {}]   ;;  %s13200_s11 = inlined_call_operand.vmem [shape: f32[1,128], index: 11, kind: input, shape index: {}]   ;;  %s13201_s12 = inlined_call_operand.vmem [shape: f32[8,1], index: 12, kind: input, shape index: {}]   ;;  %s13202_s13 = inlined_call_operand.vmem [shape: f32[4,8], index: 13, kind: input, shape index: {}]   ;;  %s13203_s14 = inlined_call_operand.vmem [shape: f32[8,128], index: 14, kind: input, shape index: {}]   ;;  %s13204_s15 = inlined_call_operand.vmem [shape: f32[16,128], index: 15, kind: input, shape index: {}]   ;;  %s13205_s16 = inlined_call_operand.vmem [shape: f32[128,8], index: 16, kind: input, shape index: {}]   ;;  %s13206_s17 = inlined_call_operand.hbm [shape: f32[2,4,256], index: 17, kind: output, shape index: {}]  }
   0x1   :  { %13277 = sst [smem:[#allocation111_spill]] %s13189_s0 }
   0x2   :  { %13278 = sst [smem:[#allocation112_spill]] %s13190_s1 }
   0x3   :  { %s13279_s26 = sld [smem:[#allocation112_spill]]  ;;  %v13208_v1 = vmov 0  }
   0x4   :  { %9686 = vset.pattern.permute.xlu0 %v13208_v1 }
   0x9   :  { %v57_v0 = vld [vmem:[%s13279_s26] sm:$0xf] }
   0xa   :  { %22 = vsyncpa [#allocation6], 0  ;;  %148 = vperm.xlu0 %9686, %v57_v0   ;;  %v58_v2 = vld [vmem:[%s13191_s2] sm:$0xf]  ;;  %v10297_v6 = vld [vmem:[%s13205_s16 + $0x8] sm:$0xff]  ;;  %v13210_v15 = vmov 0.0  }
   0xb   :  { %v10282_v3 = vld [vmem:[%s13201_s12] sm:$0xff]  ;;  %13283 = vst [vmem:[#allocation11_spill] sm:$0xff] %v10297_v6  ;;  %v10302_v7 = vld [vmem:[%s13205_s16 + $0x10] sm:$0xff]  ;;  %v10307_v8 = vld [vmem:[%s13205_s16 + $0x18] sm:$0xff]  ;;  %249 = vmatprep.mubr.f32.mxu0 %v13210_v15  ;;  %v10172_v22 = vmov 3   ;;  %v10173_v24 = vmov 1  }
   0xc   :  { %13280 = vst [vmem:[#allocation8_spill] sm:$0xff] %v10282_v3  ;;  %v10287_v4 = vld [vmem:[%s13202_s13] sm:$0xf]  ;;  %13284 = vst [vmem:[#allocation12_spill] sm:$0xff] %v10302_v7  ;;  %v10317_v10 = vld [vmem:[%s13205_s16 + $0x28] sm:$0xff]  ;;  %9687 = vset.pattern.permute.xlu1 %v10172_v22  ;;  %s13298_s19 = sld [smem:[#allocation111_spill]] }
   0xd   :  { %13281 = vst [vmem:[#allocation9_spill] sm:$0xff] %v10287_v4  ;;  %v10292_v5 = vld [vmem:[%s13205_s16] sm:$0xff]  ;;  %13285 = vst [vmem:[#allocation13_spill] sm:$0xff] %v10307_v8  ;;  %v10322_v11 = vld [vmem:[%s13205_s16 + $0x30] sm:$0xff]  ;;  %vm94_vm0 = vcmask 1043456   ;;  %v10174_v29 = vmov 2  }
   0xe   :  { %161 = vperm.xlu0 %9686, %v58_v2   ;;  %13282 = vst [vmem:[#allocation10_spill] sm:$0xff] %v10292_v5  ;;  %v10312_v9 = vld [vmem:[%s13205_s16 + $0x20] sm:$0xff]  ;;  %13287 = vst [vmem:[#allocation15_spill] sm:$0xff] %v10317_v10  ;;  %v10327_v12 = vld [vmem:[%s13205_s16 + $0x38] sm:$0xff]  ;;  %vm174_vm1 = vcmask 31744   ;;  %s10176_s21 = smov 2  }
   0xf   :  { %13286 = vst [vmem:[#allocation14_spill] sm:$0xff] %v10312_v9  ;;  %13288 = vst [vmem:[#allocation16_spill] sm:$0xff] %v10322_v11  ;;  %v10332_v13 = vld [vmem:[%s13205_s16 + $0x40] sm:$0xff]  ;;  %v10337_v14 = vld [vmem:[%s13205_s16 + $0x48] sm:$0xff]  ;;  %s10177_s2 = smov 3   ;;  %s10178_s23 = smov 1  }
  0x10   :  { %13289 = vst [vmem:[#allocation17_spill] sm:$0xff] %v10327_v12  ;;  %13290 = vst [vmem:[#allocation18_spill] sm:$0xff] %v10332_v13  ;;  %v10343_v16 = vld [vmem:[%s13205_s16 + $0x50] sm:$0xff]  ;;  %v10348_v17 = vld [vmem:[%s13205_s16 + $0x58] sm:$0xff]  ;;  %vm275_vm2 = vcmask 23552   ;;  %vm292_vm3 = vcmask 15360  }
  0x11   :  { %13291 = vst [vmem:[#allocation19_spill] sm:$0xff] %v10337_v14  ;;  %13292 = vst [vmem:[#allocation20_spill] sm:$0xff] %v10343_v16  ;;  %v10353_v18 = vld [vmem:[%s13205_s16 + $0x60] sm:$0xff]  ;;  %v10358_v19 = vld [vmem:[%s13205_s16 + $0x68] sm:$0xff]  ;;  %vm309_vm4 = vcmask 7168   ;;  %vm407_vm5 = vcmask 64512  }
  0x12   :  { %13293 = vst [vmem:[#allocation21_spill] sm:$0xff] %v10348_v17  ;;  %13294 = vst [vmem:[#allocation22_spill] sm:$0xff] %v10353_v18  ;;  %v10363_v20 = vld [vmem:[%s13205_s16 + $0x70] sm:$0xff]  ;;  %v10368_v21 = vld [vmem:[%s13205_s16 + $0x78] sm:$0xff]  ;;  %9689 = vset.pattern.permute.xlu0 %v10173_v24 }
  0x13   :  { %13295 = vst [vmem:[#allocation23_spill] sm:$0xff] %v10358_v19  ;;  %13296 = vst [vmem:[#allocation24_spill] sm:$0xff] %v10363_v20  ;;  %v61_v23 = vld [vmem:[%s13193_s4] sm:$0xff]  ;;  %v7934_v26 = vld [vmem:[%s13298_s19 + $0x8] sm:$0xff] }
  0x14   :  { %13297 = vst [vmem:[#allocation25_spill] sm:$0xff] %v10368_v21  ;;  %264 = vperm.xlu1 %9687, %v61_v23   ;;  %298 = vperm.xlu0 %9689, %v61_v23   ;;  %v90_v25 = vld [vmem:[%s13298_s19] sm:$0xff]  ;;  %v3060_v28 = vcombine.high %v7934_v26, %v7934_v26  ;;  %v3062_v32 = vsel %vm94_vm0, %v7934_v26, 0.0 }
  0x15   :  { %v92_v27 = vcombine.high %v90_v25, %v90_v25  ;;  %v95_v30 = vsel %vm94_vm0, %v90_v25, 0.0  ;;  %v3063_v36 = vrot.slane %v3062_v32, 4 }
  0x16   :  { %v3069_v33 = vsel %vm94_vm0, %v3060_v28, 0.0  ;;  %v96_v34 = vrot.slane %v95_v30, 4 }
  0x17   :  { %v102_v31 = vsel %vm94_vm0, %v92_v27, 0.0  ;;  %v3070_v37 = vrot.slane %v3069_v33, 4  ;;  %v3064_v40 = vadd.f32 %v3063_v36, %v3062_v32 }
  0x18   :  { %9688 = vset.pattern.permute.xlu1 %v13208_v1  ;;  %9691 = vset.pattern.permute.xlu0 %v13208_v1  ;;  %v103_v35 = vrot.slane %v102_v31, 4  ;;  %v97_v38 = vadd.f32 %v96_v34, %v95_v30 }
  0x19   :  { %281 = vperm.xlu1 %9688, %v61_v23   ;;  %v3071_v41 = vadd.f32 %v3070_v37, %v3069_v33  ;;  %v3065_v44 = vrot.slane %v3064_v40, 2 }
  0x1a   :  { %v104_v39 = vadd.f32 %v103_v35, %v102_v31  ;;  %v98_v42 = vrot.slane %v97_v38, 2 }
  0x1b   :  { %v3072_v45 = vrot.slane %v3071_v41, 2  ;;  %v3066_v48 = vadd.f32 %v3065_v44, %v3064_v40 }
  0x1c   :  { %v105_v43 = vrot.slane %v104_v39, 2  ;;  %v99_v46 = vadd.f32 %v98_v42, %v97_v38 }
  0x1d   :  { %9690 = vset.pattern.permute.xlu1 %v10174_v29  ;;  %v3073_v49 = vadd.f32 %v3072_v45, %v3071_v41  ;;  %v3067_v52 = vrot.slane %v3066_v48, 1 }
  0x1e   :  { %315 = vperm.xlu1 %9690, %v61_v23   ;;  %v106_v47 = vadd.f32 %v105_v43, %v104_v39  ;;  %v100_v50 = vrot.slane %v99_v46, 1 }
  0x1f   :  { %v3074_v53 = vrot.slane %v3073_v49, 1  ;;  %v3068_v56 = vadd.f32 %v3067_v52, %v3066_v48 }
  0x20   :  { %v107_v51 = vrot.slane %v106_v47, 1  ;;  %v101_v54 = vadd.f32 %v100_v50, %v99_v46 }
  0x21   :  { %v3075_v57 = vadd.f32 %v3074_v53, %v3073_v49  ;;  %v3076_v60 = vmul.f32 0.25, %v3068_v56 }
  0x22   :  { %v108_v55 = vadd.f32 %v107_v51, %v106_v47  ;;  %v110_v58 = vmul.f32 0.25, %v101_v54 }
  0x23   :  { %v3077_v61 = vmul.f32 0.25, %v3075_v57 }
  0x24   :  { %v111_v59 = vmul.f32 0.25, %v108_v55 }
  0x25   :  { %v3080_v63 = vcombine.low %v3076_v60, %v3077_v61 }
  0x26   :  { %v114_v62 = vcombine.low %v110_v58, %v111_v59 }
  0x27   :  { %v3082_v2 = vsub.f32 %v7934_v26, %v3080_v63 }
  0x28   :  { %v116_v0 = vsub.f32 %v90_v25, %v114_v62  ;;  %v10175_v62 = vmov 839922192  }
  0x29   :  { %v3083_v23 = vmul.f32 %v3082_v2, %v3082_v2  ;;  %v151_v63 = vunpack.c.l.s4 %v10175_v62 }
  0x2a   :  { %v117_v22 = vmul.f32 %v116_v0, %v116_v0 }
  0x2b   :  { %v3085_v27 = vcombine.high %v3083_v23, %v3083_v23  ;;  %v3087_v29 = vsel %vm94_vm0, %v3083_v23, 0.0 }
  0x2c   :  { %v119_v24 = vcombine.high %v117_v22, %v117_v22  ;;  %v121_v28 = vsel %vm94_vm0, %v117_v22, 0.0  ;;  %v3088_v33 = vrot.slane %v3087_v29, 4  ;;  %v13209_v22 = vlaneseq }
  0x2d   :  { %v122_v31 = vrot.slane %v121_v28, 4  ;;  %v3094_v32 = vsel %vm94_vm0, %v3085_v27, 0.0 }
  0x2e   :  { %v128_v30 = vsel %vm94_vm0, %v119_v24, 0.0  ;;  %v3095_v35 = vrot.slane %v3094_v32, 4  ;;  %v3089_v37 = vadd.f32 %v3088_v33, %v3087_v29  ;;  %v154_v29 = vshrl.u32 %v13209_v22, 7 }
  0x2f   :  { %v129_v34 = vrot.slane %v128_v30, 4  ;;  %v123_v36 = vadd.f32 %v122_v31, %v121_v28  ;;  %v152_v28 = vunpack.c.0.s8 %v151_v63 }
  0x30   :  { %v3096_v26 = vadd.f32 %v3095_v35, %v3094_v32  ;;  %v3090_v39 = vrot.slane %v3089_v37, 2 }
  0x31   :  { %v130_v25 = vadd.f32 %v129_v34, %v128_v30  ;;  %v124_v38 = vrot.slane %v123_v36, 2  ;;  %v155_v32 = vsub.s32 %v152_v28, %v154_v29 }
  0x32   :  { %v3097_v41 = vrot.slane %v3096_v26, 2  ;;  %v3091_v43 = vadd.f32 %v3090_v39, %v3089_v37 }
  0x33   :  { %v131_v40 = vrot.slane %v130_v25, 2  ;;  %v125_v42 = vadd.f32 %v124_v38, %v123_v36 }
  0x34   :  { %v3098_v45 = vadd.f32 %v3097_v41, %v3096_v26  ;;  %v3092_v47 = vrot.slane %v3091_v43, 1 }
  0x35   :  { %v132_v44 = vadd.f32 %v131_v40, %v130_v25  ;;  %v126_v46 = vrot.slane %v125_v42, 1 }
  0x36   :  { %v3099_v49 = vrot.slane %v3098_v45, 1  ;;  %v3093_v51 = vadd.f32 %v3092_v47, %v3091_v43  ;;  %v59_v43 = vld [vmem:[%s13192_s3] sm:$0xff] }
  0x37   :  { %v133_v48 = vrot.slane %v132_v44, 1  ;;  %v127_v50 = vadd.f32 %v126_v46, %v125_v42 }
  0x38   :  { %v3100_v53 = vadd.f32 %v3099_v49, %v3098_v45  ;;  %v3101_v55 = vmul.f32 0.25, %v3093_v51  ;;  %v60_v45 = vld [vmem:[%s13192_s3 + $0x8] sm:$0xff] }
  0x39   :  { %v134_v52 = vadd.f32 %v133_v48, %v132_v44  ;;  %v135_v54 = vmul.f32 0.25, %v127_v50 }
  0x3a   :  { %v3102_v57 = vmul.f32 0.25, %v3100_v53  ;;  %v3103_v59 = vadd.f32 1e-05, %v3101_v55 }
  0x3b   :  { %v136_v56 = vmul.f32 0.25, %v134_v52  ;;  %v137_v58 = vadd.f32 1e-05, %v135_v54 }
  0x3c   :  { %v3104_v61 = vadd.f32 1e-05, %v3102_v57 }
  0x3d   :  { %v138_v60 = vadd.f32 1e-05, %v136_v56  ;;  %9695 = vrsqrt.f32 %v137_v58 }
  0x3e   :  { %9697 = vrsqrt.f32 %v3103_v59 }
  0x3f   :  { %9699 = vrsqrt.f32 %v138_v60 }
  0x40   :  { %9701 = vrsqrt.f32 %v3104_v61 }
  0x4a   :  { %v9696_v23 = vpop.eup %9695 }
  0x4b   :  { %v9698_v24 = vpop.eup %9697 }
  0x4c   :  { %v9700_v27 = vpop.eup %9699 }
  0x4d   :  { %v9702_v30 = vpop.eup %9701  ;;  %v143_v31 = vcombine.low %v9696_v23, %v9700_v27 }
  0x4e   :  { %v3109_v33 = vcombine.low %v9698_v24, %v9702_v30 }
  0x4f   :  { %v145_v35 = vmul.f32 %v143_v31, %v116_v0 }
  0x50   :  { %v3111_v36 = vmul.f32 %v3109_v33, %v3082_v2  ;;  %v62_v2 = vld [vmem:[%s13194_s5] sm:$0xff] }
  0x85   :  { %v149_v34 = vpop.permute.xlu0 %148 }
  0x86   :  { %v156_v37 = vrot.slane %v149_v34, %v155_v32 }
  0x88   :  { %v158_v26 = vmul.f32 %v156_v37, %v145_v35  ;;  %v3112_v38 = vmul.f32 %v3111_v36, %v156_v37 }
  0x89   :  { %v162_v25 = vpop.permute.xlu0 %161 }
  0x8a   :  { %v169_v39 = vrot.slane %v162_v25, %v155_v32 }
  0x8c   :  { %v171_v40 = vadd.f32 %v169_v39, %v158_v26  ;;  %v10390_v41 = vadd.f32 %v3112_v38, %v169_v39 }
  0x8e   :  { %v173_v42 = vcombine.high %v171_v40, %v171_v40 }
  0x8f   :  { %v10412_v46 = vpop.permute.xlu1 %264  ;;  %v10418_v49 = vpop.permute.xlu0 %298 }
  0x90   :  { %7735 = vmatprep.subr.msk.mxu0 %vm94_vm0, %v173_v42  ;;  %13299 = vst [vmem:[#allocation26_spill] sm:$0xff] %v10412_v46  ;;  %13302 = vst [vmem:[#allocation29_spill] sm:$0xff] %v10418_v49 }
  0x91   :  { %7736 = vmatpush1.msk.msra.mxu0 %vm94_vm0, %v171_v40 }
  0x92   :  { %7737 = vmatmul.mubr.msk.f32.vlgmr.msra.gmra.mxu0 %vm174_vm1, %v59_v43 }
  0x93   :  { %255 = vmatprep.mubr.f32.mxu0 %v13210_v15  ;;  %v3115_v15 = vcombine.high %v10390_v41, %v10390_v41 }
  0x94   :  { %v10414_v47 = vpop.permute.xlu1 %281 }
  0x95   :  { %13300 = vst [vmem:[#allocation27_spill] sm:$0xff] %v10414_v47 }
  0x96   :  { %7738 = vmatmul.mubr.msk.f32.gmra.mxu0 %vm174_vm1, %v60_v45 }
  0x99   :  { %v10416_v48 = vpop.permute.xlu1 %315 }
  0x9a   :  { %13301 = vst [vmem:[#allocation28_spill] sm:$0xff] %v10416_v48 }
 0x152   :  { %v251_v0 = vpop.f32.mrf.mxu0 }
 0x153   :  { %288 = vrot.lane.b32.xlu0 %v251_v0, %s10176_s21  ;;  %271 = vrot.lane.b32.xlu1 %v251_v0, %s10177_s2  ;;  %v267_v53 = vmul.f32 %v10412_v46, %v251_v0 }
 0x154   :  { %v253_v44 = vpop.f32.mrf.mxu0 }
 0x155   :  { %v268_v31 = vmul.f32 %v10412_v46, %v253_v44 }
 0x157   :  { %324 = vperm.xlu0 %9691, %v62_v2   ;;  %305 = vrot.lane.b32.xlu1 %v251_v0, %s10178_s23 }
 0x15b   :  { %307 = vrot.lane.b32.xlu0 %v253_v44, %s10178_s23  ;;  %273 = vrot.lane.b32.xlu1 %v253_v44, %s10177_s2 }
 0x15f   :  { %290 = vrot.lane.b32.xlu1 %v253_v44, %s10176_s21 }
 0x1c5   :  { %v272_v50 = vpop.permute.xlu1 %271  ;;  %v289_v51 = vpop.permute.xlu0 %288 }
 0x1c6   :  { %v279_v52 = vsel %vm275_vm2, 0.0, %v272_v50  ;;  %v296_v55 = vsel %vm292_vm3, 0.0, %v289_v51 }
 0x1c7   :  { %v284_v54 = vmul.f32 %v10414_v47, %v279_v52  ;;  %v301_v59 = vmul.f32 %v10418_v49, %v296_v55  ;;  %v10453_v52 = vld [vmem:[%s13196_s7] sm:$0xff] }
 0x1c8   :  { %v65_v55 = vld [vmem:[%s13197_s8] sm:$0xff] }
 0x1c9   :  { %v286_v56 = vadd.f32 %v284_v54, %v267_v53  ;;  %v306_v57 = vpop.permute.xlu1 %305 }
 0x1ca   :  { %v313_v58 = vsel %vm309_vm4, 0.0, %v306_v57 }
 0x1cb   :  { %v303_v60 = vadd.f32 %v301_v59, %v286_v56  ;;  %v318_v61 = vmul.f32 %v10416_v48, %v313_v58  ;;  %v10477_v58 = vld [vmem:[%s13203_s14] sm:$0xff] }
 0x1cd   :  { %v274_v62 = vpop.permute.xlu1 %273  ;;  %v320_v23 = vadd.f32 %v318_v61, %v303_v60 }
 0x1ce   :  { %v276_v63 = vsel %vm275_vm2, %v272_v50, %v274_v62  ;;  %v10441_v50 = vld [vmem:[%s13195_s6] sm:$0xff] }
 0x1cf   :  { %v285_v27 = vmul.f32 %v10414_v47, %v276_v63  ;;  %8788 = vmatprep.subr.mxu0 %v10441_v50  ;;  %9656 = vmatprep.subr.mxu1 %v10441_v50 }
 0x1d0   :  { %8789 = vmatpush3.msra.mxu0 %v10441_v50  ;;  %9657 = vmatpush3.msra.mxu1 %v10441_v50 }
 0x1d1   :  { %v291_v24 = vpop.permute.xlu1 %290  ;;  %v287_v34 = vadd.f32 %v285_v27, %v268_v31  ;;  %8838 = vmatprep.subr.mxu0 %v10453_v52  ;;  %8888 = vmatprep.subr.mxu1 %v65_v55 }
 0x1d2   :  { %v293_v28 = vsel %vm292_vm3, %v289_v51, %v291_v24  ;;  %v10430_v29 = vpop.permute.xlu0 %324 }
 0x1d3   :  { %13303 = vst [vmem:[#allocation30_spill] sm:$0xff] %v10430_v29  ;;  %v327_v30 = vadd.f32 %v10430_v29, %v320_v23  ;;  %v302_v32 = vmul.f32 %v10418_v49, %v293_v28 }
 0x1d5   :  { %v329_v33 = vsub.f32 0.0, %v327_v30  ;;  %v304_v25 = vadd.f32 %v302_v32, %v287_v34  ;;  %v10530_v32 = vpop.f32.mrf.mxu0 }
 0x1d6   :  { %v308_v35 = vpop.permute.xlu0 %307  ;;  %13306 = vst [vmem:[#allocation33_spill] sm:$0xff] %v10530_v32 }
 0x1d7   :  { %v331_v36 = vmul.f32 1.442695, %v329_v33  ;;  %v310_v37 = vsel %vm309_vm4, %v306_v57, %v308_v35  ;;  %v10534_v34 = vpop.f32.mrf.mxu0 }
 0x1d8   :  { %v319_v26 = vmul.f32 %v10416_v48, %v310_v37  ;;  %13307 = vst [vmem:[#allocation34_spill] sm:$0xff] %v10534_v34 }
 0x1d9   :  { %9703 = vpow2.f32 %v331_v36 }
 0x1da   :  { %v321_v38 = vadd.f32 %v319_v26, %v304_v25 }
 0x1dc   :  { %v328_v39 = vadd.f32 %v10430_v29, %v321_v38 }
 0x1de   :  { %v330_v40 = vsub.f32 0.0, %v328_v39 }
 0x1e0   :  { %v333_v42 = vmul.f32 1.442695, %v330_v40 }
 0x1e2   :  { %9705 = vpow2.f32 %v333_v42 }
 0x1e6   :  { %v9704_v43 = vpop.eup %9703 }
 0x1e7   :  { %v335_v0 = vadd.f32 1.0, %v9704_v43 }
 0x1e9   :  { %9707 = vrcp.f32 %v335_v0 }
 0x1ef   :  { %v9706_v2 = vpop.eup %9705 }
 0x1f0   :  { %v336_v44 = vadd.f32 1.0, %v9706_v2 }
 0x1f2   :  { %9709 = vrcp.f32 %v336_v44 }
 0x1f6   :  { %v9708_v45 = vpop.eup %9707 }
 0x1f7   :  { %v10443_v51 = vmul.f32 %v9708_v45, %v327_v30 }
 0x1f9   :  { %13304 = vst [vmem:[#allocation31_spill] sm:$0xff] %v10443_v51  ;;  %343 = vxpose.xlu1.b32.start.end [1/1] (short) %v10443_v51, 128 }
 0x1ff   :  { %v9710_v53 = vpop.eup %9709 }
 0x200   :  { %v10456_v54 = vmul.f32 %v9710_v53, %v328_v39 }
 0x202   :  { %13305 = vst [vmem:[#allocation32_spill] sm:$0xff] %v10456_v54  ;;  %375 = vxpose.xlu0.b32.start.end [1/1] (short) %v10456_v54, 128 }
 0x217   :  { %9692 = vset.pattern.permute.xlu1 %v13208_v1 }
 0x275   :  { %v10463_v56 = vpop.trf.xlu1 }
 0x276   :  { %8790 = vmatprep.mubr.msk.f32.mxu0 %vm407_vm5, %v10463_v56 }
 0x279   :  { %v10467_v57 = vpop.trf.xlu1 }
 0x27a   :  { %8791 = vmatmul.mubr.msk.f32.vlgmr.msra.gmra.mxu0 %vm407_vm5, %v10467_v57 }
 0x27b   :  { %8840 = vmatprep.mubr.msk.f32.mxu0 %vm407_vm5, %v10463_v56  ;;  %8839 = vmatpush3.msra.mxu0 %v10453_v52 }
 0x27c   :  { %8938 = vmatprep.subr.mxu0 %v10477_v58 }
 0x27d   :  { %v10480_v59 = vpop.trf.xlu1 }
 0x27e   :  { %8793 = vmatprep.mubr.msk.f32.mxu1 %vm407_vm5, %v10480_v59  ;;  %8841 = vmatmul.mubr.msk.f32.vlgmr.msra.gmra.mxu0 %vm407_vm5, %v10467_v57  ;;  %v10486_v60 = vpop.trf.xlu0 }
 0x27f   :  { %8843 = vmatprep.mubr.msk.f32.mxu0 %vm407_vm5, %v10480_v59  ;;  %8939 = vmatpush3.msra.mxu0 %v10477_v58 }
 0x281   :  { %v10491_v61 = vpop.trf.xlu1 }
 0x282   :  { %8794 = vmatmul.mubr.msk.f32.vlgmr.msra.gmra.mxu1 %vm407_vm5, %v10491_v61  ;;  %8844 = vmatmul.mubr.msk.f32.gmra.mxu0 %vm407_vm5, %v10491_v61  ;;  %v10497_v62 = vpop.trf.xlu0 }
 0x283   :  { %8889 = vmatpush3.msra.mxu1 %v65_v55 }
 0x284   :  { %8988 = vmatprep.subr.mxu1 %v10477_v58 }
 0x285   :  { %v10500_v63 = vpop.trf.xlu1 }
 0x286   :  { %8796 = vmatprep.mubr.msk.f32.mxu1 %vm407_vm5, %v10500_v63  ;;  %8846 = vmatprep.mubr.msk.f32.mxu0 %vm407_vm5, %v10500_v63  ;;  %v10506_v23 = vpop.trf.xlu0 }
 0x289   :  { %v10508_v24 = vpop.trf.xlu1 }
 0x28a   :  { %8797 = vmatmul.mubr.msk.f32.gmra.mxu1 %vm407_vm5, %v10508_v24  ;;  %8847 = vmatmul.mubr.msk.f32.gmra.mxu0 %vm407_vm5, %v10508_v24  ;;  %v10514_v27 = vpop.trf.xlu0 }
 0x28d   :  { %v10516_v28 = vpop.trf.xlu1 }
 0x28e   :  { %8799 = vmatprep.mubr.msk.f32.mxu1 %vm407_vm5, %v10516_v28  ;;  %8849 = vmatprep.mubr.msk.f32.mxu0 %vm407_vm5, %v10516_v28  ;;  %v10522_v30 = vpop.trf.xlu0 }
 0x291   :  { %v10524_v31 = vpop.trf.xlu1 }
 0x292   :  { %8800 = vmatmul.mubr.msk.f32.gmra.mxu1 %vm407_vm5, %v10524_v31  ;;  %8850 = vmatmul.mubr.msk.f32.gmra.mxu0 %vm407_vm5, %v10524_v31  ;;  %v10532_v33 = vpop.trf.xlu0 }
 0x295   :  { %v10536_v35 = vpop.trf.xlu1 }
 0x296   :  { %8802 = vmatprep.mubr.msk.f32.mxu1 %vm407_vm5, %v10536_v35  ;;  %8852 = vmatprep.mubr.msk.f32.mxu0 %vm407_vm5, %v10536_v35  ;;  %v10544_v37 = vpop.trf.xlu0 }
 0x297   :  { %13308 = vst [vmem:[#allocation35_spill] sm:$0xff] %v10544_v37 }
 0x299   :  { %v10542_v36 = vpop.trf.xlu1 }
 0x29a   :  { %8803 = vmatmul.mubr.msk.f32.gmra.mxu1 %vm407_vm5, %v10542_v36  ;;  %8853 = vmatmul.mubr.msk.f32.gmra.mxu0 %vm407_vm5, %v10542_v36  ;;  %v10556_v26 = vpop.trf.xlu0 }
 0x29b   :  { %13309 = vst [vmem:[#allocation36_spill] sm:$0xff] %v10556_v26 }
 0x29d   :  { %v10550_v25 = vpop.trf.xlu1 }
 0x29e   :  { %8805 = vmatprep.mubr.msk.f32.mxu1 %vm407_vm5, %v10550_v25  ;;  %8855 = vmatprep.mubr.msk.f32.mxu0 %vm407_vm5, %v10550_v25  ;;  %v10566_v40 = vpop.trf.xlu0 }
 0x29f   :  { %13310 = vst [vmem:[#allocation37_spill] sm:$0xff] %v10566_v40 }
 0x2a1   :  { %v10558_v38 = vpop.trf.xlu1 }
 0x2a2   :  { %8806 = vmatmul.mubr.msk.f32.gmra.mxu1 %vm407_vm5, %v10558_v38  ;;  %8856 = vmatmul.mubr.msk.f32.gmra.mxu0 %vm407_vm5, %v10558_v38  ;;  %v10578_v43 = vpop.trf.xlu0 }
 0x2a3   :  { %13311 = vst [vmem:[#allocation38_spill] sm:$0xff] %v10578_v43 }
 0x2a5   :  { %v10564_v39 = vpop.trf.xlu1 }
 0x2a6   :  { %8808 = vmatprep.mubr.msk.f32.mxu1 %vm407_vm5, %v10564_v39  ;;  %8858 = vmatprep.mubr.msk.f32.mxu0 %vm407_vm5, %v10564_v39  ;;  %v10588_v44 = vpop.trf.xlu0 }
 0x2a7   :  { %13312 = vst [vmem:[#allocation39_spill] sm:$0xff] %v10588_v44 }
 0x2a9   :  { %v10572_v42 = vpop.trf.xlu1 }
 0x2aa   :  { %8809 = vmatmul.mubr.msk.f32.gmra.mxu1 %vm407_vm5, %v10572_v42  ;;  %8859 = vmatmul.mubr.msk.f32.gmra.mxu0 %vm407_vm5, %v10572_v42  ;;  %v10606_v45 = vpop.trf.xlu0 }
 0x2ab   :  { %13313 = vst [vmem:[#allocation40_spill] sm:$0xff] %v10606_v45 }
 0x2ad   :  { %v10580_v0 = vpop.trf.xlu1 }
 0x2ae   :  { %8811 = vmatprep.mubr.msk.f32.mxu1 %vm407_vm5, %v10580_v0  ;;  %8861 = vmatprep.mubr.msk.f32.mxu0 %vm407_vm5, %v10580_v0  ;;  %v10616_v53 = vpop.trf.xlu0 }
 0x2af   :  { %13314 = vst [vmem:[#allocation41_spill] sm:$0xff] %v10616_v53 }
 0x2b1   :  { %v10586_v2 = vpop.trf.xlu1 }
 0x2b2   :  { %8812 = vmatmul.mubr.msk.f32.gmra.mxu1 %vm407_vm5, %v10586_v2  ;;  %8862 = vmatmul.mubr.msk.f32.gmra.mxu0 %vm407_vm5, %v10586_v2  ;;  %v10634_v55 = vpop.trf.xlu0 }
 0x2b3   :  { %8814 = vmatprep.mubr.msk.f32.mxu1 %vm407_vm5, %v10486_v60  ;;  %8864 = vmatprep.mubr.msk.f32.mxu0 %vm407_vm5, %v10486_v60  ;;  %13315 = vst [vmem:[#allocation42_spill] sm:$0xff] %v10634_v55 }
 0x2b6   :  { %8815 = vmatmul.mubr.msk.f32.gmra.mxu1 %vm407_vm5, %v10497_v62  ;;  %8865 = vmatmul.mubr.msk.f32.gmra.mxu0 %vm407_vm5, %v10497_v62  ;;  %v10644_v1 = vpop.trf.xlu0 }
 0x2b7   :  { %8817 = vmatprep.mubr.msk.f32.mxu1 %vm407_vm5, %v10506_v23  ;;  %8867 = vmatprep.mubr.msk.f32.mxu0 %vm407_vm5, %v10506_v23  ;;  %13316 = vst [vmem:[#allocation43_spill] sm:$0xff] %v10644_v1 }
 0x2ba   :  { %8818 = vmatmul.mubr.msk.f32.gmra.mxu1 %vm407_vm5, %v10514_v27  ;;  %8868 = vmatmul.mubr.msk.f32.gmra.mxu0 %vm407_vm5, %v10514_v27  ;;  %v10662_v22 = vpop.trf.xlu0 }
 0x2bb   :  { %8820 = vmatprep.mubr.msk.f32.mxu1 %vm407_vm5, %v10522_v30  ;;  %8870 = vmatprep.mubr.msk.f32.mxu0 %vm407_vm5, %v10522_v30  ;;  %13317 = vst [vmem:[#allocation44_spill] sm:$0xff] %v10662_v22 }
 0x2be   :  { %8821 = vmatmul.mubr.msk.f32.gmra.mxu1 %vm407_vm5, %v10532_v33  ;;  %8871 = vmatmul.mubr.msk.f32.gmra.mxu0 %vm407_vm5, %v10532_v33 }
 0x2bf   :  { %8823 = vmatprep.mubr.msk.f32.mxu1 %vm407_vm5, %v10544_v37  ;;  %8873 = vmatprep.mubr.msk.f32.mxu0 %vm407_vm5, %v10544_v37 }
 0x2c2   :  { %8824 = vmatmul.mubr.msk.f32.gmra.mxu1 %vm407_vm5, %v10556_v26  ;;  %8874 = vmatmul.mubr.msk.f32.gmra.mxu0 %vm407_vm5, %v10556_v26 }
 0x2c3   :  { %8826 = vmatprep.mubr.msk.f32.mxu1 %vm407_vm5, %v10566_v40  ;;  %8876 = vmatprep.mubr.msk.f32.mxu0 %vm407_vm5, %v10566_v40 }
 0x2c6   :  { %8827 = vmatmul.mubr.msk.f32.gmra.mxu1 %vm407_vm5, %v10578_v43  ;;  %8877 = vmatmul.mubr.msk.f32.gmra.mxu0 %vm407_vm5, %v10578_v43 }
 0x2c7   :  { %8829 = vmatprep.mubr.msk.f32.mxu1 %vm407_vm5, %v10588_v44  ;;  %8879 = vmatprep.mubr.msk.f32.mxu0 %vm407_vm5, %v10588_v44 }
 0x2ca   :  { %8830 = vmatmul.mubr.msk.f32.gmra.mxu1 %vm407_vm5, %v10606_v45  ;;  %8880 = vmatmul.mubr.msk.f32.gmra.mxu0 %vm407_vm5, %v10606_v45 }
 0x2cb   :  { %8832 = vmatprep.mubr.msk.f32.mxu1 %vm407_vm5, %v10616_v53  ;;  %8882 = vmatprep.mubr.msk.f32.mxu0 %vm407_vm5, %v10616_v53 }
 0x2ce   :  { %8833 = vmatmul.mubr.msk.f32.gmra.mxu1 %vm407_vm5, %v10634_v55  ;;  %8883 = vmatmul.mubr.msk.f32.gmra.mxu0 %vm407_vm5, %v10634_v55 }
 0x2cf   :  { %8835 = vmatprep.mubr.msk.f32.mxu1 %vm407_vm5, %v10644_v1  ;;  %8885 = vmatprep.mubr.msk.f32.mxu0 %vm407_vm5, %v10644_v1 }
 0x2d2   :  { %8836 = vmatmul.mubr.msk.f32.gmra.mxu1 %vm407_vm5, %v10662_v22  ;;  %8886 = vmatmul.mubr.msk.f32.gmra.mxu0 %vm407_vm5, %v10662_v22 }
 0x2d3   :  { %8890 = vmatprep.mubr.msk.f32.mxu1 %vm407_vm5, %v10463_v56 }
 0x2d6   :  { %8891 = vmatmul.mubr.msk.f32.vlgmr.msra.gmra.mxu1 %vm407_vm5, %v10467_v57 }
 0x2d7   :  { %8989 = vmatpush3.msra.mxu1 %v10477_v58  ;;  %8893 = vmatprep.mubr.msk.f32.mxu1 %vm407_vm5, %v10480_v59 }
 0x2d8   :  { %7935 = vmatprep.subr.msk.mxu1 %vm94_vm0, %v3115_v15 }
 0x2da   :  { %8894 = vmatmul.mubr.msk.f32.gmra.mxu1 %vm407_vm5, %v10491_v61 }
 0x2db   :  { %8896 = vmatprep.mubr.msk.f32.mxu1 %vm407_vm5, %v10500_v63 }
 0x2de   :  { %8897 = vmatmul.mubr.msk.f32.gmra.mxu1 %vm407_vm5, %v10508_v24 }
 0x2df   :  { %8899 = vmatprep.mubr.msk.f32.mxu1 %vm407_vm5, %v10516_v28 }
 0x2e2   :  { %8900 = vmatmul.mubr.msk.f32.gmra.mxu1 %vm407_vm5, %v10524_v31 }
 0x2e3   :  { %8902 = vmatprep.mubr.msk.f32.mxu1 %vm407_vm5, %v10536_v35 }
 0x2e6   :  { %8903 = vmatmul.mubr.msk.f32.gmra.mxu1 %vm407_vm5, %v10542_v36 }
 0x2e7   :  { %8905 = vmatprep.mubr.msk.f32.mxu1 %vm407_vm5, %v10550_v25 }
 0x2ea   :  { %8906 = vmatmul.mubr.msk.f32.gmra.mxu1 %vm407_vm5, %v10558_v38 }
 0x2eb   :  { %8908 = vmatprep.mubr.msk.f32.mxu1 %vm407_vm5, %v10564_v39 }
 0x2ee   :  { %8909 = vmatmul.mubr.msk.f32.gmra.mxu1 %vm407_vm5, %v10572_v42 }
 0x2ef   :  { %8911 = vmatprep.mubr.msk.f32.mxu1 %vm407_vm5, %v10580_v0 }
 0x2f2   :  { %8912 = vmatmul.mubr.msk.f32.gmra.mxu1 %vm407_vm5, %v10586_v2 }
 0x2f3   :  { %8914 = vmatprep.mubr.msk.f32.mxu1 %vm407_vm5, %v10486_v60 }
 0x2f6   :  { %8915 = vmatmul.mubr.msk.f32.gmra.mxu1 %vm407_vm5, %v10497_v62 }
 0x2f7   :  { %8917 = vmatprep.mubr.msk.f32.mxu1 %vm407_vm5, %v10506_v23 }
 0x2fa   :  { %8918 = vmatmul.mubr.msk.f32.gmra.mxu1 %vm407_vm5, %v10514_v27 }
 0x2fb   :  { %8920 = vmatprep.mubr.msk.f32.mxu1 %vm407_vm5, %v10522_v30 }
 0x2fe   :  { %8921 = vmatmul.mubr.msk.f32.gmra.mxu1 %vm407_vm5, %v10532_v33 }
 0x2ff   :  { %8923 = vmatprep.mubr.msk.f32.mxu1 %vm407_vm5, %v10544_v37 }
 0x302   :  { %8924 = vmatmul.mubr.msk.f32.gmra.mxu1 %vm407_vm5, %v10556_v26 }
 0x303   :  { %8926 = vmatprep.mubr.msk.f32.mxu1 %vm407_vm5, %v10566_v40 }
 0x306   :  { %8927 = vmatmul.mubr.msk.f32.gmra.mxu1 %vm407_vm5, %v10578_v43 }
 0x307   :  { %8929 = vmatprep.mubr.msk.f32.mxu1 %vm407_vm5, %v10588_v44 }
 0x30a   :  { %8930 = vmatmul.mubr.msk.f32.gmra.mxu1 %vm407_vm5, %v10606_v45 }
 0x30b   :  { %8932 = vmatprep.mubr.msk.f32.mxu1 %vm407_vm5, %v10616_v53 }
 0x30e   :  { %8933 = vmatmul.mubr.msk.f32.gmra.mxu1 %vm407_vm5, %v10634_v55 }
 0x30f   :  { %8935 = vmatprep.mubr.msk.f32.mxu1 %vm407_vm5, %v10644_v1 }
 0x312   :  { %8936 = vmatmul.mubr.msk.f32.gmra.mxu1 %vm407_vm5, %v10662_v22 }
 0x33a   :  { %v8792_v15 = vpop.f32.mrf.mxu0 }
 0x33b   :  { %1186 = vperm.xlu1 %9692, %v8792_v15  }
 0x33c   :  { %v570_v58 = vpop.f32.mrf.mxu0 }
 0x33d   :  { %1181 = vperm.xlu0 %9691, %v570_v58  }
 0x342   :  { %v8795_v4 = vpop.f32.mrf.mxu1 }
 0x343   :  { %1196 = vperm.xlu0 %9691, %v8795_v4  }
 0x344   :  { %v580_v54 = vpop.f32.mrf.mxu1 }
 0x345   :  { %1191 = vperm.xlu1 %9692, %v580_v54  }
 0x34a   :  { %v8798_v51 = vpop.f32.mrf.mxu1 }
 0x34b   :  { %1206 = vperm.xlu0 %9691, %v8798_v51  }
 0x34c   :  { %v590_v32 = vpop.f32.mrf.mxu1 }
 0x34d   :  { %1201 = vperm.xlu1 %9692, %v590_v32  }
 0x352   :  { %v8801_v34 = vpop.f32.mrf.mxu1 }
 0x353   :  { %1216 = vperm.xlu0 %9691, %v8801_v34  }
 0x354   :  { %v600_v5 = vpop.f32.mrf.mxu1 }
 0x355   :  { %1211 = vperm.xlu1 %9692, %v600_v5  }
 0x35a   :  { %v8804_v6 = vpop.f32.mrf.mxu1 }
 0x35b   :  { %1226 = vperm.xlu0 %9691, %v8804_v6  }
 0x35c   :  { %v610_v7 = vpop.f32.mrf.mxu1 }
 0x35d   :  { %1221 = vperm.xlu1 %9692, %v610_v7  }
 0x362   :  { %v8807_v8 = vpop.f32.mrf.mxu1 }
 0x363   :  { %1236 = vperm.xlu0 %9691, %v8807_v8  }
 0x364   :  { %v620_v15 = vpop.f32.mrf.mxu1 }
 0x365   :  { %1231 = vperm.xlu1 %9692, %v620_v15  }
 0x36a   :  { %v8810_v58 = vpop.f32.mrf.mxu1 }
 0x36b   :  { %1246 = vperm.xlu0 %9691, %v8810_v58  }
 0x36c   :  { %v630_v4 = vpop.f32.mrf.mxu1 }
 0x36d   :  { %1241 = vperm.xlu1 %9692, %v630_v4  }
 0x372   :  { %v8813_v54 = vpop.f32.mrf.mxu1 }
 0x373   :  { %1256 = vperm.xlu0 %9691, %v8813_v54  }
 0x374   :  { %v640_v51 = vpop.f32.mrf.mxu1 }
 0x375   :  { %1251 = vperm.xlu1 %9692, %v640_v51  }
 0x376   :  { %v8816_v32 = vpop.f32.mrf.mxu1 }
 0x377   :  { %1266 = vperm.xlu0 %9691, %v8816_v32  }
 0x378   :  { %v650_v34 = vpop.f32.mrf.mxu1 }
 0x379   :  { %1261 = vperm.xlu1 %9692, %v650_v34  }
 0x37a   :  { %v8819_v5 = vpop.f32.mrf.mxu1 }
 0x37b   :  { %1276 = vperm.xlu0 %9691, %v8819_v5  }
 0x37c   :  { %v660_v6 = vpop.f32.mrf.mxu1 }
 0x37d   :  { %1271 = vperm.xlu1 %9692, %v660_v6  }
 0x37e   :  { %v8822_v7 = vpop.f32.mrf.mxu1 }
 0x37f   :  { %1286 = vperm.xlu0 %9691, %v8822_v7  }
 0x380   :  { %v670_v8 = vpop.f32.mrf.mxu1 }
 0x381   :  { %1281 = vperm.xlu1 %9692, %v670_v8  }
 0x382   :  { %v8825_v15 = vpop.f32.mrf.mxu1 }
 0x383   :  { %1296 = vperm.xlu0 %9691, %v8825_v15  }
 0x384   :  { %v680_v58 = vpop.f32.mrf.mxu1 }
 0x385   :  { %1291 = vperm.xlu1 %9692, %v680_v58  }
 0x386   :  { %v8828_v4 = vpop.f32.mrf.mxu1 }
 0x387   :  { %1306 = vperm.xlu0 %9691, %v8828_v4  }
 0x388   :  { %v690_v54 = vpop.f32.mrf.mxu1 }
 0x389   :  { %1301 = vperm.xlu1 %9692, %v690_v54  }
 0x38a   :  { %v8831_v51 = vpop.f32.mrf.mxu1 }
 0x38b   :  { %1316 = vperm.xlu0 %9691, %v8831_v51  }
 0x38c   :  { %v700_v32 = vpop.f32.mrf.mxu1 }
 0x38d   :  { %1311 = vperm.xlu1 %9692, %v700_v32  }
 0x38e   :  { %v8834_v34 = vpop.f32.mrf.mxu1 }
 0x38f   :  { %1326 = vperm.xlu0 %9691, %v8834_v34  }
 0x390   :  { %v710_v5 = vpop.f32.mrf.mxu1 }
 0x391   :  { %1321 = vperm.xlu1 %9692, %v710_v5  }
 0x392   :  { %v8837_v6 = vpop.f32.mrf.mxu1 }
 0x393   :  { %1336 = vperm.xlu0 %9691, %v8837_v6  }
 0x394   :  { %v720_v7 = vpop.f32.mrf.mxu1 }
 0x395   :  { %1331 = vperm.xlu1 %9692, %v720_v7  }
 0x396   :  { %v10736_v8 = vpop.f32.mrf.mxu1 }
 0x397   :  { %13318 = vst [vmem:[#allocation45_spill] sm:$0xff] %v10736_v8 }
 0x398   :  { %v10738_v15 = vpop.f32.mrf.mxu1 }
 0x399   :  { %13319 = vst [vmem:[#allocation46_spill] sm:$0xff] %v10738_v15 }
 0x39a   :  { %v10740_v58 = vpop.f32.mrf.mxu1 }
 0x39b   :  { %13320 = vst [vmem:[#allocation47_spill] sm:$0xff] %v10740_v58 }
 0x39c   :  { %v10742_v4 = vpop.f32.mrf.mxu1 }
 0x39d   :  { %13321 = vst [vmem:[#allocation48_spill] sm:$0xff] %v10742_v4 }
 0x39e   :  { %v10744_v54 = vpop.f32.mrf.mxu1 }
 0x39f   :  { %13322 = vst [vmem:[#allocation49_spill] sm:$0xff] %v10744_v54 }
 0x3a0   :  { %v10746_v51 = vpop.f32.mrf.mxu1 }
 0x3a1   :  { %13323 = vst [vmem:[#allocation50_spill] sm:$0xff] %v10746_v51 }
 0x3a2   :  { %v10748_v32 = vpop.f32.mrf.mxu1 }
 0x3a3   :  { %13324 = vst [vmem:[#allocation51_spill] sm:$0xff] %v10748_v32  ;;  %v10771_v32 = vld [vmem:[%s13198_s9] ss:$0 sm:$0xff] }
 0x3a4   :  { %v10750_v34 = vpop.f32.mrf.mxu1 }
 0x3a5   :  { %13325 = vst [vmem:[#allocation52_spill] sm:$0xff] %v10750_v34 }
 0x3a6   :  { %v10752_v5 = vpop.f32.mrf.mxu1 }
 0x3a7   :  { %13326 = vst [vmem:[#allocation53_spill] sm:$0xff] %v10752_v5  ;;  %v10776_v5 = vld [vmem:[%s13199_s10] ss:$0 sm:$0xff] }
 0x3a8   :  { %v10754_v6 = vpop.f32.mrf.mxu1 }
 0x3a9   :  { %13327 = vst [vmem:[#allocation54_spill] sm:$0xff] %v10754_v6 }
 0x3aa   :  { %v10756_v7 = vpop.f32.mrf.mxu1 }
 0x3ab   :  { %13328 = vst [vmem:[#allocation55_spill] sm:$0xff] %v10756_v7 }
 0x3ac   :  { %v10758_v9 = vpop.f32.mrf.mxu1 }
 0x3ad   :  { %13329 = vst [vmem:[#allocation56_spill] sm:$0xff] %v10758_v9 }
 0x3ae   :  { %v10760_v10 = vpop.f32.mrf.mxu1 }
 0x3af   :  { %13330 = vst [vmem:[#allocation57_spill] sm:$0xff] %v10760_v10 }
 0x3b0   :  { %v10762_v11 = vpop.f32.mrf.mxu1 }
 0x3b1   :  { %13331 = vst [vmem:[#allocation58_spill] sm:$0xff] %v10762_v11 }
 0x3b2   :  { %v10764_v12 = vpop.f32.mrf.mxu1 }
 0x3b3   :  { %13332 = vst [vmem:[#allocation59_spill] sm:$0xff] %v10764_v12 }
 0x3b4   :  { %v10766_v13 = vpop.f32.mrf.mxu1 }
 0x3b5   :  { %13333 = vst [vmem:[#allocation60_spill] sm:$0xff] %v10766_v13 }
 0x3b6   :  { %v1187_v7 = vpop.permute.xlu1 %1186  ;;  %v10778_v9 = vpop.f32.mrf.mxu1 }
 0x3b7   :  { %13334 = vst [vmem:[#allocation61_spill] sm:$0xff] %v10778_v9  ;;  %v1346_v10 = vmul.f32 %v10771_v32, %v1187_v7 }
 0x3b8   :  { %v10781_v11 = vpop.f32.mrf.mxu1  ;;  %v1182_v12 = vpop.permute.xlu0 %1181 }
 0x3b9   :  { %13335 = vst [vmem:[#allocation62_spill] sm:$0xff] %v10781_v11  ;;  %v10784_v13 = vadd.f32 %v10776_v5, %v1346_v10  ;;  %v1345_v6 = vmul.f32 %v10771_v32, %v1182_v12 }
 0x3ba   :  { %v10787_v14 = vpop.f32.mrf.mxu1 }
 0x3bb   :  { %13336 = vst [vmem:[#allocation63_spill] sm:$0xff] %v10787_v14  ;;  %v1416_v34 = vmin.f32 %v10784_v13, 20.0  ;;  %v10791_v54 = vadd.f32 %v10776_v5, %v1345_v6  ;;  %vm1448_vm6 = vcmp.gt.f32.partialorder %v10784_v13, 20.0 }
 0x3bc   :  { %v10793_v16 = vpop.f32.mrf.mxu1 }
 0x3bd   :  { %13337 = vst [vmem:[#allocation64_spill] sm:$0xff] %v10793_v16  ;;  %v1481_v9 = vmul.f32 1.442695, %v1416_v34  ;;  %v1415_v7 = vmin.f32 %v10791_v54, 20.0  ;;  %vm1447_vm8 = vcmp.gt.f32.partialorder %v10791_v54, 20.0 }
 0x3be   :  { %v10796_v17 = vpop.f32.mrf.mxu1  ;;  %v1197_v11 = vpop.permute.xlu0 %1196 }
 0x3bf   :  { %13338 = vst [vmem:[#allocation65_spill] sm:$0xff] %v10796_v17  ;;  %9711 = vpow2.f32 %v1481_v9  ;;  %v1479_v10 = vmul.f32 1.442695, %v1415_v7  ;;  %v1348_v51 = vmul.f32 %v10771_v32, %v1197_v11 }
 0x3c0   :  { %v1192_v12 = vpop.permute.xlu1 %1191  ;;  %v10799_v58 = vpop.f32.mrf.mxu1 }
 0x3c1   :  { %13339 = vst [vmem:[#allocation66_spill] sm:$0xff] %v10799_v58  ;;  %9713 = vpow2.f32 %v1479_v10  ;;  %v10802_v14 = vadd.f32 %v10776_v5, %v1348_v51  ;;  %v1347_v6 = vmul.f32 %v10771_v32, %v1192_v12 }
 0x3c2   :  { %v10805_v16 = vpop.f32.mrf.mxu1 }
 0x3c3   :  { %13340 = vst [vmem:[#allocation67_spill] sm:$0xff] %v10805_v16  ;;  %v1418_v34 = vmin.f32 %v10802_v14, 20.0  ;;  %v10809_v17 = vadd.f32 %v10776_v5, %v1347_v6  ;;  %vm1450_vm9 = vcmp.gt.f32.partialorder %v10802_v14, 20.0 }
 0x3c4   :  { %v10811_v9 = vpop.f32.mrf.mxu1 }
 0x3c5   :  { %13341 = vst [vmem:[#allocation68_spill] sm:$0xff] %v10811_v9  ;;  %v1485_v7 = vmul.f32 1.442695, %v1418_v34  ;;  %v1417_v11 = vmin.f32 %v10809_v17, 20.0  ;;  %vm1449_vm10 = vcmp.gt.f32.partialorder %v10809_v17, 20.0 }
 0x3c6   :  { %v10814_v3 = vpop.f32.mrf.mxu1  ;;  %v1207_v10 = vpop.permute.xlu0 %1206 }
 0x3c7   :  { %13342 = vst [vmem:[#allocation69_spill] sm:$0xff] %v10814_v3  ;;  %9715 = vpow2.f32 %v1485_v7  ;;  %v1483_v51 = vmul.f32 1.442695, %v1417_v11  ;;  %v1350_v58 = vmul.f32 %v10771_v32, %v1207_v10 }
 0x3c8   :  { %v1202_v12 = vpop.permute.xlu1 %1201  ;;  %v10817_v18 = vpop.f32.mrf.mxu1 }
 0x3c9   :  { %13343 = vst [vmem:[#allocation70_spill] sm:$0xff] %v10817_v18  ;;  %9717 = vpow2.f32 %v1483_v51  ;;  %v10820_v16 = vadd.f32 %v10776_v5, %v1350_v58  ;;  %v1349_v6 = vmul.f32 %v10771_v32, %v1202_v12 }
 0x3ca   :  { %v10823_v9 = vpop.f32.mrf.mxu1 }
 0x3cb   :  { %13344 = vst [vmem:[#allocation71_spill] sm:$0xff] %v10823_v9  ;;  %v1420_v34 = vmin.f32 %v10820_v16, 20.0  ;;  %v10827_v3 = vadd.f32 %v10776_v5, %v1349_v6  ;;  %vm1452_vm15 = vcmp.gt.f32.partialorder %v10820_v16, 20.0 }
 0x3cc   :  { %v9712_v7 = vpop.eup %9711  ;;  %v10829_v11 = vpop.f32.mrf.mxu1 }
 0x3cd   :  { %13345 = vst [vmem:[#allocation72_spill] sm:$0xff] %v10829_v11  ;;  %v1552_v10 = vadd.f32 1.0, %v9712_v7  ;;  %v1489_v19 = vmul.f32 1.442695, %v1420_v34  ;;  %v1419_v51 = vmin.f32 %v10827_v3, 20.0  ;;  %vm1451_vm14 = vcmp.gt.f32.partialorder %v10827_v3, 20.0 }
 0x3ce   :  { %v10831_v4 = vpop.eup %9713  ;;  %v10834_v58 = vpop.f32.mrf.mxu1  ;;  %v1558_v48 = vand.u32 2147483647, %v9712_v7 }
 0x3cf   :  { %13346 = vst [vmem:[#allocation73_spill] sm:$0xff] %v10834_v58  ;;  %v1217_v18 = vpop.permute.xlu0 %1216  ;;  %9719 = vlog2.f32 %v1552_v10  ;;  %v1487_v9 = vmul.f32 1.442695, %v1419_v51  ;;  %v1543_v20 = vadd.f32 1.0, %v10831_v4  ;;  %v1546_v49 = vmul.f32 -0.5, %v10831_v4 }
 0x3d0   :  { %v1352_v12 = vmul.f32 %v10771_v32, %v1217_v18  ;;  %9721 = vpow2.f32 %v1489_v19  ;;  %v1212_v8 = vpop.permute.xlu1 %1211  ;;  %v10837_v6 = vpop.f32.mrf.mxu1  ;;  %vm10880_vm7 = vcmp.lt.f32.partialorder %v1558_v48, 0.0004427343 }
 0x3d1   :  { %13347 = vst [vmem:[#allocation74_spill] sm:$0xff] %v10837_v6  ;;  %v1351_v34 = vmul.f32 %v10771_v32, %v1212_v8  ;;  %9723 = vpow2.f32 %v1487_v9  ;;  %v1555_v8 = vmul.f32 -0.5, %v9712_v7  ;;  %v1547_v22 = vadd.f32 1.0, %v1546_v49 }
 0x3d2   :  { %v10841_v11 = vadd.f32 %v10776_v5, %v1352_v12  ;;  %v10844_v21 = vpop.f32.mrf.mxu1  ;;  %9725 = vlog2.f32 %v1543_v20 }
 0x3d3   :  { %13348 = vst [vmem:[#allocation75_spill] sm:$0xff] %v10844_v21  ;;  %v10848_v10 = vadd.f32 %v10776_v5, %v1351_v34  ;;  %v1556_v47 = vadd.f32 1.0, %v1555_v8  ;;  %v1548_v37 = vmul.f32 %v10831_v4, %v1547_v22 }
 0x3d4   :  { %v1422_v58 = vmin.f32 %v10841_v11, 20.0  ;;  %v10850_v18 = vpop.eup %9715  ;;  %v10852_v19 = vpop.f32.mrf.mxu1 }
 0x3d5   :  { %13349 = vst [vmem:[#allocation76_spill] sm:$0xff] %v10852_v19  ;;  %v1421_v6 = vmin.f32 %v10848_v10, 20.0  ;;  %v1570_v12 = vadd.f32 1.0, %v10850_v18  ;;  %v1557_v53 = vmul.f32 %v9712_v7, %v1556_v47  ;;  %v1576_v40 = vand.u32 2147483647, %v10850_v18 }
 0x3d6   :  { %v1493_v51 = vmul.f32 1.442695, %v1422_v58  ;;  %v10856_v15 = vpop.eup %9717  ;;  %v1227_v9 = vpop.permute.xlu0 %1226 }
 0x3d7   :  { %v1491_v21 = vmul.f32 1.442695, %v1421_v6  ;;  %v1354_v29 = vmul.f32 %v10771_v32, %v1227_v9  ;;  %v1561_v34 = vadd.f32 1.0, %v10856_v15  ;;  %v1564_v1 = vmul.f32 -0.5, %v10856_v15 }
 0x3d8   :  { %9727 = vpow2.f32 %v1493_v51  ;;  %v1222_v20 = vpop.permute.xlu1 %1221  ;;  %vm10911_vm12 = vcmp.lt.f32.partialorder %v1576_v40, 0.0004427343 }
 0x3d9   :  { %9729 = vlog2.f32 %v1570_v12  ;;  %v10861_v19 = vadd.f32 %v10776_v5, %v1354_v29  ;;  %v1353_v58 = vmul.f32 %v10771_v32, %v1222_v20  ;;  %v10872_v12 = vld [vmem:[%s13204_s15 + $0x8] sm:$0xff]  ;;  %v1573_v20 = vmul.f32 -0.5, %v10850_v18 }
 0x3da   :  { %9731 = vpow2.f32 %v1491_v21  ;;  %13350 = vst [vmem:[#allocation77_spill] sm:$0xff] %v10872_v12  ;;  %9038 = vmatprep.subr.mxu0 %v10872_v12 }
 0x3db   :  { %9733 = vlog2.f32 %v1561_v34  ;;  %v1424_v51 = vmin.f32 %v10861_v19, 20.0  ;;  %v10867_v6 = vadd.f32 %v10776_v5, %v1353_v58  ;;  %v1574_v7 = vadd.f32 1.0, %v1573_v20 }
 0x3dc   :  { %v9720_v21 = vpop.eup %9719  ;;  %v1567_v58 = vand.u32 2147483647, %v10856_v15 }
 0x3dd   :  { %v10876_v29 = vpop.eup %9721  ;;  %v1554_v9 = vmul.f32 0.6931472, %v9720_v21  ;;  %v1497_v34 = vmul.f32 1.442695, %v1424_v51  ;;  %v1423_v8 = vmin.f32 %v10867_v6, 20.0 }
 0x3de   :  { %v1237_v46 = vpop.permute.xlu0 %1236  ;;  %v10886_v55 = vpop.eup %9723  ;;  %v1549_v51 = vand.u32 2147483647, %v10831_v4  ;;  %v1588_v21 = vadd.f32 1.0, %v10876_v29  ;;  %vm1568_vm13 = vcmp.lt.f32.partialorder %v1567_v58, 0.0004427343 }
 0x3df   :  { %v1495_v45 = vmul.f32 1.442695, %v1423_v8  ;;  %v9726_v44 = vpop.eup %9725  ;;  %9735 = vpow2.f32 %v1497_v34  ;;  %v1356_v48 = vmul.f32 %v10771_v32, %v1237_v46  ;;  %v1579_v26 = vadd.f32 1.0, %v10886_v55 }
 0x3e0   :  { %v1232_v43 = vpop.permute.xlu1 %1231  ;;  %v1560_v49 = vsel %vm10880_vm7, %v1557_v53, %v1554_v9  ;;  %v1545_v8 = vmul.f32 0.6931472, %v9726_v44  ;;  %v1565_v46 = vadd.f32 1.0, %v1564_v1  ;;  %vm1550_vm11 = vcmp.lt.f32.partialorder %v1549_v51, 0.0004427343 }
 0x3e1   :  { %9737 = vpow2.f32 %v1495_v45  ;;  %v1355_v47 = vmul.f32 %v10771_v32, %v1232_v43  ;;  %v1832_v43 = vsel %vm1448_vm6, %v10784_v13, %v1560_v49  ;;  %v10909_v44 = vadd.f32 %v10776_v5, %v1356_v48 }
 0x3e2   :  { %9739 = vlog2.f32 %v1579_v26  ;;  %v1551_v22 = vsel %vm1550_vm11, %v1548_v37, %v1545_v8  ;;  %v1575_v9 = vmul.f32 %v10850_v18, %v1574_v7  ;;  %v1582_v20 = vmul.f32 -0.5, %v10886_v55 }
 0x3e3   :  { %v10900_v34 = vadd.f32 %v10776_v5, %v1355_v47  ;;  %9741 = vlog2.f32 %v1588_v21  ;;  %v1831_v4 = vsel %vm1447_vm8, %v10791_v54, %v1551_v22  ;;  %v1566_v40 = vmul.f32 %v10856_v15, %v1565_v46  ;;  %v10930_v54 = vld [vmem:[%s13204_s15] sm:$0xff] }
 0x3e4   :  { %v1863_v51 = vmul.f32 %v1831_v4, %v10463_v56  ;;  %8940 = vmatprep.mubr.msk.f32.mxu0 %vm407_vm5, %v1831_v4  ;;  %v1591_v48 = vmul.f32 -0.5, %v10876_v29  ;;  %13355 = vst [vmem:[#allocation78_spill] sm:$0xff] %v10930_v54  ;;  %v1864_v49 = vmul.f32 %v1832_v43, %v10467_v57  ;;  %v1426_v15 = vmin.f32 %v10909_v44, 20.0 }
 0x3e5   :  { %v10903_v45 = vpop.eup %9727  ;;  %v1425_v53 = vmin.f32 %v10900_v34, 20.0  ;;  %8941 = vmatmul.mubr.msk.f32.vlgmr.msra.gmra.mxu0 %vm407_vm5, %v1832_v43  ;;  %v1583_v57 = vadd.f32 1.0, %v1582_v20  ;;  %v1585_v43 = vand.u32 2147483647, %v10886_v55  ;;  %vm1453_vm7 = vcmp.gt.f32.partialorder %v10848_v10, 20.0 }
 0x3e6   :  { %v9730_v26 = vpop.eup %9729  ;;  %v1247_v37 = vpop.permute.xlu0 %1246  ;;  %8990 = vmatprep.mubr.msk.f32.mxu1 %vm407_vm5, %v1863_v51  ;;  %9039 = vmatpush3.msra.mxu0 %v10872_v12  ;;  %v1592_v20 = vadd.f32 1.0, %v1591_v48  ;;  %v1501_v51 = vmul.f32 1.442695, %v1426_v15  ;;  %vm1455_vm11 = vcmp.gt.f32.partialorder %v10867_v6, 20.0 }
 0x3e7   :  { %v10921_v13 = vpop.eup %9731  ;;  %v1572_v21 = vmul.f32 0.6931472, %v9730_v26  ;;  %v1499_v47 = vmul.f32 1.442695, %v1425_v53  ;;  %v1358_v56 = vmul.f32 %v10771_v32, %v1247_v37  ;;  %v1606_v26 = vadd.f32 1.0, %v10903_v45  ;;  %8991 = vmatmul.mubr.msk.f32.vlgmr.msra.gmra.mxu1 %vm407_vm5, %v1864_v49  ;;  %9040 = vmatprep.subr.mxu0 %v10930_v54 }
 0x3e8   :  { %v9734_v18 = vpop.eup %9733  ;;  %v1597_v7 = vadd.f32 1.0, %v10921_v13  ;;  %v1242_v8 = vpop.permute.xlu1 %1241  ;;  %7936 = vmatpush1.msk.msra.mxu1 %vm94_vm0, %v10390_v41  ;;  %9041 = vmatpush3.msra.mxu0 %v10930_v54  ;;  %v1594_v41 = vand.u32 2147483647, %v10876_v29  ;;  %vm10975_vm0 = vcmp.lt.f32.partialorder %v1585_v43, 0.0004427343 }
 0x3e9   :  { %v1563_v46 = vmul.f32 0.6931472, %v9734_v18  ;;  %v1578_v22 = vsel %vm10911_vm12, %v1575_v9, %v1572_v21  ;;  %9743 = vpow2.f32 %v1499_v47  ;;  %v10948_v53 = vadd.f32 %v10776_v5, %v1358_v56  ;;  %9090 = vmatprep.subr.mxu0 %v10441_v50  ;;  %9140 = vmatprep.subr.mxu1 %v10453_v52 }
 0x3ea   :  { %v1834_v4 = vsel %vm1450_vm9, %v10802_v14, %v1578_v22  ;;  %9745 = vlog2.f32 %v1597_v7  ;;  %v1357_v58 = vmul.f32 %v10771_v32, %v1242_v8  ;;  %v1584_v21 = vmul.f32 %v10886_v55, %v1583_v57 }
 0x3eb   :  { %v1569_v1 = vsel %vm1568_vm13, %v1566_v40, %v1563_v46  ;;  %9747 = vlog2.f32 %v1606_v26  ;;  %v1866_v40 = vmul.f32 %v1834_v4, %v10491_v61  ;;  %v1428_v52 = vmin.f32 %v10948_v53, 20.0 }
 0x3ec   :  { %v1833_v9 = vsel %vm1449_vm10, %v10809_v17, %v1569_v1  ;;  %v10963_v14 = vpop.eup %9735  ;;  %v1600_v17 = vmul.f32 -0.5, %v10921_v13  ;;  %v1609_v61 = vmul.f32 -0.5, %v10903_v45  ;;  %v10981_v49 = vadd.f32 %v10776_v5, %v1357_v58 }
 0x3ed   :  { %v1865_v37 = vmul.f32 %v1833_v9, %v10480_v59  ;;  %8943 = vmatprep.mubr.msk.f32.mxu0 %vm407_vm5, %v1833_v9  ;;  %v1593_v56 = vmul.f32 %v10876_v29, %v1592_v20  ;;  %vm10986_vm6 = vcmp.lt.f32.partialorder %v1594_v41, 0.0004427343  ;;  %9749 = vpow2.f32 %v1501_v51 }
 0x3ee   :  { %8944 = vmatmul.mubr.msk.f32.gmra.mxu0 %vm407_vm5, %v1834_v4  ;;  %v10970_v50 = vpop.eup %9737  ;;  %v1257_v59 = vpop.permute.xlu0 %1256  ;;  %v1624_v22 = vadd.f32 1.0, %v10963_v14  ;;  %v1601_v43 = vadd.f32 1.0, %v1600_v17  ;;  %v1603_v1 = vand.u32 2147483647, %v10921_v13  ;;  %v1505_v4 = vmul.f32 1.442695, %v1428_v52 }
 0x3ef   :  { %8993 = vmatprep.mubr.msk.f32.mxu1 %vm407_vm5, %v1865_v37  ;;  %v9740_v18 = vpop.eup %9739  ;;  %v1360_v47 = vmul.f32 %v10771_v32, %v1257_v59  ;;  %v1615_v46 = vadd.f32 1.0, %v10970_v50  ;;  %v1610_v9 = vadd.f32 1.0, %v1609_v61  ;;  %v1427_v20 = vmin.f32 %v10981_v49, 20.0 }
 0x3f0   :  { %8994 = vmatmul.mubr.msk.f32.gmra.mxu1 %vm407_vm5, %v1866_v40  ;;  %v9742_v55 = vpop.eup %9741  ;;  %v1252_v15 = vpop.permute.xlu1 %1251  ;;  %v1581_v8 = vmul.f32 0.6931472, %v9740_v18  ;;  %v1612_v59 = vand.u32 2147483647, %v10903_v45  ;;  %v1602_v48 = vmul.f32 %v10921_v13, %v1601_v43  ;;  %vm11014_vm8 = vcmp.lt.f32.partialorder %v1603_v1, 0.0004427343 }
 0x3f1   :  { %v1359_v26 = vmul.f32 %v10771_v32, %v1252_v15  ;;  %v1590_v57 = vmul.f32 0.6931472, %v9742_v55  ;;  %9751 = vlog2.f32 %v1615_v46  ;;  %v10998_v41 = vadd.f32 %v10776_v5, %v1360_v47 }
 0x3f2   :  { %v1267_v29 = vpop.permute.xlu0 %1266  ;;  %v1587_v58 = vsel %vm10975_vm0, %v1584_v21, %v1581_v8  ;;  %9753 = vlog2.f32 %v1624_v22  ;;  %vm1454_vm9 = vcmp.gt.f32.partialorder %v10841_v11, 20.0  ;;  %v1611_v47 = vmul.f32 %v10903_v45, %v1610_v9 }
 0x3f3   :  { %v1362_v51 = vmul.f32 %v10771_v32, %v1267_v29  ;;  %v1835_v37 = vsel %vm1451_vm14, %v10827_v3, %v1587_v58  ;;  %v1596_v52 = vsel %vm10986_vm6, %v1593_v56, %v1590_v57  ;;  %v11010_v21 = vadd.f32 %v10776_v5, %v1359_v26 }
 0x3f4   :  { %v1867_v40 = vmul.f32 %v1835_v37, %v10500_v63  ;;  %8946 = vmatprep.mubr.msk.f32.mxu0 %vm407_vm5, %v1835_v37  ;;  %v1262_v17 = vpop.permute.xlu1 %1261  ;;  %v1836_v61 = vsel %vm1452_vm15, %v10820_v16, %v1596_v52  ;;  %v1618_v56 = vmul.f32 -0.5, %v10970_v50  ;;  %v1627_v13 = vmul.f32 -0.5, %v10963_v14 }
 0x3f5   :  { %v1503_v55 = vmul.f32 1.442695, %v1427_v20  ;;  %v1430_v15 = vmin.f32 %v10998_v41, 20.0  ;;  %v11030_v8 = vadd.f32 %v10776_v5, %v1362_v51  ;;  %8947 = vmatmul.mubr.msk.f32.gmra.mxu0 %vm407_vm5, %v1836_v61  ;;  %v1630_v16 = vand.u32 2147483647, %v10963_v14 }
 0x3f6   :  { %v11019_v63 = vpop.eup %9743  ;;  %8996 = vmatprep.mubr.msk.f32.mxu1 %vm407_vm5, %v1867_v40  ;;  %v1277_v18 = vpop.permute.xlu0 %1276  ;;  %9755 = vpow2.f32 %v1505_v4  ;;  %v1868_v46 = vmul.f32 %v1836_v61, %v10508_v24  ;;  %vm11035_vm10 = vcmp.lt.f32.partialorder %v1612_v59, 0.0004427343  ;;  %v1429_v43 = vmin.f32 %v11010_v21, 20.0 }
 0x3f7   :  { %v9746_v7 = vpop.eup %9745  ;;  %v1361_v1 = vmul.f32 %v10771_v32, %v1262_v17  ;;  %v1364_v29 = vmul.f32 %v10771_v32, %v1277_v18  ;;  %v1621_v58 = vand.u32 2147483647, %v10970_v50  ;;  %v1619_v20 = vadd.f32 1.0, %v1618_v56 }
 0x3f8   :  { %v1272_v22 = vpop.permute.xlu1 %1271  ;;  %v1599_v45 = vmul.f32 0.6931472, %v9746_v7  ;;  %v9748_v57 = vpop.eup %9747  ;;  %8997 = vmatmul.mubr.msk.f32.gmra.mxu1 %vm407_vm5, %v1868_v46  ;;  %v1633_v51 = vadd.f32 1.0, %v11019_v63  ;;  %9757 = vpow2.f32 %v1503_v55  ;;  %v1509_v37 = vmul.f32 1.442695, %v1430_v15 }
 0x3f9   :  { %v1608_v9 = vmul.f32 0.6931472, %v9748_v57  ;;  %v1432_v40 = vmin.f32 %v11030_v8, 20.0  ;;  %v1628_v17 = vadd.f32 1.0, %v1627_v13  ;;  %v1363_v52 = vmul.f32 %v10771_v32, %v1272_v22 }
 0x3fa   :  { %v1287_v4 = vpop.permute.xlu0 %1286  ;;  %v1605_v24 = vsel %vm11014_vm8, %v1602_v48, %v1599_v45  ;;  %9759 = vlog2.f32 %v1633_v51  ;;  %v11055_v3 = vpop.eup %9749  ;;  %v1507_v18 = vmul.f32 1.442695, %v1429_v43  ;;  %v11058_v56 = vadd.f32 %v10776_v5, %v1361_v1 }
 0x3fb   :  { %v1837_v59 = vsel %vm1453_vm7, %v10848_v10, %v1605_v24  ;;  %v1614_v48 = vsel %vm11035_vm10, %v1611_v47, %v1608_v9  ;;  %v11061_v7 = vadd.f32 %v10776_v5, %v1364_v29  ;;  %vm1456_vm12 = vcmp.gt.f32.partialorder %v10861_v19, 20.0 }
 0x3fc   :  { %v1282_v61 = vpop.permute.xlu1 %1281  ;;  %v1869_v13 = vmul.f32 %v1837_v59, %v10516_v28  ;;  %8949 = vmatprep.mubr.msk.f32.mxu0 %vm407_vm5, %v1837_v59  ;;  %v1366_v10 = vmul.f32 %v10771_v32, %v1287_v4  ;;  %v1838_v47 = vsel %vm1454_vm9, %v10841_v11, %v1614_v48  ;;  %v1620_v15 = vmul.f32 %v10970_v50, %v1619_v20 }
 0x3fd   :  { %vm11071_vm13 = vcmp.lt.f32.partialorder %v1621_v58, 0.0004427343  ;;  %v1513_v45 = vmul.f32 1.442695, %v1432_v40  ;;  %v1365_v28 = vmul.f32 %v10771_v32, %v1282_v61  ;;  %v1870_v26 = vmul.f32 %v1838_v47, %v10524_v31  ;;  %8950 = vmatmul.mubr.msk.f32.gmra.mxu0 %vm407_vm5, %v1838_v47 }
 0x3fe   :  { %v1297_v55 = vpop.permute.xlu0 %1296  ;;  %v9752_v22 = vpop.eup %9751  ;;  %8999 = vmatprep.mubr.msk.f32.mxu1 %vm407_vm5, %v1869_v13  ;;  %vm11079_vm14 = vcmp.lt.f32.partialorder %v1630_v16, 0.0004427343  ;;  %9761 = vpow2.f32 %v1509_v37  ;;  %v11084_v11 = vadd.f32 %v10776_v5, %v1363_v52  ;;  %v1629_v1 = vmul.f32 %v10963_v14, %v1628_v17 }
 0x3ff   :  { %v1617_v43 = vmul.f32 0.6931472, %v9752_v22  ;;  %v9754_v29 = vpop.eup %9753  ;;  %9763 = vpow2.f32 %v1507_v18  ;;  %v1431_v31 = vmin.f32 %v11058_v56, 20.0  ;;  %v1434_v58 = vmin.f32 %v11061_v7, 20.0  ;;  %9000 = vmatmul.mubr.msk.f32.gmra.mxu1 %vm407_vm5, %v1870_v26 }
 0x400   :  { %v1292_v50 = vpop.permute.xlu1 %1291  ;;  %v1368_v16 = vmul.f32 %v10771_v32, %v1297_v55  ;;  %v11092_v4 = vadd.f32 %v10776_v5, %v1366_v10  ;;  %v1626_v20 = vmul.f32 0.6931472, %v9754_v29  ;;  %v1636_v14 = vmul.f32 -0.5, %v11019_v63 }
 0x401   :  { %v1623_v9 = vsel %vm11071_vm13, %v1620_v15, %v1617_v43  ;;  %9765 = vpow2.f32 %v1513_v45  ;;  %v11098_v51 = vadd.f32 %v10776_v5, %v1365_v28  ;;  %v1367_v37 = vmul.f32 %v10771_v32, %v1292_v50 }
 0x402   :  { %v1307_v24 = vpop.permute.xlu0 %1306  ;;  %v1642_v40 = vadd.f32 1.0, %v11055_v3  ;;  %v1433_v17 = vmin.f32 %v11084_v11, 20.0  ;;  %v1839_v59 = vsel %vm1455_vm11, %v10867_v6, %v1623_v9  ;;  %v1632_v48 = vsel %vm11079_vm14, %v1629_v1, %v1626_v20 }
 0x403   :  { %v1370_v52 = vmul.f32 %v10771_v32, %v1307_v24  ;;  %v11109_v18 = vpop.eup %9755  ;;  %v1511_v13 = vmul.f32 1.442695, %v1431_v31  ;;  %v1517_v10 = vmul.f32 1.442695, %v1434_v58  ;;  %v11112_v47 = vadd.f32 %v10776_v5, %v1368_v16  ;;  %8952 = vmatprep.mubr.msk.f32.mxu0 %vm407_vm5, %v1839_v59 }
 0x404   :  { %v1302_v61 = vpop.permute.xlu1 %1301  ;;  %v1871_v55 = vmul.f32 %v1839_v59, %v10536_v35  ;;  %v1436_v15 = vmin.f32 %v11092_v4, 20.0  ;;  %v1840_v6 = vsel %vm1456_vm12, %v10861_v19, %v1632_v48  ;;  %v1637_v45 = vadd.f32 1.0, %v1636_v14 }
 0x405   :  { %v1369_v46 = vmul.f32 %v10771_v32, %v1302_v61  ;;  %v1435_v28 = vmin.f32 %v11098_v51, 20.0  ;;  %v11123_v26 = vadd.f32 %v10776_v5, %v1367_v37  ;;  %v1872_v57 = vmul.f32 %v1840_v6, %v10542_v36  ;;  %8953 = vmatmul.mubr.msk.f32.gmra.mxu0 %vm407_vm5, %v1840_v6  ;;  %v11129_v50 = vpop.eup %9757 }
 0x406   :  { %v1317_v22 = vpop.permute.xlu0 %1316  ;;  %9002 = vmatprep.mubr.msk.f32.mxu1 %vm407_vm5, %v1871_v55  ;;  %v1639_v35 = vand.u32 2147483647, %v11019_v63  ;;  %v1515_v43 = vmul.f32 1.442695, %v1433_v17  ;;  %v11132_v19 = vadd.f32 %v10776_v5, %v1370_v52  ;;  %9767 = vlog2.f32 %v1642_v40 }
 0x407   :  { %v1372_v1 = vmul.f32 %v10771_v32, %v1317_v22  ;;  %v9760_v31 = vpop.eup %9759  ;;  %9769 = vpow2.f32 %v1511_v13  ;;  %v1438_v36 = vmin.f32 %v11112_v47, 20.0  ;;  %v11137_v58 = vadd.f32 %v10776_v5, %v1369_v46  ;;  %9003 = vmatmul.mubr.msk.f32.gmra.mxu1 %vm407_vm5, %v1872_v57 }
 0x408   :  { %v1312_v29 = vpop.permute.xlu1 %1311  ;;  %vm1457_vm15 = vcmp.gt.f32.partialorder %v10900_v34, 20.0  ;;  %9771 = vpow2.f32 %v1517_v10  ;;  %v1521_v16 = vmul.f32 1.442695, %v1436_v15  ;;  %v1635_v9 = vmul.f32 0.6931472, %v9760_v31 }
 0x409   :  { %v1638_v20 = vmul.f32 %v11019_v63, %v1637_v45  ;;  %v1519_v14 = vmul.f32 1.442695, %v1435_v28  ;;  %v1437_v37 = vmin.f32 %v11123_v26, 20.0  ;;  %v1371_v40 = vmul.f32 %v10771_v32, %v1312_v29 }
 0x40a   :  { %v1327_v24 = vpop.permute.xlu0 %1326  ;;  %vm1640_vm0 = vcmp.lt.f32.partialorder %v1639_v35, 0.0004427343  ;;  %9773 = vpow2.f32 %v1515_v43  ;;  %v1440_v17 = vmin.f32 %v11132_v19, 20.0  ;;  %v11146_v52 = vadd.f32 %v10776_v5, %v1372_v1 }
 0x40b   :  { %v1641_v59 = vsel %vm1640_vm0, %v1638_v20, %v1635_v9  ;;  %v11148_v48 = vpop.eup %9761  ;;  %v1525_v13 = vmul.f32 1.442695, %v1438_v36  ;;  %v1439_v10 = vmin.f32 %v11137_v58, 20.0  ;;  %v1374_v63 = vmul.f32 %v10771_v32, %v1327_v24 }
 0x40c   :  { %v1322_v61 = vpop.permute.xlu1 %1321  ;;  %v1841_v55 = vsel %vm1457_vm15, %v10900_v34, %v1641_v59  ;;  %v11155_v15 = vpop.eup %9763  ;;  %9775 = vpow2.f32 %v1521_v16  ;;  %v1645_v6 = vmul.f32 -0.5, %v11055_v3  ;;  %v1523_v22 = vmul.f32 1.442695, %v1437_v37 }
 0x40d   :  { %v1873_v46 = vmul.f32 %v1841_v55, %v10550_v25  ;;  %8955 = vmatprep.mubr.msk.f32.mxu0 %vm407_vm5, %v1841_v55  ;;  %9777 = vpow2.f32 %v1519_v14  ;;  %v11161_v45 = vadd.f32 %v10776_v5, %v1371_v40  ;;  %v1529_v57 = vmul.f32 1.442695, %v1440_v17 }
 0x40e   :  { %v11163_v28 = vpop.eup %9765  ;;  %v1442_v35 = vmin.f32 %v11146_v52, 20.0  ;;  %v1373_v34 = vmul.f32 %v10771_v32, %v1322_v61  ;;  %v1337_v43 = vpop.permute.xlu0 %1336  ;;  %v1651_v1 = vadd.f32 1.0, %v11129_v50  ;;  %9779 = vpow2.f32 %v1525_v13 }
 0x40f   :  { %9005 = vmatprep.mubr.msk.f32.mxu1 %vm407_vm5, %v1873_v46  ;;  %v1527_v29 = vmul.f32 1.442695, %v1439_v10  ;;  %v11170_v31 = vadd.f32 %v10776_v5, %v1374_v63  ;;  %v1648_v36 = vand.u32 2147483647, %v11055_v3  ;;  %v1646_v16 = vadd.f32 1.0, %v1645_v6 }
 0x410   :  { %v1332_v25 = vpop.permute.xlu1 %1331  ;;  %9781 = vlog2.f32 %v1651_v1  ;;  %v1441_v24 = vmin.f32 %v11161_v45, 20.0  ;;  %v1376_v9 = vmul.f32 %v10771_v32, %v1337_v43  ;;  %v1533_v14 = vmul.f32 1.442695, %v1442_v35 }
 0x411   :  { %9783 = vpow2.f32 %v1523_v22  ;;  %v1375_v20 = vmul.f32 %v10771_v32, %v1332_v25  ;;  %v11177_v37 = vadd.f32 %v10776_v5, %v1373_v34  ;;  %v1660_v40 = vadd.f32 1.0, %v11109_v18 }
 0x412   :  { %9785 = vpow2.f32 %v1529_v57  ;;  %v1444_v59 = vmin.f32 %v11170_v31, 20.0  ;;  %vm11181_vm6 = vcmp.lt.f32.partialorder %v1648_v36, 0.0004427343  ;;  %v1647_v32 = vmul.f32 %v11055_v3, %v1646_v16 }
 0x413   :  { %v9768_v17 = vpop.eup %9767  ;;  %9787 = vpow2.f32 %v1527_v29  ;;  %v1654_v63 = vmul.f32 -0.5, %v11129_v50  ;;  %v1531_v46 = vmul.f32 1.442695, %v1441_v24  ;;  %v11192_v6 = vadd.f32 %v10776_v5, %v1376_v9 }
 0x414   :  { %v11185_v13 = vpop.eup %9769  ;;  %v1644_v10 = vmul.f32 0.6931472, %v9768_v17  ;;  %9789 = vlog2.f32 %v1660_v40  ;;  %v11195_v22 = vadd.f32 %v10776_v5, %v1375_v20  ;;  %v1669_v57 = vadd.f32 1.0, %v11155_v15 }
 0x415   :  { %v11189_v55 = vpop.eup %9771  ;;  %9791 = vpow2.f32 %v1533_v14  ;;  %v1443_v35 = vmin.f32 %v11177_v37, 20.0  ;;  %vm1458_vm7 = vcmp.gt.f32.partialorder %v10909_v44, 20.0  ;;  %v1537_v43 = vmul.f32 1.442695, %v1444_v59 }
 0x416   :  { %v1650_v3 = vsel %vm11181_vm6, %v1647_v32, %v1644_v10  ;;  %9793 = vlog2.f32 %v1669_v57  ;;  %v1655_v5 = vadd.f32 1.0, %v1654_v63  ;;  %v1657_v29 = vand.u32 2147483647, %v11129_v50 }
 0x417   :  { %v11202_v34 = vpop.eup %9773  ;;  %v1842_v25 = vsel %vm1458_vm7, %v10909_v44, %v1650_v3  ;;  %v1678_v36 = vadd.f32 1.0, %v11148_v48  ;;  %9795 = vpow2.f32 %v1531_v46  ;;  %v1446_v24 = vmin.f32 %v11192_v6, 20.0 }
 0x418   :  { %v1874_v1 = vmul.f32 %v1842_v25, %v10558_v38  ;;  %8956 = vmatmul.mubr.msk.f32.gmra.mxu0 %vm407_vm5, %v1842_v25  ;;  %v1445_v9 = vmin.f32 %v11195_v22, 20.0  ;;  %v1663_v20 = vmul.f32 -0.5, %v11109_v18  ;;  %v1535_v14 = vmul.f32 1.442695, %v1443_v35 }
 0x419   :  { %v11209_v16 = vpop.eup %9775  ;;  %v1666_v38 = vand.u32 2147483647, %v11109_v18  ;;  %9797 = vlog2.f32 %v1678_v36  ;;  %v1687_v40 = vadd.f32 1.0, %v11185_v13  ;;  %vm1459_vm8 = vcmp.gt.f32.partialorder %v10981_v49, 20.0 }
 0x41a   :  { %v11214_v44 = vpop.eup %9777  ;;  %9006 = vmatmul.mubr.msk.f32.gmra.mxu1 %vm407_vm5, %v1874_v1  ;;  %9799 = vpow2.f32 %v1537_v43  ;;  %v1672_v17 = vmul.f32 -0.5, %v11155_v15  ;;  %v1696_v59 = vadd.f32 1.0, %v11163_v28  ;;  %v1656_v10 = vmul.f32 %v11129_v50, %v1655_v5 }
 0x41b   :  { %v11222_v61 = vpop.eup %9779  ;;  %vm11225_vm9 = vcmp.lt.f32.partialorder %v1657_v29, 0.0004427343  ;;  %vm1460_vm10 = vcmp.gt.f32.partialorder %v10948_v53, 20.0  ;;  %9801 = vlog2.f32 %v1687_v40  ;;  %v11230_v46 = vmul.f32 1.442695, %v1446_v24 }
 0x41c   :  { %v1539_v57 = vmul.f32 1.442695, %v1445_v9  ;;  %v1664_v35 = vadd.f32 1.0, %v1663_v20  ;;  %9803 = vlog2.f32 %v1696_v59  ;;  %vm11234_vm11 = vcmp.lt.f32.partialorder %v1666_v38, 0.0004427343 }
 0x41d   :  { %v9782_v63 = vpop.eup %9781  ;;  %9805 = vpow2.f32 %v1535_v14  ;;  %v1705_v50 = vadd.f32 1.0, %v11202_v34  ;;  %vm1461_vm12 = vcmp.gt.f32.partialorder %v11010_v21, 20.0  ;;  %v1673_v5 = vadd.f32 1.0, %v1672_v17 }
 0x41e   :  { %v11232_v3 = vpop.eup %9783  ;;  %v1653_v43 = vmul.f32 0.6931472, %v9782_v63  ;;  %v1675_v29 = vand.u32 2147483647, %v11155_v15  ;;  %v1681_v36 = vmul.f32 -0.5, %v11148_v48  ;;  %v1690_v14 = vmul.f32 -0.5, %v11185_v13 }
 0x41f   :  { %v11239_v1 = vpop.eup %9785  ;;  %v1684_v24 = vand.u32 2147483647, %v11148_v48  ;;  %9807 = vlog2.f32 %v1705_v50  ;;  %v1714_v38 = vadd.f32 1.0, %v11189_v55  ;;  %v1665_v59 = vmul.f32 %v11109_v18, %v1664_v35 }
 0x420   :  { %v11245_v9 = vpop.eup %9787  ;;  %v1659_v20 = vsel %vm11225_vm9, %v1656_v10, %v1653_v43  ;;  %9809 = vpow2.f32 %v1539_v57  ;;  %v1693_v63 = vand.u32 2147483647, %v11185_v13  ;;  %vm1462_vm13 = vcmp.gt.f32.partialorder %v10998_v41, 20.0 }
 0x421   :  { %v9790_v40 = vpop.eup %9789  ;;  %v1843_v17 = vsel %vm1459_vm8, %v10981_v49, %v1659_v20  ;;  %v1699_v32 = vmul.f32 -0.5, %v11163_v28  ;;  %9811 = vlog2.f32 %v1714_v38  ;;  %v1674_v57 = vmul.f32 %v11155_v15, %v1673_v5 }
 0x422   :  { %v1875_v54 = vmul.f32 %v1843_v17, %v10564_v39  ;;  %8958 = vmatprep.mubr.msk.f32.mxu0 %vm407_vm5, %v1843_v17  ;;  %v1662_v10 = vmul.f32 0.6931472, %v9790_v40  ;;  %v11260_v43 = vpop.eup %9791  ;;  %vm11263_vm14 = vcmp.lt.f32.partialorder %v1675_v29, 0.0004427343  ;;  %v1682_v18 = vadd.f32 1.0, %v1681_v36  ;;  %v11277_v29 = vpop.f32.mrf.mxu0 }
 0x423   :  { %v1723_v35 = vadd.f32 1.0, %v11214_v44  ;;  %v9794_v39 = vpop.eup %9793  ;;  %vm11271_vm15 = vcmp.lt.f32.partialorder %v1684_v24, 0.0004427343  ;;  %vm1463_vm0 = vcmp.gt.f32.partialorder %v11058_v56, 20.0  ;;  %v1691_v15 = vadd.f32 1.0, %v1690_v14 }
 0x424   :  { %v1668_v50 = vsel %vm11234_vm11, %v1665_v59, %v1662_v10  ;;  %9008 = vmatprep.mubr.msk.f32.mxu1 %vm407_vm5, %v1875_v54  ;;  %v1702_v5 = vand.u32 2147483647, %v11163_v28  ;;  %v1671_v38 = vmul.f32 0.6931472, %v9794_v39  ;;  %v1708_v25 = vmul.f32 -0.5, %v11202_v34  ;;  %v11283_v54 = vpop.eup %9795  ;;  %v11306_v49 = vpop.f32.mrf.mxu0 }
 0x425   :  { %v1844_v36 = vsel %vm1460_vm10, %v10948_v53, %v1668_v50  ;;  %9813 = vlog2.f32 %v1723_v35  ;;  %vm11287_vm6 = vcmp.lt.f32.partialorder %v1693_v63, 0.0004427343  ;;  %vm1464_vm7 = vcmp.gt.f32.partialorder %v11030_v8, 20.0 }
 0x426   :  { %v1876_v24 = vmul.f32 %v1844_v36, %v10572_v42  ;;  %8959 = vmatmul.mubr.msk.f32.gmra.mxu0 %vm407_vm5, %v1844_v36  ;;  %v1700_v40 = vadd.f32 1.0, %v1699_v32  ;;  %v9798_v17 = vpop.eup %9797  ;;  %v1677_v53 = vsel %vm11263_vm14, %v1674_v57, %v1671_v38  ;;  %v1683_v59 = vmul.f32 %v11148_v48, %v1682_v18 }
 0x427   :  { %v1717_v10 = vmul.f32 -0.5, %v11189_v55  ;;  %v1732_v35 = vadd.f32 1.0, %v11209_v16  ;;  %v11297_v42 = vpop.eup %9799  ;;  %v1845_v63 = vsel %vm1461_vm12, %v11010_v21, %v1677_v53  ;;  %v1680_v39 = vmul.f32 0.6931472, %v9798_v17 }
 0x428   :  { %9009 = vmatmul.mubr.msk.f32.gmra.mxu1 %vm407_vm5, %v1876_v24  ;;  %v1692_v32 = vmul.f32 %v11185_v13, %v1691_v15  ;;  %vm1465_vm8 = vcmp.gt.f32.partialorder %v11084_v11, 20.0  ;;  %v1711_v57 = vand.u32 2147483647, %v11202_v34  ;;  %v9802_v48 = vpop.eup %9801  ;;  %v1877_v18 = vmul.f32 %v1845_v63, %v10580_v0  ;;  %8961 = vmatprep.mubr.msk.f32.mxu0 %vm407_vm5, %v1845_v63 }
 0x429   :  { %vm11310_vm9 = vcmp.lt.f32.partialorder %v1702_v5, 0.0004427343  ;;  %v1709_v36 = vadd.f32 1.0, %v1708_v25  ;;  %9815 = vlog2.f32 %v1732_v35  ;;  %v9804_v21 = vpop.eup %9803  ;;  %v1686_v13 = vsel %vm11271_vm15, %v1683_v59, %v1680_v39 }
 0x42a   :  { %v1689_v15 = vmul.f32 0.6931472, %v9802_v48  ;;  %v1701_v38 = vmul.f32 %v11163_v28, %v1700_v40  ;;  %v1741_v24 = vadd.f32 1.0, %v11232_v3  ;;  %v11318_v17 = vpop.eup %9805  ;;  %v1846_v0 = vsel %vm1462_vm13, %v10998_v41, %v1686_v13  ;;  %9011 = vmatprep.mubr.msk.f32.mxu1 %vm407_vm5, %v1877_v18  ;;  %v11333_v41 = vpop.f32.mrf.mxu0 }
 0x42b   :  { %v1698_v5 = vmul.f32 0.6931472, %v9804_v21  ;;  %v1718_v25 = vadd.f32 1.0, %v1717_v10  ;;  %v1726_v53 = vmul.f32 -0.5, %v11214_v44  ;;  %v1878_v20 = vmul.f32 %v1846_v0, %v10586_v2  ;;  %8962 = vmatmul.mubr.msk.f32.gmra.mxu0 %vm407_vm5, %v1846_v0 }
 0x42c   :  { %v1695_v28 = vsel %vm11287_vm6, %v1692_v32, %v1689_v15  ;;  %vm11329_vm10 = vcmp.lt.f32.partialorder %v1711_v57, 0.0004427343  ;;  %9817 = vlog2.f32 %v1741_v24  ;;  %v9808_v59 = vpop.eup %9807  ;;  %v1710_v35 = vmul.f32 %v11202_v34, %v1709_v36  ;;  %v11360_v15 = vpop.f32.mrf.mxu0 }
 0x42d   :  { %v1847_v10 = vsel %vm1463_vm0, %v11058_v56, %v1695_v28  ;;  %v1704_v2 = vsel %vm11310_vm9, %v1701_v38, %v1698_v5  ;;  %v1720_v14 = vand.u32 2147483647, %v11189_v55  ;;  %v11342_v63 = vpop.eup %9809  ;;  %9012 = vmatmul.mubr.msk.f32.gmra.mxu1 %vm407_vm5, %v1878_v20  ;;  %v1707_v56 = vmul.f32 0.6931472, %v9808_v59 }
 0x42e   :  { %v1879_v39 = vmul.f32 %v1847_v10, %v10486_v60  ;;  %8964 = vmatprep.mubr.msk.f32.mxu0 %vm407_vm5, %v1847_v10  ;;  %v1848_v32 = vsel %vm1464_vm7, %v11030_v8, %v1704_v2  ;;  %v1729_v57 = vand.u32 2147483647, %v11214_v44  ;;  %v9812_v48 = vpop.eup %9811  ;;  %v1719_v34 = vmul.f32 %v11189_v55, %v1718_v25  ;;  %v11370_v5 = vpop.f32.mrf.mxu0 }
 0x42f   :  { %v1727_v18 = vadd.f32 1.0, %v1726_v53  ;;  %v1735_v50 = vmul.f32 -0.5, %v11209_v16  ;;  %v1750_v36 = vadd.f32 1.0, %v11222_v61  ;;  %v1880_v21 = vmul.f32 %v1848_v32, %v10497_v62  ;;  %8965 = vmatmul.mubr.msk.f32.gmra.mxu0 %vm407_vm5, %v1848_v32 }
 0x430   :  { %9014 = vmatprep.mubr.msk.f32.mxu1 %vm407_vm5, %v1879_v39  ;;  %v1713_v60 = vsel %vm11329_vm10, %v1710_v35, %v1707_v56  ;;  %v1716_v8 = vmul.f32 0.6931472, %v9812_v48  ;;  %v1759_v13 = vadd.f32 1.0, %v11245_v9  ;;  %vm1721_vm11 = vcmp.lt.f32.partialorder %v1720_v14, 0.0004427343  ;;  %v11384_v2 = vpop.f32.mrf.mxu0 }
 0x431   :  { %v1849_v55 = vsel %vm1465_vm8, %v11084_v11, %v1713_v60  ;;  %v1744_v38 = vmul.f32 -0.5, %v11232_v3  ;;  %9819 = vlog2.f32 %v1750_v36  ;;  %9015 = vmatmul.mubr.msk.f32.gmra.mxu1 %vm407_vm5, %v1880_v21  ;;  %vm1466_vm12 = vcmp.gt.f32.partialorder %v11061_v7, 20.0 }
 0x432   :  { %v9814_v62 = vpop.eup %9813  ;;  %v1881_v24 = vmul.f32 %v1849_v55, %v10506_v23  ;;  %8967 = vmatprep.mubr.msk.f32.mxu0 %vm407_vm5, %v1849_v55  ;;  %v1722_v0 = vsel %vm1721_vm11, %v1719_v34, %v1716_v8  ;;  %9821 = vlog2.f32 %v1759_v13  ;;  %v1728_v53 = vmul.f32 %v11214_v44, %v1727_v18 }
 0x433   :  { %v1850_v25 = vsel %vm1466_vm12, %v11061_v7, %v1722_v0  ;;  %v1725_v11 = vmul.f32 0.6931472, %v9814_v62  ;;  %v1736_v20 = vadd.f32 1.0, %v1735_v50  ;;  %vm1730_vm13 = vcmp.lt.f32.partialorder %v1729_v57, 0.0004427343  ;;  %v11392_v57 = vpop.f32.mrf.mxu0  ;;  %v13384_v62 = vld [vmem:[#allocation35_spill] sm:$0xff] }
 0x434   :  { %v1882_v28 = vmul.f32 %v1850_v25, %v10514_v27  ;;  %8968 = vmatmul.mubr.msk.f32.gmra.mxu0 %vm407_vm5, %v1850_v25  ;;  %9017 = vmatprep.mubr.msk.f32.mxu1 %vm407_vm5, %v1881_v24  ;;  %v1738_v23 = vand.u32 2147483647, %v11209_v16  ;;  %v1768_v40 = vadd.f32 1.0, %v11239_v1  ;;  %9823 = vpow2.f32 %v11230_v46 }
 0x435   :  { %vm1467_vm14 = vcmp.gt.f32.partialorder %v11098_v51, 20.0  ;;  %v1731_v7 = vsel %vm1730_vm13, %v1728_v53, %v1725_v11  ;;  %v1745_v59 = vadd.f32 1.0, %v1744_v38  ;;  %v1753_v44 = vmul.f32 -0.5, %v11222_v61  ;;  %v11404_v13 = vpop.f32.mrf.mxu0 }
 0x436   :  { %v9816_v10 = vpop.eup %9815  ;;  %9018 = vmatmul.mubr.msk.f32.gmra.mxu1 %vm407_vm5, %v1882_v28  ;;  %v1851_v27 = vsel %vm1467_vm14, %v11098_v51, %v1731_v7  ;;  %9825 = vlog2.f32 %v1768_v40  ;;  %v1737_v46 = vmul.f32 %v11209_v16, %v1736_v20  ;;  %v1747_v39 = vand.u32 2147483647, %v11232_v3 }
 0x437   :  { %v1883_v35 = vmul.f32 %v1851_v27, %v10522_v30  ;;  %8970 = vmatprep.mubr.msk.f32.mxu0 %vm407_vm5, %v1851_v27  ;;  %v1734_v14 = vmul.f32 0.6931472, %v9816_v10  ;;  %vm1739_vm15 = vcmp.lt.f32.partialorder %v1738_v23, 0.0004427343  ;;  %v1762_v32 = vmul.f32 -0.5, %v11245_v9  ;;  %v11415_v53 = vpop.f32.mrf.mxu0 }
 0x438   :  { %v1777_v56 = vadd.f32 1.0, %v11283_v54  ;;  %vm1468_vm0 = vcmp.gt.f32.partialorder %v11092_v4, 20.0  ;;  %v1746_v30 = vmul.f32 %v11232_v3, %v1745_v59  ;;  %v1786_v34 = vadd.f32 1.0, %v11260_v43 }
 0x439   :  { %v9818_v51 = vpop.eup %9817  ;;  %v1740_v48 = vsel %vm1739_vm15, %v1737_v46, %v1734_v14  ;;  %9020 = vmatprep.mubr.msk.f32.mxu1 %vm407_vm5, %v1883_v35  ;;  %v1754_v50 = vadd.f32 1.0, %v1753_v44  ;;  %vm1748_vm6 = vcmp.lt.f32.partialorder %v1747_v39, 0.0004427343  ;;  %v1771_v21 = vmul.f32 -0.5, %v11239_v1  ;;  %v13385_v46 = vld [vmem:[#allocation36_spill] sm:$0xff] }
 0x43a   :  { %v1852_v16 = vsel %vm1468_vm0, %v11092_v4, %v1740_v48  ;;  %v1743_v18 = vmul.f32 0.6931472, %v9818_v51  ;;  %9827 = vlog2.f32 %v1777_v56  ;;  %vm1469_vm7 = vcmp.gt.f32.partialorder %v11123_v26, 20.0 }
 0x43b   :  { %v1884_v36 = vmul.f32 %v1852_v16, %v10532_v33  ;;  %8971 = vmatmul.mubr.msk.f32.gmra.mxu0 %vm407_vm5, %v1852_v16  ;;  %9829 = vlog2.f32 %v1786_v34  ;;  %v1756_v3 = vand.u32 2147483647, %v11222_v61  ;;  %v1763_v8 = vadd.f32 1.0, %v1762_v32 }
 0x43c   :  { %v1749_v60 = vsel %vm1748_vm6, %v1746_v30, %v1743_v18  ;;  %v1765_v33 = vand.u32 2147483647, %v11245_v9  ;;  %v1795_v55 = vadd.f32 1.0, %v11318_v17  ;;  %vm1470_vm8 = vcmp.gt.f32.partialorder %v11112_v47, 20.0 }
 0x43d   :  { %9021 = vmatmul.mubr.msk.f32.gmra.mxu1 %vm407_vm5, %v1884_v36  ;;  %v1853_v4 = vsel %vm1469_vm7, %v11123_v26, %v1749_v60  ;;  %v1755_v0 = vmul.f32 %v11222_v61, %v1754_v50  ;;  %v1774_v25 = vand.u32 2147483647, %v11239_v1  ;;  %v1772_v26 = vadd.f32 1.0, %v1771_v21 }
 0x43e   :  { %v9820_v38 = vpop.eup %9819  ;;  %v1885_v24 = vmul.f32 %v1853_v4, %v13384_v62  ;;  %8973 = vmatprep.mubr.msk.f32.mxu0 %vm407_vm5, %v1853_v4  ;;  %9831 = vlog2.f32 %v1795_v55  ;;  %v1804_v28 = vadd.f32 1.0, %v11297_v42  ;;  %vm1757_vm9 = vcmp.lt.f32.partialorder %v1756_v3, 0.0004427343 }
 0x43f   :  { %v9822_v11 = vpop.eup %9821  ;;  %v1752_v20 = vmul.f32 0.6931472, %v9820_v38  ;;  %v1764_v40 = vmul.f32 %v11245_v9, %v1763_v8  ;;  %v1780_v7 = vmul.f32 -0.5, %v11283_v54  ;;  %vm1766_vm10 = vcmp.lt.f32.partialorder %v1765_v33, 0.0004427343  ;;  %v11429_v9 = vpop.f32.mrf.mxu0  ;;  %v13389_v33 = vld [vmem:[#allocation38_spill] sm:$0xff] }
 0x440   :  { %9023 = vmatprep.mubr.msk.f32.mxu1 %vm407_vm5, %v1885_v24  ;;  %v1761_v23 = vmul.f32 0.6931472, %v9822_v11  ;;  %v1789_v61 = vmul.f32 -0.5, %v11260_v43  ;;  %9833 = vlog2.f32 %v1804_v28  ;;  %vm1471_vm11 = vcmp.gt.f32.partialorder %v11137_v58, 20.0 }
 0x441   :  { %v1758_v59 = vsel %vm1757_vm9, %v1755_v0, %v1752_v20  ;;  %v11422_v10 = vpop.eup %9823  ;;  %v1813_v35 = vadd.f32 1.0, %v11342_v63  ;;  %v1773_v56 = vmul.f32 %v11239_v1, %v1772_v26  ;;  %vm11435_vm12 = vcmp.lt.f32.partialorder %v1774_v25, 0.0004427343  ;;  %v11441_v16 = vpop.f32.mrf.mxu0 }
 0x442   :  { %v1854_v27 = vsel %vm1470_vm8, %v11112_v47, %v1758_v59  ;;  %v1767_v44 = vsel %vm1766_vm10, %v1764_v40, %v1761_v23  ;;  %v13388_v47 = vld [vmem:[#allocation37_spill] sm:$0xff]  ;;  %v1781_v34 = vadd.f32 1.0, %v1780_v7  ;;  %v1783_v18 = vand.u32 2147483647, %v11283_v54  ;;  %v13390_v59 = vld [vmem:[#allocation39_spill] sm:$0xff] }
 0x443   :  { %v9826_v14 = vpop.eup %9825  ;;  %v1886_v39 = vmul.f32 %v1854_v27, %v13385_v46  ;;  %8974 = vmatmul.mubr.msk.f32.gmra.mxu0 %vm407_vm5, %v1854_v27  ;;  %v1855_v32 = vsel %vm1471_vm11, %v11137_v58, %v1767_v44  ;;  %9835 = vlog2.f32 %v1813_v35  ;;  %v1790_v58 = vadd.f32 1.0, %v1789_v61  ;;  %v11458_v24 = vpop.f32.mrf.mxu0  ;;  %v13391_v44 = vld [vmem:[#allocation40_spill] sm:$0xff] }
 0x444   :  { %v1887_v48 = vmul.f32 %v1855_v32, %v13388_v47  ;;  %8976 = vmatprep.mubr.msk.f32.mxu0 %vm407_vm5, %v1855_v32  ;;  %v1770_v30 = vmul.f32 0.6931472, %v9826_v14  ;;  %v1798_v1 = vmul.f32 -0.5, %v11318_v17  ;;  %v1822_v50 = vadd.f32 1.0, %v11422_v10 }
 0x445   :  { %9024 = vmatmul.mubr.msk.f32.gmra.mxu1 %vm407_vm5, %v1886_v39  ;;  %vm1472_vm13 = vcmp.gt.f32.partialorder %v11132_v19, 20.0  ;;  %v1792_v21 = vand.u32 2147483647, %v11260_v43  ;;  %v1807_v8 = vmul.f32 -0.5, %v11297_v42  ;;  %vm1473_vm14 = vcmp.gt.f32.partialorder %v11161_v45, 20.0  ;;  %v11464_v28 = vpop.f32.mrf.mxu0 }
 0x446   :  { %v1776_v36 = vsel %vm11435_vm12, %v1773_v56, %v1770_v30  ;;  %9026 = vmatprep.mubr.msk.f32.mxu1 %vm407_vm5, %v1887_v48  ;;  %9837 = vlog2.f32 %v1822_v50  ;;  %v1782_v62 = vmul.f32 %v11283_v54, %v1781_v34  ;;  %vm1784_vm15 = vcmp.lt.f32.partialorder %v1783_v18, 0.0004427343  ;;  %v13392_v18 = vld [vmem:[#allocation41_spill] sm:$0xff] }
 0x447   :  { %v9828_v60 = vpop.eup %9827  ;;  %v1856_v3 = vsel %vm1472_vm13, %v11132_v19, %v1776_v36  ;;  %v1791_v25 = vmul.f32 %v11260_v43, %v1790_v58  ;;  %v1799_v19 = vadd.f32 1.0, %v1798_v1  ;;  %vm1793_vm0 = vcmp.lt.f32.partialorder %v1792_v21, 0.0004427343  ;;  %v11478_v56 = vpop.f32.mrf.mxu0 }
 0x448   :  { %v9830_v4 = vpop.eup %9829  ;;  %v1888_v55 = vmul.f32 %v1856_v3, %v13389_v33  ;;  %8977 = vmatmul.mubr.msk.f32.gmra.mxu0 %vm407_vm5, %v1856_v3  ;;  %v1779_v38 = vmul.f32 0.6931472, %v9828_v60  ;;  %v1801_v20 = vand.u32 2147483647, %v11318_v17  ;;  %v1816_v26 = vmul.f32 -0.5, %v11342_v63 }
 0x449   :  { %v1788_v0 = vmul.f32 0.6931472, %v9830_v4  ;;  %vm1474_vm6 = vcmp.gt.f32.partialorder %v11146_v52, 20.0  ;;  %v1808_v40 = vadd.f32 1.0, %v1807_v8  ;;  %v1810_v27 = vand.u32 2147483647, %v11297_v42  ;;  %v11484_v34 = vpop.f32.mrf.mxu0 }
 0x44a   :  { %9027 = vmatmul.mubr.msk.f32.gmra.mxu1 %vm407_vm5, %v1888_v55  ;;  %v1785_v11 = vsel %vm1784_vm15, %v1782_v62, %v1779_v38  ;;  %v1825_v46 = vmul.f32 -0.5, %v11422_v10  ;;  %vm1475_vm7 = vcmp.gt.f32.partialorder %v11177_v37, 20.0  ;;  %vm1802_vm8 = vcmp.lt.f32.partialorder %v1801_v20, 0.0004427343  ;;  %v13394_v38 = vld [vmem:[#allocation43_spill] sm:$0xff] }
 0x44b   :  { %v1857_v23 = vsel %vm1473_vm14, %v11161_v45, %v1785_v11  ;;  %v1794_v54 = vsel %vm1793_vm0, %v1791_v25, %v1788_v0  ;;  %v9832_v7 = vpop.eup %9831  ;;  %v1800_v45 = vmul.f32 %v11318_v17, %v1799_v19  ;;  %v1817_v32 = vadd.f32 1.0, %v1816_v26  ;;  %v865_v33 = vpop.f32.mrf.mxu0  ;;  %v13395_v11 = vld [vmem:[#allocation44_spill] sm:$0xff]  ;;  %v11524_v26 = vld [vmem:[%s13197_s8] sm:$0xff] }
 0x44c   :  { %v1889_v43 = vmul.f32 %v1857_v23, %v13390_v59  ;;  %8979 = vmatprep.mubr.msk.f32.mxu0 %vm407_vm5, %v1857_v23  ;;  %v1858_v61 = vsel %vm1474_vm6, %v11146_v52, %v1794_v54  ;;  %v1797_v14 = vmul.f32 0.6931472, %v9832_v7  ;;  %v1809_v47 = vmul.f32 %v11297_v42, %v1808_v40  ;;  %v11536_v23 = vld [vmem:[%s13203_s14] sm:$0xff]  ;;  %v10108_v54 = vld [vmem:[%s13192_s3 + $0x8] sm:$0xff] }
 0x44d   :  { %v1890_v35 = vmul.f32 %v1858_v61, %v13391_v44  ;;  %8980 = vmatmul.mubr.msk.f32.gmra.mxu0 %vm407_vm5, %v1858_v61  ;;  %v9834_v39 = vpop.eup %9833  ;;  %v1819_v48 = vand.u32 2147483647, %v11342_v63  ;;  %vm1811_vm9 = vcmp.lt.f32.partialorder %v1810_v27, 0.0004427343  ;;  %vm1476_vm10 = vcmp.gt.f32.partialorder %v11170_v31, 20.0  ;;  %v8866_v19 = vpop.f32.mrf.mxu0 }
 0x44e   :  { %9029 = vmatprep.mubr.msk.f32.mxu1 %vm407_vm5, %v1889_v43  ;;  %v1803_v52 = vsel %vm1802_vm8, %v1800_v45, %v1797_v14  ;;  %v1806_v51 = vmul.f32 0.6931472, %v9834_v39  ;;  %v1826_v50 = vadd.f32 1.0, %v1825_v46  ;;  %v1818_v42 = vmul.f32 %v11342_v63, %v1817_v32  ;;  %v11585_v43 = vld [vmem:[%s13200_s11] ss:$0 sm:$0xff] }
 0x44f   :  { %9030 = vmatmul.mubr.msk.f32.gmra.mxu1 %vm407_vm5, %v1890_v35  ;;  %v1859_v17 = vsel %vm1475_vm7, %v11177_v37, %v1803_v52  ;;  %v1828_v60 = vand.u32 2147483647, %v11422_v10  ;;  %v13393_v37 = vld [vmem:[#allocation42_spill] sm:$0xff]  ;;  %vm1820_vm11 = vcmp.lt.f32.partialorder %v1819_v48, 0.0004427343  ;;  %vm1477_vm12 = vcmp.gt.f32.partialorder %v11195_v22, 20.0 }
 0x450   :  { %v9836_v30 = vpop.eup %9835  ;;  %v1891_v58 = vmul.f32 %v1859_v17, %v13392_v18  ;;  %8982 = vmatprep.mubr.msk.f32.mxu0 %vm407_vm5, %v1859_v17  ;;  %v1812_v1 = vsel %vm1811_vm9, %v1809_v47, %v1806_v51  ;;  %v1827_v63 = vmul.f32 %v11422_v10, %v1826_v50  ;;  %vm1478_vm14 = vcmp.gt.f32.partialorder %v11192_v6, 20.0  ;;  %v875_v10 = vpop.f32.mrf.mxu0 }
 0x451   :  { %v1860_v36 = vsel %vm1476_vm10, %v11170_v31, %v1812_v1  ;;  %v1815_v21 = vmul.f32 0.6931472, %v9836_v30  ;;  %vm1829_vm13 = vcmp.lt.f32.partialorder %v1828_v60, 0.0004427343  ;;  %vm2537_vm15 = vcmask 130048  }
 0x452   :  { %v1892_v3 = vmul.f32 %v1860_v36, %v13393_v37  ;;  %8983 = vmatmul.mubr.msk.f32.gmra.mxu0 %vm407_vm5, %v1860_v36  ;;  %9032 = vmatprep.mubr.msk.f32.mxu1 %vm407_vm5, %v1891_v58 }
 0x453   :  { %v9838_v8 = vpop.eup %9837  ;;  %v1821_v4 = vsel %vm1820_vm11, %v1818_v42, %v1815_v21 }
 0x454   :  { %9033 = vmatmul.mubr.msk.f32.gmra.mxu1 %vm407_vm5, %v1892_v3  ;;  %v1861_v31 = vsel %vm1477_vm12, %v11195_v22, %v1821_v4  ;;  %v1824_v55 = vmul.f32 0.6931472, %v9838_v8  ;;  %v13396_v22 = vmov 0.0  }
 0x455   :  { %v1893_v62 = vmul.f32 %v1861_v31, %v13394_v38  ;;  %8985 = vmatprep.mubr.msk.f32.mxu0 %vm407_vm5, %v1861_v31 }
 0x456   :  { %v1830_v0 = vsel %vm1829_vm13, %v1827_v63, %v1824_v55 }
 0x457   :  { %v1862_v25 = vsel %vm1478_vm14, %v11192_v6, %v1830_v0  ;;  %9035 = vmatprep.mubr.msk.f32.mxu1 %vm407_vm5, %v1893_v62  ;;  %v10103_v6 = vld [vmem:[%s13195_s6] sm:$0xff] }
 0x458   :  { %v1894_v20 = vmul.f32 %v1862_v25, %v13395_v11  ;;  %8986 = vmatmul.mubr.msk.f32.gmra.mxu0 %vm407_vm5, %v1862_v25 }
 0x459   :  { %9042 = vmatprep.mubr.msk.f32.mxu0 %vm2537_vm15, %v11306_v49  ;;  %v10104_v49 = vld [vmem:[%s13192_s3] sm:$0xff] }
 0x45a   :  { %9036 = vmatmul.mubr.msk.f32.gmra.mxu1 %vm407_vm5, %v1894_v20 }
 0x45b   :  { %3184 = vmatprep.mubr.f32.mxu1 %v13396_v22 }
 0x45c   :  { %9043 = vmatmul.mubr.msk.f32.vlgmr.msra.gmra.mxu0 %vm2537_vm15, %v11277_v29  ;;  %v10106_v29 = vld [vmem:[%s13196_s7] sm:$0xff] }
 0x45d   :  { %9045 = vmatprep.mubr.msk.f32.mxu0 %vm2537_vm15, %v11360_v15  ;;  %9091 = vmatpush3.msra.mxu0 %v10103_v6  ;;  %v8869_v15 = vpop.f32.mrf.mxu0 }
 0x45e   :  { %7937 = vmatmul.mubr.msk.f32.vlgmr.msra.gmra.mxu1 %vm174_vm1, %v10104_v49  ;;  %9190 = vmatprep.subr.mxu0 %v11524_v26 }
 0x45f   :  { %3190 = vmatprep.mubr.f32.mxu1 %v13396_v22  ;;  %9141 = vmatpush3.msra.mxu1 %v10106_v29  ;;  %v885_v40 = vpop.f32.mrf.mxu0 }
 0x460   :  { %9046 = vmatmul.mubr.msk.f32.gmra.mxu0 %vm2537_vm15, %v11333_v41  ;;  %9240 = vmatprep.subr.mxu1 %v11536_v23 }
 0x461   :  { %9048 = vmatprep.mubr.msk.f32.mxu0 %vm2537_vm15, %v11384_v2  ;;  %v8872_v41 = vpop.f32.mrf.mxu0 }
 0x462   :  { %7938 = vmatmul.mubr.msk.f32.gmra.mxu1 %vm174_vm1, %v10108_v54 }
 0x463   :  { %v895_v2 = vpop.f32.mrf.mxu0 }
 0x464   :  { %9049 = vmatmul.mubr.msk.f32.gmra.mxu0 %vm2537_vm15, %v11370_v5 }
 0x465   :  { %9051 = vmatprep.mubr.msk.f32.mxu0 %vm2537_vm15, %v11404_v13  ;;  %v8875_v7 = vpop.f32.mrf.mxu0 }
 0x467   :  { %v905_v5 = vpop.f32.mrf.mxu0 }
 0x468   :  { %9052 = vmatmul.mubr.msk.f32.gmra.mxu0 %vm2537_vm15, %v11392_v57 }
 0x469   :  { %9054 = vmatprep.mubr.msk.f32.mxu0 %vm2537_vm15, %v11429_v9  ;;  %v8878_v57 = vpop.f32.mrf.mxu0 }
 0x46b   :  { %v915_v13 = vpop.f32.mrf.mxu0 }
 0x46c   :  { %9055 = vmatmul.mubr.msk.f32.gmra.mxu0 %vm2537_vm15, %v11415_v53 }
 0x46d   :  { %9057 = vmatprep.mubr.msk.f32.mxu0 %vm2537_vm15, %v11458_v24  ;;  %v8881_v53 = vpop.f32.mrf.mxu0 }
 0x46f   :  { %v925_v9 = vpop.f32.mrf.mxu0 }
 0x470   :  { %9058 = vmatmul.mubr.msk.f32.gmra.mxu0 %vm2537_vm15, %v11441_v16 }
 0x471   :  { %9060 = vmatprep.mubr.msk.f32.mxu0 %vm2537_vm15, %v11478_v56  ;;  %v8884_v16 = vpop.f32.mrf.mxu0 }
 0x473   :  { %v935_v24 = vpop.f32.mrf.mxu0 }
 0x474   :  { %9061 = vmatmul.mubr.msk.f32.gmra.mxu0 %vm2537_vm15, %v11464_v28 }
 0x475   :  { %9063 = vmatprep.mubr.msk.f32.mxu0 %vm2537_vm15, %v865_v33  ;;  %v8887_v28 = vpop.f32.mrf.mxu0 }
 0x477   :  { %v945_v59 = vpop.f32.mrf.mxu0 }
 0x478   :  { %9064 = vmatmul.mubr.msk.f32.gmra.mxu0 %vm2537_vm15, %v11484_v34 }
 0x479   :  { %9066 = vmatprep.mubr.msk.f32.mxu0 %vm2537_vm15, %v875_v10 }
 0x47c   :  { %9067 = vmatmul.mubr.msk.f32.gmra.mxu0 %vm2537_vm15, %v8866_v19 }
 0x47d   :  { %9069 = vmatprep.mubr.msk.f32.mxu0 %vm2537_vm15, %v885_v40 }
 0x480   :  { %9070 = vmatmul.mubr.msk.f32.gmra.mxu0 %vm2537_vm15, %v8869_v15 }
 0x481   :  { %9072 = vmatprep.mubr.msk.f32.mxu0 %vm2537_vm15, %v895_v2 }
 0x484   :  { %9073 = vmatmul.mubr.msk.f32.gmra.mxu0 %vm2537_vm15, %v8872_v41 }
 0x485   :  { %9075 = vmatprep.mubr.msk.f32.mxu0 %vm2537_vm15, %v905_v5 }
 0x488   :  { %9076 = vmatmul.mubr.msk.f32.gmra.mxu0 %vm2537_vm15, %v8875_v7 }
 0x489   :  { %9078 = vmatprep.mubr.msk.f32.mxu0 %vm2537_vm15, %v915_v13 }
 0x48c   :  { %9079 = vmatmul.mubr.msk.f32.gmra.mxu0 %vm2537_vm15, %v8878_v57 }
 0x48d   :  { %9081 = vmatprep.mubr.msk.f32.mxu0 %vm2537_vm15, %v925_v9 }
 0x490   :  { %9082 = vmatmul.mubr.msk.f32.gmra.mxu0 %vm2537_vm15, %v8881_v53 }
 0x491   :  { %9084 = vmatprep.mubr.msk.f32.mxu0 %vm2537_vm15, %v935_v24 }
 0x494   :  { %9085 = vmatmul.mubr.msk.f32.gmra.mxu0 %vm2537_vm15, %v8884_v16 }
 0x495   :  { %9087 = vmatprep.mubr.msk.f32.mxu0 %vm2537_vm15, %v945_v59 }
 0x498   :  { %9088 = vmatmul.mubr.msk.f32.gmra.mxu0 %vm2537_vm15, %v8887_v28 }
 0x4a5   :  { %v8942_v61 = vpop.f32.mrf.mxu0 }
 0x4a6   :  { %v2866_v27 = vmul.f32 %v8942_v61, %v11585_v43 }
 0x4a7   :  { %v2057_v44 = vpop.f32.mrf.mxu0  ;;  %v11595_v4 = vpop.f32.mrf.mxu1 }
 0x4a8   :  { %v2899_v35 = vmul.f32 1.442695, %v2866_v27  ;;  %v2865_v14 = vmul.f32 %v11585_v43, %v2057_v44 }
 0x4a9   :  { %v11598_v38 = vpop.f32.mrf.mxu1 }
 0x4aa   :  { %9839 = vpow2.f32 %v2899_v35  ;;  %v2897_v45 = vmul.f32 1.442695, %v2865_v14 }
 0x4ac   :  { %9841 = vpow2.f32 %v2897_v45 }
 0x4ae   :  { %v8945_v46 = vpop.f32.mrf.mxu0 }
 0x4af   :  { %v2868_v39 = vmul.f32 %v8945_v46, %v11585_v43 }
 0x4b0   :  { %v2067_v32 = vpop.f32.mrf.mxu0  ;;  %v11601_v19 = vpop.f32.mrf.mxu1 }
 0x4b1   :  { %v2903_v56 = vmul.f32 1.442695, %v2868_v39  ;;  %v2867_v52 = vmul.f32 %v11585_v43, %v2067_v32 }
 0x4b2   :  { %v11603_v20 = vpop.f32.mrf.mxu1 }
 0x4b3   :  { %9843 = vpow2.f32 %v2903_v56  ;;  %v2901_v51 = vmul.f32 1.442695, %v2867_v52 }
 0x4b5   :  { %9845 = vpow2.f32 %v2901_v51  ;;  %v8948_v47 = vpop.f32.mrf.mxu0 }
 0x4b6   :  { %v2870_v48 = vmul.f32 %v8948_v47, %v11585_v43 }
 0x4b7   :  { %v9840_v17 = vpop.eup %9839  ;;  %v2077_v30 = vpop.f32.mrf.mxu0 }
 0x4b8   :  { %2962 = vst [vmem:[#allocation2 + $0x10] sm:$0xff] %v9840_v17  ;;  %v2907_v34 = vmul.f32 1.442695, %v2870_v48  ;;  %v2869_v18 = vmul.f32 %v11585_v43, %v2077_v30  ;;  %v11605_v10 = vpop.f32.mrf.mxu1 }
 0x4b9   :  { %v9842_v58 = vpop.eup %9841 }
 0x4ba   :  { %2961 = vst [vmem:[#allocation2] sm:$0xff] %v9842_v58  ;;  %9847 = vpow2.f32 %v2907_v34  ;;  %v2905_v1 = vmul.f32 1.442695, %v2869_v18  ;;  %v11607_v49 = vpop.f32.mrf.mxu1 }
 0x4bc   :  { %9849 = vpow2.f32 %v2905_v1 }
 0x4bd   :  { %v8951_v36 = vpop.f32.mrf.mxu0 }
 0x4be   :  { %v2872_v21 = vmul.f32 %v8951_v36, %v11585_v43 }
 0x4bf   :  { %v2087_v60 = vpop.f32.mrf.mxu0  ;;  %v11609_v29 = vpop.f32.mrf.mxu1 }
 0x4c0   :  { %v9844_v50 = vpop.eup %9843  ;;  %v2911_v37 = vmul.f32 1.442695, %v2872_v21  ;;  %v2871_v3 = vmul.f32 %v11585_v43, %v2087_v60 }
 0x4c1   :  { %2964 = vst [vmem:[#allocation2 + $0x30] sm:$0xff] %v9844_v50  ;;  %v11612_v2 = vpop.f32.mrf.mxu1 }
 0x4c2   :  { %v9846_v42 = vpop.eup %9845  ;;  %9851 = vpow2.f32 %v2911_v37  ;;  %v2909_v8 = vmul.f32 1.442695, %v2871_v3 }
 0x4c3   :  { %2963 = vst [vmem:[#allocation2 + $0x20] sm:$0xff] %v9846_v42 }
 0x4c4   :  { %9853 = vpow2.f32 %v2909_v8 }
 0x4c5   :  { %v8954_v33 = vpop.f32.mrf.mxu0 }
 0x4c6   :  { %v2874_v31 = vmul.f32 %v8954_v33, %v11585_v43 }
 0x4c7   :  { %v9848_v55 = vpop.eup %9847  ;;  %v2097_v63 = vpop.f32.mrf.mxu0 }
 0x4c8   :  { %2966 = vst [vmem:[#allocation2 + $0x50] sm:$0xff] %v9848_v55  ;;  %v2915_v62 = vmul.f32 1.442695, %v2874_v31  ;;  %v2873_v0 = vmul.f32 %v11585_v43, %v2097_v63  ;;  %v11615_v13 = vpop.f32.mrf.mxu1 }
 0x4c9   :  { %v9850_v25 = vpop.eup %9849 }
 0x4ca   :  { %2965 = vst [vmem:[#allocation2 + $0x40] sm:$0xff] %v9850_v25  ;;  %9855 = vpow2.f32 %v2915_v62  ;;  %v2913_v11 = vmul.f32 1.442695, %v2873_v0  ;;  %v11617_v9 = vpop.f32.mrf.mxu1 }
 0x4cc   :  { %9857 = vpow2.f32 %v2913_v11 }
 0x4cf   :  { %v9852_v22 = vpop.eup %9851 }
 0x4d0   :  { %2968 = vst [vmem:[#allocation2 + $0x70] sm:$0xff] %v9852_v22 }
 0x4d1   :  { %v9854_v6 = vpop.eup %9853 }
 0x4d2   :  { %2967 = vst [vmem:[#allocation2 + $0x60] sm:$0xff] %v9854_v6 }
 0x4d7   :  { %v9856_v15 = vpop.eup %9855 }
 0x4d8   :  { %2970 = vst [vmem:[#allocation2 + $0x90] sm:$0xff] %v9856_v15  ;;  %v8957_v54 = vpop.f32.mrf.mxu0 }
 0x4d9   :  { %v9858_v40 = vpop.eup %9857  ;;  %v2876_v41 = vmul.f32 %v8957_v54, %v11585_v43 }
 0x4da   :  { %2969 = vst [vmem:[#allocation2 + $0x80] sm:$0xff] %v9858_v40  ;;  %v2107_v7 = vpop.f32.mrf.mxu0  ;;  %v11619_v16 = vpop.f32.mrf.mxu1 }
 0x4db   :  { %v2919_v5 = vmul.f32 1.442695, %v2876_v41  ;;  %v2875_v57 = vmul.f32 %v11585_v43, %v2107_v7 }
 0x4dc   :  { %v11621_v24 = vpop.f32.mrf.mxu1 }
 0x4dd   :  { %9859 = vpow2.f32 %v2919_v5  ;;  %v2917_v53 = vmul.f32 1.442695, %v2875_v57 }
 0x4df   :  { %9861 = vpow2.f32 %v2917_v53 }
 0x4e6   :  { %v8960_v28 = vpop.f32.mrf.mxu0 }
 0x4e7   :  { %v2878_v59 = vmul.f32 %v8960_v28, %v11585_v43 }
 0x4e8   :  { %v2117_v61 = vpop.f32.mrf.mxu0  ;;  %v11624_v27 = vpop.f32.mrf.mxu1 }
 0x4e9   :  { %v2923_v44 = vmul.f32 1.442695, %v2878_v59  ;;  %v2877_v35 = vmul.f32 %v11585_v43, %v2117_v61 }
 0x4ea   :  { %v9860_v14 = vpop.eup %9859  ;;  %v11627_v39 = vpop.f32.mrf.mxu1 }
 0x4eb   :  { %2972 = vst [vmem:[#allocation2 + $0xb0] sm:$0xff] %v9860_v14  ;;  %9863 = vpow2.f32 %v2923_v44  ;;  %v2921_v45 = vmul.f32 1.442695, %v2877_v35  ;;  %v8963_v32 = vpop.f32.mrf.mxu0 }
 0x4ec   :  { %v9862_v46 = vpop.eup %9861  ;;  %v2880_v56 = vmul.f32 %v8963_v32, %v11585_v43 }
 0x4ed   :  { %2971 = vst [vmem:[#allocation2 + $0xa0] sm:$0xff] %v9862_v46  ;;  %9865 = vpow2.f32 %v2921_v45  ;;  %v2127_v52 = vpop.f32.mrf.mxu0  ;;  %v11630_v51 = vpop.f32.mrf.mxu1 }
 0x4ee   :  { %v2927_v47 = vmul.f32 1.442695, %v2880_v56  ;;  %v2879_v48 = vmul.f32 %v11585_v43, %v2127_v52 }
 0x4ef   :  { %v8966_v17 = vpop.f32.mrf.mxu0  ;;  %v11633_v30 = vpop.f32.mrf.mxu1 }
 0x4f0   :  { %9867 = vpow2.f32 %v2927_v47  ;;  %v2925_v34 = vmul.f32 1.442695, %v2879_v48  ;;  %v2882_v18 = vmul.f32 %v8966_v17, %v11585_v43 }
 0x4f1   :  { %v2137_v58 = vpop.f32.mrf.mxu0  ;;  %v11636_v1 = vpop.f32.mrf.mxu1 }
 0x4f2   :  { %9869 = vpow2.f32 %v2925_v34  ;;  %v2931_v50 = vmul.f32 1.442695, %v2882_v18  ;;  %v2881_v36 = vmul.f32 %v11585_v43, %v2137_v58 }
 0x4f3   :  { %v11639_v42 = vpop.f32.mrf.mxu1 }
 0x4f4   :  { %v8969_v21 = vpop.f32.mrf.mxu0  ;;  %9871 = vpow2.f32 %v2931_v50  ;;  %v2929_v60 = vmul.f32 1.442695, %v2881_v36 }
 0x4f5   :  { %v2884_v37 = vmul.f32 %v8969_v21, %v11585_v43 }
 0x4f6   :  { %v2147_v3 = vpop.f32.mrf.mxu0  ;;  %v11642_v8 = vpop.f32.mrf.mxu1  ;;  %9873 = vpow2.f32 %v2929_v60 }
 0x4f7   :  { %v2935_v33 = vmul.f32 1.442695, %v2884_v37  ;;  %v2883_v31 = vmul.f32 %v11585_v43, %v2147_v3 }
 0x4f8   :  { %v9864_v55 = vpop.eup %9863  ;;  %v11645_v62 = vpop.f32.mrf.mxu1 }
 0x4f9   :  { %2974 = vst [vmem:[#allocation2 + $0xd0] sm:$0xff] %v9864_v55  ;;  %9875 = vpow2.f32 %v2935_v33  ;;  %v2933_v63 = vmul.f32 1.442695, %v2883_v31 }
 0x4fa   :  { %v9866_v0 = vpop.eup %9865 }
 0x4fb   :  { %2973 = vst [vmem:[#allocation2 + $0xc0] sm:$0xff] %v9866_v0  ;;  %9877 = vpow2.f32 %v2933_v63  ;;  %v8972_v25 = vpop.f32.mrf.mxu0 }
 0x4fc   :  { %v2886_v11 = vmul.f32 %v8972_v25, %v11585_v43 }
 0x4fd   :  { %v2157_v22 = vpop.f32.mrf.mxu0  ;;  %v11648_v6 = vpop.f32.mrf.mxu1 }
 0x4fe   :  { %v9868_v15 = vpop.eup %9867  ;;  %v2939_v54 = vmul.f32 1.442695, %v2886_v11  ;;  %v2885_v40 = vmul.f32 %v11585_v43, %v2157_v22 }
 0x4ff   :  { %2976 = vst [vmem:[#allocation2 + $0xf0] sm:$0xff] %v9868_v15  ;;  %v9870_v41 = vpop.eup %9869  ;;  %v11651_v5 = vpop.f32.mrf.mxu1 }
 0x500   :  { %9879 = vpow2.f32 %v2939_v54  ;;  %v2937_v7 = vmul.f32 1.442695, %v2885_v40  ;;  %2975 = vst [vmem:[#allocation2 + $0xe0] sm:$0xff] %v9870_v41 }
 0x501   :  { %v9872_v57 = vpop.eup %9871 }
 0x502   :  { %9881 = vpow2.f32 %v2937_v7  ;;  %2978 = vst [vmem:[#allocation2 + $0x110] sm:$0xff] %v9872_v57 }
 0x503   :  { %v8975_v53 = vpop.f32.mrf.mxu0  ;;  %v9874_v28 = vpop.eup %9873 }
 0x504   :  { %v2888_v59 = vmul.f32 %v8975_v53, %v11585_v43  ;;  %2977 = vst [vmem:[#allocation2 + $0x100] sm:$0xff] %v9874_v28 }
 0x505   :  { %v2167_v61 = vpop.f32.mrf.mxu0  ;;  %v11654_v44 = vpop.f32.mrf.mxu1 }
 0x506   :  { %v9876_v35 = vpop.eup %9875  ;;  %v2943_v14 = vmul.f32 1.442695, %v2888_v59  ;;  %v2887_v45 = vmul.f32 %v11585_v43, %v2167_v61 }
 0x507   :  { %2980 = vst [vmem:[#allocation2 + $0x130] sm:$0xff] %v9876_v35  ;;  %v11657_v46 = vpop.f32.mrf.mxu1 }
 0x508   :  { %v9878_v32 = vpop.eup %9877  ;;  %9883 = vpow2.f32 %v2943_v14  ;;  %v2941_v56 = vmul.f32 1.442695, %v2887_v45  ;;  %v8978_v52 = vpop.f32.mrf.mxu0 }
 0x509   :  { %2979 = vst [vmem:[#allocation2 + $0x120] sm:$0xff] %v9878_v32  ;;  %v2890_v47 = vmul.f32 %v8978_v52, %v11585_v43 }
 0x50a   :  { %9885 = vpow2.f32 %v2941_v56  ;;  %v2177_v48 = vpop.f32.mrf.mxu0  ;;  %v11660_v17 = vpop.f32.mrf.mxu1 }
 0x50b   :  { %v2947_v34 = vmul.f32 1.442695, %v2890_v47  ;;  %v2889_v18 = vmul.f32 %v11585_v43, %v2177_v48 }
 0x50c   :  { %v11663_v58 = vpop.f32.mrf.mxu1 }
 0x50d   :  { %v9880_v50 = vpop.eup %9879  ;;  %9887 = vpow2.f32 %v2947_v34  ;;  %v2945_v36 = vmul.f32 1.442695, %v2889_v18  ;;  %v8981_v21 = vpop.f32.mrf.mxu0 }
 0x50e   :  { %2982 = vst [vmem:[#allocation2 + $0x150] sm:$0xff] %v9880_v50  ;;  %v2892_v60 = vmul.f32 %v8981_v21, %v11585_v43 }
 0x50f   :  { %v9882_v37 = vpop.eup %9881  ;;  %9889 = vpow2.f32 %v2945_v36  ;;  %v2187_v3 = vpop.f32.mrf.mxu0 }
 0x510   :  { %v11666_v33 = vpop.f32.mrf.mxu1  ;;  %2981 = vst [vmem:[#allocation2 + $0x140] sm:$0xff] %v9882_v37  ;;  %v2951_v31 = vmul.f32 1.442695, %v2892_v60  ;;  %v2891_v55 = vmul.f32 %v11585_v43, %v2187_v3 }
 0x512   :  { %v11669_v63 = vpop.f32.mrf.mxu1  ;;  %9891 = vpow2.f32 %v2951_v31  ;;  %v2949_v0 = vmul.f32 1.442695, %v2891_v55  ;;  %v8984_v25 = vpop.f32.mrf.mxu0 }
 0x513   :  { %v2894_v11 = vmul.f32 %v8984_v25, %v11585_v43 }
 0x514   :  { %9893 = vpow2.f32 %v2949_v0  ;;  %v2197_v15 = vpop.f32.mrf.mxu0  ;;  %v11672_v54 = vpop.f32.mrf.mxu1 }
 0x515   :  { %v9884_v22 = vpop.eup %9883  ;;  %v2955_v40 = vmul.f32 1.442695, %v2894_v11  ;;  %v2893_v41 = vmul.f32 %v11585_v43, %v2197_v15 }
 0x516   :  { %2984 = vst [vmem:[#allocation2 + $0x170] sm:$0xff] %v9884_v22  ;;  %v11675_v57 = vpop.f32.mrf.mxu1 }
 0x517   :  { %v9886_v7 = vpop.eup %9885  ;;  %9895 = vpow2.f32 %v2955_v40  ;;  %v2953_v53 = vmul.f32 1.442695, %v2893_v41 }
 0x518   :  { %2983 = vst [vmem:[#allocation2 + $0x160] sm:$0xff] %v9886_v7  ;;  %v8987_v28 = vpop.f32.mrf.mxu0 }
 0x519   :  { %9897 = vpow2.f32 %v2953_v53  ;;  %v2896_v61 = vmul.f32 %v8987_v28, %v11585_v43 }
 0x51a   :  { %v9888_v59 = vpop.eup %9887  ;;  %v2207_v35 = vpop.f32.mrf.mxu0 }
 0x51b   :  { %2986 = vst [vmem:[#allocation2 + $0x190] sm:$0xff] %v9888_v59  ;;  %v11678_v14 = vpop.f32.mrf.mxu1  ;;  %v2959_v32 = vmul.f32 1.442695, %v2896_v61  ;;  %v2895_v56 = vmul.f32 %v11585_v43, %v2207_v35 }
 0x51c   :  { %v9890_v45 = vpop.eup %9889  ;;  %v9044_v47 = vpop.f32.mrf.mxu0 }
 0x51d   :  { %2985 = vst [vmem:[#allocation2 + $0x180] sm:$0xff] %v9890_v45  ;;  %v11681_v52 = vpop.f32.mrf.mxu1  ;;  %9899 = vpow2.f32 %v2959_v32  ;;  %v2957_v48 = vmul.f32 1.442695, %v2895_v56  ;;  %v2994_v34 = vmul.f32 %v9044_v47, %v11595_v4 }
 0x51e   :  { %v2700_v50 = vpop.f32.mrf.mxu0 }
 0x51f   :  { %v9892_v18 = vpop.eup %9891  ;;  %v11684_v36 = vpop.f32.mrf.mxu1  ;;  %9901 = vpow2.f32 %v2957_v48  ;;  %3026 = vst [vmem:[#allocation3 + $0x10] sm:$0xff] %v2994_v34  ;;  %v2993_v21 = vmul.f32 %v2700_v50, %v11598_v38 }
 0x520   :  { %2988 = vst [vmem:[#allocation2 + $0x1b0] sm:$0xff] %v9892_v18  ;;  %3213 = vrot.lane.b32.xlu0 %v11684_v36, %s10176_s21  ;;  %3201 = vrot.lane.b32.xlu1 %v11684_v36, %s10177_s2  ;;  %v9047_v60 = vpop.f32.mrf.mxu0 }
 0x521   :  { %v9894_v43 = vpop.eup %9893  ;;  %3025 = vst [vmem:[#allocation3] sm:$0xff] %v2993_v21  ;;  %v2996_v4 = vmul.f32 %v9047_v60, %v11601_v19  ;;  %v11692_v37 = vpop.f32.mrf.mxu1 }
 0x522   :  { %2987 = vst [vmem:[#allocation2 + $0x1a0] sm:$0xff] %v9894_v43  ;;  %v2710_v3 = vpop.f32.mrf.mxu0 }
 0x523   :  { %3028 = vst [vmem:[#allocation3 + $0x30] sm:$0xff] %v2996_v4  ;;  %v2995_v31 = vmul.f32 %v2710_v3, %v11603_v20 }
 0x524   :  { %3225 = vrot.lane.b32.xlu1 %v11684_v36, %s10178_s23  ;;  %3203 = vrot.lane.b32.xlu0 %v11692_v37, %s10177_s2  ;;  %v9896_v38 = vpop.eup %9895  ;;  %v9050_v55 = vpop.f32.mrf.mxu0 }
 0x525   :  { %2990 = vst [vmem:[#allocation2 + $0x1d0] sm:$0xff] %v9896_v38  ;;  %3027 = vst [vmem:[#allocation3 + $0x20] sm:$0xff] %v2995_v31  ;;  %v2998_v0 = vmul.f32 %v9050_v55, %v11605_v10 }
 0x526   :  { %v9898_v25 = vpop.eup %9897  ;;  %v2720_v19 = vpop.f32.mrf.mxu0 }
 0x527   :  { %2989 = vst [vmem:[#allocation2 + $0x1c0] sm:$0xff] %v9898_v25  ;;  %3030 = vst [vmem:[#allocation3 + $0x50] sm:$0xff] %v2998_v0  ;;  %v2997_v11 = vmul.f32 %v2720_v19, %v11607_v49 }
 0x528   :  { %3215 = vrot.lane.b32.xlu1 %v11692_v37, %s10176_s21  ;;  %3227 = vrot.lane.b32.xlu0 %v11692_v37, %s10178_s23  ;;  %v9053_v20 = vpop.f32.mrf.mxu0 }
 0x529   :  { %3029 = vst [vmem:[#allocation3 + $0x40] sm:$0xff] %v2997_v11  ;;  %v3000_v22 = vmul.f32 %v9053_v20, %v11609_v29 }
 0x52a   :  { %v9900_v15 = vpop.eup %9899  ;;  %v2730_v40 = vpop.f32.mrf.mxu0 }
 0x52b   :  { %2992 = vst [vmem:[#allocation2 + $0x1f0] sm:$0xff] %v9900_v15  ;;  %3032 = vst [vmem:[#allocation3 + $0x70] sm:$0xff] %v3000_v22  ;;  %v2999_v10 = vmul.f32 %v2730_v40, %v11612_v2 }
 0x52c   :  { %v9902_v41 = vpop.eup %9901  ;;  %v9056_v7 = vpop.f32.mrf.mxu0 }
 0x52d   :  { %2991 = vst [vmem:[#allocation2 + $0x1e0] sm:$0xff] %v9902_v41  ;;  %3031 = vst [vmem:[#allocation3 + $0x60] sm:$0xff] %v2999_v10  ;;  %v3002_v49 = vmul.f32 %v9056_v7, %v11615_v13  ;;  %v13398_v10 = vld [vmem:[#allocation27_spill] sm:$0xff]  ;;  %v13399_v41 = vld [vmem:[#allocation29_spill] sm:$0xff] }
 0x52e   :  { %v2740_v53 = vpop.f32.mrf.mxu0 }
 0x52f   :  { %3034 = vst [vmem:[#allocation3 + $0x90] sm:$0xff] %v3002_v49  ;;  %v3001_v28 = vmul.f32 %v2740_v53, %v11617_v9 }
 0x530   :  { %v9059_v59 = vpop.f32.mrf.mxu0 }
 0x531   :  { %3033 = vst [vmem:[#allocation3 + $0x80] sm:$0xff] %v3001_v28  ;;  %v3004_v29 = vmul.f32 %v9059_v59, %v11619_v16 }
 0x532   :  { %v2750_v61 = vpop.f32.mrf.mxu0 }
 0x533   :  { %3036 = vst [vmem:[#allocation3 + $0xb0] sm:$0xff] %v3004_v29  ;;  %v3003_v35 = vmul.f32 %v2750_v61, %v11621_v24  ;;  %v13400_v29 = vld [vmem:[#allocation28_spill] sm:$0xff] }
 0x534   :  { %v9062_v45 = vpop.f32.mrf.mxu0 }
 0x535   :  { %3035 = vst [vmem:[#allocation3 + $0xa0] sm:$0xff] %v3003_v35  ;;  %v3006_v2 = vmul.f32 %v9062_v45, %v11624_v27 }
 0x536   :  { %v2760_v32 = vpop.f32.mrf.mxu0 }
 0x537   :  { %3038 = vst [vmem:[#allocation3 + $0xd0] sm:$0xff] %v3006_v2  ;;  %v3005_v13 = vmul.f32 %v2760_v32, %v11627_v39 }
 0x538   :  { %v9065_v56 = vpop.f32.mrf.mxu0 }
 0x539   :  { %3037 = vst [vmem:[#allocation3 + $0xc0] sm:$0xff] %v3005_v13  ;;  %v3008_v9 = vmul.f32 %v9065_v56, %v11630_v51 }
 0x53a   :  { %v2770_v47 = vpop.f32.mrf.mxu0 }
 0x53b   :  { %3040 = vst [vmem:[#allocation3 + $0xf0] sm:$0xff] %v3008_v9  ;;  %v3007_v16 = vmul.f32 %v2770_v47, %v11633_v30  ;;  %v13401_v9 = vld [vmem:[#allocation30_spill] sm:$0xff] }
 0x53c   :  { %v9068_v48 = vpop.f32.mrf.mxu0 }
 0x53d   :  { %3039 = vst [vmem:[#allocation3 + $0xe0] sm:$0xff] %v3007_v16  ;;  %v3010_v24 = vmul.f32 %v9068_v48, %v11636_v1 }
 0x53e   :  { %v2780_v34 = vpop.f32.mrf.mxu0 }
 0x53f   :  { %3042 = vst [vmem:[#allocation3 + $0x110] sm:$0xff] %v3010_v24  ;;  %v3009_v27 = vmul.f32 %v2780_v34, %v11639_v42 }
 0x540   :  { %v9071_v18 = vpop.f32.mrf.mxu0 }
 0x541   :  { %3041 = vst [vmem:[#allocation3 + $0x100] sm:$0xff] %v3009_v27  ;;  %v3012_v39 = vmul.f32 %v9071_v18, %v11642_v8 }
 0x542   :  { %v2790_v50 = vpop.f32.mrf.mxu0 }
 0x543   :  { %3044 = vst [vmem:[#allocation3 + $0x130] sm:$0xff] %v3012_v39  ;;  %v3011_v51 = vmul.f32 %v2790_v50, %v11645_v62 }
 0x544   :  { %v9074_v21 = vpop.f32.mrf.mxu0 }
 0x545   :  { %3043 = vst [vmem:[#allocation3 + $0x120] sm:$0xff] %v3011_v51  ;;  %v3014_v30 = vmul.f32 %v9074_v21, %v11648_v6 }
 0x546   :  { %v2800_v43 = vpop.f32.mrf.mxu0 }
 0x547   :  { %3046 = vst [vmem:[#allocation3 + $0x150] sm:$0xff] %v3014_v30  ;;  %v3013_v1 = vmul.f32 %v2800_v43, %v11651_v5 }
 0x548   :  { %v9077_v60 = vpop.f32.mrf.mxu0 }
 0x549   :  { %3045 = vst [vmem:[#allocation3 + $0x140] sm:$0xff] %v3013_v1  ;;  %v3016_v42 = vmul.f32 %v9077_v60, %v11654_v44 }
 0x54a   :  { %v2810_v4 = vpop.f32.mrf.mxu0 }
 0x54b   :  { %3048 = vst [vmem:[#allocation3 + $0x170] sm:$0xff] %v3016_v42  ;;  %v3015_v8 = vmul.f32 %v2810_v4, %v11657_v46 }
 0x54c   :  { %v9080_v3 = vpop.f32.mrf.mxu0 }
 0x54d   :  { %3047 = vst [vmem:[#allocation3 + $0x160] sm:$0xff] %v3015_v8  ;;  %v3018_v62 = vmul.f32 %v9080_v3, %v11660_v17 }
 0x54e   :  { %v2820_v31 = vpop.f32.mrf.mxu0 }
 0x54f   :  { %3050 = vst [vmem:[#allocation3 + $0x190] sm:$0xff] %v3018_v62  ;;  %v3017_v6 = vmul.f32 %v2820_v31, %v11663_v58 }
 0x550   :  { %v9083_v38 = vpop.f32.mrf.mxu0 }
 0x551   :  { %3049 = vst [vmem:[#allocation3 + $0x180] sm:$0xff] %v3017_v6  ;;  %v3020_v5 = vmul.f32 %v9083_v38, %v11666_v33  ;;  %v11775_v6 = vld [vmem:[%s13204_s15 + $0x8] sm:$0xff] }
 0x552   :  { %v2830_v55 = vpop.f32.mrf.mxu0 }
 0x553   :  { %3052 = vst [vmem:[#allocation3 + $0x1b0] sm:$0xff] %v3020_v5  ;;  %v3019_v44 = vmul.f32 %v2830_v55, %v11669_v63 }
 0x554   :  { %v9086_v0 = vpop.f32.mrf.mxu0 }
 0x555   :  { %3051 = vst [vmem:[#allocation3 + $0x1a0] sm:$0xff] %v3019_v44  ;;  %v3022_v46 = vmul.f32 %v9086_v0, %v11672_v54  ;;  %v13397_v54 = vld [vmem:[#allocation26_spill] sm:$0xff] }
 0x556   :  { %v2840_v25 = vpop.f32.mrf.mxu0  ;;  %v3197_v40 = vmul.f32 %v11684_v36, %v13397_v54  ;;  %v3198_v45 = vmul.f32 %v11692_v37, %v13397_v54 }
 0x557   :  { %3054 = vst [vmem:[#allocation3 + $0x1d0] sm:$0xff] %v3022_v46  ;;  %v3021_v17 = vmul.f32 %v2840_v25, %v11675_v57 }
 0x558   :  { %v9089_v19 = vpop.f32.mrf.mxu0 }
 0x559   :  { %3053 = vst [vmem:[#allocation3 + $0x1c0] sm:$0xff] %v3021_v17  ;;  %v3024_v58 = vmul.f32 %v9089_v19, %v11678_v14  ;;  %v11822_v19 = vpop.f32.mrf.mxu1 }
 0x55a   :  { %v2850_v11 = vpop.f32.mrf.mxu0  ;;  %13404 = vst [vmem:[#allocation37_spill] sm:$0xff] %v11822_v19 }
 0x55b   :  { %3056 = vst [vmem:[#allocation3 + $0x1f0] sm:$0xff] %v3024_v58  ;;  %v3023_v33 = vmul.f32 %v2850_v11, %v11681_v52  ;;  %v11826_v11 = vpop.f32.mrf.mxu1 }
 0x55c   :  { %13405 = vst [vmem:[#allocation38_spill] sm:$0xff] %v11826_v11 }
 0x55d   :  { %3055 = vst [vmem:[#allocation3 + $0x1e0] sm:$0xff] %v3023_v33 }
 0x592   :  { %v3214_v20 = vpop.permute.xlu0 %3213  ;;  %v3202_v22 = vpop.permute.xlu1 %3201 }
 0x593   :  { %v3220_v63 = vsel %vm292_vm3, 0.0, %v3214_v20  ;;  %v3208_v15 = vsel %vm275_vm2, 0.0, %v3202_v22 }
 0x594   :  { %v3209_v57 = vmul.f32 %v3208_v15, %v13398_v10  ;;  %v3221_v7 = vmul.f32 %v3220_v63, %v13399_v41 }
 0x596   :  { %v3211_v49 = vadd.f32 %v3209_v57, %v3197_v40  ;;  %v3226_v14 = vpop.permute.xlu1 %3225  ;;  %v3204_v53 = vpop.permute.xlu0 %3203 }
 0x597   :  { %v3232_v28 = vsel %vm309_vm4, 0.0, %v3226_v14  ;;  %v3205_v52 = vsel %vm275_vm2, %v3202_v22, %v3204_v53 }
 0x598   :  { %v3223_v59 = vadd.f32 %v3221_v7, %v3211_v49  ;;  %v3233_v61 = vmul.f32 %v3232_v28, %v13400_v29  ;;  %v3210_v35 = vmul.f32 %v3205_v52, %v13398_v10 }
 0x59a   :  { %v3235_v36 = vadd.f32 %v3233_v61, %v3223_v59  ;;  %v3216_v2 = vpop.permute.xlu1 %3215  ;;  %v3228_v32 = vpop.permute.xlu0 %3227  ;;  %v3212_v16 = vadd.f32 %v3210_v35, %v3198_v45  ;;  %v10110_v61 = vld [vmem:[%s13203_s14] sm:$0xff] }
 0x59b   :  { %v3217_v13 = vsel %vm292_vm3, %v3214_v20, %v3216_v2  ;;  %v3229_v56 = vsel %vm309_vm4, %v3226_v14, %v3228_v32 }
 0x59c   :  { %v3237_v47 = vadd.f32 %v3235_v36, %v13401_v9  ;;  %v3222_v48 = vmul.f32 %v3217_v13, %v13399_v41  ;;  %v3234_v27 = vmul.f32 %v3229_v56, %v13400_v29 }
 0x59e   :  { %v3239_v24 = vsub.f32 0.0, %v3237_v47  ;;  %v3224_v34 = vadd.f32 %v3222_v48, %v3212_v16 }
 0x5a0   :  { %v3241_v18 = vmul.f32 1.442695, %v3239_v24  ;;  %v3236_v39 = vadd.f32 %v3234_v27, %v3224_v34 }
 0x5a2   :  { %9903 = vpow2.f32 %v3241_v18  ;;  %v3238_v37 = vadd.f32 %v3236_v39, %v13401_v9 }
 0x5a4   :  { %v3240_v50 = vsub.f32 0.0, %v3238_v37 }
 0x5a6   :  { %v3243_v51 = vmul.f32 1.442695, %v3240_v50 }
 0x5a8   :  { %9905 = vpow2.f32 %v3243_v51 }
 0x5af   :  { %v9904_v21 = vpop.eup %9903 }
 0x5b0   :  { %v3245_v30 = vadd.f32 1.0, %v9904_v21 }
 0x5b2   :  { %9907 = vrcp.f32 %v3245_v30 }
 0x5b5   :  { %v9906_v43 = vpop.eup %9905 }
 0x5b6   :  { %v3246_v1 = vadd.f32 1.0, %v9906_v43 }
 0x5b8   :  { %9909 = vrcp.f32 %v3246_v1 }
 0x5bf   :  { %v9908_v60 = vpop.eup %9907 }
 0x5c0   :  { %v11749_v42 = vmul.f32 %v9908_v60, %v3237_v47 }
 0x5c2   :  { %13402 = vst [vmem:[#allocation35_spill] sm:$0xff] %v11749_v42  ;;  %3253 = vxpose.xlu1.b32.start.end [1/1] (short) %v11749_v42, 128 }
 0x5c5   :  { %v9910_v4 = vpop.eup %9909 }
 0x5c6   :  { %v11752_v8 = vmul.f32 %v9910_v4, %v3238_v37 }
 0x5c8   :  { %13403 = vst [vmem:[#allocation36_spill] sm:$0xff] %v11752_v8  ;;  %3285 = vxpose.xlu0.b32.start.end [1/1] (short) %v11752_v8, 128 }
 0x63e   :  { %v11755_v3 = vpop.trf.xlu1 }
 0x63f   :  { %9092 = vmatprep.mubr.msk.f32.mxu0 %vm407_vm5, %v11755_v3  ;;  %9142 = vmatprep.mubr.msk.f32.mxu1 %vm407_vm5, %v11755_v3 }
 0x642   :  { %v11761_v62 = vpop.trf.xlu1 }
 0x643   :  { %9093 = vmatmul.mubr.msk.f32.vlgmr.msra.gmra.mxu0 %vm407_vm5, %v11761_v62  ;;  %9143 = vmatmul.mubr.msk.f32.vlgmr.msra.gmra.mxu1 %vm407_vm5, %v11761_v62 }
 0x644   :  { %v11767_v31 = vpop.trf.xlu0  ;;  %9191 = vmatpush3.msra.mxu0 %v11524_v26  ;;  %9241 = vmatpush3.msra.mxu1 %v11536_v23 }
 0x645   :  { %9290 = vmatprep.subr.mxu0 %v11536_v23  ;;  %9340 = vmatprep.subr.mxu1 %v11775_v6 }
 0x646   :  { %v11778_v38 = vpop.trf.xlu1 }
 0x647   :  { %9095 = vmatprep.mubr.msk.f32.mxu0 %vm407_vm5, %v11778_v38  ;;  %9145 = vmatprep.mubr.msk.f32.mxu1 %vm407_vm5, %v11778_v38 }
 0x648   :  { %v11784_v26 = vpop.trf.xlu0 }
 0x64a   :  { %v11786_v5 = vpop.trf.xlu1 }
 0x64b   :  { %9096 = vmatmul.mubr.msk.f32.gmra.mxu0 %vm407_vm5, %v11786_v5  ;;  %9146 = vmatmul.mubr.msk.f32.gmra.mxu1 %vm407_vm5, %v11786_v5 }
 0x64c   :  { %v11792_v23 = vpop.trf.xlu0 }
 0x64e   :  { %v11794_v55 = vpop.trf.xlu1 }
 0x64f   :  { %9098 = vmatprep.mubr.msk.f32.mxu0 %vm407_vm5, %v11794_v55  ;;  %9148 = vmatprep.mubr.msk.f32.mxu1 %vm407_vm5, %v11794_v55 }
 0x650   :  { %v11800_v44 = vpop.trf.xlu0 }
 0x652   :  { %v11802_v0 = vpop.trf.xlu1 }
 0x653   :  { %9099 = vmatmul.mubr.msk.f32.gmra.mxu0 %vm407_vm5, %v11802_v0  ;;  %9149 = vmatmul.mubr.msk.f32.gmra.mxu1 %vm407_vm5, %v11802_v0 }
 0x654   :  { %v11810_v25 = vpop.trf.xlu0 }
 0x656   :  { %v11808_v46 = vpop.trf.xlu1 }
 0x657   :  { %9101 = vmatprep.mubr.msk.f32.mxu0 %vm407_vm5, %v11808_v46  ;;  %9151 = vmatprep.mubr.msk.f32.mxu1 %vm407_vm5, %v11808_v46 }
 0x658   :  { %v11824_v58 = vpop.trf.xlu0 }
 0x65a   :  { %v11816_v17 = vpop.trf.xlu1 }
 0x65b   :  { %9102 = vmatmul.mubr.msk.f32.gmra.mxu0 %vm407_vm5, %v11816_v17  ;;  %9152 = vmatmul.mubr.msk.f32.gmra.mxu1 %vm407_vm5, %v11816_v17 }
 0x65c   :  { %v11836_v22 = vpop.trf.xlu0 }
 0x65e   :  { %v11828_v33 = vpop.trf.xlu1 }
 0x65f   :  { %9104 = vmatprep.mubr.msk.f32.mxu0 %vm407_vm5, %v11828_v33  ;;  %9154 = vmatprep.mubr.msk.f32.mxu1 %vm407_vm5, %v11828_v33 }
 0x660   :  { %v11848_v15 = vpop.trf.xlu0 }
 0x662   :  { %v11834_v20 = vpop.trf.xlu1 }
 0x663   :  { %9105 = vmatmul.mubr.msk.f32.gmra.mxu0 %vm407_vm5, %v11834_v20  ;;  %9155 = vmatmul.mubr.msk.f32.gmra.mxu1 %vm407_vm5, %v11834_v20 }
 0x664   :  { %v11858_v10 = vpop.trf.xlu0 }
 0x666   :  { %v11842_v63 = vpop.trf.xlu1 }
 0x667   :  { %9107 = vmatprep.mubr.msk.f32.mxu0 %vm407_vm5, %v11842_v63  ;;  %9157 = vmatprep.mubr.msk.f32.mxu1 %vm407_vm5, %v11842_v63 }
 0x668   :  { %v11870_v41 = vpop.trf.xlu0 }
 0x669   :  { %13406 = vst [vmem:[#allocation39_spill] sm:$0xff] %v11870_v41 }
 0x66a   :  { %v11850_v54 = vpop.trf.xlu1 }
 0x66b   :  { %9108 = vmatmul.mubr.msk.f32.gmra.mxu0 %vm407_vm5, %v11850_v54  ;;  %9158 = vmatmul.mubr.msk.f32.gmra.mxu1 %vm407_vm5, %v11850_v54 }
 0x66c   :  { %v11880_v14 = vpop.trf.xlu0 }
 0x66d   :  { %13407 = vst [vmem:[#allocation40_spill] sm:$0xff] %v11880_v14 }
 0x66e   :  { %v11856_v40 = vpop.trf.xlu1 }
 0x66f   :  { %9110 = vmatprep.mubr.msk.f32.mxu0 %vm407_vm5, %v11856_v40  ;;  %9160 = vmatprep.mubr.msk.f32.mxu1 %vm407_vm5, %v11856_v40 }
 0x670   :  { %v11898_v53 = vpop.trf.xlu0 }
 0x671   :  { %13408 = vst [vmem:[#allocation41_spill] sm:$0xff] %v11898_v53 }
 0x672   :  { %v11864_v57 = vpop.trf.xlu1 }
 0x673   :  { %9111 = vmatmul.mubr.msk.f32.gmra.mxu0 %vm407_vm5, %v11864_v57  ;;  %9161 = vmatmul.mubr.msk.f32.gmra.mxu1 %vm407_vm5, %v11864_v57 }
 0x674   :  { %v11908_v28 = vpop.trf.xlu0 }
 0x675   :  { %13409 = vst [vmem:[#allocation42_spill] sm:$0xff] %v11908_v28 }
 0x676   :  { %v11872_v7 = vpop.trf.xlu1 }
 0x677   :  { %9113 = vmatprep.mubr.msk.f32.mxu0 %vm407_vm5, %v11872_v7  ;;  %9163 = vmatprep.mubr.msk.f32.mxu1 %vm407_vm5, %v11872_v7 }
 0x678   :  { %v11926_v52 = vpop.trf.xlu0 }
 0x679   :  { %13410 = vst [vmem:[#allocation43_spill] sm:$0xff] %v11926_v52 }
 0x67a   :  { %v11878_v49 = vpop.trf.xlu1 }
 0x67b   :  { %9114 = vmatmul.mubr.msk.f32.gmra.mxu0 %vm407_vm5, %v11878_v49  ;;  %9164 = vmatmul.mubr.msk.f32.gmra.mxu1 %vm407_vm5, %v11878_v49 }
 0x67c   :  { %9116 = vmatprep.mubr.msk.f32.mxu0 %vm407_vm5, %v11767_v31  ;;  %9166 = vmatprep.mubr.msk.f32.mxu1 %vm407_vm5, %v11767_v31  ;;  %v11936_v59 = vpop.trf.xlu0 }
 0x67d   :  { %13411 = vst [vmem:[#allocation44_spill] sm:$0xff] %v11936_v59 }
 0x67f   :  { %9117 = vmatmul.mubr.msk.f32.gmra.mxu0 %vm407_vm5, %v11784_v26  ;;  %9167 = vmatmul.mubr.msk.f32.gmra.mxu1 %vm407_vm5, %v11784_v26 }
 0x680   :  { %9119 = vmatprep.mubr.msk.f32.mxu0 %vm407_vm5, %v11792_v23  ;;  %9169 = vmatprep.mubr.msk.f32.mxu1 %vm407_vm5, %v11792_v23  ;;  %v11954_v29 = vpop.trf.xlu0 }
 0x681   :  { %13412 = vst [vmem:[#allocation26_spill] sm:$0xff] %v11954_v29 }
 0x683   :  { %9120 = vmatmul.mubr.msk.f32.gmra.mxu0 %vm407_vm5, %v11800_v44  ;;  %9170 = vmatmul.mubr.msk.f32.gmra.mxu1 %vm407_vm5, %v11800_v44 }
 0x684   :  { %9122 = vmatprep.mubr.msk.f32.mxu0 %vm407_vm5, %v11810_v25  ;;  %9172 = vmatprep.mubr.msk.f32.mxu1 %vm407_vm5, %v11810_v25 }
 0x687   :  { %9123 = vmatmul.mubr.msk.f32.gmra.mxu0 %vm407_vm5, %v11824_v58  ;;  %9173 = vmatmul.mubr.msk.f32.gmra.mxu1 %vm407_vm5, %v11824_v58 }
 0x688   :  { %9125 = vmatprep.mubr.msk.f32.mxu0 %vm407_vm5, %v11836_v22  ;;  %9175 = vmatprep.mubr.msk.f32.mxu1 %vm407_vm5, %v11836_v22 }
 0x68b   :  { %9126 = vmatmul.mubr.msk.f32.gmra.mxu0 %vm407_vm5, %v11848_v15  ;;  %9176 = vmatmul.mubr.msk.f32.gmra.mxu1 %vm407_vm5, %v11848_v15 }
 0x68c   :  { %9128 = vmatprep.mubr.msk.f32.mxu0 %vm407_vm5, %v11858_v10  ;;  %9178 = vmatprep.mubr.msk.f32.mxu1 %vm407_vm5, %v11858_v10 }
 0x68f   :  { %9129 = vmatmul.mubr.msk.f32.gmra.mxu0 %vm407_vm5, %v11870_v41  ;;  %9179 = vmatmul.mubr.msk.f32.gmra.mxu1 %vm407_vm5, %v11870_v41 }
 0x690   :  { %9131 = vmatprep.mubr.msk.f32.mxu0 %vm407_vm5, %v11880_v14  ;;  %9181 = vmatprep.mubr.msk.f32.mxu1 %vm407_vm5, %v11880_v14 }
 0x693   :  { %9132 = vmatmul.mubr.msk.f32.gmra.mxu0 %vm407_vm5, %v11898_v53  ;;  %9182 = vmatmul.mubr.msk.f32.gmra.mxu1 %vm407_vm5, %v11898_v53 }
 0x694   :  { %9134 = vmatprep.mubr.msk.f32.mxu0 %vm407_vm5, %v11908_v28  ;;  %9184 = vmatprep.mubr.msk.f32.mxu1 %vm407_vm5, %v11908_v28 }
 0x697   :  { %9135 = vmatmul.mubr.msk.f32.gmra.mxu0 %vm407_vm5, %v11926_v52  ;;  %9185 = vmatmul.mubr.msk.f32.gmra.mxu1 %vm407_vm5, %v11926_v52 }
 0x698   :  { %9137 = vmatprep.mubr.msk.f32.mxu0 %vm407_vm5, %v11936_v59  ;;  %9187 = vmatprep.mubr.msk.f32.mxu1 %vm407_vm5, %v11936_v59 }
 0x69b   :  { %9138 = vmatmul.mubr.msk.f32.gmra.mxu0 %vm407_vm5, %v11954_v29  ;;  %9188 = vmatmul.mubr.msk.f32.gmra.mxu1 %vm407_vm5, %v11954_v29 }
 0x69c   :  { %9192 = vmatprep.mubr.msk.f32.mxu0 %vm407_vm5, %v11755_v3 }
 0x69f   :  { %9193 = vmatmul.mubr.msk.f32.vlgmr.msra.gmra.mxu0 %vm407_vm5, %v11761_v62 }
 0x6a0   :  { %9195 = vmatprep.mubr.msk.f32.mxu0 %vm407_vm5, %v11778_v38  ;;  %9291 = vmatpush3.msra.mxu0 %v10110_v61 }
 0x6a3   :  { %9196 = vmatmul.mubr.msk.f32.gmra.mxu0 %vm407_vm5, %v11786_v5 }
 0x6a4   :  { %9198 = vmatprep.mubr.msk.f32.mxu0 %vm407_vm5, %v11794_v55 }
 0x6a7   :  { %9199 = vmatmul.mubr.msk.f32.gmra.mxu0 %vm407_vm5, %v11802_v0 }
 0x6a8   :  { %9201 = vmatprep.mubr.msk.f32.mxu0 %vm407_vm5, %v11808_v46 }
 0x6ab   :  { %9202 = vmatmul.mubr.msk.f32.gmra.mxu0 %vm407_vm5, %v11816_v17 }
 0x6ac   :  { %9204 = vmatprep.mubr.msk.f32.mxu0 %vm407_vm5, %v11828_v33 }
 0x6af   :  { %9205 = vmatmul.mubr.msk.f32.gmra.mxu0 %vm407_vm5, %v11834_v20 }
 0x6b0   :  { %9207 = vmatprep.mubr.msk.f32.mxu0 %vm407_vm5, %v11842_v63 }
 0x6b3   :  { %9208 = vmatmul.mubr.msk.f32.gmra.mxu0 %vm407_vm5, %v11850_v54 }
 0x6b4   :  { %9210 = vmatprep.mubr.msk.f32.mxu0 %vm407_vm5, %v11856_v40 }
 0x6b7   :  { %9211 = vmatmul.mubr.msk.f32.gmra.mxu0 %vm407_vm5, %v11864_v57 }
 0x6b8   :  { %9213 = vmatprep.mubr.msk.f32.mxu0 %vm407_vm5, %v11872_v7 }
 0x6bb   :  { %9214 = vmatmul.mubr.msk.f32.gmra.mxu0 %vm407_vm5, %v11878_v49 }
 0x6bc   :  { %9216 = vmatprep.mubr.msk.f32.mxu0 %vm407_vm5, %v11767_v31 }
 0x6bf   :  { %9217 = vmatmul.mubr.msk.f32.gmra.mxu0 %vm407_vm5, %v11784_v26 }
 0x6c0   :  { %9219 = vmatprep.mubr.msk.f32.mxu0 %vm407_vm5, %v11792_v23 }
 0x6c3   :  { %9220 = vmatmul.mubr.msk.f32.gmra.mxu0 %vm407_vm5, %v11800_v44 }
 0x6c4   :  { %9222 = vmatprep.mubr.msk.f32.mxu0 %vm407_vm5, %v11810_v25 }
 0x6c7   :  { %9223 = vmatmul.mubr.msk.f32.gmra.mxu0 %vm407_vm5, %v11824_v58 }
 0x6c8   :  { %9225 = vmatprep.mubr.msk.f32.mxu0 %vm407_vm5, %v11836_v22 }
 0x6cb   :  { %9226 = vmatmul.mubr.msk.f32.gmra.mxu0 %vm407_vm5, %v11848_v15 }
 0x6cc   :  { %9228 = vmatprep.mubr.msk.f32.mxu0 %vm407_vm5, %v11858_v10 }
 0x6cf   :  { %9229 = vmatmul.mubr.msk.f32.gmra.mxu0 %vm407_vm5, %v11870_v41 }
 0x6d0   :  { %9231 = vmatprep.mubr.msk.f32.mxu0 %vm407_vm5, %v11880_v14 }
 0x6d3   :  { %9232 = vmatmul.mubr.msk.f32.gmra.mxu0 %vm407_vm5, %v11898_v53 }
 0x6d4   :  { %9234 = vmatprep.mubr.msk.f32.mxu0 %vm407_vm5, %v11908_v28 }
 0x6d7   :  { %9235 = vmatmul.mubr.msk.f32.gmra.mxu0 %vm407_vm5, %v11926_v52 }
 0x6d8   :  { %9237 = vmatprep.mubr.msk.f32.mxu0 %vm407_vm5, %v11936_v59 }
 0x6db   :  { %9238 = vmatmul.mubr.msk.f32.gmra.mxu0 %vm407_vm5, %v11954_v29 }
 0x703   :  { %v9094_v35 = vpop.f32.mrf.mxu0 }
 0x704   :  { %4095 = vperm.xlu1 %9692, %v9094_v35  }
 0x705   :  { %v3479_v45 = vpop.f32.mrf.mxu0 }
 0x706   :  { %4090 = vperm.xlu0 %9691, %v3479_v45  }
 0x70b   :  { %v9097_v36 = vpop.f32.mrf.mxu0 }
 0x70c   :  { %4105 = vperm.xlu0 %9691, %v9097_v36  }
 0x70d   :  { %v3489_v2 = vpop.f32.mrf.mxu0 }
 0x70e   :  { %4100 = vperm.xlu1 %9692, %v3489_v2  }
 0x713   :  { %v9100_v32 = vpop.f32.mrf.mxu0 }
 0x714   :  { %4115 = vperm.xlu0 %9691, %v9100_v32  }
 0x715   :  { %v3499_v13 = vpop.f32.mrf.mxu0 }
 0x716   :  { %4110 = vperm.xlu1 %9692, %v3499_v13  }
 0x71b   :  { %v9103_v56 = vpop.f32.mrf.mxu0 }
 0x71c   :  { %4125 = vperm.xlu0 %9691, %v9103_v56  }
 0x71d   :  { %v3509_v9 = vpop.f32.mrf.mxu0 }
 0x71e   :  { %4120 = vperm.xlu1 %9692, %v3509_v9  }
 0x723   :  { %v9106_v47 = vpop.f32.mrf.mxu0 }
 0x724   :  { %4135 = vperm.xlu0 %9691, %v9106_v47  }
 0x725   :  { %v3519_v16 = vpop.f32.mrf.mxu0 }
 0x726   :  { %4130 = vperm.xlu1 %9692, %v3519_v16  }
 0x72b   :  { %v9109_v48 = vpop.f32.mrf.mxu0 }
 0x72c   :  { %4145 = vperm.xlu0 %9691, %v9109_v48  }
 0x72d   :  { %v3529_v24 = vpop.f32.mrf.mxu0 }
 0x72e   :  { %4140 = vperm.xlu1 %9692, %v3529_v24  }
 0x733   :  { %v9112_v34 = vpop.f32.mrf.mxu0 }
 0x734   :  { %4155 = vperm.xlu0 %9691, %v9112_v34  }
 0x735   :  { %v3539_v27 = vpop.f32.mrf.mxu0 }
 0x736   :  { %4150 = vperm.xlu1 %9692, %v3539_v27  }
 0x73b   :  { %v9115_v18 = vpop.f32.mrf.mxu0 }
 0x73c   :  { %4165 = vperm.xlu0 %9691, %v9115_v18  }
 0x73d   :  { %v3549_v39 = vpop.f32.mrf.mxu0 }
 0x73e   :  { %4160 = vperm.xlu1 %9692, %v3549_v39  }
 0x73f   :  { %v9118_v37 = vpop.f32.mrf.mxu0 }
 0x740   :  { %4175 = vperm.xlu0 %9691, %v9118_v37  }
 0x741   :  { %v3559_v50 = vpop.f32.mrf.mxu0 }
 0x742   :  { %4170 = vperm.xlu1 %9692, %v3559_v50  }
 0x743   :  { %v9121_v51 = vpop.f32.mrf.mxu0 }
 0x744   :  { %4185 = vperm.xlu0 %9691, %v9121_v51  }
 0x745   :  { %v3569_v21 = vpop.f32.mrf.mxu0 }
 0x746   :  { %4180 = vperm.xlu1 %9692, %v3569_v21  }
 0x747   :  { %v9124_v30 = vpop.f32.mrf.mxu0 }
 0x748   :  { %4195 = vperm.xlu0 %9691, %v9124_v30  }
 0x749   :  { %v3579_v43 = vpop.f32.mrf.mxu0 }
 0x74a   :  { %4190 = vperm.xlu1 %9692, %v3579_v43  }
 0x74b   :  { %v9127_v1 = vpop.f32.mrf.mxu0 }
 0x74c   :  { %4205 = vperm.xlu0 %9691, %v9127_v1  }
 0x74d   :  { %v3589_v60 = vpop.f32.mrf.mxu0 }
 0x74e   :  { %4200 = vperm.xlu1 %9692, %v3589_v60  }
 0x74f   :  { %v9130_v4 = vpop.f32.mrf.mxu0 }
 0x750   :  { %4215 = vperm.xlu0 %9691, %v9130_v4   ;;  %v12064_v4 = vld [vmem:[%s13198_s9] ss:$0 sm:$0xff] }
 0x751   :  { %v3599_v61 = vpop.f32.mrf.mxu0 }
 0x752   :  { %4210 = vperm.xlu1 %9692, %v3599_v61  }
 0x753   :  { %v9133_v35 = vpop.f32.mrf.mxu0 }
 0x754   :  { %4225 = vperm.xlu0 %9691, %v9133_v35  }
 0x755   :  { %v3609_v45 = vpop.f32.mrf.mxu0 }
 0x756   :  { %4220 = vperm.xlu1 %9692, %v3609_v45  }
 0x757   :  { %v9136_v36 = vpop.f32.mrf.mxu0 }
 0x758   :  { %4235 = vperm.xlu0 %9691, %v9136_v36   ;;  %v12072_v36 = vld [vmem:[%s13199_s10] ss:$0 sm:$0xff] }
 0x759   :  { %v3619_v2 = vpop.f32.mrf.mxu0 }
 0x75a   :  { %4230 = vperm.xlu1 %9692, %v3619_v2  }
 0x75b   :  { %v9139_v32 = vpop.f32.mrf.mxu0 }
 0x75c   :  { %4245 = vperm.xlu0 %9691, %v9139_v32  }
 0x75d   :  { %v3629_v13 = vpop.f32.mrf.mxu0 }
 0x75e   :  { %4240 = vperm.xlu1 %9692, %v3629_v13  }
 0x75f   :  { %v12027_v56 = vpop.f32.mrf.mxu0 }
 0x760   :  { %13413 = vst [vmem:[#allocation27_spill] sm:$0xff] %v12027_v56 }
 0x761   :  { %v12029_v9 = vpop.f32.mrf.mxu0 }
 0x762   :  { %13414 = vst [vmem:[#allocation29_spill] sm:$0xff] %v12029_v9 }
 0x763   :  { %v12031_v47 = vpop.f32.mrf.mxu0 }
 0x764   :  { %13415 = vst [vmem:[#allocation28_spill] sm:$0xff] %v12031_v47 }
 0x765   :  { %v12033_v16 = vpop.f32.mrf.mxu0 }
 0x766   :  { %13416 = vst [vmem:[#allocation30_spill] sm:$0xff] %v12033_v16 }
 0x767   :  { %v12035_v48 = vpop.f32.mrf.mxu0 }
 0x768   :  { %13417 = vst [vmem:[#allocation79_spill] sm:$0xff] %v12035_v48 }
 0x769   :  { %v12037_v24 = vpop.f32.mrf.mxu0 }
 0x76a   :  { %13418 = vst [vmem:[#allocation80_spill] sm:$0xff] %v12037_v24 }
 0x76b   :  { %v12039_v34 = vpop.f32.mrf.mxu0 }
 0x76c   :  { %13419 = vst [vmem:[#allocation81_spill] sm:$0xff] %v12039_v34 }
 0x76d   :  { %v12041_v27 = vpop.f32.mrf.mxu0 }
 0x76e   :  { %13420 = vst [vmem:[#allocation82_spill] sm:$0xff] %v12041_v27 }
 0x76f   :  { %v12043_v18 = vpop.f32.mrf.mxu0 }
 0x770   :  { %13421 = vst [vmem:[#allocation83_spill] sm:$0xff] %v12043_v18 }
 0x771   :  { %v12045_v39 = vpop.f32.mrf.mxu0 }
 0x772   :  { %13422 = vst [vmem:[#allocation84_spill] sm:$0xff] %v12045_v39 }
 0x773   :  { %v12047_v37 = vpop.f32.mrf.mxu0 }
 0x774   :  { %13423 = vst [vmem:[#allocation85_spill] sm:$0xff] %v12047_v37 }
 0x775   :  { %v12049_v50 = vpop.f32.mrf.mxu0 }
 0x776   :  { %13424 = vst [vmem:[#allocation86_spill] sm:$0xff] %v12049_v50 }
 0x777   :  { %v12051_v51 = vpop.f32.mrf.mxu0 }
 0x778   :  { %13425 = vst [vmem:[#allocation87_spill] sm:$0xff] %v12051_v51 }
 0x779   :  { %v12053_v21 = vpop.f32.mrf.mxu0 }
 0x77a   :  { %13426 = vst [vmem:[#allocation88_spill] sm:$0xff] %v12053_v21 }
 0x77b   :  { %v12055_v30 = vpop.f32.mrf.mxu0 }
 0x77c   :  { %13427 = vst [vmem:[#allocation89_spill] sm:$0xff] %v12055_v30 }
 0x77d   :  { %v12057_v43 = vpop.f32.mrf.mxu0 }
 0x77e   :  { %13428 = vst [vmem:[#allocation90_spill] sm:$0xff] %v12057_v43 }
 0x77f   :  { %v4096_v1 = vpop.permute.xlu1 %4095  ;;  %v12059_v60 = vpop.f32.mrf.mxu0 }
 0x780   :  { %13429 = vst [vmem:[#allocation91_spill] sm:$0xff] %v12059_v60  ;;  %v4249_v61 = vmul.f32 %v12064_v4, %v4096_v1 }
 0x781   :  { %v12067_v35 = vpop.f32.mrf.mxu0  ;;  %v4091_v45 = vpop.permute.xlu0 %4090 }
 0x782   :  { %13430 = vst [vmem:[#allocation92_spill] sm:$0xff] %v12067_v35  ;;  %v12075_v2 = vadd.f32 %v12072_v36, %v4249_v61  ;;  %v4248_v32 = vmul.f32 %v12064_v4, %v4091_v45 }
 0x783   :  { %v12078_v13 = vpop.f32.mrf.mxu0 }
 0x784   :  { %13431 = vst [vmem:[#allocation93_spill] sm:$0xff] %v12078_v13  ;;  %v4313_v8 = vmin.f32 %v12075_v2, 20.0  ;;  %v12082_v42 = vadd.f32 %v12072_v36, %v4248_v32  ;;  %vm4345_vm2 = vcmp.gt.f32.partialorder %v12075_v2, 20.0 }
 0x785   :  { %v12084_v1 = vpop.f32.mrf.mxu0 }
 0x786   :  { %13432 = vst [vmem:[#allocation94_spill] sm:$0xff] %v12084_v1  ;;  %v4378_v19 = vmul.f32 1.442695, %v4313_v8  ;;  %v4312_v11 = vmin.f32 %v12082_v42, 20.0  ;;  %vm4344_vm4 = vcmp.gt.f32.partialorder %v12082_v42, 20.0 }
 0x787   :  { %v12087_v60 = vpop.f32.mrf.mxu0  ;;  %v4106_v35 = vpop.permute.xlu0 %4105 }
 0x788   :  { %13433 = vst [vmem:[#allocation95_spill] sm:$0xff] %v12087_v60  ;;  %9911 = vpow2.f32 %v4378_v19  ;;  %v4376_v61 = vmul.f32 1.442695, %v4312_v11  ;;  %v4251_v30 = vmul.f32 %v12064_v4, %v4106_v35 }
 0x789   :  { %v4101_v45 = vpop.permute.xlu1 %4100  ;;  %v12090_v43 = vpop.f32.mrf.mxu0 }
 0x78a   :  { %13434 = vst [vmem:[#allocation96_spill] sm:$0xff] %v12090_v43  ;;  %9913 = vpow2.f32 %v4376_v61  ;;  %v12093_v13 = vadd.f32 %v12072_v36, %v4251_v30  ;;  %v4250_v32 = vmul.f32 %v12064_v4, %v4101_v45 }
 0x78b   :  { %v12096_v1 = vpop.f32.mrf.mxu0 }
 0x78c   :  { %13435 = vst [vmem:[#allocation97_spill] sm:$0xff] %v12096_v1  ;;  %v4315_v8 = vmin.f32 %v12093_v13, 20.0  ;;  %v12100_v60 = vadd.f32 %v12072_v36, %v4250_v32  ;;  %vm4347_vm6 = vcmp.gt.f32.partialorder %v12093_v13, 20.0 }
 0x78d   :  { %v12102_v19 = vpop.f32.mrf.mxu0 }
 0x78e   :  { %13436 = vst [vmem:[#allocation98_spill] sm:$0xff] %v12102_v19  ;;  %v4382_v11 = vmul.f32 1.442695, %v4315_v8  ;;  %v4314_v35 = vmin.f32 %v12100_v60, 20.0  ;;  %vm4346_vm7 = vcmp.gt.f32.partialorder %v12100_v60, 20.0 }
 0x78f   :  { %v12105_v51 = vpop.f32.mrf.mxu0  ;;  %v4116_v61 = vpop.permute.xlu0 %4115 }
 0x790   :  { %13437 = vst [vmem:[#allocation99_spill] sm:$0xff] %v12105_v51  ;;  %9915 = vpow2.f32 %v4382_v11  ;;  %v4380_v30 = vmul.f32 1.442695, %v4314_v35  ;;  %v4253_v43 = vmul.f32 %v12064_v4, %v4116_v61 }
 0x791   :  { %v4111_v45 = vpop.permute.xlu1 %4110  ;;  %v12108_v21 = vpop.f32.mrf.mxu0 }
 0x792   :  { %13438 = vst [vmem:[#allocation100_spill] sm:$0xff] %v12108_v21  ;;  %9917 = vpow2.f32 %v4380_v30  ;;  %v12111_v1 = vadd.f32 %v12072_v36, %v4253_v43  ;;  %v4252_v32 = vmul.f32 %v12064_v4, %v4111_v45 }
 0x793   :  { %v12114_v19 = vpop.f32.mrf.mxu0 }
 0x794   :  { %13439 = vst [vmem:[#allocation101_spill] sm:$0xff] %v12114_v19  ;;  %v4317_v8 = vmin.f32 %v12111_v1, 20.0  ;;  %v12118_v51 = vadd.f32 %v12072_v36, %v4252_v32  ;;  %vm4349_vm9 = vcmp.gt.f32.partialorder %v12111_v1, 20.0 }
 0x795   :  { %v9912_v11 = vpop.eup %9911  ;;  %v12120_v35 = vpop.f32.mrf.mxu0 }
 0x796   :  { %13440 = vst [vmem:[#allocation102_spill] sm:$0xff] %v12120_v35  ;;  %v4449_v61 = vadd.f32 1.0, %v9912_v11  ;;  %v4386_v37 = vmul.f32 1.442695, %v4317_v8  ;;  %v4316_v30 = vmin.f32 %v12118_v51, 20.0  ;;  %vm4348_vm10 = vcmp.gt.f32.partialorder %v12118_v51, 20.0 }
 0x797   :  { %v12122_v50 = vpop.eup %9913  ;;  %v12125_v43 = vpop.f32.mrf.mxu0 }
 0x798   :  { %13441 = vst [vmem:[#allocation103_spill] sm:$0xff] %v12125_v43  ;;  %v4126_v21 = vpop.permute.xlu0 %4125  ;;  %9919 = vlog2.f32 %v4449_v61  ;;  %v4384_v19 = vmul.f32 1.442695, %v4316_v30  ;;  %v4440_v39 = vadd.f32 1.0, %v12122_v50  ;;  %v4443_v24 = vmul.f32 -0.5, %v12122_v50 }
 0x799   :  { %v4255_v45 = vmul.f32 %v12064_v4, %v4126_v21  ;;  %9921 = vpow2.f32 %v4386_v37  ;;  %v4121_v18 = vpop.permute.xlu1 %4120  ;;  %v12128_v32 = vpop.f32.mrf.mxu0 }
 0x79a   :  { %13442 = vst [vmem:[#allocation104_spill] sm:$0xff] %v12128_v32  ;;  %v4254_v8 = vmul.f32 %v12064_v4, %v4121_v18  ;;  %9923 = vpow2.f32 %v4384_v19  ;;  %v4452_v18 = vmul.f32 -0.5, %v9912_v11  ;;  %v4444_v9 = vadd.f32 1.0, %v4443_v24 }
 0x79b   :  { %v12132_v35 = vadd.f32 %v12072_v36, %v4255_v45  ;;  %v12135_v34 = vpop.f32.mrf.mxu0  ;;  %9925 = vlog2.f32 %v4440_v39 }
 0x79c   :  { %13443 = vst [vmem:[#allocation105_spill] sm:$0xff] %v12135_v34  ;;  %v12139_v61 = vadd.f32 %v12072_v36, %v4254_v8  ;;  %v4453_v47 = vadd.f32 1.0, %v4452_v18 }
 0x79d   :  { %v4319_v43 = vmin.f32 %v12132_v35, 20.0  ;;  %v12141_v37 = vpop.eup %9915  ;;  %v12143_v21 = vpop.f32.mrf.mxu0  ;;  %vm4351_vm14 = vcmp.gt.f32.partialorder %v12132_v35, 20.0 }
 0x79e   :  { %13444 = vst [vmem:[#allocation106_spill] sm:$0xff] %v12143_v21  ;;  %v4318_v32 = vmin.f32 %v12139_v61, 20.0  ;;  %v4467_v45 = vadd.f32 1.0, %v12141_v37  ;;  %v4454_v12 = vmul.f32 %v9912_v11, %v4453_v47  ;;  %vm4350_vm12 = vcmp.gt.f32.partialorder %v12139_v61, 20.0 }
 0x79f   :  { %v4390_v30 = vmul.f32 1.442695, %v4319_v43  ;;  %v12147_v27 = vpop.eup %9917  ;;  %v4136_v19 = vpop.permute.xlu0 %4135 }
 0x7a0   :  { %v4388_v34 = vmul.f32 1.442695, %v4318_v32  ;;  %v4257_v48 = vmul.f32 %v12064_v4, %v4136_v19  ;;  %v4458_v8 = vadd.f32 1.0, %v12147_v27  ;;  %v4455_v19 = vand.u32 2147483647, %v9912_v11 }
 0x7a1   :  { %9927 = vpow2.f32 %v4390_v30  ;;  %v4131_v39 = vpop.permute.xlu1 %4130 }
 0x7a2   :  { %9929 = vlog2.f32 %v4467_v45  ;;  %v12152_v21 = vadd.f32 %v12072_v36, %v4257_v48  ;;  %v4256_v43 = vmul.f32 %v12064_v4, %v4131_v39  ;;  %v4470_v39 = vmul.f32 -0.5, %v12141_v37 }
 0x7a3   :  { %9931 = vpow2.f32 %v4388_v34  ;;  %vm12169_vm1 = vcmp.lt.f32.partialorder %v4455_v19, 0.0004427343  ;;  %v4473_v19 = vand.u32 2147483647, %v12141_v37 }
 0x7a4   :  { %9933 = vlog2.f32 %v4458_v8  ;;  %v4321_v16 = vmin.f32 %v12152_v21, 20.0  ;;  %v12158_v32 = vadd.f32 %v12072_v36, %v4256_v43  ;;  %v4446_v8 = vand.u32 2147483647, %v12122_v50 }
 0x7a5   :  { %v9920_v30 = vpop.eup %9919  ;;  %v4461_v43 = vmul.f32 -0.5, %v12147_v27  ;;  %v4471_v14 = vadd.f32 1.0, %v4470_v39  ;;  %v4464_v39 = vand.u32 2147483647, %v12147_v27  ;;  %vm12195_vm0 = vcmp.lt.f32.partialorder %v4473_v19, 0.0004427343 }
 0x7a6   :  { %v12160_v56 = vpop.eup %9921  ;;  %v4451_v45 = vmul.f32 0.6931472, %v9920_v30  ;;  %v4394_v34 = vmul.f32 1.442695, %v4321_v16  ;;  %v4320_v48 = vmin.f32 %v12158_v32, 20.0 }
 0x7a7   :  { %v12164_v29 = vpop.eup %9923  ;;  %v4485_v59 = vadd.f32 1.0, %v12160_v56  ;;  %v4146_v11 = vpop.permute.xlu0 %4145  ;;  %vm4447_vm3 = vcmp.lt.f32.partialorder %v4446_v8, 0.0004427343  ;;  %v4472_v8 = vmul.f32 %v12141_v37, %v4471_v14  ;;  %vm4465_vm8 = vcmp.lt.f32.partialorder %v4464_v39, 0.0004427343 }
 0x7a8   :  { %v4392_v18 = vmul.f32 1.442695, %v4320_v48  ;;  %v9926_v52 = vpop.eup %9925  ;;  %9935 = vpow2.f32 %v4394_v34  ;;  %v4476_v47 = vadd.f32 1.0, %v12164_v29  ;;  %v4457_v24 = vsel %vm12169_vm1, %v4454_v12, %v4451_v45 }
 0x7a9   :  { %v4141_v16 = vpop.permute.xlu1 %4140  ;;  %v4445_v48 = vmul.f32 %v12122_v50, %v4444_v9  ;;  %v4442_v53 = vmul.f32 0.6931472, %v9926_v52  ;;  %v4462_v34 = vadd.f32 1.0, %v4461_v43  ;;  %v4729_v12 = vsel %vm4345_vm2, %v12075_v2, %v4457_v24 }
 0x7aa   :  { %9937 = vpow2.f32 %v4392_v18  ;;  %v4258_v30 = vmul.f32 %v12064_v4, %v4141_v16  ;;  %v4259_v28 = vmul.f32 %v12064_v4, %v4146_v11  ;;  %v4761_v16 = vmul.f32 %v4729_v12, %v11761_v62 }
 0x7ab   :  { %9939 = vlog2.f32 %v4476_v47  ;;  %v4448_v45 = vsel %vm4447_vm3, %v4445_v48, %v4442_v53  ;;  %v4479_v47 = vmul.f32 -0.5, %v12164_v29  ;;  %vm4352_vm2 = vcmp.gt.f32.partialorder %v12158_v32, 20.0 }
 0x7ac   :  { %9941 = vlog2.f32 %v4485_v59  ;;  %v12186_v52 = vadd.f32 %v12072_v36, %v4258_v30  ;;  %v4728_v50 = vsel %vm4344_vm4, %v12082_v42, %v4448_v45  ;;  %v4463_v42 = vmul.f32 %v12147_v27, %v4462_v34  ;;  %v10113_v30 = vld [vmem:[%s13204_s15] sm:$0xff] }
 0x7ad   :  { %v4760_v59 = vmul.f32 %v4728_v50, %v11755_v3  ;;  %9242 = vmatprep.mubr.msk.f32.mxu1 %vm407_vm5, %v4728_v50  ;;  %v12205_v24 = vadd.f32 %v12072_v36, %v4259_v28  ;;  %v4480_v45 = vadd.f32 1.0, %v4479_v47  ;;  %vm4353_vm4 = vcmp.gt.f32.partialorder %v12152_v21, 20.0 }
 0x7ae   :  { %v12180_v41 = vpop.eup %9927  ;;  %9243 = vmatmul.mubr.msk.f32.vlgmr.msra.gmra.mxu1 %vm407_vm5, %v4729_v12  ;;  %v4322_v27 = vmin.f32 %v12186_v52, 20.0 }
 0x7af   :  { %v9930_v9 = vpop.eup %9929  ;;  %9292 = vmatprep.mubr.msk.f32.mxu0 %vm407_vm5, %v4760_v59  ;;  %v4156_v14 = vpop.permute.xlu0 %4155  ;;  %v4503_v62 = vadd.f32 1.0, %v12180_v41  ;;  %9341 = vmatpush3.msra.mxu1 %v11775_v6  ;;  %v4488_v6 = vmul.f32 -0.5, %v12160_v56  ;;  %v4323_v50 = vmin.f32 %v12205_v24, 20.0 }
 0x7b0   :  { %v12190_v18 = vpop.eup %9931  ;;  %v4469_v2 = vmul.f32 0.6931472, %v9930_v9  ;;  %9293 = vmatmul.mubr.msk.f32.vlgmr.msra.gmra.mxu0 %vm407_vm5, %v4761_v16  ;;  %9342 = vmatprep.subr.mxu1 %v10113_v30  ;;  %v4261_v12 = vmul.f32 %v12064_v4, %v4156_v14  ;;  %v4482_v9 = vand.u32 2147483647, %v12164_v29 }
 0x7b1   :  { %v9934_v53 = vpop.eup %9933  ;;  %v4494_v3 = vadd.f32 1.0, %v12190_v18  ;;  %v4151_v48 = vpop.permute.xlu1 %4150  ;;  %9343 = vmatpush3.msra.mxu1 %v10113_v30  ;;  %v4497_v59 = vmul.f32 -0.5, %v12190_v18 }
 0x7b2   :  { %v4460_v37 = vmul.f32 0.6931472, %v9934_v53  ;;  %v4475_v11 = vsel %vm12195_vm0, %v4472_v8, %v4469_v2  ;;  %v4396_v2 = vmul.f32 1.442695, %v4322_v27  ;;  %v4260_v8 = vmul.f32 %v12064_v4, %v4151_v48 }
 0x7b3   :  { %v4731_v34 = vsel %vm4347_vm6, %v12093_v13, %v4475_v11  ;;  %9943 = vlog2.f32 %v4494_v3  ;;  %v4489_v53 = vadd.f32 1.0, %v4488_v6  ;;  %vm12243_vm11 = vcmp.lt.f32.partialorder %v4482_v9, 0.0004427343 }
 0x7b4   :  { %v4466_v19 = vsel %vm4465_vm8, %v4463_v42, %v4460_v37  ;;  %9945 = vlog2.f32 %v4503_v62  ;;  %v4763_v43 = vmul.f32 %v4731_v34, %v11786_v5  ;;  %v12239_v42 = vadd.f32 %v12072_v36, %v4261_v12 }
 0x7b5   :  { %v4730_v28 = vsel %vm4346_vm7, %v12100_v60, %v4466_v19  ;;  %v12228_v13 = vpop.eup %9935  ;;  %v4481_v5 = vmul.f32 %v12164_v29, %v4480_v45  ;;  %v4491_v3 = vand.u32 2147483647, %v12160_v56  ;;  %v4398_v37 = vmul.f32 1.442695, %v4323_v50 }
 0x7b6   :  { %v4762_v39 = vmul.f32 %v4730_v28, %v11778_v38  ;;  %9245 = vmatprep.mubr.msk.f32.mxu1 %vm407_vm5, %v4730_v28  ;;  %v4498_v27 = vadd.f32 1.0, %v4497_v59  ;;  %9947 = vpow2.f32 %v4396_v2  ;;  %v12250_v48 = vadd.f32 %v12072_v36, %v4260_v8 }
 0x7b7   :  { %9246 = vmatmul.mubr.msk.f32.gmra.mxu1 %vm407_vm5, %v4731_v34  ;;  %v12233_v60 = vpop.eup %9937  ;;  %v4166_v38 = vpop.permute.xlu0 %4165  ;;  %v4490_v12 = vmul.f32 %v12160_v56, %v4489_v53  ;;  %v4521_v28 = vadd.f32 1.0, %v12228_v13  ;;  %v4325_v45 = vmin.f32 %v12239_v42, 20.0  ;;  %vm12259_vm13 = vcmp.lt.f32.partialorder %v4491_v3, 0.0004427343 }
 0x7b8   :  { %9295 = vmatprep.mubr.msk.f32.mxu0 %vm407_vm5, %v4762_v39  ;;  %v9940_v16 = vpop.eup %9939  ;;  %v4512_v30 = vadd.f32 1.0, %v12233_v60  ;;  %v4263_v19 = vmul.f32 %v12064_v4, %v4166_v38  ;;  %v4500_v50 = vand.u32 2147483647, %v12190_v18  ;;  %v4506_v39 = vmul.f32 -0.5, %v12180_v41 }
 0x7b9   :  { %9296 = vmatmul.mubr.msk.f32.gmra.mxu0 %vm407_vm5, %v4763_v43  ;;  %v9942_v14 = vpop.eup %9941  ;;  %v4161_v11 = vpop.permute.xlu1 %4160  ;;  %v4478_v62 = vmul.f32 0.6931472, %v9940_v16  ;;  %v4499_v8 = vmul.f32 %v12190_v18, %v4498_v27  ;;  %v4324_v43 = vmin.f32 %v12250_v48, 20.0  ;;  %v4515_v47 = vmul.f32 -0.5, %v12233_v60 }
 0x7ba   :  { %v4487_v29 = vmul.f32 0.6931472, %v9942_v14  ;;  %9949 = vlog2.f32 %v4512_v30  ;;  %v12274_v38 = vadd.f32 %v12072_v36, %v4263_v19  ;;  %v4262_v53 = vmul.f32 %v12064_v4, %v4161_v11 }
 0x7bb   :  { %v4176_v34 = vpop.permute.xlu0 %4175  ;;  %v4484_v6 = vsel %vm12243_vm11, %v4481_v5, %v4478_v62  ;;  %9951 = vpow2.f32 %v4398_v37  ;;  %v4402_v14 = vmul.f32 1.442695, %v4325_v45  ;;  %vm12287_vm1 = vcmp.lt.f32.partialorder %v4500_v50, 0.0004427343 }
 0x7bc   :  { %v4732_v56 = vsel %vm4348_vm10, %v12118_v51, %v4484_v6  ;;  %v4493_v2 = vsel %vm12259_vm13, %v4490_v12, %v4487_v29  ;;  %v4265_v51 = vmul.f32 %v12064_v4, %v4176_v34  ;;  %9953 = vlog2.f32 %v4521_v28 }
 0x7bd   :  { %v4171_v59 = vpop.permute.xlu1 %4170  ;;  %v4764_v16 = vmul.f32 %v4732_v56, %v11794_v55  ;;  %9248 = vmatprep.mubr.msk.f32.mxu1 %vm407_vm5, %v4732_v56  ;;  %v4733_v5 = vsel %vm4349_vm9, %v12111_v1, %v4493_v2  ;;  %v4507_v11 = vadd.f32 1.0, %v4506_v39  ;;  %v4509_v30 = vand.u32 2147483647, %v12180_v41 }
 0x7be   :  { %v4264_v37 = vmul.f32 %v12064_v4, %v4171_v59  ;;  %9249 = vmatmul.mubr.msk.f32.gmra.mxu1 %vm407_vm5, %v4733_v5  ;;  %v4765_v62 = vmul.f32 %v4733_v5, %v11802_v0  ;;  %v4524_v19 = vmul.f32 -0.5, %v12228_v13  ;;  %v4400_v34 = vmul.f32 1.442695, %v4324_v43 }
 0x7bf   :  { %v4186_v18 = vpop.permute.xlu0 %4185  ;;  %9298 = vmatprep.mubr.msk.f32.mxu0 %vm407_vm5, %v4764_v16  ;;  %v4327_v6 = vmin.f32 %v12274_v38, 20.0  ;;  %v12296_v12 = vadd.f32 %v12072_v36, %v4262_v53  ;;  %v4527_v28 = vand.u32 2147483647, %v12228_v13  ;;  %v12300_v45 = vadd.f32 %v12072_v36, %v4265_v51 }
 0x7c0   :  { %v9944_v3 = vpop.eup %9943  ;;  %9299 = vmatmul.mubr.msk.f32.gmra.mxu0 %vm407_vm5, %v4765_v62  ;;  %v4516_v39 = vadd.f32 1.0, %v4515_v47  ;;  %v12306_v56 = vadd.f32 %v12072_v36, %v4264_v37  ;;  %v4508_v2 = vmul.f32 %v12180_v41, %v4507_v11  ;;  %v4518_v43 = vand.u32 2147483647, %v12233_v60 }
 0x7c1   :  { %v4181_v1 = vpop.permute.xlu1 %4180  ;;  %v4496_v27 = vmul.f32 0.6931472, %v9944_v3  ;;  %v9946_v29 = vpop.eup %9945  ;;  %9955 = vpow2.f32 %v4402_v14  ;;  %v4267_v53 = vmul.f32 %v12064_v4, %v4186_v18  ;;  %vm4510_vm3 = vcmp.lt.f32.partialorder %v4509_v30, 0.0004427343 }
 0x7c2   :  { %v4505_v50 = vmul.f32 0.6931472, %v9946_v29  ;;  %v4406_v51 = vmul.f32 1.442695, %v4327_v6  ;;  %v4326_v5 = vmin.f32 %v12296_v12, 20.0  ;;  %9957 = vpow2.f32 %v4400_v34 }
 0x7c3   :  { %v4196_v0 = vpop.permute.xlu0 %4195  ;;  %v4502_v9 = vsel %vm12287_vm1, %v4499_v8, %v4496_v27  ;;  %v12319_v41 = vpop.eup %9947  ;;  %v4329_v3 = vmin.f32 %v12300_v45, 20.0  ;;  %v4517_v14 = vmul.f32 %v12233_v60, %v4516_v39  ;;  %v4328_v55 = vmin.f32 %v12306_v56, 20.0 }
 0x7c4   :  { %v4734_v59 = vsel %vm4350_vm12, %v12139_v61, %v4502_v9  ;;  %v4266_v61 = vmul.f32 %v12064_v4, %v4181_v1  ;;  %v4511_v47 = vsel %vm4510_vm3, %v4508_v2, %v4505_v50  ;;  %v4269_v11 = vmul.f32 %v12064_v4, %v4196_v0 }
 0x7c5   :  { %v4766_v8 = vmul.f32 %v4734_v59, %v11808_v46  ;;  %9251 = vmatprep.mubr.msk.f32.mxu1 %vm407_vm5, %v4734_v59  ;;  %v4191_v16 = vpop.permute.xlu1 %4190  ;;  %v4735_v46 = vsel %vm4351_vm14, %v12132_v35, %v4511_v47  ;;  %vm12331_vm0 = vcmp.lt.f32.partialorder %v4518_v43, 0.0004427343  ;;  %v4525_v1 = vadd.f32 1.0, %v4524_v19 }
 0x7c6   :  { %9252 = vmatmul.mubr.msk.f32.gmra.mxu1 %vm407_vm5, %v4735_v46  ;;  %v12336_v27 = vadd.f32 %v12072_v36, %v4267_v53  ;;  %v4268_v35 = vmul.f32 %v12064_v4, %v4191_v16  ;;  %v4767_v30 = vmul.f32 %v4735_v46, %v11816_v17  ;;  %9959 = vpow2.f32 %v4406_v51 }
 0x7c7   :  { %9301 = vmatprep.mubr.msk.f32.mxu0 %vm407_vm5, %v4766_v8  ;;  %v4206_v18 = vpop.permute.xlu0 %4205  ;;  %v9950_v37 = vpop.eup %9949  ;;  %v4404_v6 = vmul.f32 1.442695, %v4326_v5  ;;  %v12343_v0 = vadd.f32 %v12072_v36, %v4266_v61  ;;  %v4410_v50 = vmul.f32 1.442695, %v4329_v3  ;;  %v4530_v59 = vadd.f32 1.0, %v12319_v41 }
 0x7c8   :  { %v4514_v29 = vmul.f32 0.6931472, %v9950_v37  ;;  %v12340_v34 = vpop.eup %9951  ;;  %v4271_v9 = vmul.f32 %v12064_v4, %v4206_v18  ;;  %9302 = vmatmul.mubr.msk.f32.gmra.mxu0 %vm407_vm5, %v4767_v30  ;;  %v4408_v43 = vmul.f32 1.442695, %v4328_v55  ;;  %v12352_v53 = vadd.f32 %v12072_v36, %v4269_v11 }
 0x7c9   :  { %v4201_v60 = vpop.permute.xlu1 %4200  ;;  %v9954_v2 = vpop.eup %9953  ;;  %v4526_v16 = vmul.f32 %v12228_v13, %v4525_v1  ;;  %v4331_v51 = vmin.f32 %v12336_v27, 20.0  ;;  %v12358_v5 = vadd.f32 %v12072_v36, %v4268_v35  ;;  %v4330_v46 = vmin.f32 %v12343_v0, 20.0 }
 0x7ca   :  { %v4270_v19 = vmul.f32 %v12064_v4, %v4201_v60  ;;  %v4520_v17 = vsel %vm12331_vm0, %v4517_v14, %v4514_v29  ;;  %v4523_v3 = vmul.f32 0.6931472, %v9954_v2  ;;  %v12365_v18 = vadd.f32 %v12072_v36, %v4271_v9 }
 0x7cb   :  { %v4216_v39 = vpop.permute.xlu0 %4215  ;;  %v4736_v61 = vsel %vm4352_vm2, %v12158_v32, %v4520_v17  ;;  %vm4528_vm6 = vcmp.lt.f32.partialorder %v4527_v28, 0.0004427343  ;;  %9961 = vlog2.f32 %v4530_v59  ;;  %v4333_v62 = vmin.f32 %v12352_v53, 20.0 }
 0x7cc   :  { %v4273_v8 = vmul.f32 %v12064_v4, %v4216_v39  ;;  %v4768_v14 = vmul.f32 %v4736_v61, %v11828_v33  ;;  %9254 = vmatprep.mubr.msk.f32.mxu1 %vm407_vm5, %v4736_v61  ;;  %v12372_v37 = vadd.f32 %v12072_v36, %v4270_v19  ;;  %v4529_v32 = vsel %vm4528_vm6, %v4526_v16, %v4523_v3 }
 0x7cd   :  { %v4211_v47 = vpop.permute.xlu1 %4210  ;;  %9963 = vpow2.f32 %v4404_v6  ;;  %v4737_v33 = vsel %vm4353_vm4, %v12152_v21, %v4529_v32  ;;  %v4414_v13 = vmul.f32 1.442695, %v4331_v51  ;;  %v4332_v28 = vmin.f32 %v12358_v5, 20.0 }
 0x7ce   :  { %v4272_v55 = vmul.f32 %v12064_v4, %v4211_v47  ;;  %v12377_v1 = vadd.f32 %v12072_v36, %v4273_v8  ;;  %9304 = vmatprep.mubr.msk.f32.mxu0 %vm407_vm5, %v4768_v14  ;;  %v4769_v35 = vmul.f32 %v4737_v33, %v11834_v20  ;;  %9255 = vmatmul.mubr.msk.f32.gmra.mxu1 %vm407_vm5, %v4737_v33  ;;  %v12387_v29 = vpop.eup %9955  ;;  %9965 = vpow2.f32 %v4410_v50 }
 0x7cf   :  { %v4226_v11 = vpop.permute.xlu0 %4225  ;;  %v4335_v6 = vmin.f32 %v12365_v18, 20.0  ;;  %9967 = vpow2.f32 %v4408_v43  ;;  %v4412_v19 = vmul.f32 1.442695, %v4330_v46  ;;  %v4334_v39 = vmin.f32 %v12372_v37, 20.0  ;;  %v12397_v59 = vpop.eup %9957 }
 0x7d0   :  { %v4275_v30 = vmul.f32 %v12064_v4, %v4226_v11  ;;  %v12391_v9 = vadd.f32 %v12072_v36, %v4272_v55  ;;  %9305 = vmatmul.mubr.msk.f32.gmra.mxu0 %vm407_vm5, %v4769_v35  ;;  %v4539_v17 = vadd.f32 1.0, %v12340_v34  ;;  %v4418_v2 = vmul.f32 1.442695, %v4333_v62 }
 0x7d1   :  { %v4221_v60 = vpop.permute.xlu1 %4220  ;;  %v4337_v50 = vmin.f32 %v12377_v1, 20.0  ;;  %v4533_v16 = vmul.f32 -0.5, %v12319_v41  ;;  %9969 = vpow2.f32 %v4414_v13  ;;  %v4416_v43 = vmul.f32 1.442695, %v4332_v28 }
 0x7d2   :  { %v4274_v21 = vmul.f32 %v12064_v4, %v4221_v60  ;;  %v12401_v8 = vadd.f32 %v12072_v36, %v4275_v30  ;;  %v4422_v47 = vmul.f32 1.442695, %v4335_v6  ;;  %v4336_v3 = vmin.f32 %v12391_v9, 20.0 }
 0x7d3   :  { %v4236_v20 = vpop.permute.xlu0 %4235  ;;  %9971 = vlog2.f32 %v4539_v17  ;;  %v12409_v14 = vpop.eup %9959  ;;  %v4420_v55 = vmul.f32 1.442695, %v4334_v39  ;;  %v4426_v62 = vmul.f32 1.442695, %v4337_v50  ;;  %v4534_v13 = vadd.f32 1.0, %v4533_v16 }
 0x7d4   :  { %v4277_v51 = vmul.f32 %v12064_v4, %v4236_v20  ;;  %v12407_v46 = vadd.f32 %v12072_v36, %v4274_v21  ;;  %9973 = vpow2.f32 %v4412_v19  ;;  %v4339_v33 = vmin.f32 %v12401_v8, 20.0 }
 0x7d5   :  { %v4231_v61 = vpop.permute.xlu1 %4230  ;;  %9975 = vpow2.f32 %v4418_v2  ;;  %vm4354_vm7 = vcmp.gt.f32.partialorder %v12186_v52, 20.0  ;;  %v4424_v60 = vmul.f32 1.442695, %v4336_v3  ;;  %v4536_v21 = vand.u32 2147483647, %v12319_v41 }
 0x7d6   :  { %v4276_v32 = vmul.f32 %v12064_v4, %v4231_v61  ;;  %9977 = vpow2.f32 %v4416_v43  ;;  %v12414_v28 = vadd.f32 %v12072_v36, %v4277_v51  ;;  %v4338_v6 = vmin.f32 %v12407_v46, 20.0 }
 0x7d7   :  { %v4246_v11 = vpop.permute.xlu0 %4245  ;;  %9979 = vpow2.f32 %v4422_v47  ;;  %v4548_v20 = vadd.f32 1.0, %v12397_v59  ;;  %v4430_v2 = vmul.f32 1.442695, %v4339_v33  ;;  %v4535_v50 = vmul.f32 %v12319_v41, %v4534_v13 }
 0x7d8   :  { %13457 = vst [vmem:[#allocation107_spill] sm:$0xff] %v12414_v28  ;;  %v4279_v35 = vmul.f32 %v12064_v4, %v4246_v11  ;;  %9981 = vpow2.f32 %v4420_v55  ;;  %v12421_v19 = vadd.f32 %v12072_v36, %v4276_v32  ;;  %v9962_v17 = vpop.eup %9961  ;;  %v4542_v16 = vmul.f32 -0.5, %v12340_v34 }
 0x7d9   :  { %v4241_v30 = vpop.permute.xlu1 %4240  ;;  %9983 = vpow2.f32 %v4426_v62  ;;  %v4341_v51 = vmin.f32 %v12414_v28, 20.0  ;;  %v4532_v61 = vmul.f32 0.6931472, %v9962_v17  ;;  %vm4537_vm8 = vcmp.lt.f32.partialorder %v4536_v21, 0.0004427343 }
 0x7da   :  { %13458 = vst [vmem:[#allocation108_spill] sm:$0xff] %v12421_v19  ;;  %v4278_v39 = vmul.f32 %v12064_v4, %v4241_v30  ;;  %v12427_v43 = vpop.eup %9963  ;;  %v12431_v47 = vadd.f32 %v12072_v36, %v4279_v35  ;;  %9985 = vlog2.f32 %v4548_v20  ;;  %v4428_v4 = vmul.f32 1.442695, %v4338_v6 }
 0x7db   :  { %9987 = vpow2.f32 %v4424_v60  ;;  %v4545_v3 = vand.u32 2147483647, %v12340_v34  ;;  %v12434_v55 = vpop.eup %9965  ;;  %v4538_v32 = vsel %vm4537_vm8, %v4535_v50, %v4532_v61  ;;  %v4340_v41 = vmin.f32 %v12421_v19, 20.0 }
 0x7dc   :  { %13459 = vst [vmem:[#allocation109_spill] sm:$0xff] %v12431_v47  ;;  %v12438_v11 = vadd.f32 %v12072_v36, %v4278_v39  ;;  %v4557_v62 = vadd.f32 1.0, %v12387_v29  ;;  %v12441_v33 = vpop.eup %9967  ;;  %9989 = vpow2.f32 %v4430_v2  ;;  %v4738_v13 = vsel %vm4354_vm7, %v12186_v52, %v4538_v32 }
 0x7dd   :  { %v4543_v35 = vadd.f32 1.0, %v4542_v16  ;;  %v4434_v30 = vmul.f32 1.442695, %v4341_v51  ;;  %v4770_v60 = vmul.f32 %v4738_v13, %v11842_v63  ;;  %9257 = vmatprep.mubr.msk.f32.mxu1 %vm407_vm5, %v4738_v13  ;;  %v4343_v6 = vmin.f32 %v12431_v47, 20.0 }
 0x7de   :  { %13460 = vst [vmem:[#allocation110_spill] sm:$0xff] %v12438_v11  ;;  %v4551_v36 = vmul.f32 -0.5, %v12397_v59  ;;  %v12450_v21 = vpop.eup %9969  ;;  %vm4355_vm9 = vcmp.gt.f32.partialorder %v12205_v24, 20.0  ;;  %9991 = vpow2.f32 %v4428_v4  ;;  %v4566_v39 = vadd.f32 1.0, %v12427_v43 }
 0x7df   :  { %v4432_v17 = vmul.f32 1.442695, %v4340_v41  ;;  %vm12454_vm10 = vcmp.lt.f32.partialorder %v4545_v3, 0.0004427343  ;;  %9307 = vmatprep.mubr.msk.f32.mxu0 %vm407_vm5, %v4770_v60  ;;  %v4342_v63 = vmin.f32 %v12438_v11, 20.0  ;;  %9993 = vlog2.f32 %v4557_v62 }
 0x7e0   :  { %v9972_v20 = vpop.eup %9971  ;;  %v4544_v16 = vmul.f32 %v12340_v34, %v4543_v35  ;;  %9995 = vlog2.f32 %v4566_v39  ;;  %v4575_v51 = vadd.f32 1.0, %v12409_v14  ;;  %v4438_v4 = vmul.f32 1.442695, %v4343_v6 }
 0x7e1   :  { %v12460_v2 = vpop.eup %9973  ;;  %v4541_v50 = vmul.f32 0.6931472, %v9972_v20  ;;  %9997 = vpow2.f32 %v4434_v30  ;;  %v4552_v3 = vadd.f32 1.0, %v4551_v36  ;;  %v4560_v32 = vmul.f32 -0.5, %v12387_v29 }
 0x7e2   :  { %v12464_v61 = vpop.eup %9975  ;;  %v4554_v13 = vand.u32 2147483647, %v12397_v59  ;;  %9999 = vlog2.f32 %v4575_v51  ;;  %v4584_v34 = vadd.f32 1.0, %v12441_v33  ;;  %v4436_v60 = vmul.f32 1.442695, %v4342_v63 }
 0x7e3   :  { %v12467_v41 = vpop.eup %9977  ;;  %v4547_v62 = vsel %vm12454_vm10, %v4544_v16, %v4541_v50  ;;  %10001 = vpow2.f32 %v4432_v17  ;;  %vm4356_vm11 = vcmp.gt.f32.partialorder %v12250_v48, 20.0  ;;  %v4569_v39 = vmul.f32 -0.5, %v12427_v43 }
 0x7e4   :  { %v12473_v35 = vpop.eup %9979  ;;  %v4739_v30 = vsel %vm4355_vm9, %v12205_v24, %v4547_v62  ;;  %10003 = vlog2.f32 %v4584_v34  ;;  %v4593_v20 = vadd.f32 1.0, %v12434_v55  ;;  %v4553_v17 = vmul.f32 %v12397_v59, %v4552_v3 }
 0x7e5   :  { %v12479_v6 = vpop.eup %9981  ;;  %v4771_v36 = vmul.f32 %v4739_v30, %v11850_v54  ;;  %9258 = vmatmul.mubr.msk.f32.gmra.mxu1 %vm407_vm5, %v4739_v30  ;;  %10005 = vpow2.f32 %v4438_v4  ;;  %v4561_v24 = vadd.f32 1.0, %v4560_v32  ;;  %v4578_v63 = vmul.f32 -0.5, %v12409_v14 }
 0x7e6   :  { %v12485_v52 = vpop.eup %9983  ;;  %vm12490_vm12 = vcmp.lt.f32.partialorder %v4554_v13, 0.0004427343  ;;  %v4587_v16 = vmul.f32 -0.5, %v12441_v33  ;;  %10007 = vlog2.f32 %v4593_v20  ;;  %v4602_v51 = vadd.f32 1.0, %v12460_v2 }
 0x7e7   :  { %v9986_v50 = vpop.eup %9985  ;;  %9308 = vmatmul.mubr.msk.f32.gmra.mxu0 %vm407_vm5, %v4771_v36  ;;  %vm4357_vm13 = vcmp.gt.f32.partialorder %v12239_v42, 20.0  ;;  %10009 = vpow2.f32 %v4436_v60  ;;  %v4563_v4 = vand.u32 2147483647, %v12387_v29  ;;  %v4572_v3 = vand.u32 2147483647, %v12427_v43 }
 0x7e8   :  { %v12496_v62 = vpop.eup %9987  ;;  %v4550_v59 = vmul.f32 0.6931472, %v9986_v50  ;;  %vm4358_vm14 = vcmp.gt.f32.partialorder %v12296_v12, 20.0  ;;  %v4570_v32 = vadd.f32 1.0, %v4569_v39  ;;  %v4581_v13 = vand.u32 2147483647, %v12409_v14 }
 0x7e9   :  { %10011 = vlog2.f32 %v4602_v51  ;;  %v4611_v34 = vadd.f32 1.0, %v12450_v21  ;;  %v12504_v30 = vpop.eup %9989  ;;  %v4562_v60 = vmul.f32 %v12387_v29, %v4561_v24  ;;  %v4579_v20 = vadd.f32 1.0, %v4578_v63 }
 0x7ea   :  { %v4556_v36 = vsel %vm12490_vm12, %v4553_v17, %v4550_v59  ;;  %v4596_v50 = vmul.f32 -0.5, %v12434_v55  ;;  %vm4359_vm1 = vcmp.gt.f32.partialorder %v12274_v38, 20.0  ;;  %v4588_v47 = vadd.f32 1.0, %v4587_v16 }
 0x7eb   :  { %v4740_v39 = vsel %vm4356_vm11, %v12250_v48, %v4556_v36  ;;  %v4590_v51 = vand.u32 2147483647, %v12441_v33  ;;  %10013 = vlog2.f32 %v4611_v34  ;;  %v12515_v11 = vpop.eup %9991  ;;  %vm12519_vm2 = vcmp.lt.f32.partialorder %v4563_v4, 0.0004427343 }
 0x7ec   :  { %v4772_v54 = vmul.f32 %v4740_v39, %v11856_v40  ;;  %9260 = vmatprep.mubr.msk.f32.mxu1 %vm407_vm5, %v4740_v39  ;;  %vm12523_vm3 = vcmp.lt.f32.partialorder %v4572_v3, 0.0004427343  ;;  %v4605_v48 = vmul.f32 -0.5, %v12460_v2  ;;  %v9994_v24 = vpop.eup %9993  ;;  %v4571_v63 = vmul.f32 %v12427_v43, %v4570_v32  ;;  %v12536_v3 = vpop.f32.mrf.mxu1 }
 0x7ed   :  { %vm12529_vm4 = vcmp.lt.f32.partialorder %v4581_v13, 0.0004427343  ;;  %vm4360_vm0 = vcmp.gt.f32.partialorder %v12306_v56, 20.0  ;;  %v4599_v40 = vand.u32 2147483647, %v12434_v55  ;;  %v4620_v59 = vadd.f32 1.0, %v12467_v41  ;;  %v9996_v4 = vpop.eup %9995 }
 0x7ee   :  { %v4559_v34 = vmul.f32 0.6931472, %v9994_v24  ;;  %9310 = vmatprep.mubr.msk.f32.mxu0 %vm407_vm5, %v4772_v54  ;;  %v4580_v36 = vmul.f32 %v12409_v14, %v4579_v20  ;;  %v4597_v39 = vadd.f32 1.0, %v4596_v50  ;;  %v4629_v43 = vadd.f32 1.0, %v12464_v61  ;;  %v12541_v32 = vpop.eup %9997  ;;  %v12564_v29 = vpop.f32.mrf.mxu1 }
 0x7ef   :  { %vm4361_vm6 = vcmp.gt.f32.partialorder %v12300_v45, 20.0  ;;  %v4568_v13 = vmul.f32 0.6931472, %v9996_v4  ;;  %v4589_v28 = vmul.f32 %v12441_v33, %v4588_v47  ;;  %vm12545_vm7 = vcmp.lt.f32.partialorder %v4590_v51, 0.0004427343  ;;  %v10000_v24 = vpop.eup %9999 }
 0x7f0   :  { %10015 = vlog2.f32 %v4620_v59  ;;  %v4565_v54 = vsel %vm12519_vm2, %v4562_v60, %v4559_v34  ;;  %v4606_v14 = vadd.f32 1.0, %v4605_v48  ;;  %v4614_v20 = vmul.f32 -0.5, %v12450_v21  ;;  %v12552_v50 = vpop.eup %10001 }
 0x7f1   :  { %10017 = vlog2.f32 %v4629_v43  ;;  %v4741_v4 = vsel %vm4357_vm13, %v12239_v42, %v4565_v54  ;;  %v4574_v47 = vsel %vm12523_vm3, %v4571_v63, %v4568_v13  ;;  %v4577_v33 = vmul.f32 0.6931472, %v10000_v24  ;;  %v10004_v60 = vpop.eup %10003 }
 0x7f2   :  { %vm12559_vm8 = vcmp.lt.f32.partialorder %v4599_v40, 0.0004427343  ;;  %vm4362_vm9 = vcmp.gt.f32.partialorder %v12343_v0, 20.0  ;;  %v4773_v48 = vmul.f32 %v4741_v4, %v11864_v57  ;;  %9261 = vmatmul.mubr.msk.f32.gmra.mxu1 %vm407_vm5, %v4741_v4  ;;  %v4742_v42 = vsel %vm4358_vm14, %v12296_v12, %v4574_v47  ;;  %v12573_v40 = vpop.eup %10005  ;;  %v12581_v12 = vpop.f32.mrf.mxu1 }
 0x7f3   :  { %v4598_v17 = vmul.f32 %v12434_v55, %v4597_v39  ;;  %v4608_v63 = vand.u32 2147483647, %v12460_v2  ;;  %vm4363_vm10 = vcmp.gt.f32.partialorder %v12336_v27, 20.0  ;;  %v4774_v59 = vmul.f32 %v4742_v42, %v11872_v7  ;;  %9263 = vmatprep.mubr.msk.f32.mxu1 %vm407_vm5, %v4742_v42  ;;  %v10008_v13 = vpop.eup %10007 }
 0x7f4   :  { %v4583_v57 = vsel %vm12529_vm4, %v4580_v36, %v4577_v33  ;;  %v4586_v34 = vmul.f32 0.6931472, %v10004_v60  ;;  %v4617_v43 = vand.u32 2147483647, %v12450_v21  ;;  %9311 = vmatmul.mubr.msk.f32.gmra.mxu0 %vm407_vm5, %v4773_v48  ;;  %v4607_v39 = vmul.f32 %v12460_v2, %v4606_v14  ;;  %v12589_v54 = vpop.eup %10009 }
 0x7f5   :  { %v4743_v55 = vsel %vm4359_vm1, %v12274_v38, %v4583_v57  ;;  %v4615_v7 = vadd.f32 1.0, %v4614_v20  ;;  %v4638_v24 = vadd.f32 1.0, %v12479_v6  ;;  %9313 = vmatprep.mubr.msk.f32.mxu0 %vm407_vm5, %v4774_v59  ;;  %v4595_v36 = vmul.f32 0.6931472, %v10008_v13 }
 0x7f6   :  { %v4592_v16 = vsel %vm12545_vm7, %v4589_v28, %v4586_v34  ;;  %v4623_v4 = vmul.f32 -0.5, %v12467_v41  ;;  %v4647_v47 = vadd.f32 1.0, %v12473_v35  ;;  %v10012_v33 = vpop.eup %10011  ;;  %v4775_v38 = vmul.f32 %v4743_v55, %v11878_v49  ;;  %9264 = vmatmul.mubr.msk.f32.gmra.mxu1 %vm407_vm5, %v4743_v55  ;;  %v12606_v49 = vpop.f32.mrf.mxu1 }
 0x7f7   :  { %v4744_v2 = vsel %vm4360_vm0, %v12306_v56, %v4592_v16  ;;  %v4632_v14 = vmul.f32 -0.5, %v12464_v61  ;;  %10019 = vlog2.f32 %v4638_v24  ;;  %v4601_v28 = vsel %vm12559_vm8, %v4598_v17, %v4595_v36 }
 0x7f8   :  { %v4776_v19 = vmul.f32 %v4744_v2, %v11767_v31  ;;  %9266 = vmatprep.mubr.msk.f32.mxu1 %vm407_vm5, %v4744_v2  ;;  %v4604_v20 = vmul.f32 0.6931472, %v10012_v33  ;;  %10021 = vlog2.f32 %v4647_v47  ;;  %v10014_v60 = vpop.eup %10013  ;;  %vm4365_vm11 = vcmp.gt.f32.partialorder %v12352_v53, 20.0  ;;  %9314 = vmatmul.mubr.msk.f32.gmra.mxu0 %vm407_vm5, %v4775_v38  ;;  %v12620_v57 = vpop.f32.mrf.mxu1 }
 0x7f9   :  { %v4745_v56 = vsel %vm4361_vm6, %v12300_v45, %v4601_v28  ;;  %vm4609_vm12 = vcmp.lt.f32.partialorder %v4608_v63, 0.0004427343  ;;  %vm12613_vm13 = vcmp.lt.f32.partialorder %v4617_v43, 0.0004427343  ;;  %v4626_v51 = vand.u32 2147483647, %v12467_v41 }
 0x7fa   :  { %9316 = vmatprep.mubr.msk.f32.mxu0 %vm407_vm5, %v4776_v19  ;;  %v4610_v48 = vsel %vm4609_vm12, %v4607_v39, %v4604_v20  ;;  %v4613_v42 = vmul.f32 0.6931472, %v10014_v60  ;;  %v4616_v17 = vmul.f32 %v12450_v21, %v4615_v7  ;;  %v4624_v59 = vadd.f32 1.0, %v4623_v4  ;;  %9267 = vmatmul.mubr.msk.f32.gmra.mxu1 %vm407_vm5, %v4745_v56  ;;  %v12643_v4 = vpop.f32.mrf.mxu1 }
 0x7fb   :  { %v4777_v34 = vmul.f32 %v4745_v56, %v11784_v26  ;;  %v4746_v45 = vsel %vm4362_vm9, %v12343_v0, %v4610_v48  ;;  %v4633_v63 = vadd.f32 1.0, %v4632_v14  ;;  %v4656_v43 = vadd.f32 1.0, %v12496_v62 }
 0x7fc   :  { %v4778_v13 = vmul.f32 %v4746_v45, %v11792_v23  ;;  %9269 = vmatprep.mubr.msk.f32.mxu1 %vm407_vm5, %v4746_v45  ;;  %v4619_v21 = vsel %vm12613_vm13, %v4616_v17, %v4613_v42  ;;  %vm4364_vm14 = vcmp.gt.f32.partialorder %v12358_v5, 20.0  ;;  %v4635_v26 = vand.u32 2147483647, %v12464_v61 }
 0x7fd   :  { %v10016_v55 = vpop.eup %10015  ;;  %9317 = vmatmul.mubr.msk.f32.gmra.mxu0 %vm407_vm5, %v4777_v34  ;;  %v4747_v0 = vsel %vm4363_vm10, %v12336_v27, %v4619_v21  ;;  %v4641_v39 = vmul.f32 -0.5, %v12479_v6  ;;  %10023 = vlog2.f32 %v4656_v43  ;;  %v4665_v23 = vadd.f32 1.0, %v12485_v52 }
 0x7fe   :  { %v10018_v7 = vpop.eup %10017  ;;  %9319 = vmatprep.mubr.msk.f32.mxu0 %vm407_vm5, %v4778_v13  ;;  %v4622_v24 = vmul.f32 0.6931472, %v10016_v55  ;;  %v4625_v16 = vmul.f32 %v12467_v41, %v4624_v59  ;;  %vm4627_vm1 = vcmp.lt.f32.partialorder %v4626_v51, 0.0004427343  ;;  %v4650_v36 = vmul.f32 -0.5, %v12473_v35  ;;  %9270 = vmatmul.mubr.msk.f32.gmra.mxu1 %vm407_vm5, %v4747_v0  ;;  %v12650_v41 = vpop.f32.mrf.mxu1 }
 0x7ff   :  { %v4779_v47 = vmul.f32 %v4747_v0, %v11800_v44  ;;  %v4631_v27 = vmul.f32 0.6931472, %v10018_v7  ;;  %v4634_v33 = vmul.f32 %v12464_v61, %v4633_v63  ;;  %10025 = vlog2.f32 %v4665_v23 }
 0x800   :  { %v4628_v38 = vsel %vm4627_vm1, %v4625_v16, %v4622_v24  ;;  %vm4636_vm2 = vcmp.lt.f32.partialorder %v4635_v26, 0.0004427343  ;;  %v4644_v2 = vand.u32 2147483647, %v12479_v6  ;;  %v4674_v14 = vadd.f32 1.0, %v12515_v11 }
 0x801   :  { %9320 = vmatmul.mubr.msk.f32.gmra.mxu0 %vm407_vm5, %v4779_v47  ;;  %v4748_v44 = vsel %vm4364_vm14, %v12358_v5, %v4628_v38  ;;  %v4637_v19 = vsel %vm4636_vm2, %v4634_v33, %v4631_v27  ;;  %v4642_v28 = vadd.f32 1.0, %v4641_v39  ;;  %v4653_v20 = vand.u32 2147483647, %v12473_v35 }
 0x802   :  { %v4780_v61 = vmul.f32 %v4748_v44, %v11810_v25  ;;  %9272 = vmatprep.mubr.msk.f32.mxu1 %vm407_vm5, %v4748_v44  ;;  %v4749_v60 = vsel %vm4365_vm11, %v12352_v53, %v4637_v19  ;;  %v4651_v56 = vadd.f32 1.0, %v4650_v36  ;;  %10027 = vlog2.f32 %v4674_v14  ;;  %v12674_v53 = vpop.f32.mrf.mxu1 }
 0x803   :  { %v4781_v31 = vmul.f32 %v4749_v60, %v11824_v58  ;;  %9273 = vmatmul.mubr.msk.f32.gmra.mxu1 %vm407_vm5, %v4749_v60  ;;  %v4659_v5 = vmul.f32 -0.5, %v12496_v62  ;;  %v4668_v51 = vmul.f32 -0.5, %v12485_v52  ;;  %v4683_v48 = vadd.f32 1.0, %v12504_v30 }
 0x804   :  { %v10020_v42 = vpop.eup %10019  ;;  %vm4367_vm3 = vcmp.gt.f32.partialorder %v12365_v18, 20.0  ;;  %9322 = vmatprep.mubr.msk.f32.mxu0 %vm407_vm5, %v4780_v61  ;;  %vm4366_vm4 = vcmp.gt.f32.partialorder %v12372_v37, 20.0  ;;  %vm12670_vm0 = vcmp.lt.f32.partialorder %v4644_v2, 0.0004427343  ;;  %v4643_v59 = vmul.f32 %v12479_v6, %v4642_v28  ;;  %v12681_v13 = vpop.f32.mrf.mxu1 }
 0x805   :  { %v10022_v58 = vpop.eup %10021  ;;  %9323 = vmatmul.mubr.msk.f32.gmra.mxu0 %vm407_vm5, %v4781_v31  ;;  %v4640_v17 = vmul.f32 0.6931472, %v10020_v42  ;;  %10029 = vlog2.f32 %v4683_v48  ;;  %v4692_v34 = vadd.f32 1.0, %v12552_v50  ;;  %v4652_v63 = vmul.f32 %v12473_v35, %v4651_v56 }
 0x806   :  { %v4649_v45 = vmul.f32 0.6931472, %v10022_v58  ;;  %vm4654_vm6 = vcmp.lt.f32.partialorder %v4653_v20, 0.0004427343  ;;  %v4662_v43 = vand.u32 2147483647, %v12496_v62 }
 0x807   :  { %v4646_v21 = vsel %vm12670_vm0, %v4643_v59, %v4640_v17  ;;  %v4660_v26 = vadd.f32 1.0, %v4659_v5  ;;  %v4669_v55 = vadd.f32 1.0, %v4668_v51  ;;  %10031 = vlog2.f32 %v4692_v34 }
 0x808   :  { %v4750_v6 = vsel %vm4366_vm4, %v12372_v37, %v4646_v21  ;;  %v4655_v0 = vsel %vm4654_vm6, %v4652_v63, %v4649_v45  ;;  %v4677_v39 = vmul.f32 -0.5, %v12515_v11  ;;  %v4701_v35 = vadd.f32 1.0, %v12541_v32  ;;  %v13483_v37 = vld [vmem:[#allocation41_spill] sm:$0xff] }
 0x809   :  { %v4782_v23 = vmul.f32 %v4750_v6, %v11836_v22  ;;  %9275 = vmatprep.mubr.msk.f32.mxu1 %vm407_vm5, %v4750_v6  ;;  %v4751_v7 = vsel %vm4367_vm3, %v12365_v18, %v4655_v0  ;;  %vm4368_vm7 = vcmp.gt.f32.partialorder %v12391_v9, 20.0  ;;  %vm12698_vm8 = vcmp.lt.f32.partialorder %v4662_v43, 0.0004427343  ;;  %v12703_v22 = vpop.f32.mrf.mxu1 }
 0x80a   :  { %v10024_v24 = vpop.eup %10023  ;;  %v4783_v16 = vmul.f32 %v4751_v7, %v11848_v15  ;;  %9276 = vmatmul.mubr.msk.f32.gmra.mxu1 %vm407_vm5, %v4751_v7  ;;  %v4671_v36 = vand.u32 2147483647, %v12485_v52  ;;  %10033 = vlog2.f32 %v4701_v35  ;;  %v4661_v18 = vmul.f32 %v12496_v62, %v4660_v26 }
 0x80b   :  { %9325 = vmatprep.mubr.msk.f32.mxu0 %vm407_vm5, %v4782_v23  ;;  %v4658_v47 = vmul.f32 0.6931472, %v10024_v24  ;;  %v4686_v27 = vmul.f32 -0.5, %v12504_v30  ;;  %v4710_v15 = vadd.f32 1.0, %v12589_v54  ;;  %v4670_v38 = vmul.f32 %v12485_v52, %v4669_v55  ;;  %v12713_v19 = vpop.f32.mrf.mxu1  ;;  %v13482_v55 = vld [vmem:[#allocation40_spill] sm:$0xff] }
 0x80c   :  { %v10026_v33 = vpop.eup %10025  ;;  %9326 = vmatmul.mubr.msk.f32.gmra.mxu0 %vm407_vm5, %v4783_v16  ;;  %v4678_v2 = vadd.f32 1.0, %v4677_v39  ;;  %v4680_v14 = vand.u32 2147483647, %v12515_v11  ;;  %v4695_v44 = vmul.f32 -0.5, %v12552_v50  ;;  %v4719_v20 = vadd.f32 1.0, %v12573_v40 }
 0x80d   :  { %v4664_v28 = vsel %vm12698_vm8, %v4661_v18, %v4658_v47  ;;  %v4667_v62 = vmul.f32 0.6931472, %v10026_v33  ;;  %10035 = vlog2.f32 %v4710_v15  ;;  %vm4369_vm9 = vcmp.gt.f32.partialorder %v12377_v1, 20.0  ;;  %v12728_v58 = vpop.f32.mrf.mxu1  ;;  %v13484_v47 = vld [vmem:[#allocation108_spill] sm:$0xff] }
 0x80e   :  { %v4752_v52 = vsel %vm4368_vm7, %v12391_v9, %v4664_v28  ;;  %vm4672_vm10 = vcmp.lt.f32.partialorder %v4671_v36, 0.0004427343  ;;  %v4689_v61 = vand.u32 2147483647, %v12504_v30  ;;  %v4687_v5 = vadd.f32 1.0, %v4686_v27  ;;  %v13481_v9 = vld [vmem:[#allocation39_spill] sm:$0xff] }
 0x80f   :  { %v10028_v60 = vpop.eup %10027  ;;  %v4784_v56 = vmul.f32 %v4752_v52, %v11858_v10  ;;  %9278 = vmatprep.mubr.msk.f32.mxu1 %vm407_vm5, %v4752_v52  ;;  %v4673_v31 = vsel %vm4672_vm10, %v4670_v38, %v4667_v62  ;;  %10037 = vlog2.f32 %v4719_v20  ;;  %v4679_v42 = vmul.f32 %v12515_v11, %v4678_v2  ;;  %v12736_v34 = vpop.f32.mrf.mxu1  ;;  %v13485_v2 = vld [vmem:[#allocation42_spill] sm:$0xff]  ;;  %v13486_v62 = vld [vmem:[#allocation107_spill] sm:$0xff] }
 0x810   :  { %v4753_v51 = vsel %vm4369_vm9, %v12377_v1, %v4673_v31  ;;  %v4676_v48 = vmul.f32 0.6931472, %v10028_v60  ;;  %v4704_v25 = vmul.f32 -0.5, %v12541_v32  ;;  %vm4681_vm11 = vcmp.lt.f32.partialorder %v4680_v14, 0.0004427343  ;;  %v13487_v31 = vld [vmem:[#allocation43_spill] sm:$0xff] }
 0x811   :  { %v4785_v17 = vmul.f32 %v4753_v51, %v13481_v9  ;;  %9279 = vmatmul.mubr.msk.f32.gmra.mxu1 %vm407_vm5, %v4753_v51  ;;  %9328 = vmatprep.mubr.msk.f32.mxu0 %vm407_vm5, %v4784_v56  ;;  %v4696_v10 = vadd.f32 1.0, %v4695_v44  ;;  %vm4371_vm12 = vcmp.gt.f32.partialorder %v12401_v8, 20.0  ;;  %vm4370_vm13 = vcmp.gt.f32.partialorder %v12407_v46, 20.0  ;;  %v12751_v16 = vpop.f32.mrf.mxu1 }
 0x812   :  { %v10030_v59 = vpop.eup %10029  ;;  %v4682_v1 = vsel %vm4681_vm11, %v4679_v42, %v4676_v48  ;;  %v4698_v11 = vand.u32 2147483647, %v12552_v50  ;;  %v4688_v43 = vmul.f32 %v12504_v30, %v4687_v5  ;;  %v4713_v21 = vmul.f32 -0.5, %v12589_v54  ;;  %v13488_v48 = vld [vmem:[#allocation110_spill] sm:$0xff] }
 0x813   :  { %9329 = vmatmul.mubr.msk.f32.gmra.mxu0 %vm407_vm5, %v4785_v17  ;;  %v4754_v45 = vsel %vm4370_vm13, %v12407_v46, %v4682_v1  ;;  %v4685_v63 = vmul.f32 0.6931472, %v10030_v59  ;;  %vm4690_vm14 = vcmp.lt.f32.partialorder %v4689_v61, 0.0004427343  ;;  %v4705_v0 = vadd.f32 1.0, %v4704_v25  ;;  %v9165_v38 = vpop.f32.mrf.mxu1 }
 0x814   :  { %v10032_v26 = vpop.eup %10031  ;;  %v4786_v6 = vmul.f32 %v4754_v45, %v13482_v55  ;;  %9281 = vmatprep.mubr.msk.f32.mxu1 %vm407_vm5, %v4754_v45  ;;  %v4707_v39 = vand.u32 2147483647, %v12541_v32  ;;  %v4697_v7 = vmul.f32 %v12552_v50, %v4696_v10  ;;  %v4722_v46 = vmul.f32 -0.5, %v12573_v40  ;;  %v13489_v10 = vld [vmem:[#allocation109_spill] sm:$0xff]  ;;  %v12830_v55 = vld [vmem:[%s13200_s11] ss:$0 sm:$0xff] }
 0x815   :  { %v4691_v35 = vsel %vm4690_vm14, %v4688_v43, %v4685_v63  ;;  %v4694_v23 = vmul.f32 0.6931472, %v10032_v26  ;;  %vm4699_vm1 = vcmp.lt.f32.partialorder %v4698_v11, 0.0004427343  ;;  %vm4372_vm2 = vcmp.gt.f32.partialorder %v13484_v47, 20.0  ;;  %v3774_v51 = vpop.f32.mrf.mxu1  ;;  %v13491_v63 = vld [vmem:[#allocation26_spill] sm:$0xff] }
 0x816   :  { %v4755_v30 = vsel %vm4371_vm12, %v12401_v8, %v4691_v35  ;;  %9331 = vmatprep.mubr.msk.f32.mxu0 %vm407_vm5, %v4786_v6  ;;  %v4714_v50 = vadd.f32 1.0, %v4713_v21  ;;  %v4706_v33 = vmul.f32 %v12541_v32, %v4705_v0  ;;  %v4716_v8 = vand.u32 2147483647, %v12589_v54  ;;  %s12917_s11 = smov 0  }
 0x817   :  { %v10034_v24 = vpop.eup %10033  ;;  %v4787_v36 = vmul.f32 %v4755_v30, %v13483_v37  ;;  %9282 = vmatmul.mubr.msk.f32.gmra.mxu1 %vm407_vm5, %v4755_v30  ;;  %v4700_v18 = vsel %vm4699_vm1, %v4697_v7, %v4694_v23  ;;  %vm4708_vm3 = vcmp.lt.f32.partialorder %v4707_v39, 0.0004427343  ;;  %v4723_v44 = vadd.f32 1.0, %v4722_v46  ;;  %v9168_v45 = vpop.f32.mrf.mxu1 }
 0x818   :  { %v4756_v27 = vsel %vm4372_vm2, %v13484_v47, %v4700_v18  ;;  %v4703_v15 = vmul.f32 0.6931472, %v10034_v24  ;;  %vm4373_vm4 = vcmp.gt.f32.partialorder %v13486_v62, 20.0  ;;  %v4725_v52 = vand.u32 2147483647, %v12573_v40 }
 0x819   :  { %9332 = vmatmul.mubr.msk.f32.gmra.mxu0 %vm407_vm5, %v4787_v36  ;;  %v4788_v14 = vmul.f32 %v4756_v27, %v13485_v2  ;;  %9284 = vmatprep.mubr.msk.f32.mxu1 %vm407_vm5, %v4756_v27  ;;  %v4715_v60 = vmul.f32 %v12589_v54, %v4714_v50  ;;  %vm4717_vm0 = vcmp.lt.f32.partialorder %v4716_v8, 0.0004427343  ;;  %vm4374_vm6 = vcmp.gt.f32.partialorder %v13488_v48, 20.0  ;;  %v13490_v54 = vld [vmem:[#allocation44_spill] sm:$0xff] }
 0x81a   :  { %v10036_v28 = vpop.eup %10035  ;;  %v4709_v20 = vsel %vm4708_vm3, %v4706_v33, %v4703_v15  ;;  %v4724_v9 = vmul.f32 %v12573_v40, %v4723_v44  ;;  %vm4726_vm7 = vcmp.lt.f32.partialorder %v4725_v52, 0.0004427343  ;;  %vm4375_vm8 = vcmp.gt.f32.partialorder %v13489_v10, 20.0  ;;  %v3784_v40 = vpop.f32.mrf.mxu1 }
 0x81b   :  { %v4757_v61 = vsel %vm4373_vm4, %v13486_v62, %v4709_v20  ;;  %9334 = vmatprep.mubr.msk.f32.mxu0 %vm407_vm5, %v4788_v14  ;;  %v4712_v32 = vmul.f32 0.6931472, %v10036_v28 }
 0x81c   :  { %v10038_v56 = vpop.eup %10037  ;;  %v4789_v5 = vmul.f32 %v4757_v61, %v13487_v31  ;;  %9285 = vmatmul.mubr.msk.f32.gmra.mxu1 %vm407_vm5, %v4757_v61  ;;  %v9171_v21 = vpop.f32.mrf.mxu1 }
 0x81d   :  { %v4718_v42 = vsel %vm4717_vm0, %v4715_v60, %v4712_v32  ;;  %v4721_v25 = vmul.f32 0.6931472, %v10038_v56 }
 0x81e   :  { %9335 = vmatmul.mubr.msk.f32.gmra.mxu0 %vm407_vm5, %v4789_v5  ;;  %v4758_v17 = vsel %vm4374_vm6, %v13488_v48, %v4718_v42  ;;  %v3794_v26 = vpop.f32.mrf.mxu1 }
 0x81f   :  { %v4790_v59 = vmul.f32 %v4758_v17, %v13490_v54  ;;  %9287 = vmatprep.mubr.msk.f32.mxu1 %vm407_vm5, %v4758_v17  ;;  %v4727_v1 = vsel %vm4726_vm7, %v4724_v9, %v4721_v25 }
 0x820   :  { %v4759_v11 = vsel %vm4375_vm8, %v13489_v10, %v4727_v1 }
 0x821   :  { %v4791_v43 = vmul.f32 %v4759_v11, %v13491_v63  ;;  %9288 = vmatmul.mubr.msk.f32.gmra.mxu1 %vm407_vm5, %v4759_v11  ;;  %9337 = vmatprep.mubr.msk.f32.mxu0 %vm407_vm5, %v4790_v59 }
 0x822   :  { %9344 = vmatprep.mubr.msk.f32.mxu1 %vm2537_vm15, %v12564_v29  ;;  %v9174_v29 = vpop.f32.mrf.mxu1 }
 0x823   :  { %9338 = vmatmul.mubr.msk.f32.gmra.mxu0 %vm407_vm5, %v4791_v43 }
 0x825   :  { %9345 = vmatmul.mubr.msk.f32.vlgmr.msra.gmra.mxu1 %vm2537_vm15, %v12536_v3  ;;  %v3804_v3 = vpop.f32.mrf.mxu1 }
 0x826   :  { %9347 = vmatprep.mubr.msk.f32.mxu1 %vm2537_vm15, %v12606_v49 }
 0x829   :  { %9348 = vmatmul.mubr.msk.f32.gmra.mxu1 %vm2537_vm15, %v12581_v12  ;;  %v9177_v12 = vpop.f32.mrf.mxu1 }
 0x82a   :  { %9350 = vmatprep.mubr.msk.f32.mxu1 %vm2537_vm15, %v12643_v4 }
 0x82b   :  { %v3814_v49 = vpop.f32.mrf.mxu1 }
 0x82d   :  { %9351 = vmatmul.mubr.msk.f32.gmra.mxu1 %vm2537_vm15, %v12620_v57  ;;  %v9180_v57 = vpop.f32.mrf.mxu1 }
 0x82e   :  { %9353 = vmatprep.mubr.msk.f32.mxu1 %vm2537_vm15, %v12674_v53 }
 0x82f   :  { %v3824_v4 = vpop.f32.mrf.mxu1 }
 0x831   :  { %9354 = vmatmul.mubr.msk.f32.gmra.mxu1 %vm2537_vm15, %v12650_v41  ;;  %v9183_v41 = vpop.f32.mrf.mxu1 }
 0x832   :  { %9356 = vmatprep.mubr.msk.f32.mxu1 %vm2537_vm15, %v12703_v22 }
 0x833   :  { %v3834_v53 = vpop.f32.mrf.mxu1 }
 0x835   :  { %9357 = vmatmul.mubr.msk.f32.gmra.mxu1 %vm2537_vm15, %v12681_v13  ;;  %v9186_v13 = vpop.f32.mrf.mxu1 }
 0x836   :  { %9359 = vmatprep.mubr.msk.f32.mxu1 %vm2537_vm15, %v12728_v58 }
 0x837   :  { %v3844_v22 = vpop.f32.mrf.mxu1 }
 0x839   :  { %9360 = vmatmul.mubr.msk.f32.gmra.mxu1 %vm2537_vm15, %v12713_v19  ;;  %v9189_v19 = vpop.f32.mrf.mxu1 }
 0x83a   :  { %9362 = vmatprep.mubr.msk.f32.mxu1 %vm2537_vm15, %v12751_v16 }
 0x83b   :  { %v3854_v58 = vpop.f32.mrf.mxu1 }
 0x83d   :  { %9363 = vmatmul.mubr.msk.f32.gmra.mxu1 %vm2537_vm15, %v12736_v34 }
 0x83e   :  { %9365 = vmatprep.mubr.msk.f32.mxu1 %vm2537_vm15, %v3774_v51 }
 0x841   :  { %9366 = vmatmul.mubr.msk.f32.gmra.mxu1 %vm2537_vm15, %v9165_v38 }
 0x842   :  { %9368 = vmatprep.mubr.msk.f32.mxu1 %vm2537_vm15, %v3784_v40 }
 0x845   :  { %9369 = vmatmul.mubr.msk.f32.gmra.mxu1 %vm2537_vm15, %v9168_v45 }
 0x846   :  { %9371 = vmatprep.mubr.msk.f32.mxu1 %vm2537_vm15, %v3794_v26 }
 0x849   :  { %9372 = vmatmul.mubr.msk.f32.gmra.mxu1 %vm2537_vm15, %v9171_v21 }
 0x84a   :  { %9374 = vmatprep.mubr.msk.f32.mxu1 %vm2537_vm15, %v3804_v3 }
 0x84d   :  { %9375 = vmatmul.mubr.msk.f32.gmra.mxu1 %vm2537_vm15, %v9174_v29 }
 0x84e   :  { %9377 = vmatprep.mubr.msk.f32.mxu1 %vm2537_vm15, %v3814_v49 }
 0x851   :  { %9378 = vmatmul.mubr.msk.f32.gmra.mxu1 %vm2537_vm15, %v9177_v12 }
 0x852   :  { %9380 = vmatprep.mubr.msk.f32.mxu1 %vm2537_vm15, %v3824_v4 }
 0x855   :  { %9381 = vmatmul.mubr.msk.f32.gmra.mxu1 %vm2537_vm15, %v9180_v57 }
 0x856   :  { %9383 = vmatprep.mubr.msk.f32.mxu1 %vm2537_vm15, %v3834_v53 }
 0x859   :  { %9384 = vmatmul.mubr.msk.f32.gmra.mxu1 %vm2537_vm15, %v9183_v41 }
 0x85a   :  { %9386 = vmatprep.mubr.msk.f32.mxu1 %vm2537_vm15, %v3844_v22 }
 0x85d   :  { %9387 = vmatmul.mubr.msk.f32.gmra.mxu1 %vm2537_vm15, %v9186_v13 }
 0x85e   :  { %9389 = vmatprep.mubr.msk.f32.mxu1 %vm2537_vm15, %v3854_v58 }
 0x861   :  { %9390 = vmatmul.mubr.msk.f32.gmra.mxu1 %vm2537_vm15, %v9189_v19 }
 0x86e   :  { %v9244_v34 = vpop.f32.mrf.mxu1 }
 0x86f   :  { %v5756_v6 = vmul.f32 %v12830_v55, %v9244_v34 }
 0x870   :  { %v4954_v0 = vpop.f32.mrf.mxu1  ;;  %v12845_v40 = vpop.f32.mrf.mxu0 }
 0x871   :  { %v5789_v39 = vmul.f32 1.442695, %v5756_v6  ;;  %v5755_v35 = vmul.f32 %v12830_v55, %v4954_v0 }
 0x872   :  { %v12849_v4 = vpop.f32.mrf.mxu0 }
 0x873   :  { %10039 = vpow2.f32 %v5789_v39  ;;  %v5787_v23 = vmul.f32 1.442695, %v5755_v35 }
 0x875   :  { %10041 = vpow2.f32 %v5787_v23 }
 0x877   :  { %v9247_v7 = vpop.f32.mrf.mxu1 }
 0x878   :  { %v5758_v46 = vmul.f32 %v12830_v55, %v9247_v7 }
 0x879   :  { %v4964_v30 = vpop.f32.mrf.mxu1  ;;  %v12852_v19 = vpop.f32.mrf.mxu0 }
 0x87a   :  { %v5793_v24 = vmul.f32 1.442695, %v5758_v46  ;;  %v5757_v16 = vmul.f32 %v12830_v55, %v4964_v30 }
 0x87b   :  { %v12856_v23 = vpop.f32.mrf.mxu0 }
 0x87c   :  { %10043 = vpow2.f32 %v5793_v24  ;;  %v5791_v37 = vmul.f32 1.442695, %v5757_v16 }
 0x87e   :  { %10045 = vpow2.f32 %v5791_v37  ;;  %v9250_v36 = vpop.f32.mrf.mxu1 }
 0x87f   :  { %v5760_v47 = vmul.f32 %v12830_v55, %v9250_v36 }
 0x880   :  { %v10040_v18 = vpop.eup %10039  ;;  %v4974_v50 = vpop.f32.mrf.mxu1 }
 0x881   :  { %5852 = vst [vmem:[#allocation2 + $0x18] sm:$0xff] %v10040_v18  ;;  %v5797_v27 = vmul.f32 1.442695, %v5760_v47  ;;  %v5759_v15 = vmul.f32 %v12830_v55, %v4974_v50  ;;  %v12859_v24 = vpop.f32.mrf.mxu0 }
 0x882   :  { %v10042_v33 = vpop.eup %10041 }
 0x883   :  { %5851 = vst [vmem:[#allocation2 + $0x8] sm:$0xff] %v10042_v33  ;;  %10047 = vpow2.f32 %v5797_v27  ;;  %v5795_v8 = vmul.f32 1.442695, %v5759_v15  ;;  %v12863_v15 = vpop.f32.mrf.mxu0 }
 0x885   :  { %10049 = vpow2.f32 %v5795_v8 }
 0x886   :  { %v9253_v2 = vpop.f32.mrf.mxu1 }
 0x887   :  { %v5762_v14 = vmul.f32 %v12830_v55, %v9253_v2 }
 0x888   :  { %v4984_v28 = vpop.f32.mrf.mxu1 }
 0x889   :  { %v10044_v38 = vpop.eup %10043  ;;  %v5801_v62 = vmul.f32 1.442695, %v5762_v14  ;;  %v5761_v20 = vmul.f32 %v12830_v55, %v4984_v28  ;;  %v12866_v14 = vpop.f32.mrf.mxu0 }
 0x88a   :  { %5854 = vst [vmem:[#allocation2 + $0x38] sm:$0xff] %v10044_v38 }
 0x88b   :  { %v10046_v44 = vpop.eup %10045  ;;  %10051 = vpow2.f32 %v5801_v62  ;;  %v5799_v52 = vmul.f32 1.442695, %v5761_v20 }
 0x88c   :  { %5853 = vst [vmem:[#allocation2 + $0x28] sm:$0xff] %v10046_v44 }
 0x88d   :  { %10053 = vpow2.f32 %v5799_v52  ;;  %v12868_v52 = vpop.f32.mrf.mxu0 }
 0x88e   :  { %v9256_v61 = vpop.f32.mrf.mxu1 }
 0x88f   :  { %v5764_v60 = vmul.f32 %v12830_v55, %v9256_v61 }
 0x890   :  { %v10048_v32 = vpop.eup %10047  ;;  %v4994_v56 = vpop.f32.mrf.mxu1 }
 0x891   :  { %5856 = vst [vmem:[#allocation2 + $0x58] sm:$0xff] %v10048_v32  ;;  %v5805_v5 = vmul.f32 1.442695, %v5764_v60  ;;  %v5763_v51 = vmul.f32 %v12830_v55, %v4994_v56  ;;  %v12871_v56 = vpop.f32.mrf.mxu0 }
 0x892   :  { %v10050_v31 = vpop.eup %10049 }
 0x893   :  { %5855 = vst [vmem:[#allocation2 + $0x48] sm:$0xff] %v10050_v31  ;;  %10055 = vpow2.f32 %v5805_v5  ;;  %v5803_v48 = vmul.f32 1.442695, %v5763_v51 }
 0x895   :  { %10057 = vpow2.f32 %v5803_v48 }
 0x898   :  { %v10052_v42 = vpop.eup %10051 }
 0x899   :  { %5858 = vst [vmem:[#allocation2 + $0x78] sm:$0xff] %v10052_v42 }
 0x89a   :  { %v10054_v25 = vpop.eup %10053 }
 0x89b   :  { %5857 = vst [vmem:[#allocation2 + $0x68] sm:$0xff] %v10054_v25  ;;  %v12874_v25 = vpop.f32.mrf.mxu0 }
 0x8a0   :  { %v10056_v9 = vpop.eup %10055 }
 0x8a1   :  { %5860 = vst [vmem:[#allocation2 + $0x98] sm:$0xff] %v10056_v9 }
 0x8a2   :  { %v10058_v17 = vpop.eup %10057 }
 0x8a3   :  { %5859 = vst [vmem:[#allocation2 + $0x88] sm:$0xff] %v10058_v17 }
 0x8a5   :  { %v9259_v10 = vpop.f32.mrf.mxu1 }
 0x8a6   :  { %v5766_v54 = vmul.f32 %v12830_v55, %v9259_v10 }
 0x8a7   :  { %v5004_v59 = vpop.f32.mrf.mxu1 }
 0x8a8   :  { %v5809_v1 = vmul.f32 1.442695, %v5766_v54  ;;  %v5765_v11 = vmul.f32 %v12830_v55, %v5004_v59  ;;  %v12877_v54 = vpop.f32.mrf.mxu0 }
 0x8aa   :  { %10059 = vpow2.f32 %v5809_v1  ;;  %v5807_v45 = vmul.f32 1.442695, %v5765_v11 }
 0x8ac   :  { %10061 = vpow2.f32 %v5807_v45 }
 0x8b2   :  { %v9262_v63 = vpop.f32.mrf.mxu1 }
 0x8b3   :  { %v5768_v43 = vmul.f32 %v12830_v55, %v9262_v63 }
 0x8b4   :  { %v5014_v21 = vpop.f32.mrf.mxu1 }
 0x8b5   :  { %v5813_v26 = vmul.f32 1.442695, %v5768_v43  ;;  %v5767_v29 = vmul.f32 %v12830_v55, %v5014_v21  ;;  %v12880_v21 = vpop.f32.mrf.mxu0 }
 0x8b6   :  { %v9265_v3 = vpop.f32.mrf.mxu1 }
 0x8b7   :  { %v10060_v12 = vpop.eup %10059  ;;  %10063 = vpow2.f32 %v5813_v26  ;;  %v5811_v49 = vmul.f32 1.442695, %v5767_v29  ;;  %v5770_v57 = vmul.f32 %v12830_v55, %v9265_v3  ;;  %v12883_v3 = vpop.f32.mrf.mxu0 }
 0x8b8   :  { %5862 = vst [vmem:[#allocation2 + $0xb8] sm:$0xff] %v10060_v12  ;;  %v5024_v41 = vpop.f32.mrf.mxu1 }
 0x8b9   :  { %v10062_v53 = vpop.eup %10061  ;;  %10065 = vpow2.f32 %v5811_v49  ;;  %v5817_v13 = vmul.f32 1.442695, %v5770_v57  ;;  %v5769_v22 = vmul.f32 %v12830_v55, %v5024_v41 }
 0x8ba   :  { %5861 = vst [vmem:[#allocation2 + $0xa8] sm:$0xff] %v10062_v53  ;;  %v9268_v58 = vpop.f32.mrf.mxu1 }
 0x8bb   :  { %10067 = vpow2.f32 %v5817_v13  ;;  %v5815_v34 = vmul.f32 1.442695, %v5769_v22  ;;  %v5772_v6 = vmul.f32 %v12830_v55, %v9268_v58  ;;  %v12886_v22 = vpop.f32.mrf.mxu0 }
 0x8bc   :  { %v5034_v0 = vpop.f32.mrf.mxu1 }
 0x8bd   :  { %10069 = vpow2.f32 %v5815_v34  ;;  %v5821_v39 = vmul.f32 1.442695, %v5772_v6  ;;  %v5771_v35 = vmul.f32 %v12830_v55, %v5034_v0  ;;  %v12889_v0 = vpop.f32.mrf.mxu0 }
 0x8be   :  { %v9271_v7 = vpop.f32.mrf.mxu1 }
 0x8bf   :  { %10071 = vpow2.f32 %v5821_v39  ;;  %v5819_v46 = vmul.f32 1.442695, %v5771_v35  ;;  %v5774_v30 = vmul.f32 %v12830_v55, %v9271_v7 }
 0x8c0   :  { %v5044_v16 = vpop.f32.mrf.mxu1 }
 0x8c1   :  { %10073 = vpow2.f32 %v5819_v46  ;;  %v5825_v37 = vmul.f32 1.442695, %v5774_v30  ;;  %v5773_v36 = vmul.f32 %v12830_v55, %v5044_v16 }
 0x8c3   :  { %v9274_v47 = vpop.f32.mrf.mxu1  ;;  %10075 = vpow2.f32 %v5825_v37  ;;  %v5823_v18 = vmul.f32 1.442695, %v5773_v36  ;;  %v12893_v37 = vpop.f32.mrf.mxu0 }
 0x8c4   :  { %v5776_v50 = vmul.f32 %v12830_v55, %v9274_v47  ;;  %v10064_v27 = vpop.eup %10063 }
 0x8c5   :  { %v5054_v33 = vpop.f32.mrf.mxu1  ;;  %5864 = vst [vmem:[#allocation2 + $0xd8] sm:$0xff] %v10064_v27  ;;  %10077 = vpow2.f32 %v5823_v18 }
 0x8c6   :  { %v5829_v8 = vmul.f32 1.442695, %v5776_v50  ;;  %v5775_v38 = vmul.f32 %v12830_v55, %v5054_v33  ;;  %v10066_v2 = vpop.eup %10065 }
 0x8c7   :  { %5863 = vst [vmem:[#allocation2 + $0xc8] sm:$0xff] %v10066_v2 }
 0x8c8   :  { %10079 = vpow2.f32 %v5829_v8  ;;  %v5827_v44 = vmul.f32 1.442695, %v5775_v38  ;;  %v10068_v28 = vpop.eup %10067  ;;  %v12897_v38 = vpop.f32.mrf.mxu0 }
 0x8c9   :  { %5866 = vst [vmem:[#allocation2 + $0xf8] sm:$0xff] %v10068_v28 }
 0x8ca   :  { %10081 = vpow2.f32 %v5827_v44  ;;  %v9277_v62 = vpop.f32.mrf.mxu1  ;;  %v10070_v20 = vpop.eup %10069 }
 0x8cb   :  { %v5778_v61 = vmul.f32 %v12830_v55, %v9277_v62  ;;  %5865 = vst [vmem:[#allocation2 + $0xe8] sm:$0xff] %v10070_v20 }
 0x8cc   :  { %v5064_v32 = vpop.f32.mrf.mxu1  ;;  %v10072_v60 = vpop.eup %10071 }
 0x8cd   :  { %v5833_v31 = vmul.f32 1.442695, %v5778_v61  ;;  %v5777_v5 = vmul.f32 %v12830_v55, %v5064_v32  ;;  %5868 = vst [vmem:[#allocation2 + $0x118] sm:$0xff] %v10072_v60  ;;  %v5355_v61 = vpop.f32.mrf.mxu0 }
 0x8ce   :  { %v10074_v51 = vpop.eup %10073 }
 0x8cf   :  { %10083 = vpow2.f32 %v5833_v31  ;;  %v5831_v48 = vmul.f32 1.442695, %v5777_v5  ;;  %5867 = vst [vmem:[#allocation2 + $0x108] sm:$0xff] %v10074_v51  ;;  %v9321_v51 = vpop.f32.mrf.mxu0 }
 0x8d0   :  { %v10076_v42 = vpop.eup %10075 }
 0x8d1   :  { %10085 = vpow2.f32 %v5831_v48  ;;  %v9280_v9 = vpop.f32.mrf.mxu1  ;;  %5870 = vst [vmem:[#allocation2 + $0x138] sm:$0xff] %v10076_v42 }
 0x8d2   :  { %v5780_v17 = vmul.f32 %v12830_v55, %v9280_v9  ;;  %v10078_v10 = vpop.eup %10077 }
 0x8d3   :  { %v5074_v59 = vpop.f32.mrf.mxu1  ;;  %5869 = vst [vmem:[#allocation2 + $0x128] sm:$0xff] %v10078_v10  ;;  %v5365_v10 = vpop.f32.mrf.mxu0 }
 0x8d4   :  { %v5837_v1 = vmul.f32 1.442695, %v5780_v17  ;;  %v5779_v11 = vmul.f32 %v12830_v55, %v5074_v59 }
 0x8d5   :  { %v10080_v45 = vpop.eup %10079 }
 0x8d6   :  { %5872 = vst [vmem:[#allocation2 + $0x158] sm:$0xff] %v10080_v45  ;;  %10087 = vpow2.f32 %v5837_v1  ;;  %v5835_v63 = vmul.f32 1.442695, %v5779_v11  ;;  %v9324_v45 = vpop.f32.mrf.mxu0 }
 0x8d7   :  { %v10082_v43 = vpop.eup %10081  ;;  %v9283_v26 = vpop.f32.mrf.mxu1 }
 0x8d8   :  { %5871 = vst [vmem:[#allocation2 + $0x148] sm:$0xff] %v10082_v43  ;;  %10089 = vpow2.f32 %v5835_v63  ;;  %v5782_v29 = vmul.f32 %v12830_v55, %v9283_v26  ;;  %v5375_v26 = vpop.f32.mrf.mxu0 }
 0x8d9   :  { %v5084_v12 = vpop.f32.mrf.mxu1 }
 0x8da   :  { %v5841_v49 = vmul.f32 1.442695, %v5782_v29  ;;  %v5781_v57 = vmul.f32 %v12830_v55, %v5084_v12 }
 0x8dc   :  { %v10084_v41 = vpop.eup %10083  ;;  %10091 = vpow2.f32 %v5841_v49  ;;  %v5839_v53 = vmul.f32 1.442695, %v5781_v57  ;;  %v9286_v13 = vpop.f32.mrf.mxu1 }
 0x8dd   :  { %5874 = vst [vmem:[#allocation2 + $0x178] sm:$0xff] %v10084_v41  ;;  %v5784_v58 = vmul.f32 %v12830_v55, %v9286_v13  ;;  %v9327_v57 = vpop.f32.mrf.mxu0 }
 0x8de   :  { %v10086_v34 = vpop.eup %10085  ;;  %10093 = vpow2.f32 %v5839_v53  ;;  %v5094_v6 = vpop.f32.mrf.mxu1 }
 0x8df   :  { %5873 = vst [vmem:[#allocation2 + $0x168] sm:$0xff] %v10086_v34  ;;  %v5845_v39 = vmul.f32 1.442695, %v5784_v58  ;;  %v5783_v35 = vmul.f32 %v12830_v55, %v5094_v6  ;;  %v5385_v13 = vpop.f32.mrf.mxu0 }
 0x8e1   :  { %10095 = vpow2.f32 %v5845_v39  ;;  %v5843_v7 = vmul.f32 1.442695, %v5783_v35  ;;  %v9289_v46 = vpop.f32.mrf.mxu1  ;;  %v9330_v6 = vpop.f32.mrf.mxu0 }
 0x8e2   :  { %v5786_v30 = vmul.f32 %v12830_v55, %v9289_v46 }
 0x8e3   :  { %v10088_v16 = vpop.eup %10087  ;;  %10097 = vpow2.f32 %v5843_v7  ;;  %v5104_v36 = vpop.f32.mrf.mxu1 }
 0x8e4   :  { %5876 = vst [vmem:[#allocation2 + $0x198] sm:$0xff] %v10088_v16  ;;  %v5849_v47 = vmul.f32 1.442695, %v5786_v30  ;;  %v5785_v18 = vmul.f32 %v12830_v55, %v5104_v36  ;;  %v5395_v7 = vpop.f32.mrf.mxu0 }
 0x8e5   :  { %v10090_v50 = vpop.eup %10089  ;;  %v9346_v27 = vpop.f32.mrf.mxu1 }
 0x8e6   :  { %5875 = vst [vmem:[#allocation2 + $0x188] sm:$0xff] %v10090_v50  ;;  %10099 = vpow2.f32 %v5849_v47  ;;  %v5847_v33 = vmul.f32 1.442695, %v5785_v18  ;;  %v5884_v8 = vmul.f32 %v9346_v27, %v12845_v40  ;;  %v9333_v36 = vpop.f32.mrf.mxu0 }
 0x8e7   :  { %v5596_v2 = vpop.f32.mrf.mxu1 }
 0x8e8   :  { %10101 = vpow2.f32 %v5847_v33  ;;  %5916 = vst [vmem:[#allocation3 + $0x18] sm:$0xff] %v5884_v8  ;;  %v5883_v44 = vmul.f32 %v5596_v2, %v12849_v4  ;;  %v5405_v27 = vpop.f32.mrf.mxu0 }
 0x8e9   :  { %v10092_v28 = vpop.eup %10091  ;;  %v9349_v62 = vpop.f32.mrf.mxu1 }
 0x8ea   :  { %5878 = vst [vmem:[#allocation2 + $0x1b8] sm:$0xff] %v10092_v28  ;;  %5915 = vst [vmem:[#allocation3 + $0x8] sm:$0xff] %v5883_v44  ;;  %v5886_v55 = vmul.f32 %v9349_v62, %v12852_v19  ;;  %v9336_v44 = vpop.f32.mrf.mxu0 }
 0x8eb   :  { %v10094_v20 = vpop.eup %10093  ;;  %v5606_v32 = vpop.f32.mrf.mxu1 }
 0x8ec   :  { %5877 = vst [vmem:[#allocation2 + $0x1a8] sm:$0xff] %v10094_v20  ;;  %5918 = vst [vmem:[#allocation3 + $0x38] sm:$0xff] %v5886_v55  ;;  %v5885_v40 = vmul.f32 %v5606_v32, %v12856_v23 }
 0x8ed   :  { %v9352_v60 = vpop.f32.mrf.mxu1 }
 0x8ee   :  { %v10096_v31 = vpop.eup %10095  ;;  %5917 = vst [vmem:[#allocation3 + $0x28] sm:$0xff] %v5885_v40  ;;  %v5888_v5 = vmul.f32 %v9352_v60, %v12859_v24 }
 0x8ef   :  { %5880 = vst [vmem:[#allocation2 + $0x1d8] sm:$0xff] %v10096_v31  ;;  %v5616_v4 = vpop.f32.mrf.mxu1 }
 0x8f0   :  { %v10098_v48 = vpop.eup %10097  ;;  %5920 = vst [vmem:[#allocation3 + $0x58] sm:$0xff] %v5888_v5  ;;  %v5887_v42 = vmul.f32 %v5616_v4, %v12863_v15 }
 0x8f1   :  { %5879 = vst [vmem:[#allocation2 + $0x1c8] sm:$0xff] %v10098_v48  ;;  %v9355_v19 = vpop.f32.mrf.mxu1 }
 0x8f2   :  { %5919 = vst [vmem:[#allocation3 + $0x48] sm:$0xff] %v5887_v42  ;;  %v5890_v9 = vmul.f32 %v9355_v19, %v12866_v14 }
 0x8f3   :  { %v10100_v17 = vpop.eup %10099  ;;  %v5626_v23 = vpop.f32.mrf.mxu1 }
 0x8f4   :  { %5882 = vst [vmem:[#allocation2 + $0x1f8] sm:$0xff] %v10100_v17  ;;  %5922 = vst [vmem:[#allocation3 + $0x78] sm:$0xff] %v5890_v9  ;;  %v5889_v59 = vmul.f32 %v5626_v23, %v12868_v52 }
 0x8f5   :  { %v10102_v24 = vpop.eup %10101  ;;  %v9358_v1 = vpop.f32.mrf.mxu1 }
 0x8f6   :  { %5881 = vst [vmem:[#allocation2 + $0x1e8] sm:$0xff] %v10102_v24  ;;  %5921 = vst [vmem:[#allocation3 + $0x68] sm:$0xff] %v5889_v59  ;;  %v5892_v11 = vmul.f32 %v9358_v1, %v12871_v56 }
 0x8f7   :  { %v5636_v15 = vpop.f32.mrf.mxu1 }
 0x8f8   :  { %5924 = vst [vmem:[#allocation3 + $0x98] sm:$0xff] %v5892_v11  ;;  %v5891_v63 = vmul.f32 %v5636_v15, %v12874_v25 }
 0x8f9   :  { %v9361_v43 = vpop.f32.mrf.mxu1 }
 0x8fa   :  { %5923 = vst [vmem:[#allocation3 + $0x88] sm:$0xff] %v5891_v63  ;;  %v5894_v14 = vmul.f32 %v9361_v43, %v12877_v54 }
 0x8fb   :  { %v5646_v29 = vpop.f32.mrf.mxu1 }
 0x8fc   :  { %5926 = vst [vmem:[#allocation3 + $0xb8] sm:$0xff] %v5894_v14  ;;  %v5893_v52 = vmul.f32 %v5646_v29, %v12880_v21 }
 0x8fd   :  { %v9364_v12 = vpop.f32.mrf.mxu1 }
 0x8fe   :  { %5925 = vst [vmem:[#allocation3 + $0xa8] sm:$0xff] %v5893_v52  ;;  %v5896_v49 = vmul.f32 %v9364_v12, %v12883_v3 }
 0x8ff   :  { %v5656_v56 = vpop.f32.mrf.mxu1 }
 0x900   :  { %5928 = vst [vmem:[#allocation3 + $0xd8] sm:$0xff] %v5896_v49  ;;  %v5895_v41 = vmul.f32 %v5656_v56, %v12886_v22 }
 0x901   :  { %v9367_v53 = vpop.f32.mrf.mxu1 }
 0x902   :  { %5927 = vst [vmem:[#allocation3 + $0xc8] sm:$0xff] %v5895_v41  ;;  %v5898_v25 = vmul.f32 %v9367_v53, %v12889_v0 }
 0x903   :  { %v5666_v54 = vpop.f32.mrf.mxu1 }
 0x904   :  { %5930 = vst [vmem:[#allocation3 + $0xf8] sm:$0xff] %v5898_v25  ;;  %v5897_v58 = vmul.f32 %v5666_v54, %v12893_v37 }
 0x905   :  { %v9370_v34 = vpop.f32.mrf.mxu1 }
 0x906   :  { %5929 = vst [vmem:[#allocation3 + $0xe8] sm:$0xff] %v5897_v58  ;;  %v5900_v21 = vmul.f32 %v9370_v34, %v12897_v38 }
 0x907   :  { %v5676_v3 = vpop.f32.mrf.mxu1 }
 0x908   :  { %5932 = vst [vmem:[#allocation3 + $0x118] sm:$0xff] %v5900_v21  ;;  %v5899_v39 = vmul.f32 %v5676_v3, %v5355_v61  ;;  %v5415_v61 = vpop.f32.mrf.mxu0 }
 0x909   :  { %v9373_v35 = vpop.f32.mrf.mxu1 }
 0x90a   :  { %5931 = vst [vmem:[#allocation3 + $0x108] sm:$0xff] %v5899_v39  ;;  %v5902_v22 = vmul.f32 %v9373_v35, %v9321_v51  ;;  %v9339_v5 = vpop.f32.mrf.mxu0 }
 0x90b   :  { %v5686_v46 = vpop.f32.mrf.mxu1 }
 0x90c   :  { %5934 = vst [vmem:[#allocation3 + $0x138] sm:$0xff] %v5902_v22  ;;  %v5901_v0 = vmul.f32 %v5686_v46, %v5365_v10  ;;  %v5425_v19 = vpop.f32.mrf.mxu0  ;;  %v12915_v10 = vmov 0.0  }
 0x90d   :  { %v9376_v30 = vpop.f32.mrf.mxu1 }
 0x90e   :  { %5933 = vst [vmem:[#allocation3 + $0x128] sm:$0xff] %v5901_v0  ;;  %v5904_v16 = vmul.f32 %v9376_v30, %v9324_v45 }
 0x90f   :  { %v5696_v37 = vpop.f32.mrf.mxu1 }
 0x910   :  { %5936 = vst [vmem:[#allocation3 + $0x158] sm:$0xff] %v5904_v16  ;;  %v5903_v47 = vmul.f32 %v5696_v37, %v5375_v26 }
 0x911   :  { %v9379_v18 = vpop.f32.mrf.mxu1 }
 0x912   :  { %5935 = vst [vmem:[#allocation3 + $0x148] sm:$0xff] %v5903_v47  ;;  %v5906_v50 = vmul.f32 %v9379_v18, %v9327_v57 }
 0x913   :  { %v5706_v33 = vpop.f32.mrf.mxu1 }
 0x914   :  { %5938 = vst [vmem:[#allocation3 + $0x178] sm:$0xff] %v5906_v50  ;;  %v5905_v8 = vmul.f32 %v5706_v33, %v5385_v13 }
 0x915   :  { %v9382_v38 = vpop.f32.mrf.mxu1 }
 0x916   :  { %5937 = vst [vmem:[#allocation3 + $0x168] sm:$0xff] %v5905_v8  ;;  %v5908_v2 = vmul.f32 %v9382_v38, %v9330_v6 }
 0x917   :  { %v5716_v28 = vpop.f32.mrf.mxu1 }
 0x918   :  { %5940 = vst [vmem:[#allocation3 + $0x198] sm:$0xff] %v5908_v2  ;;  %v5907_v62 = vmul.f32 %v5716_v28, %v5395_v7 }
 0x919   :  { %v9385_v55 = vpop.f32.mrf.mxu1 }
 0x91a   :  { %5939 = vst [vmem:[#allocation3 + $0x188] sm:$0xff] %v5907_v62  ;;  %v5910_v20 = vmul.f32 %v9385_v55, %v9333_v36 }
 0x91b   :  { %v5726_v32 = vpop.f32.mrf.mxu1 }
 0x91c   :  { %5942 = vst [vmem:[#allocation3 + $0x1b8] sm:$0xff] %v5910_v20  ;;  %v5909_v40 = vmul.f32 %v5726_v32, %v5405_v27 }
 0x91d   :  { %v9388_v60 = vpop.f32.mrf.mxu1 }
 0x91e   :  { %5941 = vst [vmem:[#allocation3 + $0x1a8] sm:$0xff] %v5909_v40  ;;  %v5912_v31 = vmul.f32 %v9388_v60, %v9336_v44 }
 0x91f   :  { %v5736_v51 = vpop.f32.mrf.mxu1 }
 0x920   :  { %5944 = vst [vmem:[#allocation3 + $0x1d8] sm:$0xff] %v5912_v31  ;;  %v5911_v4 = vmul.f32 %v5736_v51, %v5415_v61 }
 0x921   :  { %v9391_v48 = vpop.f32.mrf.mxu1 }
 0x922   :  { %5943 = vst [vmem:[#allocation3 + $0x1c8] sm:$0xff] %v5911_v4  ;;  %v5914_v42 = vmul.f32 %v9391_v48, %v9339_v5 }
 0x923   :  { %v5746_v9 = vpop.f32.mrf.mxu1 }
 0x924   :  { %5946 = vst [vmem:[#allocation3 + $0x1f8] sm:$0xff] %v5914_v42  ;;  %v5913_v17 = vmul.f32 %v5746_v9, %v5425_v19 }
 0x926   :  { %5945 = vst [vmem:[#allocation3 + $0x1e8] sm:$0xff] %v5913_v17 }
 0x927 LB: > { %s12924_s16 = sshll.u32 %s10168_s11, 3  ;;  %v13492_v1 = vlaneseq  ;;  %s5952_s11 = sadd.s32 1, %s10168_s11   ;;  %s10168_s11 = sphi %s12917_s11, %s5952_s11   ;;  %v10164_v10 = vphi %v12915_v10, %v6089_v10  }
 0x928   : > { %s5955_s22 = sshra.s32 %s12924_s16, 3  ;;  %s5974_s12 = sadd.s32 1, %s12924_s16 }
 0x929   : > { %s8216_s13 = sshll.u32 %s5955_s22, 4  ;;  %s5975_s24 = sshra.s32 %s5974_s12, 3  ;;  %vm12929_vm9 = vcmp.lt.s32.totalorder %v13492_v1, 256 }
 0x92a   : > { %s5959_s5 = scalar_lea.vmem [#allocation2], %s8216_s13  ;;  %s5963_s25 = scalar_lea.vmem [#allocation3], %s8216_s13 }
 0x92b   : > { %v5960_v23 = vld [vmem:[%s5959_s5] ss:$8 sm:$0x3]  ;;  %s5978_s26 = sand.u32 7, %s5974_s12  ;;  %s8219_s27 = sshll.u32 %s5975_s24, 4 }
 0x92c   : > { %v5961_v24 = vmul.f32 %v10164_v10, %v5960_v23  ;;  %s5991_s28 = sadd.s32 2, %s12924_s16  ;;  %s5981_s29 = sadd.s32 %s8219_s27, %s5978_s26 }
 0x92d   : > { %v5964_v59 = vld [vmem:[%s5963_s25] ss:$8 sm:$0x3]  ;;  %s5992_s6 = sshra.s32 %s5991_s28, 3  ;;  %s5967_s0 = scalar_lea.vmem [#allocation4], %s8216_s13 }
 0x92e   : > { %v5965_v45 = vadd.f32 %v5964_v59, %v5961_v24  ;;  %s5982_s8 = scalar_lea.vmem [#allocation2], %s5981_s29  ;;  %s5985_s30 = scalar_lea.vmem [#allocation3], %s5981_s29 }
 0x92f   : > { %v5983_v15 = vld [vmem:[%s5982_s8] ss:$8 sm:$0x3]  ;;  %s5995_s3 = sand.u32 7, %s5991_s28  ;;  %s8220_s7 = sshll.u32 %s5992_s6, 4 }
 0x930   : > { %5972 = vst.msk [vmem:[%s5967_s0] ss:$8 sm:$0x3] %vm12929_vm9, %v5965_v45  ;;  %v5986_v63 = vld [vmem:[%s5985_s30] ss:$8 sm:$0x3]  ;;  %v5984_v43 = vmul.f32 %v5983_v15, %v5965_v45  ;;  %s5998_s2 = sadd.s32 %s8220_s7, %s5995_s3 }
 0x931   : > { %s6008_s21 = sadd.s32 3, %s12924_s16  ;;  %s5988_s18 = scalar_lea.vmem [#allocation4], %s5981_s29 }
 0x932   : > { %v5987_v14 = vadd.f32 %v5986_v63, %v5984_v43  ;;  %s6009_s23 = sshra.s32 %s6008_s21, 3  ;;  %s5999_s14 = scalar_lea.vmem [#allocation2], %s5998_s2 }
 0x933   : > { %v6000_v26 = vld [vmem:[%s5999_s14] ss:$8 sm:$0x3]  ;;  %s6002_s19 = scalar_lea.vmem [#allocation3], %s5998_s2  ;;  %s6012_s1 = sand.u32 7, %s6008_s21 }
 0x934   : > { %5989 = vst.msk [vmem:[%s5988_s18] ss:$8 sm:$0x3] %vm12929_vm9, %v5987_v14  ;;  %v6003_v29 = vld [vmem:[%s6002_s19] ss:$8 sm:$0x3]  ;;  %v6001_v52 = vmul.f32 %v6000_v26, %v5987_v14 }
 0x935   : > { %s8221_s20 = sshll.u32 %s6009_s23, 4  ;;  %s6025_s9 = sadd.s32 4, %s12924_s16 }
 0x936   : > { %v6004_v12 = vadd.f32 %v6003_v29, %v6001_v52  ;;  %s6015_s10 = sadd.s32 %s8221_s20, %s6012_s1  ;;  %s6026_s15 = sshra.s32 %s6025_s9, 3 }
 0x937   : > { %s6005_s4 = scalar_lea.vmem [#allocation4], %s5998_s2  ;;  %s6016_s22 = scalar_lea.vmem [#allocation2], %s6015_s10 }
 0x938   : > { %6006 = vst.msk [vmem:[%s6005_s4] ss:$8 sm:$0x3] %vm12929_vm9, %v6004_v12  ;;  %v6017_v49 = vld [vmem:[%s6016_s22] ss:$8 sm:$0x3] }
 0x939   : > { %s6019_s12 = scalar_lea.vmem [#allocation3], %s6015_s10  ;;  %v6018_v56 = vmul.f32 %v6017_v49, %v6004_v12  ;;  %s6029_s13 = sand.u32 7, %s6025_s9 }
 0x93a   : > { %v6020_v57 = vld [vmem:[%s6019_s12] ss:$8 sm:$0x3]  ;;  %s8222_s24 = sshll.u32 %s6026_s15, 4  ;;  %s6042_s5 = sadd.s32 5, %s12924_s16 }
 0x93b   : > { %v6021_v41 = vadd.f32 %v6020_v57, %v6018_v56  ;;  %s6032_s25 = sadd.s32 %s8222_s24, %s6029_s13  ;;  %s6043_s26 = sshra.s32 %s6042_s5, 3 }
 0x93c   : > { %s6022_s27 = scalar_lea.vmem [#allocation4], %s6015_s10  ;;  %s6033_s28 = scalar_lea.vmem [#allocation2], %s6032_s25 }
 0x93d   : > { %6023 = vst.msk [vmem:[%s6022_s27] ss:$8 sm:$0x3] %vm12929_vm9, %v6021_v41  ;;  %v6034_v53 = vld [vmem:[%s6033_s28] ss:$8 sm:$0x3] }
 0x93e   : > { %s6036_s29 = scalar_lea.vmem [#allocation3], %s6032_s25  ;;  %v6035_v13 = vmul.f32 %v6034_v53, %v6021_v41  ;;  %s6046_s6 = sand.u32 7, %s6042_s5 }
 0x93f   : > { %v6037_v25 = vld [vmem:[%s6036_s29] ss:$8 sm:$0x3]  ;;  %s8223_s0 = sshll.u32 %s6043_s26, 4  ;;  %s6059_s8 = sadd.s32 6, %s12924_s16 }
 0x940   : > { %v6038_v54 = vadd.f32 %v6037_v25, %v6035_v13  ;;  %s6049_s30 = sadd.s32 %s8223_s0, %s6046_s6  ;;  %s6060_s3 = sshra.s32 %s6059_s8, 3 }
 0x941   : > { %s6039_s7 = scalar_lea.vmem [#allocation4], %s6032_s25  ;;  %s6050_s21 = scalar_lea.vmem [#allocation2], %s6049_s30 }
 0x942   : > { %6040 = vst.msk [vmem:[%s6039_s7] ss:$8 sm:$0x3] %vm12929_vm9, %v6038_v54  ;;  %v6051_v58 = vld [vmem:[%s6050_s21] ss:$8 sm:$0x3] }
 0x943   : > { %s6053_s2 = scalar_lea.vmem [#allocation3], %s6049_s30  ;;  %v6052_v21 = vmul.f32 %v6051_v58, %v6038_v54  ;;  %s6063_s23 = sand.u32 7, %s6059_s8 }
 0x944   : > { %v6054_v34 = vld [vmem:[%s6053_s2] ss:$8 sm:$0x3]  ;;  %s8224_s18 = sshll.u32 %s6060_s3, 4  ;;  %s6076_s14 = sadd.s32 7, %s12924_s16 }
 0x945   : > { %v6055_v6 = vadd.f32 %v6054_v34, %v6052_v21  ;;  %s6066_s19 = sadd.s32 %s8224_s18, %s6063_s23  ;;  %s6077_s1 = sshra.s32 %s6076_s14, 3 }
 0x946   : > { %s6056_s20 = scalar_lea.vmem [#allocation4], %s6049_s30  ;;  %s6067_s9 = scalar_lea.vmem [#allocation2], %s6066_s19 }
 0x947   : > { %6057 = vst.msk [vmem:[%s6056_s20] ss:$8 sm:$0x3] %vm12929_vm9, %v6055_v6  ;;  %v6068_v3 = vld [vmem:[%s6067_s9] ss:$8 sm:$0x3] }
 0x948   : > { %s6070_s10 = scalar_lea.vmem [#allocation3], %s6066_s19  ;;  %v6069_v35 = vmul.f32 %v6068_v3, %v6055_v6  ;;  %s6080_s15 = sand.u32 7, %s6076_s14 }
 0x949   : > { %v6071_v39 = vld [vmem:[%s6070_s10] ss:$8 sm:$0x3]  ;;  %s8225_s4 = sshll.u32 %s6077_s1, 4  ;;  %s6073_s12 = scalar_lea.vmem [#allocation4], %s6066_s19 }
 0x94a   : > { %v6072_v22 = vadd.f32 %v6071_v39, %v6069_v35  ;;  %s6083_s22 = sadd.s32 %s8225_s4, %s6080_s15  ;;  %p5949_p0 = scmp.ge.s32.totalorder %s5952_s11, 32  }
 0x94b   : > { %s6084_s16 = scalar_lea.vmem [#allocation2], %s6083_s22  ;;  %s6087_s13 = scalar_lea.vmem [#allocation3], %s6083_s22  ;;  %v13495_v30 = vld [vmem:[#allocation77_spill] sm:$0xff] (%p5949_p0)  ;;  %v13496_v16 = vld [vmem:[#allocation46_spill] sm:$0xff] (%p5949_p0)  ;;  %v13499_v47 = vld [vmem:[#allocation24_spill] sm:$0xff] (%p5949_p0)  ;;  %v13503_v33 = vmov (%p5949_p0), 0  }
 0x94c   : > { %6074 = vst.msk [vmem:[%s6073_s12] ss:$8 sm:$0x3] %vm12929_vm9, %v6072_v22  ;;  %v6085_v7 = vld [vmem:[%s6084_s16] ss:$8 sm:$0x3]  ;;  %9392 = vmatprep.subr.mxu0 (%p5949_p0), %v13495_v30  ;;  %9396 = vmatprep.mubr.msk.f32.mxu0 (%p5949_p0), %vm2537_vm15, %v13496_v16 }
 0x94d   : > { %v6088_v46 = vld [vmem:[%s6087_s13] ss:$8 sm:$0x3]  ;;  %v6086_v0 = vmul.f32 %v6085_v7, %v6072_v22  ;;  %s6090_s24 = scalar_lea.vmem [#allocation4], %s6083_s22  ;;  %5951 = sbr.rel (!%p5949_p0) target bundleno = 2343 (0x927), region = 121  ;;  %9393 = vmatpush3.msra.mxu0 (%p5949_p0), %v13495_v30  ;;  %v13497_v36 = vld [vmem:[#allocation25_spill] sm:$0xff] (%p5949_p0)  ;;  %10115 = vset.pattern.permute.xlu0 (%p5949_p0), %v13503_v33 }
 0x94e   :  { %9444 = vmatprep.subr.mxu1 (%p5949_p0), %v13497_v36  ;;  %v13498_v37 = vld [vmem:[#allocation78_spill] sm:$0xff] (%p5949_p0)  ;;  %v13500_v18 = vld [vmem:[#allocation45_spill] sm:$0xff] (%p5949_p0)  ;;  %v13501_v50 = vld [vmem:[#allocation48_spill] sm:$0xff] (%p5949_p0)  ;;  %s10179_s11 = smov (%p5949_p0), [#allocation5]  }
 0x94f   : > { %v6089_v10 = vadd.f32 %v6088_v46, %v6086_v0   ;;  %9394 = vmatprep.subr.mxu0 (%p5949_p0), %v13498_v37  ;;  %9445 = vmatpush3.msra.mxu1 (%p5949_p0), %v13497_v36  ;;  %v13502_v27 = vld [vmem:[#allocation23_spill] sm:$0xff] (%p5949_p0)  ;;  %v13504_v8 = vld [vmem:[#allocation22_spill] sm:$0xff] (%p5949_p0)  ;;  %v13505_v38 = vld [vmem:[#allocation8_spill] sm:$0xff] (%p5949_p0)  ;;  %s7647_s5 = sshll.u32 (%p5949_p0), %s10179_s11, 4  ;;  %s7648_s5 = int_to_ptr.vmem [resolvable:$true] %s7647_s5 }
 0x950   :  { %9395 = vmatpush3.msra.mxu0 (%p5949_p0), %v13498_v37  ;;  %9446 = vmatprep.subr.mxu1 (%p5949_p0), %v13499_v47  ;;  %v13506_v2 = vld [vmem:[#allocation47_spill] sm:$0xff] (%p5949_p0)  ;;  %v13507_v44 = vld [vmem:[#allocation50_spill] sm:$0xff] (%p5949_p0)  ;;  %v13508_v28 = vld [vmem:[#allocation21_spill] sm:$0xff] (%p5949_p0)  ;;  %s10132_s25 = scalar_lea.vmem (%p5949_p0), %s7648_s5, 256  ;;  %p10137_p2 = scmp.lt.s32.totalorder (%p5949_p0), %s7648_s5, %s7648_s5 }
 0x951   : > { %6091 = vst.msk [vmem:[%s6090_s24] ss:$8 sm:$0x3] %vm12929_vm9, %v6089_v10  ;;  %9397 = vmatmul.mubr.msk.f32.vlgmr.msra.gmra.mxu0 (%p5949_p0), %vm2537_vm15, %v13500_v18  ;;  %9447 = vmatpush3.msra.mxu1 (%p5949_p0), %v13499_v47  ;;  %v13509_v62 = vld [vmem:[#allocation20_spill] sm:$0xff] (%p5949_p0)  ;;  %v13510_v55 = vld [vmem:[#allocation49_spill] sm:$0xff] (%p5949_p0)  ;;  %v13512_v61 = vld [vmem:[#allocation19_spill] sm:$0xff] (%p5949_p0)  ;;  %p10133_p1 = scmp.ne.s32.totalorder (%p5949_p0), %s7648_s5, %s10132_s25  ;;  %p10138_p3 = scmp.lt.s32.totalorder (%p5949_p0), %s10132_s25, %s10132_s25 }
 0x952   :  { %9399 = vmatprep.mubr.msk.f32.mxu0 %vm2537_vm15, %v13501_v50  ;;  %9448 = vmatprep.subr.mxu1 %v13502_v27  ;;  %v13511_v20 = vld [vmem:[#allocation52_spill] sm:$0xff]  ;;  %v13513_v32 = vld [vmem:[#allocation18_spill] sm:$0xff]  ;;  %v13514_v40 = vld [vmem:[#allocation51_spill] sm:$0xff] }
 0x953   :  { %9449 = vmatpush3.msra.mxu1 %v13502_v27  ;;  %6769 = vperm.xlu0 %10115, %v13505_v38   ;;  %v13515_v60 = vld [vmem:[#allocation54_spill] sm:$0xff]  ;;  %v13516_v31 = vld [vmem:[#allocation17_spill] sm:$0xff]  ;;  %v13517_v5 = vld [vmem:[#allocation16_spill] sm:$0xff]  ;;  %p10139_p4 = por %p10138_p3, %p10137_p2 }
 0x954   :  { %9450 = vmatprep.subr.mxu1 %v13504_v8  ;;  %9576 = vmatprep.subr.mxu0 %v13497_v36  ;;  %v13518_v51 = vld [vmem:[#allocation53_spill] sm:$0xff]  ;;  %v13519_v4 = vld [vmem:[#allocation56_spill] sm:$0xff]  ;;  %v13520_v48 = vld [vmem:[#allocation15_spill] sm:$0xff] }
 0x955   :  { %9400 = vmatmul.mubr.msk.f32.gmra.mxu0 %vm2537_vm15, %v13506_v2  ;;  %9451 = vmatpush3.msra.mxu1 %v13504_v8  ;;  %v13521_v42 = vld [vmem:[#allocation14_spill] sm:$0xff]  ;;  %v13522_v19 = vld [vmem:[#allocation55_spill] sm:$0xff]  ;;  %v13524_v17 = vld [vmem:[#allocation13_spill] sm:$0xff]  ;;  %p10140_p5 = pnand %p10139_p4, %p10133_p1 }
 0x956   :  { %9402 = vmatprep.mubr.msk.f32.mxu0 %vm2537_vm15, %v13507_v44  ;;  %9452 = vmatprep.subr.mxu1 %v13508_v28  ;;  %v13523_v9 = vld [vmem:[#allocation58_spill] sm:$0xff]  ;;  %v13525_v10 = vld [vmem:[#allocation12_spill] sm:$0xff]  ;;  %v13526_v23 = vld [vmem:[#allocation57_spill] sm:$0xff] }
 0x957   :  { %9453 = vmatpush3.msra.mxu1 %v13508_v28  ;;  %9577 = vmatpush3.msra.mxu0 %v13497_v36  ;;  %v13527_v59 = vld [vmem:[#allocation60_spill] sm:$0xff]  ;;  %v13528_v24 = vld [vmem:[#allocation11_spill] sm:$0xff]  ;;  %v13529_v1 = vld [vmem:[#allocation10_spill] sm:$0xff] }
 0x958   :  { %9454 = vmatprep.subr.mxu1 %v13509_v62  ;;  %9578 = vmatprep.subr.mxu0 %v13499_v47  ;;  %v13530_v11 = vld [vmem:[#allocation59_spill] sm:$0xff]  ;;  %v13531_v45 = vld [vmem:[#allocation62_spill] sm:$0xff]  ;;  %v13532_v15 = vld [vmem:[#allocation61_spill] sm:$0xff] }
 0x959   :  { %9403 = vmatmul.mubr.msk.f32.gmra.mxu0 %vm2537_vm15, %v13510_v55  ;;  %9455 = vmatpush3.msra.mxu1 %v13509_v62  ;;  %v13533_v63 = vld [vmem:[#allocation64_spill] sm:$0xff]  ;;  %v13534_v43 = vld [vmem:[#allocation63_spill] sm:$0xff]  ;;  %v13535_v14 = vld [vmem:[#allocation66_spill] sm:$0xff] }
 0x95a   :  { %9405 = vmatprep.mubr.msk.f32.mxu0 %vm2537_vm15, %v13511_v20  ;;  %9456 = vmatprep.subr.mxu1 %v13512_v61  ;;  %v13536_v26 = vld [vmem:[#allocation65_spill] sm:$0xff]  ;;  %v13537_v29 = vld [vmem:[#allocation68_spill] sm:$0xff]  ;;  %v13538_v52 = vld [vmem:[#allocation67_spill] sm:$0xff] }
 0x95b   :  { %9457 = vmatpush3.msra.mxu1 %v13512_v61  ;;  %9579 = vmatpush3.msra.mxu0 %v13499_v47  ;;  %v13539_v12 = vld [vmem:[#allocation70_spill] sm:$0xff]  ;;  %v13540_v49 = vld [vmem:[#allocation69_spill] sm:$0xff]  ;;  %v13541_v57 = vld [vmem:[#allocation72_spill] sm:$0xff] }
 0x95c   :  { %9458 = vmatprep.subr.mxu1 %v13513_v32  ;;  %9580 = vmatprep.subr.mxu0 %v13502_v27  ;;  %v13542_v56 = vld [vmem:[#allocation71_spill] sm:$0xff]  ;;  %v13543_v41 = vld [vmem:[#allocation74_spill] sm:$0xff]  ;;  %v13544_v53 = vld [vmem:[#allocation73_spill] sm:$0xff] }
 0x95d   :  { %9406 = vmatmul.mubr.msk.f32.gmra.mxu0 %vm2537_vm15, %v13514_v40  ;;  %9459 = vmatpush3.msra.mxu1 %v13513_v32  ;;  %v13545_v25 = vld [vmem:[#allocation76_spill] sm:$0xff]  ;;  %v13546_v13 = vld [vmem:[#allocation75_spill] sm:$0xff]  ;;  %v6093_v58 = vld [vmem:[#allocation4] sm:$0xff] }
 0x95e   :  { %9408 = vmatprep.mubr.msk.f32.mxu0 %vm2537_vm15, %v13515_v60  ;;  %9460 = vmatprep.subr.mxu1 %v13516_v31  ;;  %v6094_v34 = vld [vmem:[#allocation4 + $0x10] sm:$0xff]  ;;  %v6095_v35 = vld [vmem:[#allocation4 + $0x20] sm:$0xff] }
 0x95f   :  { %9461 = vmatpush3.msra.mxu1 %v13516_v31  ;;  %9581 = vmatpush3.msra.mxu0 %v13502_v27  ;;  %v6096_v22 = vld [vmem:[#allocation4 + $0x30] sm:$0xff]  ;;  %v6097_v36 = vld [vmem:[#allocation4 + $0x40] sm:$0xff] }
 0x960   :  { %9462 = vmatprep.subr.mxu1 %v13517_v5  ;;  %9582 = vmatprep.subr.mxu0 %v13504_v8  ;;  %v6098_v47 = vld [vmem:[#allocation4 + $0x50] sm:$0xff]  ;;  %v6101_v55 = vld [vmem:[#allocation4 + $0x80] sm:$0xff] }
 0x961   :  { %9409 = vmatmul.mubr.msk.f32.gmra.mxu0 %vm2537_vm15, %v13518_v51  ;;  %9463 = vmatpush3.msra.mxu1 %v13517_v5  ;;  %v6100_v38 = vld [vmem:[#allocation4 + $0x70] sm:$0xff] }
 0x962   :  { %9411 = vmatprep.mubr.msk.f32.mxu0 %vm2537_vm15, %v13519_v4  ;;  %9464 = vmatprep.subr.mxu1 %v13520_v48  ;;  %v6102_v20 = vld [vmem:[#allocation4 + $0x90] sm:$0xff] }
 0x963   :  { %9465 = vmatpush3.msra.mxu1 %v13520_v48  ;;  %9583 = vmatpush3.msra.mxu0 %v13504_v8  ;;  %v6099_v8 = vld [vmem:[#allocation4 + $0x60] sm:$0xff] }
 0x964   :  { %9466 = vmatprep.subr.mxu1 %v13521_v42  ;;  %9584 = vmatprep.subr.mxu0 %v13508_v28 }
 0x965   :  { %9412 = vmatmul.mubr.msk.f32.gmra.mxu0 %vm2537_vm15, %v13522_v19  ;;  %9467 = vmatpush3.msra.mxu1 %v13521_v42  ;;  %v6105_v19 = vld [vmem:[#allocation4 + $0xc0] sm:$0xff] }
 0x966   :  { %9414 = vmatprep.mubr.msk.f32.mxu0 %vm2537_vm15, %v13523_v9  ;;  %9468 = vmatprep.subr.mxu1 %v13524_v17  ;;  %v6106_v9 = vld [vmem:[#allocation4 + $0xd0] sm:$0xff] }
 0x967   :  { %9469 = vmatpush3.msra.mxu1 %v13524_v17  ;;  %9585 = vmatpush3.msra.mxu0 %v13508_v28 }
 0x968   :  { %9470 = vmatprep.subr.mxu1 %v13525_v10  ;;  %9586 = vmatprep.subr.mxu0 %v13509_v62 }
 0x969   :  { %9415 = vmatmul.mubr.msk.f32.gmra.mxu0 %vm2537_vm15, %v13526_v23  ;;  %9471 = vmatpush3.msra.mxu1 %v13525_v10 }
 0x96a   :  { %9417 = vmatprep.mubr.msk.f32.mxu0 %vm2537_vm15, %v13527_v59  ;;  %9472 = vmatprep.subr.mxu1 %v13528_v24 }
 0x96b   :  { %9473 = vmatpush3.msra.mxu1 %v13528_v24  ;;  %9587 = vmatpush3.msra.mxu0 %v13509_v62 }
 0x96c   :  { %9474 = vmatprep.subr.mxu1 %v13529_v1  ;;  %9588 = vmatprep.subr.mxu0 %v13512_v61 }
 0x96d   :  { %9418 = vmatmul.mubr.msk.f32.gmra.mxu0 %vm2537_vm15, %v13530_v11  ;;  %9475 = vmatpush3.msra.mxu1 %v13529_v1 }
 0x96e   :  { %9420 = vmatprep.mubr.msk.f32.mxu0 %vm2537_vm15, %v13531_v45  ;;  %9589 = vmatpush3.msra.mxu0 %v13512_v61 }
 0x96f   :  { %9590 = vmatprep.subr.mxu0 %v13513_v32 }
 0x970   :  { %9591 = vmatpush3.msra.mxu0 %v13513_v32 }
 0x971   :  { %9421 = vmatmul.mubr.msk.f32.gmra.mxu0 %vm2537_vm15, %v13532_v15  ;;  %9592 = vmatprep.subr.mxu0 %v13516_v31 }
 0x972   :  { %9423 = vmatprep.mubr.msk.f32.mxu0 %vm2537_vm15, %v13533_v63  ;;  %9593 = vmatpush3.msra.mxu0 %v13516_v31  ;;  %v6103_v31 = vld [vmem:[#allocation4 + $0xa0] sm:$0xff] }
 0x973   :  { %9594 = vmatprep.subr.mxu0 %v13517_v5 }
 0x974   :  { %9595 = vmatpush3.msra.mxu0 %v13517_v5  ;;  %v6104_v5 = vld [vmem:[#allocation4 + $0xb0] sm:$0xff] }
 0x975   :  { %9424 = vmatmul.mubr.msk.f32.gmra.mxu0 %vm2537_vm15, %v13534_v43  ;;  %9596 = vmatprep.subr.mxu0 %v13520_v48  ;;  %v6109_v43 = vld [vmem:[#allocation4 + $0x100] sm:$0xff] }
 0x976   :  { %9426 = vmatprep.mubr.msk.f32.mxu0 %vm2537_vm15, %v13535_v14  ;;  %9597 = vmatpush3.msra.mxu0 %v13520_v48  ;;  %v6110_v14 = vld [vmem:[#allocation4 + $0x110] sm:$0xff] }
 0x977   :  { %9598 = vmatprep.subr.mxu0 %v13521_v42 }
 0x978   :  { %9599 = vmatpush3.msra.mxu0 %v13521_v42 }
 0x979   :  { %9427 = vmatmul.mubr.msk.f32.gmra.mxu0 %vm2537_vm15, %v13536_v26  ;;  %9600 = vmatprep.subr.mxu0 %v13524_v17 }
 0x97a   :  { %9429 = vmatprep.mubr.msk.f32.mxu0 %vm2537_vm15, %v13537_v29  ;;  %9601 = vmatpush3.msra.mxu0 %v13524_v17 }
 0x97b   :  { %9602 = vmatprep.subr.mxu0 %v13525_v10 }
 0x97c   :  { %9603 = vmatpush3.msra.mxu0 %v13525_v10 }
 0x97d   :  { %9430 = vmatmul.mubr.msk.f32.gmra.mxu0 %vm2537_vm15, %v13538_v52  ;;  %9604 = vmatprep.subr.mxu0 %v13528_v24  ;;  %v6112_v52 = vld [vmem:[#allocation4 + $0x130] sm:$0xff] }
 0x97e   :  { %9432 = vmatprep.mubr.msk.f32.mxu0 %vm2537_vm15, %v13539_v12  ;;  %9605 = vmatpush3.msra.mxu0 %v13528_v24  ;;  %v6107_v24 = vld [vmem:[#allocation4 + $0xe0] sm:$0xff] }
 0x97f   :  { %9606 = vmatprep.subr.mxu0 %v13529_v1 }
 0x980   :  { %9607 = vmatpush3.msra.mxu0 %v13529_v1  ;;  %v6108_v1 = vld [vmem:[#allocation4 + $0xf0] sm:$0xff] }
 0x981   :  { %9433 = vmatmul.mubr.msk.f32.gmra.mxu0 %vm2537_vm15, %v13540_v49 }
 0x982   :  { %9435 = vmatprep.mubr.msk.f32.mxu0 %vm2537_vm15, %v13541_v57  ;;  %v6111_v57 = vld [vmem:[#allocation4 + $0x120] sm:$0xff] }
 0x985   :  { %9436 = vmatmul.mubr.msk.f32.gmra.mxu0 %vm2537_vm15, %v13542_v56 }
 0x986   :  { %9438 = vmatprep.mubr.msk.f32.mxu0 %vm2537_vm15, %v13543_v41 }
 0x989   :  { %9439 = vmatmul.mubr.msk.f32.gmra.mxu0 %vm2537_vm15, %v13544_v53 }
 0x98a   :  { %9441 = vmatprep.mubr.msk.f32.mxu0 %vm2537_vm15, %v13545_v25  ;;  %v6114_v25 = vld [vmem:[#allocation4 + $0x150] sm:$0xff] }
 0x98d   :  { %9442 = vmatmul.mubr.msk.f32.gmra.mxu0 %vm2537_vm15, %v13546_v13 }
 0xa11   :  { %v9398_v54 = vpop.f32.mrf.mxu0 }
 0xa12   :  { %v6447_v3 = vmul.f32 %v9398_v54, %v6094_v34  ;;  %v6113_v54 = vld [vmem:[#allocation4 + $0x140] sm:$0xff] }
 0xa13   :  { %v6287_v21 = vpop.f32.mrf.mxu0 }
 0xa14   :  { %v6446_v6 = vmul.f32 %v6287_v21, %v6093_v58 }
 0xa15   :  { %v9401_v39 = vpop.f32.mrf.mxu0 }
 0xa16   :  { %9476 = vmatprep.mubr.f32.mxu1 %v6446_v6  ;;  %v6449_v0 = vmul.f32 %v9401_v39, %v6096_v22  ;;  %v6116_v6 = vld [vmem:[#allocation4 + $0x170] sm:$0xff]  ;;  %v6115_v39 = vld [vmem:[#allocation4 + $0x160] sm:$0xff] }
 0xa17   :  { %v6297_v7 = vpop.f32.mrf.mxu0  ;;  %9477 = vmatmul.mubr.f32.vlgmr.msra.gmra.mxu1 %v6447_v3 }
 0xa18   :  { %v6448_v46 = vmul.f32 %v6297_v7, %v6095_v35 }
 0xa19   :  { %v9404_v16 = vpop.f32.mrf.mxu0 }
 0xa1a   :  { %9479 = vmatprep.mubr.f32.mxu1 %v6448_v46  ;;  %v6451_v27 = vmul.f32 %v9404_v16, %v6098_v47  ;;  %v6118_v46 = vld [vmem:[#allocation4 + $0x190] sm:$0xff]  ;;  %v6117_v16 = vld [vmem:[#allocation4 + $0x180] sm:$0xff] }
 0xa1b   :  { %v6307_v18 = vpop.f32.mrf.mxu0  ;;  %9480 = vmatmul.mubr.f32.gmra.mxu1 %v6449_v0 }
 0xa1c   :  { %v6450_v50 = vmul.f32 %v6307_v18, %v6097_v36 }
 0xa1d   :  { %v9407_v33 = vpop.f32.mrf.mxu0 }
 0xa1e   :  { %9482 = vmatprep.mubr.f32.mxu1 %v6450_v50  ;;  %v6453_v28 = vmul.f32 %v9407_v33, %v6100_v38  ;;  %v6120_v50 = vld [vmem:[#allocation4 + $0x1b0] sm:$0xff]  ;;  %v6119_v33 = vld [vmem:[#allocation4 + $0x1a0] sm:$0xff] }
 0xa1f   :  { %v6317_v2 = vpop.f32.mrf.mxu0  ;;  %9483 = vmatmul.mubr.f32.gmra.mxu1 %v6451_v27 }
 0xa20   :  { %v6452_v44 = vmul.f32 %v6317_v2, %v6099_v8 }
 0xa21   :  { %v9410_v62 = vpop.f32.mrf.mxu0 }
 0xa22   :  { %9485 = vmatprep.mubr.f32.mxu1 %v6452_v44  ;;  %v6455_v40 = vmul.f32 %v9410_v62, %v6102_v20  ;;  %v6122_v44 = vld [vmem:[#allocation4 + $0x1d0] sm:$0xff]  ;;  %v6121_v62 = vld [vmem:[#allocation4 + $0x1c0] sm:$0xff] }
 0xa23   :  { %v6327_v61 = vpop.f32.mrf.mxu0  ;;  %9486 = vmatmul.mubr.f32.gmra.mxu1 %v6453_v28 }
 0xa24   :  { %v6454_v32 = vmul.f32 %v6327_v61, %v6101_v55 }
 0xa25   :  { %v9413_v60 = vpop.f32.mrf.mxu0 }
 0xa26   :  { %9488 = vmatprep.mubr.f32.mxu1 %v6454_v32  ;;  %v6457_v48 = vmul.f32 %v9413_v60, %v6104_v5  ;;  %v6124_v32 = vld [vmem:[#allocation4 + $0x1f0] sm:$0xff]  ;;  %v6123_v60 = vld [vmem:[#allocation4 + $0x1e0] sm:$0xff] }
 0xa27   :  { %v6337_v51 = vpop.f32.mrf.mxu0  ;;  %9489 = vmatmul.mubr.f32.gmra.mxu1 %v6455_v40 }
 0xa28   :  { %v6456_v4 = vmul.f32 %v6337_v51, %v6103_v31 }
 0xa29   :  { %v9416_v42 = vpop.f32.mrf.mxu0 }
 0xa2a   :  { %9491 = vmatprep.mubr.f32.mxu1 %v6456_v4  ;;  %v6459_v23 = vmul.f32 %v9416_v42, %v6106_v9  ;;  %v13547_v4 = vmov 0.0  }
 0xa2b   :  { %v6347_v17 = vpop.f32.mrf.mxu0  ;;  %9492 = vmatmul.mubr.f32.gmra.mxu1 %v6457_v48 }
 0xa2c   :  { %v6458_v10 = vmul.f32 %v6347_v17, %v6105_v19 }
 0xa2d   :  { %v9419_v59 = vpop.f32.mrf.mxu0 }
 0xa2e   :  { %9494 = vmatprep.mubr.f32.mxu1 %v6458_v10  ;;  %v6461_v15 = vmul.f32 %v9419_v59, %v6108_v1 }
 0xa2f   :  { %v6357_v11 = vpop.f32.mrf.mxu0  ;;  %9495 = vmatmul.mubr.f32.gmra.mxu1 %v6459_v23 }
 0xa30   :  { %v6460_v45 = vmul.f32 %v6357_v11, %v6107_v24 }
 0xa31   :  { %v9422_v63 = vpop.f32.mrf.mxu0 }
 0xa32   :  { %9497 = vmatprep.mubr.f32.mxu1 %v6460_v45  ;;  %v6463_v12 = vmul.f32 %v9422_v63, %v6110_v14 }
 0xa33   :  { %v6367_v26 = vpop.f32.mrf.mxu0  ;;  %9498 = vmatmul.mubr.f32.gmra.mxu1 %v6461_v15 }
 0xa34   :  { %v6462_v29 = vmul.f32 %v6367_v26, %v6109_v43 }
 0xa35   :  { %v9425_v49 = vpop.f32.mrf.mxu0 }
 0xa36   :  { %9500 = vmatprep.mubr.f32.mxu1 %v6462_v29  ;;  %v6465_v56 = vmul.f32 %v9425_v49, %v6112_v52 }
 0xa37   :  { %v6377_v41 = vpop.f32.mrf.mxu0  ;;  %9501 = vmatmul.mubr.f32.gmra.mxu1 %v6463_v12 }
 0xa38   :  { %v6464_v53 = vmul.f32 %v6377_v41, %v6111_v57 }
 0xa39   :  { %v9428_v13 = vpop.f32.mrf.mxu0 }
 0xa3a   :  { %9503 = vmatprep.mubr.f32.mxu1 %v6464_v53  ;;  %v6467_v58 = vmul.f32 %v9428_v13, %v6114_v25 }
 0xa3b   :  { %9504 = vmatmul.mubr.f32.gmra.mxu1 %v6465_v56  ;;  %v6387_v34 = vpop.f32.mrf.mxu0 }
 0xa3c   :  { %v6466_v21 = vmul.f32 %v6387_v34, %v6113_v54 }
 0xa3d   :  { %v9431_v3 = vpop.f32.mrf.mxu0 }
 0xa3e   :  { %9506 = vmatprep.mubr.f32.mxu1 %v6466_v21  ;;  %v6469_v35 = vmul.f32 %v9431_v3, %v6116_v6  ;;  %v13548_v3 = vld [vmem:[#allocation34_spill] sm:$0xff] }
 0xa3f   :  { %9507 = vmatmul.mubr.f32.gmra.mxu1 %v6467_v58  ;;  %v6397_v22 = vpop.f32.mrf.mxu0 }
 0xa40   :  { %v6468_v7 = vmul.f32 %v6397_v22, %v6115_v39  ;;  %v6777_v39 = vsub.f32 0.0, %v13548_v3 }
 0xa41   :  { %v9434_v0 = vpop.f32.mrf.mxu0 }
 0xa42   :  { %9509 = vmatprep.mubr.f32.mxu1 %v6468_v7  ;;  %v6471_v36 = vmul.f32 %v9434_v0, %v6118_v46  ;;  %v6780_v7 = vmul.f32 1.442695, %v6777_v39 }
 0xa43   :  { %9510 = vmatmul.mubr.f32.gmra.mxu1 %v6469_v35  ;;  %v6407_v47 = vpop.f32.mrf.mxu0  ;;  %v13549_v35 = vld [vmem:[#allocation33_spill] sm:$0xff] }
 0xa44   :  { %v6470_v18 = vmul.f32 %v6407_v47, %v6117_v16  ;;  %v6776_v22 = vsub.f32 0.0, %v13549_v35  ;;  %10116 = vpow2.f32 %v6780_v7 }
 0xa45   :  { %v9437_v27 = vpop.f32.mrf.mxu0 }
 0xa46   :  { %9512 = vmatprep.mubr.f32.mxu1 %v6470_v18  ;;  %v6473_v8 = vmul.f32 %v9437_v27, %v6120_v50  ;;  %v6778_v46 = vmul.f32 1.442695, %v6776_v22  ;;  %v13097_v18 = vpop.permute.xlu0 %6769  ;;  %v13550_v27 = vld [vmem:[#allocation31_spill] sm:$0xff] }
 0xa47   :  { %9513 = vmatmul.mubr.f32.gmra.mxu1 %v6471_v36  ;;  %v6417_v38 = vpop.f32.mrf.mxu0 }
 0xa48   :  { %v6472_v2 = vmul.f32 %v6417_v38, %v6119_v33  ;;  %10118 = vpow2.f32 %v6778_v46  ;;  %v6772_v33 = vmul.f32 %v13097_v18, %v13550_v27  ;;  %v6873_v46 = vld [vmem:[#allocation4 + $0x28] sm:$0xff]  ;;  %v6876_v27 = vld [vmem:[#allocation4 + $0x58] sm:$0xff] }
 0xa49   :  { %v9440_v28 = vpop.f32.mrf.mxu0 }
 0xa4a   :  { %9515 = vmatprep.mubr.f32.mxu1 %v6472_v2  ;;  %v6475_v55 = vmul.f32 %v9440_v28, %v6122_v44  ;;  %v13551_v2 = vld [vmem:[#allocation32_spill] sm:$0xff] }
 0xa4b   :  { %9516 = vmatmul.mubr.f32.gmra.mxu1 %v6473_v8  ;;  %v6427_v20 = vpop.f32.mrf.mxu0  ;;  %v6773_v44 = vmul.f32 %v13097_v18, %v13551_v2 }
 0xa4c   :  { %v6474_v61 = vmul.f32 %v6427_v20, %v6121_v62 }
 0xa4d   :  { %v9443_v40 = vpop.f32.mrf.mxu0 }
 0xa4e   :  { %9518 = vmatprep.mubr.f32.mxu1 %v6474_v61  ;;  %v6477_v31 = vmul.f32 %v9443_v40, %v6124_v32 }
 0xa4f   :  { %9519 = vmatmul.mubr.f32.gmra.mxu1 %v6475_v55  ;;  %v6437_v5 = vpop.f32.mrf.mxu0 }
 0xa50   :  { %v6476_v51 = vmul.f32 %v6437_v5, %v6123_v60  ;;  %v13552_v60 = vld [vmem:[#allocation9_spill] sm:$0xff]  ;;  %v13554_v5 = vld [vmem:[#allocation27_spill] sm:$0xff] }
 0xa51   :  { %v10117_v0 = vpop.eup %10116 }
 0xa52   :  { %9521 = vmatprep.mubr.f32.mxu1 %v6476_v51  ;;  %v6783_v36 = vadd.f32 1.0, %v10117_v0  ;;  %v13555_v51 = vld [vmem:[#allocation30_spill] sm:$0xff]  ;;  %v6874_v0 = vld [vmem:[#allocation4 + $0x38] sm:$0xff] }
 0xa53   :  { %9522 = vmatmul.mubr.f32.gmra.mxu1 %v6477_v31  ;;  %v13553_v31 = vld [vmem:[#allocation29_spill] sm:$0xff] }
 0xa54   :  { %6859 = vmatprep.mubr.f32.mxu1 %v13547_v4  ;;  %10120 = vrcp.f32 %v6783_v36 }
 0xa55   :  { %v10119_v16 = vpop.eup %10118 }
 0xa56   :  { %v6782_v47 = vadd.f32 1.0, %v10119_v16 }
 0xa58   :  { %10122 = vrcp.f32 %v6782_v47 }
 0xa61   :  { %v10121_v50 = vpop.eup %10120 }
 0xa62   :  { %v6789_v28 = vmul.f32 %v10121_v50, %v13548_v3  ;;  %v6872_v3 = vld [vmem:[#allocation4 + $0x18] sm:$0xff] }
 0xa65   :  { %v10123_v8 = vpop.eup %10122 }
 0xa66   :  { %v6788_v62 = vmul.f32 %v10123_v8, %v13549_v35 }
 0xad7   :  { %v9478_v48 = vpop.f32.mrf.mxu1 }
 0xad9   :  { %v6544_v42 = vpop.f32.mrf.mxu1 }
 0xada   :  { %6703 = vxpose.xlu1.b32.start [1/16] (narrow) %v6544_v42, 8  ;;  %v13557_v42 = vld [vmem:[#allocation80_spill] sm:$0xff] }
 0xadb   :  { %v9481_v19 = vpop.f32.mrf.mxu1 }
 0xadd   :  { %v6554_v9 = vpop.f32.mrf.mxu1 }
 0xade   :  { %6704 = vxpose.xlu1.b32.cont [2/16] (narrow) %v9478_v48, 8  ;;  %v13556_v48 = vld [vmem:[#allocation28_spill] sm:$0xff] }
 0xadf   :  { %v9484_v17 = vpop.f32.mrf.mxu1 }
 0xae1   :  { %v6564_v10 = vpop.f32.mrf.mxu1 }
 0xae2   :  { %6705 = vxpose.xlu1.b32.cont [3/16] (narrow) %v6554_v9, 8  ;;  %v13560_v9 = vld [vmem:[#allocation81_spill] sm:$0xff] }
 0xae3   :  { %v9487_v23 = vpop.f32.mrf.mxu1 }
 0xae5   :  { %v6574_v59 = vpop.f32.mrf.mxu1 }
 0xae6   :  { %6706 = vxpose.xlu1.b32.cont [4/16] (narrow) %v9481_v19, 8  ;;  %v13559_v19 = vld [vmem:[#allocation82_spill] sm:$0xff] }
 0xae7   :  { %v9490_v24 = vpop.f32.mrf.mxu1 }
 0xae9   :  { %v6584_v1 = vpop.f32.mrf.mxu1 }
 0xaea   :  { %6707 = vxpose.xlu1.b32.cont [5/16] (narrow) %v6564_v10, 8  ;;  %v13563_v10 = vld [vmem:[#allocation86_spill] sm:$0xff] }
 0xaeb   :  { %v9493_v11 = vpop.f32.mrf.mxu1 }
 0xaed   :  { %v6594_v45 = vpop.f32.mrf.mxu1 }
 0xaee   :  { %6708 = vxpose.xlu1.b32.cont [6/16] (narrow) %v9484_v17, 8  ;;  %v13562_v17 = vld [vmem:[#allocation83_spill] sm:$0xff] }
 0xaef   :  { %v9496_v15 = vpop.f32.mrf.mxu1 }
 0xaf1   :  { %v6604_v63 = vpop.f32.mrf.mxu1 }
 0xaf2   :  { %6709 = vxpose.xlu1.b32.cont [7/16] (narrow) %v6574_v59, 8  ;;  %v13565_v59 = vld [vmem:[#allocation88_spill] sm:$0xff] }
 0xaf3   :  { %v9499_v43 = vpop.f32.mrf.mxu1 }
 0xaf5   :  { %v6614_v14 = vpop.f32.mrf.mxu1 }
 0xaf6   :  { %6710 = vxpose.xlu1.b32.cont [8/16] (narrow) %v9487_v23, 8  ;;  %v13564_v23 = vld [vmem:[#allocation85_spill] sm:$0xff] }
 0xaf7   :  { %v9502_v26 = vpop.f32.mrf.mxu1 }
 0xaf9   :  { %v6624_v29 = vpop.f32.mrf.mxu1 }
 0xafa   :  { %6711 = vxpose.xlu1.b32.cont [9/16] (narrow) %v6584_v1, 8  ;;  %6735 = vxpose.xlu0.b32.start [1/16] (narrow) %v6624_v29, 8  ;;  %v13567_v1 = vld [vmem:[#allocation90_spill] sm:$0xff] }
 0xafb   :  { %v9505_v52 = vpop.f32.mrf.mxu1  ;;  %v13575_v29 = vld [vmem:[#allocation98_spill] sm:$0xff] }
 0xafd   :  { %v6634_v12 = vpop.f32.mrf.mxu1 }
 0xafe   :  { %6712 = vxpose.xlu1.b32.cont [10/16] (narrow) %v9490_v24, 8  ;;  %6736 = vxpose.xlu0.b32.cont [2/16] (narrow) %v9502_v26, 8  ;;  %v13566_v24 = vld [vmem:[#allocation87_spill] sm:$0xff] }
 0xaff   :  { %v9508_v49 = vpop.f32.mrf.mxu1  ;;  %v13574_v26 = vld [vmem:[#allocation95_spill] sm:$0xff] }
 0xb01   :  { %v6644_v57 = vpop.f32.mrf.mxu1 }
 0xb02   :  { %6713 = vxpose.xlu1.b32.cont [11/16] (narrow) %v6594_v45, 8  ;;  %6737 = vxpose.xlu0.b32.cont [3/16] (narrow) %v6634_v12, 8  ;;  %v13569_v45 = vld [vmem:[#allocation92_spill] sm:$0xff] }
 0xb03   :  { %v9511_v56 = vpop.f32.mrf.mxu1  ;;  %v13577_v12 = vld [vmem:[#allocation100_spill] sm:$0xff] }
 0xb05   :  { %v6654_v41 = vpop.f32.mrf.mxu1 }
 0xb06   :  { %6714 = vxpose.xlu1.b32.cont [12/16] (narrow) %v9493_v11, 8  ;;  %6738 = vxpose.xlu0.b32.cont [4/16] (narrow) %v9505_v52, 8  ;;  %v13568_v11 = vld [vmem:[#allocation89_spill] sm:$0xff] }
 0xb07   :  { %v9514_v53 = vpop.f32.mrf.mxu1  ;;  %v13576_v52 = vld [vmem:[#allocation97_spill] sm:$0xff] }
 0xb09   :  { %v6664_v25 = vpop.f32.mrf.mxu1 }
 0xb0a   :  { %6715 = vxpose.xlu1.b32.cont [13/16] (narrow) %v6604_v63, 8  ;;  %6739 = vxpose.xlu0.b32.cont [5/16] (narrow) %v6644_v57, 8  ;;  %v13571_v63 = vld [vmem:[#allocation94_spill] sm:$0xff] }
 0xb0b   :  { %v9517_v13 = vpop.f32.mrf.mxu1  ;;  %v13579_v57 = vld [vmem:[#allocation102_spill] sm:$0xff] }
 0xb0d   :  { %v6674_v54 = vpop.f32.mrf.mxu1 }
 0xb0e   :  { %6716 = vxpose.xlu1.b32.cont [14/16] (narrow) %v9496_v15, 8  ;;  %6740 = vxpose.xlu0.b32.cont [6/16] (narrow) %v9508_v49, 8  ;;  %v13570_v15 = vld [vmem:[#allocation91_spill] sm:$0xff] }
 0xb0f   :  { %v9520_v58 = vpop.f32.mrf.mxu1  ;;  %v13578_v49 = vld [vmem:[#allocation99_spill] sm:$0xff] }
 0xb11   :  { %v6684_v34 = vpop.f32.mrf.mxu1 }
 0xb12   :  { %6717 = vxpose.xlu1.b32.cont [15/16] (narrow) %v6614_v14, 8  ;;  %6741 = vxpose.xlu0.b32.cont [7/16] (narrow) %v6654_v41, 8  ;;  %v13573_v14 = vld [vmem:[#allocation96_spill] sm:$0xff] }
 0xb13   :  { %v9523_v21 = vpop.f32.mrf.mxu1  ;;  %v13581_v41 = vld [vmem:[#allocation104_spill] sm:$0xff] }
 0xb15   :  { %v6694_v6 = vpop.f32.mrf.mxu1 }
 0xb16   :  { %6718 = vxpose.xlu1.b32.end [16/16] (narrow) %v9499_v43, 8  ;;  %6742 = vxpose.xlu0.b32.cont [8/16] (narrow) %v9511_v56, 8  ;;  %v13572_v43 = vld [vmem:[#allocation93_spill] sm:$0xff] }
 0xb17   :  { %v13580_v56 = vld [vmem:[#allocation101_spill] sm:$0xff] }
 0xb1a   :  { %6743 = vxpose.xlu0.b32.cont [9/16] (narrow) %v6664_v25, 8  ;;  %v13583_v25 = vld [vmem:[#allocation106_spill] sm:$0xff] }
 0xb1e   :  { %6744 = vxpose.xlu0.b32.cont [10/16] (narrow) %v9514_v53, 8  ;;  %v13582_v53 = vld [vmem:[#allocation103_spill] sm:$0xff] }
 0xb22   :  { %6745 = vxpose.xlu0.b32.cont [11/16] (narrow) %v6674_v54, 8 }
 0xb26   :  { %6746 = vxpose.xlu0.b32.cont [12/16] (narrow) %v9517_v13, 8  ;;  %v13584_v13 = vld [vmem:[#allocation105_spill] sm:$0xff] }
 0xb2a   :  { %6747 = vxpose.xlu0.b32.cont [13/16] (narrow) %v6684_v34, 8 }
 0xb2e   :  { %6748 = vxpose.xlu0.b32.cont [14/16] (narrow) %v9520_v58, 8 }
 0xb32   :  { %6749 = vxpose.xlu0.b32.cont [15/16] (narrow) %v6694_v6, 8  ;;  %v6871_v6 = vld [vmem:[#allocation4 + $0x8] sm:$0xff] }
 0xb36   :  { %6750 = vxpose.xlu0.b32.end [16/16] (narrow) %v9523_v21, 8 }
 0xb56   :  { %v6719_v38 = vpop.trf.xlu1 }
 0xb57   :  { %v6774_v55 = vadd.f32 %v6772_v33, %v6719_v38 }
 0xb59   :  { %v6790_v40 = vmul.f32 %v6788_v62, %v6774_v55 }
 0xb76   :  { %v6751_v20 = vpop.trf.xlu0 }
 0xb77   :  { %v6775_v61 = vadd.f32 %v6773_v44, %v6751_v20  ;;  %v6877_v44 = vld [vmem:[#allocation4 + $0x68] sm:$0xff] }
 0xb79   :  { %v6791_v32 = vmul.f32 %v6789_v28, %v6775_v61  ;;  %v6878_v28 = vld [vmem:[#allocation4 + $0x78] sm:$0xff] }
 0xb7b   :  { %6825 = vmatprep.subr.mxu1 %v6791_v32  ;;  %v6879_v32 = vld [vmem:[#allocation4 + $0x88] sm:$0xff] }
 0xb7c   :  { %6826 = vmatpush1.msra.mxu1 %v6790_v40  ;;  %v6880_v40 = vld [vmem:[#allocation4 + $0x98] sm:$0xff] }
 0xb7d   :  { %8182 = vmatmul.mubr.msk.f32.vlgmr.msra.gmra.mxu1 %vm407_vm5, %v13552_v60  ;;  %9524 = vmatprep.subr.mxu1 %v13495_v30 }
 0xb7e   :  { %9525 = vmatpush3.msra.mxu1 %v13495_v30  ;;  %9528 = vmatprep.mubr.msk.f32.mxu1 %vm2537_vm15, %v13553_v31  ;;  %v13558_v30 = vld [vmem:[#allocation79_spill] sm:$0xff] }
 0xb7f   :  { %9526 = vmatprep.subr.mxu1 %v13498_v37 }
 0xb80   :  { %9527 = vmatpush3.msra.mxu1 %v13498_v37  ;;  %v13561_v37 = vld [vmem:[#allocation84_spill] sm:$0xff] }
 0xb81   :  { %9529 = vmatmul.mubr.msk.f32.vlgmr.msra.gmra.mxu1 %vm2537_vm15, %v13554_v5 }
 0xb82   :  { %9531 = vmatprep.mubr.msk.f32.mxu1 %vm2537_vm15, %v13555_v51 }
 0xb85   :  { %9532 = vmatmul.mubr.msk.f32.gmra.mxu1 %vm2537_vm15, %v13556_v48 }
 0xb86   :  { %9534 = vmatprep.mubr.msk.f32.mxu1 %vm2537_vm15, %v13557_v42  ;;  %v6881_v42 = vld [vmem:[#allocation4 + $0xa8] sm:$0xff] }
 0xb89   :  { %9535 = vmatmul.mubr.msk.f32.gmra.mxu1 %vm2537_vm15, %v13558_v30  ;;  %v6882_v30 = vld [vmem:[#allocation4 + $0xb8] sm:$0xff] }
 0xb8a   :  { %9537 = vmatprep.mubr.msk.f32.mxu1 %vm2537_vm15, %v13559_v19 }
 0xb8d   :  { %9538 = vmatmul.mubr.msk.f32.gmra.mxu1 %vm2537_vm15, %v13560_v9 }
 0xb8e   :  { %9540 = vmatprep.mubr.msk.f32.mxu1 %vm2537_vm15, %v13561_v37 }
 0xb91   :  { %9541 = vmatmul.mubr.msk.f32.gmra.mxu1 %vm2537_vm15, %v13562_v17 }
 0xb92   :  { %9543 = vmatprep.mubr.msk.f32.mxu1 %vm2537_vm15, %v13563_v10  ;;  %v6883_v10 = vld [vmem:[#allocation4 + $0xc8] sm:$0xff] }
 0xb95   :  { %9544 = vmatmul.mubr.msk.f32.gmra.mxu1 %vm2537_vm15, %v13564_v23  ;;  %v6884_v23 = vld [vmem:[#allocation4 + $0xd8] sm:$0xff] }
 0xb96   :  { %9546 = vmatprep.mubr.msk.f32.mxu1 %vm2537_vm15, %v13565_v59 }
 0xb99   :  { %9547 = vmatmul.mubr.msk.f32.gmra.mxu1 %vm2537_vm15, %v13566_v24 }
 0xb9a   :  { %9549 = vmatprep.mubr.msk.f32.mxu1 %vm2537_vm15, %v13567_v1 }
 0xb9d   :  { %9550 = vmatmul.mubr.msk.f32.gmra.mxu1 %vm2537_vm15, %v13568_v11 }
 0xb9e   :  { %9552 = vmatprep.mubr.msk.f32.mxu1 %vm2537_vm15, %v13569_v45  ;;  %v6885_v45 = vld [vmem:[#allocation4 + $0xe8] sm:$0xff] }
 0xba1   :  { %9553 = vmatmul.mubr.msk.f32.gmra.mxu1 %vm2537_vm15, %v13570_v15  ;;  %v6886_v15 = vld [vmem:[#allocation4 + $0xf8] sm:$0xff] }
 0xba2   :  { %9555 = vmatprep.mubr.msk.f32.mxu1 %vm2537_vm15, %v13571_v63 }
 0xba5   :  { %9556 = vmatmul.mubr.msk.f32.gmra.mxu1 %vm2537_vm15, %v13572_v43 }
 0xba6   :  { %9558 = vmatprep.mubr.msk.f32.mxu1 %vm2537_vm15, %v13573_v14 }
 0xba9   :  { %9559 = vmatmul.mubr.msk.f32.gmra.mxu1 %vm2537_vm15, %v13574_v26 }
 0xbaa   :  { %9561 = vmatprep.mubr.msk.f32.mxu1 %vm2537_vm15, %v13575_v29  ;;  %v6887_v29 = vld [vmem:[#allocation4 + $0x108] sm:$0xff] }
 0xbad   :  { %9562 = vmatmul.mubr.msk.f32.gmra.mxu1 %vm2537_vm15, %v13576_v52  ;;  %v6888_v52 = vld [vmem:[#allocation4 + $0x118] sm:$0xff] }
 0xbae   :  { %9564 = vmatprep.mubr.msk.f32.mxu1 %vm2537_vm15, %v13577_v12 }
 0xbb1   :  { %9565 = vmatmul.mubr.msk.f32.gmra.mxu1 %vm2537_vm15, %v13578_v49 }
 0xbb2   :  { %9567 = vmatprep.mubr.msk.f32.mxu1 %vm2537_vm15, %v13579_v57  ;;  %v6890_v57 = vld [vmem:[#allocation4 + $0x138] sm:$0xff] }
 0xbb5   :  { %9568 = vmatmul.mubr.msk.f32.gmra.mxu1 %vm2537_vm15, %v13580_v56 }
 0xbb6   :  { %9570 = vmatprep.mubr.msk.f32.mxu1 %vm2537_vm15, %v13581_v41 }
 0xbb9   :  { %9571 = vmatmul.mubr.msk.f32.gmra.mxu1 %vm2537_vm15, %v13582_v53  ;;  %v6889_v53 = vld [vmem:[#allocation4 + $0x128] sm:$0xff] }
 0xbba   :  { %9573 = vmatprep.mubr.msk.f32.mxu1 %vm2537_vm15, %v13583_v25 }
 0xbbd   :  { %9574 = vmatmul.mubr.msk.f32.gmra.mxu1 %vm2537_vm15, %v13584_v13 }
 0xbbe   :  { %7629 = vmatprep.mubr.f32.mxu1 %v13547_v4  ;;  %v6875_v4 = vld [vmem:[#allocation4 + $0x48] sm:$0xff] }
 0xc3d   :  { %v6861_v54 = vpop.f32.mrf.mxu1 }
 0xc3f   :  { %v6863_v58 = vpop.f32.mrf.mxu1 }
 0xc40   :  { %v6868_v34 = vcombine.low %v6861_v54, %v6863_v58  ;;  %v6892_v58 = vld [vmem:[#allocation4 + $0x158] sm:$0xff] }
 0xc41   :  { %v9530_v21 = vpop.f32.mrf.mxu1 }
 0xc42   :  { %6870 = vst [vmem:[#allocation5] sm:$0xff] %v6868_v34  ;;  %v7225_v22 = vmul.f32 %v9530_v21, %v6872_v3  ;;  %v6891_v21 = vld [vmem:[#allocation4 + $0x148] sm:$0xff] }
 0xc43   :  { %v7065_v39 = vpop.f32.mrf.mxu1 }
 0xc44   :  { %v7224_v35 = vmul.f32 %v7065_v39, %v6871_v6 }
 0xc45   :  { %v9533_v7 = vpop.f32.mrf.mxu1 }
 0xc46   :  { %9608 = vmatprep.mubr.f32.mxu0 %v7224_v35  ;;  %v7227_v47 = vmul.f32 %v9533_v7, %v6874_v0  ;;  %v6894_v35 = vld [vmem:[#allocation4 + $0x178] sm:$0xff]  ;;  %v6893_v7 = vld [vmem:[#allocation4 + $0x168] sm:$0xff] }
 0xc47   :  { %v7075_v16 = vpop.f32.mrf.mxu1  ;;  %9609 = vmatmul.mubr.f32.vlgmr.msra.gmra.mxu0 %v7225_v22 }
 0xc48   :  { %v7226_v36 = vmul.f32 %v7075_v16, %v6873_v46 }
 0xc49   :  { %v9536_v50 = vpop.f32.mrf.mxu1 }
 0xc4a   :  { %9611 = vmatprep.mubr.f32.mxu0 %v7226_v36  ;;  %v7229_v38 = vmul.f32 %v9536_v50, %v6876_v27  ;;  %v6896_v36 = vld [vmem:[#allocation4 + $0x198] sm:$0xff]  ;;  %v6895_v50 = vld [vmem:[#allocation4 + $0x188] sm:$0xff] }
 0xc4b   :  { %v7085_v33 = vpop.f32.mrf.mxu1  ;;  %9612 = vmatmul.mubr.f32.gmra.mxu0 %v7227_v47 }
 0xc4c   :  { %v7228_v8 = vmul.f32 %v7085_v33, %v6875_v4 }
 0xc4d   :  { %v9539_v2 = vpop.f32.mrf.mxu1 }
 0xc4e   :  { %9614 = vmatprep.mubr.f32.mxu0 %v7228_v8  ;;  %v7231_v20 = vmul.f32 %v9539_v2, %v6878_v28  ;;  %v6898_v8 = vld [vmem:[#allocation4 + $0x1b8] sm:$0xff]  ;;  %v6897_v2 = vld [vmem:[#allocation4 + $0x1a8] sm:$0xff] }
 0xc4f   :  { %v7095_v62 = vpop.f32.mrf.mxu1  ;;  %9615 = vmatmul.mubr.f32.gmra.mxu0 %v7229_v38 }
 0xc50   :  { %v7230_v55 = vmul.f32 %v7095_v62, %v6877_v44 }
 0xc51   :  { %v9542_v61 = vpop.f32.mrf.mxu1 }
 0xc52   :  { %9617 = vmatprep.mubr.f32.mxu0 %v7230_v55  ;;  %v7233_v51 = vmul.f32 %v9542_v61, %v6880_v40  ;;  %v6900_v55 = vld [vmem:[#allocation4 + $0x1d8] sm:$0xff]  ;;  %v6899_v61 = vld [vmem:[#allocation4 + $0x1c8] sm:$0xff] }
 0xc53   :  { %v7105_v31 = vpop.f32.mrf.mxu1  ;;  %9618 = vmatmul.mubr.f32.gmra.mxu0 %v7231_v20 }
 0xc54   :  { %v7232_v5 = vmul.f32 %v7105_v31, %v6879_v32 }
 0xc55   :  { %v9545_v48 = vpop.f32.mrf.mxu1 }
 0xc56   :  { %9620 = vmatprep.mubr.f32.mxu0 %v7232_v5  ;;  %v7235_v37 = vmul.f32 %v9545_v48, %v6882_v30  ;;  %v6902_v5 = vld [vmem:[#allocation4 + $0x1f8] sm:$0xff]  ;;  %v6901_v48 = vld [vmem:[#allocation4 + $0x1e8] sm:$0xff] }
 0xc57   :  { %v7115_v19 = vpop.f32.mrf.mxu1  ;;  %9621 = vmatmul.mubr.f32.gmra.mxu0 %v7233_v51 }
 0xc58   :  { %v7234_v9 = vmul.f32 %v7115_v19, %v6881_v42 }
 0xc59   :  { %v9548_v17 = vpop.f32.mrf.mxu1 }
 0xc5a   :  { %9623 = vmatprep.mubr.f32.mxu0 %v7234_v9  ;;  %v7237_v1 = vmul.f32 %v9548_v17, %v6884_v23 }
 0xc5b   :  { %v7125_v59 = vpop.f32.mrf.mxu1  ;;  %9624 = vmatmul.mubr.f32.gmra.mxu0 %v7235_v37 }
 0xc5c   :  { %v7236_v24 = vmul.f32 %v7125_v59, %v6883_v10 }
 0xc5d   :  { %v9551_v11 = vpop.f32.mrf.mxu1 }
 0xc5e   :  { %9626 = vmatprep.mubr.f32.mxu0 %v7236_v24  ;;  %v7239_v14 = vmul.f32 %v9551_v11, %v6886_v15 }
 0xc5f   :  { %v7135_v63 = vpop.f32.mrf.mxu1  ;;  %9627 = vmatmul.mubr.f32.gmra.mxu0 %v7237_v1 }
 0xc60   :  { %v7238_v43 = vmul.f32 %v7135_v63, %v6885_v45 }
 0xc61   :  { %v9554_v26 = vpop.f32.mrf.mxu1 }
 0xc62   :  { %9629 = vmatprep.mubr.f32.mxu0 %v7238_v43  ;;  %v7241_v56 = vmul.f32 %v9554_v26, %v6888_v52 }
 0xc63   :  { %v7145_v12 = vpop.f32.mrf.mxu1  ;;  %9630 = vmatmul.mubr.f32.gmra.mxu0 %v7239_v14 }
 0xc64   :  { %v7240_v49 = vmul.f32 %v7145_v12, %v6887_v29 }
 0xc65   :  { %v9557_v41 = vpop.f32.mrf.mxu1 }
 0xc66   :  { %9632 = vmatprep.mubr.f32.mxu0 %v7240_v49  ;;  %v7243_v25 = vmul.f32 %v9557_v41, %v6890_v57 }
 0xc67   :  { %v7155_v13 = vpop.f32.mrf.mxu1  ;;  %9633 = vmatmul.mubr.f32.gmra.mxu0 %v7241_v56 }
 0xc68   :  { %v7242_v54 = vmul.f32 %v7155_v13, %v6889_v53 }
 0xc69   :  { %v9560_v34 = vpop.f32.mrf.mxu1 }
 0xc6a   :  { %9635 = vmatprep.mubr.f32.mxu0 %v7242_v54  ;;  %v7245_v6 = vmul.f32 %v9560_v34, %v6892_v58 }
 0xc6b   :  { %9636 = vmatmul.mubr.f32.gmra.mxu0 %v7243_v25  ;;  %v7165_v3 = vpop.f32.mrf.mxu1 }
 0xc6c   :  { %v7244_v39 = vmul.f32 %v7165_v3, %v6891_v21 }
 0xc6d   :  { %v9563_v22 = vpop.f32.mrf.mxu1 }
 0xc6e   :  { %9638 = vmatprep.mubr.f32.mxu0 %v7244_v39  ;;  %v7247_v46 = vmul.f32 %v9563_v22, %v6894_v35  ;;  %v13585_v35 = vld [vmem:[#allocation38_spill] sm:$0xff] }
 0xc6f   :  { %9639 = vmatmul.mubr.f32.gmra.mxu0 %v7245_v6  ;;  %v7175_v0 = vpop.f32.mrf.mxu1  ;;  %v7550_v22 = vsub.f32 0.0, %v13585_v35 }
 0xc70   :  { %v7246_v16 = vmul.f32 %v7175_v0, %v6893_v7  ;;  %v13586_v7 = vld [vmem:[#allocation37_spill] sm:$0xff] }
 0xc71   :  { %v9566_v47 = vpop.f32.mrf.mxu1  ;;  %v7553_v0 = vmul.f32 1.442695, %v7550_v22 }
 0xc72   :  { %9641 = vmatprep.mubr.f32.mxu0 %v7246_v16  ;;  %v7249_v4 = vmul.f32 %v9566_v47, %v6896_v36 }
 0xc73   :  { %9642 = vmatmul.mubr.f32.gmra.mxu0 %v7247_v46  ;;  %v7185_v27 = vpop.f32.mrf.mxu1  ;;  %v7549_v46 = vsub.f32 0.0, %v13586_v7  ;;  %10124 = vpow2.f32 %v7553_v0 }
 0xc74   :  { %v7248_v33 = vmul.f32 %v7185_v27, %v6895_v50 }
 0xc75   :  { %v9569_v38 = vpop.f32.mrf.mxu1  ;;  %v7551_v16 = vmul.f32 1.442695, %v7549_v46 }
 0xc76   :  { %9644 = vmatprep.mubr.f32.mxu0 %v7248_v33  ;;  %v7251_v44 = vmul.f32 %v9569_v38, %v6898_v8  ;;  %v13587_v38 = vld [vmem:[#allocation35_spill] sm:$0xff] }
 0xc77   :  { %9645 = vmatmul.mubr.f32.gmra.mxu0 %v7249_v4  ;;  %v7195_v28 = vpop.f32.mrf.mxu1  ;;  %10126 = vpow2.f32 %v7551_v16 }
 0xc78   :  { %v7250_v62 = vmul.f32 %v7195_v28, %v6897_v2  ;;  %v7545_v2 = vmul.f32 %v13097_v18, %v13587_v38 }
 0xc79   :  { %v9572_v20 = vpop.f32.mrf.mxu1 }
 0xc7a   :  { %9647 = vmatprep.mubr.f32.mxu0 %v7250_v62  ;;  %v7253_v32 = vmul.f32 %v9572_v20, %v6900_v55 }
 0xc7b   :  { %9648 = vmatmul.mubr.f32.gmra.mxu0 %v7251_v44  ;;  %v7205_v40 = vpop.f32.mrf.mxu1  ;;  %v13588_v44 = vld [vmem:[#allocation36_spill] sm:$0xff] }
 0xc7c   :  { %v7252_v31 = vmul.f32 %v7205_v40, %v6899_v61  ;;  %v7546_v28 = vmul.f32 %v13097_v18, %v13588_v44 }
 0xc7d   :  { %v9575_v51 = vpop.f32.mrf.mxu1 }
 0xc7e   :  { %9650 = vmatprep.mubr.f32.mxu0 %v7252_v31  ;;  %v7255_v42 = vmul.f32 %v9575_v51, %v6902_v5 }
 0xc7f   :  { %9651 = vmatmul.mubr.f32.gmra.mxu0 %v7253_v32  ;;  %v7215_v30 = vpop.f32.mrf.mxu1 }
 0xc80   :  { %v7254_v19 = vmul.f32 %v7215_v30, %v6901_v48  ;;  %v10125_v36 = vpop.eup %10124 }
 0xc81   :  { %v7556_v50 = vadd.f32 1.0, %v10125_v36 }
 0xc82   :  { %9653 = vmatprep.mubr.f32.mxu0 %v7254_v19 }
 0xc83   :  { %9654 = vmatmul.mubr.f32.gmra.mxu0 %v7255_v42  ;;  %10128 = vrcp.f32 %v7556_v50 }
 0xc84   :  { %v10127_v47 = vpop.eup %10126 }
 0xc85   :  { %v7555_v4 = vadd.f32 1.0, %v10127_v47 }
 0xc87   :  { %10130 = vrcp.f32 %v7555_v4 }
 0xc90   :  { %v10129_v27 = vpop.eup %10128 }
 0xc91   :  { %v7562_v62 = vmul.f32 %v10129_v27, %v13585_v35 }
 0xc94   :  { %v10131_v33 = vpop.eup %10130 }
 0xc95   :  { %v7561_v55 = vmul.f32 %v10131_v33, %v13586_v7 }
 0xd07   :  { %v9610_v9 = vpop.f32.mrf.mxu0 }
 0xd09   :  { %v7322_v37 = vpop.f32.mrf.mxu0 }
 0xd0a   :  { %7481 = vxpose.xlu0.b32.start [1/16] (narrow) %v7322_v37, 8 }
 0xd0b   :  { %v9613_v17 = vpop.f32.mrf.mxu0 }
 0xd0d   :  { %v7332_v10 = vpop.f32.mrf.mxu0 }
 0xd0e   :  { %7482 = vxpose.xlu0.b32.cont [2/16] (narrow) %v9610_v9, 8 }
 0xd0f   :  { %v9616_v23 = vpop.f32.mrf.mxu0 }
 0xd11   :  { %v7342_v59 = vpop.f32.mrf.mxu0 }
 0xd12   :  { %7483 = vxpose.xlu0.b32.cont [3/16] (narrow) %v7332_v10, 8 }
 0xd13   :  { %v9619_v24 = vpop.f32.mrf.mxu0 }
 0xd15   :  { %v7352_v1 = vpop.f32.mrf.mxu0 }
 0xd16   :  { %7484 = vxpose.xlu0.b32.cont [4/16] (narrow) %v9613_v17, 8 }
 0xd17   :  { %v9622_v11 = vpop.f32.mrf.mxu0 }
 0xd19   :  { %v7362_v45 = vpop.f32.mrf.mxu0 }
 0xd1a   :  { %7485 = vxpose.xlu0.b32.cont [5/16] (narrow) %v7342_v59, 8 }
 0xd1b   :  { %v9625_v15 = vpop.f32.mrf.mxu0 }
 0xd1d   :  { %v7372_v63 = vpop.f32.mrf.mxu0 }
 0xd1e   :  { %7486 = vxpose.xlu0.b32.cont [6/16] (narrow) %v9616_v23, 8 }
 0xd1f   :  { %v9628_v43 = vpop.f32.mrf.mxu0 }
 0xd21   :  { %v7382_v14 = vpop.f32.mrf.mxu0 }
 0xd22   :  { %7487 = vxpose.xlu0.b32.cont [7/16] (narrow) %v7352_v1, 8 }
 0xd23   :  { %v9631_v26 = vpop.f32.mrf.mxu0 }
 0xd25   :  { %v7392_v29 = vpop.f32.mrf.mxu0 }
 0xd26   :  { %7488 = vxpose.xlu0.b32.cont [8/16] (narrow) %v9619_v24, 8 }
 0xd27   :  { %v9634_v52 = vpop.f32.mrf.mxu0 }
 0xd29   :  { %v7402_v12 = vpop.f32.mrf.mxu0 }
 0xd2a   :  { %7489 = vxpose.xlu0.b32.cont [9/16] (narrow) %v7362_v45, 8  ;;  %7513 = vxpose.xlu1.b32.start [1/16] (narrow) %v7402_v12, 8 }
 0xd2b   :  { %v9637_v49 = vpop.f32.mrf.mxu0 }
 0xd2d   :  { %v7412_v57 = vpop.f32.mrf.mxu0 }
 0xd2e   :  { %7490 = vxpose.xlu0.b32.cont [10/16] (narrow) %v9622_v11, 8  ;;  %7514 = vxpose.xlu1.b32.cont [2/16] (narrow) %v9634_v52, 8 }
 0xd2f   :  { %v9640_v56 = vpop.f32.mrf.mxu0 }
 0xd31   :  { %v7422_v41 = vpop.f32.mrf.mxu0 }
 0xd32   :  { %7491 = vxpose.xlu0.b32.cont [11/16] (narrow) %v7372_v63, 8  ;;  %7515 = vxpose.xlu1.b32.cont [3/16] (narrow) %v7412_v57, 8 }
 0xd33   :  { %v9643_v53 = vpop.f32.mrf.mxu0 }
 0xd35   :  { %v7432_v25 = vpop.f32.mrf.mxu0 }
 0xd36   :  { %7492 = vxpose.xlu0.b32.cont [12/16] (narrow) %v9625_v15, 8  ;;  %7516 = vxpose.xlu1.b32.cont [4/16] (narrow) %v9637_v49, 8 }
 0xd37   :  { %v9646_v13 = vpop.f32.mrf.mxu0 }
 0xd39   :  { %v7442_v54 = vpop.f32.mrf.mxu0 }
 0xd3a   :  { %7493 = vxpose.xlu0.b32.cont [13/16] (narrow) %v7382_v14, 8  ;;  %7517 = vxpose.xlu1.b32.cont [5/16] (narrow) %v7422_v41, 8 }
 0xd3b   :  { %v9649_v58 = vpop.f32.mrf.mxu0 }
 0xd3d   :  { %v7452_v34 = vpop.f32.mrf.mxu0 }
 0xd3e   :  { %7494 = vxpose.xlu0.b32.cont [14/16] (narrow) %v9628_v43, 8  ;;  %7518 = vxpose.xlu1.b32.cont [6/16] (narrow) %v9640_v56, 8 }
 0xd3f   :  { %v9652_v21 = vpop.f32.mrf.mxu0 }
 0xd41   :  { %v7462_v6 = vpop.f32.mrf.mxu0 }
 0xd42   :  { %7495 = vxpose.xlu0.b32.cont [15/16] (narrow) %v7392_v29, 8  ;;  %7519 = vxpose.xlu1.b32.cont [7/16] (narrow) %v7432_v25, 8 }
 0xd43   :  { %v9655_v3 = vpop.f32.mrf.mxu0 }
 0xd45   :  { %v7472_v39 = vpop.f32.mrf.mxu0 }
 0xd46   :  { %7496 = vxpose.xlu0.b32.end [16/16] (narrow) %v9631_v26, 8  ;;  %7520 = vxpose.xlu1.b32.cont [8/16] (narrow) %v9643_v53, 8 }
 0xd4a   :  { %7521 = vxpose.xlu1.b32.cont [9/16] (narrow) %v7442_v54, 8 }
 0xd4e   :  { %7522 = vxpose.xlu1.b32.cont [10/16] (narrow) %v9646_v13, 8 }
 0xd52   :  { %7523 = vxpose.xlu1.b32.cont [11/16] (narrow) %v7452_v34, 8 }
 0xd56   :  { %7524 = vxpose.xlu1.b32.cont [12/16] (narrow) %v9649_v58, 8 }
 0xd5a   :  { %7525 = vxpose.xlu1.b32.cont [13/16] (narrow) %v7462_v6, 8 }
 0xd5e   :  { %7526 = vxpose.xlu1.b32.cont [14/16] (narrow) %v9652_v21, 8 }
 0xd62   :  { %7527 = vxpose.xlu1.b32.cont [15/16] (narrow) %v7472_v39, 8 }
 0xd66   :  { %7528 = vxpose.xlu1.b32.end [16/16] (narrow) %v9655_v3, 8 }
 0xd86   :  { %v7497_v8 = vpop.trf.xlu0 }
 0xd87   :  { %v7547_v20 = vadd.f32 %v7545_v2, %v7497_v8 }
 0xd89   :  { %v7563_v31 = vmul.f32 %v7561_v55, %v7547_v20 }
 0xda6   :  { %v7529_v61 = vpop.trf.xlu1 }
 0xda7   :  { %v7548_v32 = vadd.f32 %v7546_v28, %v7529_v61 }
 0xda9   :  { %v7564_v40 = vmul.f32 %v7562_v62, %v7548_v32 }
 0xdab   :  { %7595 = vmatprep.subr.mxu1 %v7564_v40 }
 0xdac   :  { %7596 = vmatpush1.msra.mxu1 %v7563_v31 }
 0xdad   :  { %8215 = vmatmul.mubr.msk.f32.vlgmr.msra.gmra.mxu1 %vm407_vm5, %v13552_v60 }
 0xe6d   :  { %v7631_v5 = vpop.f32.mrf.mxu1 }
 0xe6f   :  { %v7633_v51 = vpop.f32.mrf.mxu1 }
 0xe70   :  { %v7638_v18 = vcombine.low %v7631_v5, %v7633_v51 }
 0xe72   :  { %7641 = vst [vmem:[#allocation5 + $0x8] sm:$0xff] %v7638_v18 }
 0xe73   :  { %10143 = shalt.err (!%p10140_p5)
}
 0xe74   :  { %s10180_s26 = smov 128   ;;  %s10181_s27 = smov 8  }
 0xe75   :  { %7653 = dma.vmem_to_hbm [thread:$0]  %s7648_s5, 256, %s13206_s17, [#allocation6], %s10180_s26, %s10180_s26, %s10181_s27  }
 0xe76   :  { %10160 = dma.done.wait [#allocation6], 256  }
 0xe77   :  { %10161 = vsyncadd [#allocation6], 4294967040 }
 0xe78   :  { %7657 = vsyncpa [#allocation6], 1 }

</bundles_post_ra>
